<compile_context>
chip_gen: v7x
topology: tpu7x:2x2x1
jax: 0.10.0
libtpu: 0.0.40
codegen_flags: <defaults>
</compile_context>

<pallas_src>
import functools

import numpy as np
import jax
import jax.numpy as jnp
from jax.experimental import pallas as pl
from jax.experimental.pallas import tpu as pltpu

LANES = 128  # pad all channel dims to this -> lane-dense layout everywhere


# ----------------------------------------------------------------------------
# Pallas kernel (fused encoder)
# ----------------------------------------------------------------------------
def _shift_rows(x, s):
    """y[r] = x[(r + s) mod n] along axis 0 (cyclic; invalid rows masked later)."""
    n = x.shape[0]
    s = s % n
    if s == 0:
        return x
    return jnp.concatenate([x[s:], x[:s]], axis=0)


def _encoder_fused_kernel(x_ref, mask_ref, w1_ref, b1_ref, w2_ref, b2_ref,
                          o_ref, *, H, W):
    """One image: conv3x3+ReLU -> conv3x3+ReLU -> global average pool."""
    HW = H * W
    C = x_ref.shape[-1]          # = LANES (padded channels)

    def conv3x3_relu(inp, w_ref, b_ref):
        acc = jnp.zeros((HW, C), jnp.float32)
        for di in range(3):
            for dj in range(3):
                t = di * 3 + dj
                oi, oj = di - 1, dj - 1
                # src[r, :] = inp[(h+oi)*W + (w+oj), :], zeroed where the tap
                # falls outside the image (== PyTorch padding=1 zero border).
                src = _shift_rows(inp, oi * W + oj) * mask_ref[t]
                acc = acc + jnp.dot(src, w_ref[t],
                                    preferred_element_type=jnp.float32)
        return jnp.maximum(acc + b_ref[...], 0.0)

    x = x_ref[0]                                   # (HW, 128), lane-dense
    h1 = conv3x3_relu(x, w1_ref, b1_ref)           # (HW, 128)
    h2 = conv3x3_relu(h1, w2_ref, b2_ref)          # (HW, 128)
    pooled = jnp.mean(h2, axis=0, keepdims=True)   # (1, 128)  global avg pool
    # Lane-dense full-tile store (replicated across the 8 sublanes).
    o_ref[...] = jnp.broadcast_to(pooled[None], (1, 8, C))


# ----------------------------------------------------------------------------
# Wrapper
# ----------------------------------------------------------------------------
def _pad_last(a, target):
    pad = target - a.shape[-1]
    if pad <= 0:
        return a
    cfg = [(0, 0)] * (a.ndim - 1) + [(0, pad)]
    return jnp.pad(a, cfg)


def _build_tap_masks(H, W):
    """(9, H*W, 1) f32: 1 where tap (di,dj) lands inside the image, else 0."""
    hh = np.repeat(np.arange(H), W)
    ww = np.tile(np.arange(W), H)
    masks = []
    for di in range(3):
        for dj in range(3):
            oi, oj = di - 1, dj - 1
            ok = ((hh + oi >= 0) & (hh + oi < H) &
                  (ww + oj >= 0) & (ww + oj < W))
            masks.append(ok.astype(np.float32))
    return jnp.asarray(np.stack(masks)[..., None])            # (9, HW, 1)


def encoder_forward(params, x_nchw):
    """Fused encoder: conv3x3+ReLU x2 -> global avg pool. Returns (N, C2)."""
    N, Cin, H, W = x_nchw.shape
    C1 = params["w1"].shape[0]
    C2 = params["w2"].shape[0]
    assert max(Cin, C1, C2) <= LANES
    HW = H * W

    # NCHW -> (N, H*W, LANES): channel-last on the lane axis, zero-padded.
    x = x_nchw.transpose(0, 2, 3, 1).reshape(N, HW, Cin)
    x = _pad_last(x, LANES)

    # (Cout, Cin, 3, 3) -> per-tap (Cin, Cout) matrices, zero-padded to 128x128.
    def prep_w(w):
        cout, cin = w.shape[0], w.shape[1]
        taps = jnp.transpose(w, (2, 3, 1, 0)).reshape(9, cin, cout)
        return jnp.pad(taps, ((0, 0), (0, LANES - cin), (0, LANES - cout)))

    def prep_b(b):
        return _pad_last(b.reshape(1, -1), LANES)

    w1, b1 = prep_w(params["w1"]), prep_b(params["b1"])
    w2, b2 = prep_w(params["w2"]), prep_b(params["b2"])
    masks = _build_tap_masks(H, W)

    kernel = functools.partial(_encoder_fused_kernel, H=H, W=W)
    out = pl.pallas_call(
        kernel,
        out_shape=jax.ShapeDtypeStruct((N, 8, LANES), jnp.float32),
        grid=(N,),                                   # one image per step
        in_specs=[
            pl.BlockSpec((1, HW, LANES), lambda i: (i, 0, 0)),   # x
            pl.BlockSpec((9, HW, 1), lambda i: (0, 0, 0)),       # tap masks
            pl.BlockSpec((9, LANES, LANES), lambda i: (0, 0, 0)),  # w1 taps
            pl.BlockSpec((1, LANES), lambda i: (0, 0)),          # b1
            pl.BlockSpec((9, LANES, LANES), lambda i: (0, 0, 0)),  # w2 taps
            pl.BlockSpec((1, LANES), lambda i: (0, 0)),          # b2
        ],
        out_specs=pl.BlockSpec((1, 8, LANES), lambda i: (i, 0, 0)),
        compiler_params=pltpu.CompilerParams(
            dimension_semantics=("parallel",)),       # megacore split on v7x
    )(x, masks, w1, b1, w2, b2)

    return out[:, 0, :C2]                            # (N, C2)  (fc = Identity)


# ----------------------------------------------------------------------------
# Model
# ----------------------------------------------------------------------------
def init_backbone_params(cin=4, c1=16, c2=32):
    """Deterministic synthetic backbone parameters (fc = Identity)."""
    k = jax.random.PRNGKey(42)
    k1, k2, k3, k4 = jax.random.split(k, 4)
    return {
        "w1": (jax.random.normal(k1, (c1, cin, 3, 3), jnp.float32)
               * (1.0 / jnp.sqrt(cin * 9.0))),
        "b1": jax.random.normal(k2, (c1,), jnp.float32) * 0.01,
        "w2": (jax.random.normal(k3, (c2, c1, 3, 3), jnp.float32)
               * (1.0 / jnp.sqrt(c1 * 9.0))),
        "b2": jax.random.normal(k4, (c2,), jnp.float32) * 0.01,
    }


@functools.partial(jax.jit, static_argnames=("return_dict",))
def siamese_net_sync_forward(params, x1, x2, return_dict=True):
    batch_size = x1.shape[0]
    views = jnp.concatenate([x1, x2], axis=0)        # (2B, C, H, W)
    f = encoder_forward(params, views)               # (2B, F)
    if return_dict:
        return {"view1": f[:batch_size], "view2": f[batch_size:]}
    return f


# Pure-JAX reference (for in-script correctness check only).
def _reference_encoder(params, x_nchw):
    def conv(x, w, b):
        y = jax.lax.conv_general_dilated(
            x, w, window_strides=(1, 1), padding="SAME",
            dimension_numbers=("NCHW", "OIHW", "NCHW"),
            precision=jax.lax.Precision.HIGHEST)
        return jax.nn.relu(y + b[None, :, None, None])
    h = conv(x_nchw, params["w1"], params["b1"])
    h = conv(h, params["w2"], params["b2"])
    return h.mean(axis=(2, 3))


# ----------------------------------------------------------------------------
if __name__ == "__main__":
    B, Cin, H, W = 2, 4, 16, 16
    key = jax.random.PRNGKey(0)
    k1, k2 = jax.random.split(key)
    x1 = jax.random.normal(k1, (B, Cin, H, W), jnp.float32)
    x2 = jax.random.normal(k2, (B, Cin, H, W), jnp.float32)

    params = init_backbone_params(cin=Cin, c1=16, c2=32)

    out = siamese_net_sync_forward(params, x1, x2, return_dict=True)
    jax.block_until_ready(out)

    assert out["view1"].shape == (B, 32)
    assert out["view2"].shape == (B, 32)

    # Correctness vs. pure-JAX reference.
    got = jnp.concatenate([out["view1"], out["view2"]], axis=0)
    ref = _reference_encoder(params, jnp.concatenate([x1, x2], axis=0))
    err = float(jnp.max(jnp.abs(got - ref)))
    assert err < 1e-2, f"max abs error {err}"

    print("KERNEL_OK")
</pallas_src>

<mosaic_0001>
module attributes {stable_mosaic.version = 11 : i64} {
  func.func @_encoder_fused_kernel(%arg0: i32, %arg1: memref<1x256x128xf32, #tpu.memory_space<vmem>>, %arg2: memref<9x256x1xf32, #tpu.memory_space<vmem>>, %arg3: memref<9x128x128xf32, #tpu.memory_space<vmem>>, %arg4: memref<1x128xf32, #tpu.memory_space<vmem>>, %arg5: memref<9x128x128xf32, #tpu.memory_space<vmem>>, %arg6: memref<1x128xf32, #tpu.memory_space<vmem>>, %arg7: memref<1x8x128xf32, #tpu.memory_space<vmem>>) attributes {dimension_semantics = [#tpu.dimension_semantics<parallel>], iteration_bounds = array<i64: 4>, scalar_prefetch = 0 : i64, scratch_operands = 0 : i64, tpu.core_type = #tpu.core_type<tc>, window_params = [{transform_indices = @transform_0, window_bounds = array<i64: 1, 256, 128>}, {pipeline_mode = #tpu.pipeline_mode<synchronous>, transform_indices = @transform_1, window_bounds = array<i64: 9, 256, 1>}, {pipeline_mode = #tpu.pipeline_mode<synchronous>, transform_indices = @transform_2, window_bounds = array<i64: 9, 128, 128>}, {pipeline_mode = #tpu.pipeline_mode<synchronous>, transform_indices = @transform_3, window_bounds = array<i64: 1, 128>}, {pipeline_mode = #tpu.pipeline_mode<synchronous>, transform_indices = @transform_4, window_bounds = array<i64: 9, 128, 128>}, {pipeline_mode = #tpu.pipeline_mode<synchronous>, transform_indices = @transform_5, window_bounds = array<i64: 1, 128>}, {transform_indices = @transform_6, window_bounds = array<i64: 1, 8, 128>}]} {
    %c0 = arith.constant 0 : index
    %c0_0 = arith.constant 0 : index
    %c0_1 = arith.constant 0 : index
    %0 = vector.load %arg1[%c0, %c0_0, %c0_1] : memref<1x256x128xf32, #tpu.memory_space<vmem>>, vector<1x256x128xf32>
    %1 = vector.shape_cast %0 : vector<1x256x128xf32> to vector<256x128xf32>
    %cst = arith.constant 0.000000e+00 : f32
    %2 = vector.broadcast %cst : f32 to vector<256x128xf32>
    %3 = vector.extract_strided_slice %1 {offsets = [239, 0], sizes = [17, 128], strides = [1, 1]} : vector<256x128xf32> to vector<17x128xf32>
    %4 = vector.extract_strided_slice %1 {offsets = [0, 0], sizes = [239, 128], strides = [1, 1]} : vector<256x128xf32> to vector<239x128xf32>
    %5 = tpu.concatenate %3, %4 in 0 : vector<17x128xf32>, vector<239x128xf32> -> vector<256x128xf32>
    %c0_2 = arith.constant 0 : index
    %c0_3 = arith.constant 0 : index
    %c0_4 = arith.constant 0 : index
    %6 = vector.load %arg2[%c0_2, %c0_3, %c0_4] : memref<9x256x1xf32, #tpu.memory_space<vmem>>, vector<1x256x1xf32>
    %7 = vector.shape_cast %6 : vector<1x256x1xf32> to vector<256x1xf32>
    %8 = vector.broadcast %7 : vector<256x1xf32> to vector<256x128xf32>
    %9 = arith.mulf %5, %8 : vector<256x128xf32>
    %c0_5 = arith.constant 0 : index
    %c0_6 = arith.constant 0 : index
    %c0_7 = arith.constant 0 : index
    %10 = vector.load %arg3[%c0_5, %c0_6, %c0_7] : memref<9x128x128xf32, #tpu.memory_space<vmem>>, vector<1x128x128xf32>
    %11 = vector.shape_cast %10 : vector<1x128x128xf32> to vector<128x128xf32>
    %cst_8 = arith.constant dense<0.000000e+00> : vector<256x128xf32>
    %12 = tpu.matmul %9, %11, %cst_8 {dimension_numbers = #tpu.dot_dimension_numbers<[1], [0], [0], [1], [0, 0, 1, 1], [], []>} : vector<256x128xf32>, vector<128x128xf32>, vector<256x128xf32> -> vector<256x128xf32>
    %13 = arith.addf %2, %12 : vector<256x128xf32>
    %14 = vector.extract_strided_slice %1 {offsets = [240, 0], sizes = [16, 128], strides = [1, 1]} : vector<256x128xf32> to vector<16x128xf32>
    %15 = vector.extract_strided_slice %1 {offsets = [0, 0], sizes = [240, 128], strides = [1, 1]} : vector<256x128xf32> to vector<240x128xf32>
    %16 = tpu.concatenate %14, %15 in 0 : vector<16x128xf32>, vector<240x128xf32> -> vector<256x128xf32>
    %c1 = arith.constant 1 : index
    %c0_9 = arith.constant 0 : index
    %c0_10 = arith.constant 0 : index
    %17 = vector.load %arg2[%c1, %c0_9, %c0_10] : memref<9x256x1xf32, #tpu.memory_space<vmem>>, vector<1x256x1xf32>
    %18 = vector.shape_cast %17 : vector<1x256x1xf32> to vector<256x1xf32>
    %19 = vector.broadcast %18 : vector<256x1xf32> to vector<256x128xf32>
    %20 = arith.mulf %16, %19 : vector<256x128xf32>
    %c1_11 = arith.constant 1 : index
    %c0_12 = arith.constant 0 : index
    %c0_13 = arith.constant 0 : index
    %21 = vector.load %arg3[%c1_11, %c0_12, %c0_13] : memref<9x128x128xf32, #tpu.memory_space<vmem>>, vector<1x128x128xf32>
    %22 = vector.shape_cast %21 : vector<1x128x128xf32> to vector<128x128xf32>
    %cst_14 = arith.constant dense<0.000000e+00> : vector<256x128xf32>
    %23 = tpu.matmul %20, %22, %cst_14 {dimension_numbers = #tpu.dot_dimension_numbers<[1], [0], [0], [1], [0, 0, 1, 1], [], []>} : vector<256x128xf32>, vector<128x128xf32>, vector<256x128xf32> -> vector<256x128xf32>
    %24 = arith.addf %13, %23 : vector<256x128xf32>
    %25 = vector.extract_strided_slice %1 {offsets = [241, 0], sizes = [15, 128], strides = [1, 1]} : vector<256x128xf32> to vector<15x128xf32>
    %26 = vector.extract_strided_slice %1 {offsets = [0, 0], sizes = [241, 128], strides = [1, 1]} : vector<256x128xf32> to vector<241x128xf32>
    %27 = tpu.concatenate %25, %26 in 0 : vector<15x128xf32>, vector<241x128xf32> -> vector<256x128xf32>
    %c2 = arith.constant 2 : index
    %c0_15 = arith.constant 0 : index
    %c0_16 = arith.constant 0 : index
    %28 = vector.load %arg2[%c2, %c0_15, %c0_16] : memref<9x256x1xf32, #tpu.memory_space<vmem>>, vector<1x256x1xf32>
    %29 = vector.shape_cast %28 : vector<1x256x1xf32> to vector<256x1xf32>
    %30 = vector.broadcast %29 : vector<256x1xf32> to vector<256x128xf32>
    %31 = arith.mulf %27, %30 : vector<256x128xf32>
    %c2_17 = arith.constant 2 : index
    %c0_18 = arith.constant 0 : index
    %c0_19 = arith.constant 0 : index
    %32 = vector.load %arg3[%c2_17, %c0_18, %c0_19] : memref<9x128x128xf32, #tpu.memory_space<vmem>>, vector<1x128x128xf32>
    %33 = vector.shape_cast %32 : vector<1x128x128xf32> to vector<128x128xf32>
    %cst_20 = arith.constant dense<0.000000e+00> : vector<256x128xf32>
    %34 = tpu.matmul %31, %33, %cst_20 {dimension_numbers = #tpu.dot_dimension_numbers<[1], [0], [0], [1], [0, 0, 1, 1], [], []>} : vector<256x128xf32>, vector<128x128xf32>, vector<256x128xf32> -> vector<256x128xf32>
    %35 = arith.addf %24, %34 : vector<256x128xf32>
    %36 = vector.extract_strided_slice %1 {offsets = [255, 0], sizes = [1, 128], strides = [1, 1]} : vector<256x128xf32> to vector<1x128xf32>
    %37 = vector.extract_strided_slice %1 {offsets = [0, 0], sizes = [255, 128], strides = [1, 1]} : vector<256x128xf32> to vector<255x128xf32>
    %38 = tpu.concatenate %36, %37 in 0 : vector<1x128xf32>, vector<255x128xf32> -> vector<256x128xf32>
    %c3 = arith.constant 3 : index
    %c0_21 = arith.constant 0 : index
    %c0_22 = arith.constant 0 : index
    %39 = vector.load %arg2[%c3, %c0_21, %c0_22] : memref<9x256x1xf32, #tpu.memory_space<vmem>>, vector<1x256x1xf32>
    %40 = vector.shape_cast %39 : vector<1x256x1xf32> to vector<256x1xf32>
    %41 = vector.broadcast %40 : vector<256x1xf32> to vector<256x128xf32>
    %42 = arith.mulf %38, %41 : vector<256x128xf32>
    %c3_23 = arith.constant 3 : index
    %c0_24 = arith.constant 0 : index
    %c0_25 = arith.constant 0 : index
    %43 = vector.load %arg3[%c3_23, %c0_24, %c0_25] : memref<9x128x128xf32, #tpu.memory_space<vmem>>, vector<1x128x128xf32>
    %44 = vector.shape_cast %43 : vector<1x128x128xf32> to vector<128x128xf32>
    %cst_26 = arith.constant dense<0.000000e+00> : vector<256x128xf32>
    %45 = tpu.matmul %42, %44, %cst_26 {dimension_numbers = #tpu.dot_dimension_numbers<[1], [0], [0], [1], [0, 0, 1, 1], [], []>} : vector<256x128xf32>, vector<128x128xf32>, vector<256x128xf32> -> vector<256x128xf32>
    %46 = arith.addf %35, %45 : vector<256x128xf32>
    %c4 = arith.constant 4 : index
    %c0_27 = arith.constant 0 : index
    %c0_28 = arith.constant 0 : index
    %47 = vector.load %arg2[%c4, %c0_27, %c0_28] : memref<9x256x1xf32, #tpu.memory_space<vmem>>, vector<1x256x1xf32>
    %48 = vector.shape_cast %47 : vector<1x256x1xf32> to vector<256x1xf32>
    %49 = vector.broadcast %48 : vector<256x1xf32> to vector<256x128xf32>
    %50 = arith.mulf %1, %49 : vector<256x128xf32>
    %c4_29 = arith.constant 4 : index
    %c0_30 = arith.constant 0 : index
    %c0_31 = arith.constant 0 : index
    %51 = vector.load %arg3[%c4_29, %c0_30, %c0_31] : memref<9x128x128xf32, #tpu.memory_space<vmem>>, vector<1x128x128xf32>
    %52 = vector.shape_cast %51 : vector<1x128x128xf32> to vector<128x128xf32>
    %cst_32 = arith.constant dense<0.000000e+00> : vector<256x128xf32>
    %53 = tpu.matmul %50, %52, %cst_32 {dimension_numbers = #tpu.dot_dimension_numbers<[1], [0], [0], [1], [0, 0, 1, 1], [], []>} : vector<256x128xf32>, vector<128x128xf32>, vector<256x128xf32> -> vector<256x128xf32>
    %54 = arith.addf %46, %53 : vector<256x128xf32>
    %55 = vector.extract_strided_slice %1 {offsets = [1, 0], sizes = [255, 128], strides = [1, 1]} : vector<256x128xf32> to vector<255x128xf32>
    %56 = vector.extract_strided_slice %1 {offsets = [0, 0], sizes = [1, 128], strides = [1, 1]} : vector<256x128xf32> to vector<1x128xf32>
    %57 = tpu.concatenate %55, %56 in 0 : vector<255x128xf32>, vector<1x128xf32> -> vector<256x128xf32>
    %c5 = arith.constant 5 : index
    %c0_33 = arith.constant 0 : index
    %c0_34 = arith.constant 0 : index
    %58 = vector.load %arg2[%c5, %c0_33, %c0_34] : memref<9x256x1xf32, #tpu.memory_space<vmem>>, vector<1x256x1xf32>
    %59 = vector.shape_cast %58 : vector<1x256x1xf32> to vector<256x1xf32>
    %60 = vector.broadcast %59 : vector<256x1xf32> to vector<256x128xf32>
    %61 = arith.mulf %57, %60 : vector<256x128xf32>
    %c5_35 = arith.constant 5 : index
    %c0_36 = arith.constant 0 : index
    %c0_37 = arith.constant 0 : index
    %62 = vector.load %arg3[%c5_35, %c0_36, %c0_37] : memref<9x128x128xf32, #tpu.memory_space<vmem>>, vector<1x128x128xf32>
    %63 = vector.shape_cast %62 : vector<1x128x128xf32> to vector<128x128xf32>
    %cst_38 = arith.constant dense<0.000000e+00> : vector<256x128xf32>
    %64 = tpu.matmul %61, %63, %cst_38 {dimension_numbers = #tpu.dot_dimension_numbers<[1], [0], [0], [1], [0, 0, 1, 1], [], []>} : vector<256x128xf32>, vector<128x128xf32>, vector<256x128xf32> -> vector<256x128xf32>
    %65 = arith.addf %54, %64 : vector<256x128xf32>
    %66 = vector.extract_strided_slice %1 {offsets = [15, 0], sizes = [241, 128], strides = [1, 1]} : vector<256x128xf32> to vector<241x128xf32>
    %67 = vector.extract_strided_slice %1 {offsets = [0, 0], sizes = [15, 128], strides = [1, 1]} : vector<256x128xf32> to vector<15x128xf32>
    %68 = tpu.concatenate %66, %67 in 0 : vector<241x128xf32>, vector<15x128xf32> -> vector<256x128xf32>
    %c6 = arith.constant 6 : index
    %c0_39 = arith.constant 0 : index
    %c0_40 = arith.constant 0 : index
    %69 = vector.load %arg2[%c6, %c0_39, %c0_40] : memref<9x256x1xf32, #tpu.memory_space<vmem>>, vector<1x256x1xf32>
    %70 = vector.shape_cast %69 : vector<1x256x1xf32> to vector<256x1xf32>
    %71 = vector.broadcast %70 : vector<256x1xf32> to vector<256x128xf32>
    %72 = arith.mulf %68, %71 : vector<256x128xf32>
    %c6_41 = arith.constant 6 : index
    %c0_42 = arith.constant 0 : index
    %c0_43 = arith.constant 0 : index
    %73 = vector.load %arg3[%c6_41, %c0_42, %c0_43] : memref<9x128x128xf32, #tpu.memory_space<vmem>>, vector<1x128x128xf32>
    %74 = vector.shape_cast %73 : vector<1x128x128xf32> to vector<128x128xf32>
    %cst_44 = arith.constant dense<0.000000e+00> : vector<256x128xf32>
    %75 = tpu.matmul %72, %74, %cst_44 {dimension_numbers = #tpu.dot_dimension_numbers<[1], [0], [0], [1], [0, 0, 1, 1], [], []>} : vector<256x128xf32>, vector<128x128xf32>, vector<256x128xf32> -> vector<256x128xf32>
    %76 = arith.addf %65, %75 : vector<256x128xf32>
    %77 = vector.extract_strided_slice %1 {offsets = [16, 0], sizes = [240, 128], strides = [1, 1]} : vector<256x128xf32> to vector<240x128xf32>
    %78 = vector.extract_strided_slice %1 {offsets = [0, 0], sizes = [16, 128], strides = [1, 1]} : vector<256x128xf32> to vector<16x128xf32>
    %79 = tpu.concatenate %77, %78 in 0 : vector<240x128xf32>, vector<16x128xf32> -> vector<256x128xf32>
    %c7 = arith.constant 7 : index
    %c0_45 = arith.constant 0 : index
    %c0_46 = arith.constant 0 : index
    %80 = vector.load %arg2[%c7, %c0_45, %c0_46] : memref<9x256x1xf32, #tpu.memory_space<vmem>>, vector<1x256x1xf32>
    %81 = vector.shape_cast %80 : vector<1x256x1xf32> to vector<256x1xf32>
    %82 = vector.broadcast %81 : vector<256x1xf32> to vector<256x128xf32>
    %83 = arith.mulf %79, %82 : vector<256x128xf32>
    %c7_47 = arith.constant 7 : index
    %c0_48 = arith.constant 0 : index
    %c0_49 = arith.constant 0 : index
    %84 = vector.load %arg3[%c7_47, %c0_48, %c0_49] : memref<9x128x128xf32, #tpu.memory_space<vmem>>, vector<1x128x128xf32>
    %85 = vector.shape_cast %84 : vector<1x128x128xf32> to vector<128x128xf32>
    %cst_50 = arith.constant dense<0.000000e+00> : vector<256x128xf32>
    %86 = tpu.matmul %83, %85, %cst_50 {dimension_numbers = #tpu.dot_dimension_numbers<[1], [0], [0], [1], [0, 0, 1, 1], [], []>} : vector<256x128xf32>, vector<128x128xf32>, vector<256x128xf32> -> vector<256x128xf32>
    %87 = arith.addf %76, %86 : vector<256x128xf32>
    %88 = vector.extract_strided_slice %1 {offsets = [17, 0], sizes = [239, 128], strides = [1, 1]} : vector<256x128xf32> to vector<239x128xf32>
    %89 = vector.extract_strided_slice %1 {offsets = [0, 0], sizes = [17, 128], strides = [1, 1]} : vector<256x128xf32> to vector<17x128xf32>
    %90 = tpu.concatenate %88, %89 in 0 : vector<239x128xf32>, vector<17x128xf32> -> vector<256x128xf32>
    %c8 = arith.constant 8 : index
    %c0_51 = arith.constant 0 : index
    %c0_52 = arith.constant 0 : index
    %91 = vector.load %arg2[%c8, %c0_51, %c0_52] : memref<9x256x1xf32, #tpu.memory_space<vmem>>, vector<1x256x1xf32>
    %92 = vector.shape_cast %91 : vector<1x256x1xf32> to vector<256x1xf32>
    %93 = vector.broadcast %92 : vector<256x1xf32> to vector<256x128xf32>
    %94 = arith.mulf %90, %93 : vector<256x128xf32>
    %c8_53 = arith.constant 8 : index
    %c0_54 = arith.constant 0 : index
    %c0_55 = arith.constant 0 : index
    %95 = vector.load %arg3[%c8_53, %c0_54, %c0_55] : memref<9x128x128xf32, #tpu.memory_space<vmem>>, vector<1x128x128xf32>
    %96 = vector.shape_cast %95 : vector<1x128x128xf32> to vector<128x128xf32>
    %cst_56 = arith.constant dense<0.000000e+00> : vector<256x128xf32>
    %97 = tpu.matmul %94, %96, %cst_56 {dimension_numbers = #tpu.dot_dimension_numbers<[1], [0], [0], [1], [0, 0, 1, 1], [], []>} : vector<256x128xf32>, vector<128x128xf32>, vector<256x128xf32> -> vector<256x128xf32>
    %98 = arith.addf %87, %97 : vector<256x128xf32>
    %c0_57 = arith.constant 0 : index
    %c0_58 = arith.constant 0 : index
    %99 = vector.load %arg4[%c0_57, %c0_58] : memref<1x128xf32, #tpu.memory_space<vmem>>, vector<1x128xf32>
    %100 = vector.broadcast %99 : vector<1x128xf32> to vector<256x128xf32>
    %101 = arith.addf %98, %100 : vector<256x128xf32>
    %cst_59 = arith.constant 0.000000e+00 : f32
    %102 = vector.broadcast %cst_59 : f32 to vector<256x128xf32>
    %103 = arith.maximumf %101, %102 : vector<256x128xf32>
    %cst_60 = arith.constant 0.000000e+00 : f32
    %104 = vector.broadcast %cst_60 : f32 to vector<256x128xf32>
    %105 = vector.extract_strided_slice %103 {offsets = [239, 0], sizes = [17, 128], strides = [1, 1]} : vector<256x128xf32> to vector<17x128xf32>
    %106 = vector.extract_strided_slice %103 {offsets = [0, 0], sizes = [239, 128], strides = [1, 1]} : vector<256x128xf32> to vector<239x128xf32>
    %107 = tpu.concatenate %105, %106 in 0 : vector<17x128xf32>, vector<239x128xf32> -> vector<256x128xf32>
    %c0_61 = arith.constant 0 : index
    %c0_62 = arith.constant 0 : index
    %c0_63 = arith.constant 0 : index
    %108 = vector.load %arg2[%c0_61, %c0_62, %c0_63] : memref<9x256x1xf32, #tpu.memory_space<vmem>>, vector<1x256x1xf32>
    %109 = vector.shape_cast %108 : vector<1x256x1xf32> to vector<256x1xf32>
    %110 = vector.broadcast %109 : vector<256x1xf32> to vector<256x128xf32>
    %111 = arith.mulf %107, %110 : vector<256x128xf32>
    %c0_64 = arith.constant 0 : index
    %c0_65 = arith.constant 0 : index
    %c0_66 = arith.constant 0 : index
    %112 = vector.load %arg5[%c0_64, %c0_65, %c0_66] : memref<9x128x128xf32, #tpu.memory_space<vmem>>, vector<1x128x128xf32>
    %113 = vector.shape_cast %112 : vector<1x128x128xf32> to vector<128x128xf32>
    %cst_67 = arith.constant dense<0.000000e+00> : vector<256x128xf32>
    %114 = tpu.matmul %111, %113, %cst_67 {dimension_numbers = #tpu.dot_dimension_numbers<[1], [0], [0], [1], [0, 0, 1, 1], [], []>} : vector<256x128xf32>, vector<128x128xf32>, vector<256x128xf32> -> vector<256x128xf32>
    %115 = arith.addf %104, %114 : vector<256x128xf32>
    %116 = vector.extract_strided_slice %103 {offsets = [240, 0], sizes = [16, 128], strides = [1, 1]} : vector<256x128xf32> to vector<16x128xf32>
    %117 = vector.extract_strided_slice %103 {offsets = [0, 0], sizes = [240, 128], strides = [1, 1]} : vector<256x128xf32> to vector<240x128xf32>
    %118 = tpu.concatenate %116, %117 in 0 : vector<16x128xf32>, vector<240x128xf32> -> vector<256x128xf32>
    %c1_68 = arith.constant 1 : index
    %c0_69 = arith.constant 0 : index
    %c0_70 = arith.constant 0 : index
    %119 = vector.load %arg2[%c1_68, %c0_69, %c0_70] : memref<9x256x1xf32, #tpu.memory_space<vmem>>, vector<1x256x1xf32>
    %120 = vector.shape_cast %119 : vector<1x256x1xf32> to vector<256x1xf32>
    %121 = vector.broadcast %120 : vector<256x1xf32> to vector<256x128xf32>
    %122 = arith.mulf %118, %121 : vector<256x128xf32>
    %c1_71 = arith.constant 1 : index
    %c0_72 = arith.constant 0 : index
    %c0_73 = arith.constant 0 : index
    %123 = vector.load %arg5[%c1_71, %c0_72, %c0_73] : memref<9x128x128xf32, #tpu.memory_space<vmem>>, vector<1x128x128xf32>
    %124 = vector.shape_cast %123 : vector<1x128x128xf32> to vector<128x128xf32>
    %cst_74 = arith.constant dense<0.000000e+00> : vector<256x128xf32>
    %125 = tpu.matmul %122, %124, %cst_74 {dimension_numbers = #tpu.dot_dimension_numbers<[1], [0], [0], [1], [0, 0, 1, 1], [], []>} : vector<256x128xf32>, vector<128x128xf32>, vector<256x128xf32> -> vector<256x128xf32>
    %126 = arith.addf %115, %125 : vector<256x128xf32>
    %127 = vector.extract_strided_slice %103 {offsets = [241, 0], sizes = [15, 128], strides = [1, 1]} : vector<256x128xf32> to vector<15x128xf32>
    %128 = vector.extract_strided_slice %103 {offsets = [0, 0], sizes = [241, 128], strides = [1, 1]} : vector<256x128xf32> to vector<241x128xf32>
    %129 = tpu.concatenate %127, %128 in 0 : vector<15x128xf32>, vector<241x128xf32> -> vector<256x128xf32>
    %c2_75 = arith.constant 2 : index
    %c0_76 = arith.constant 0 : index
    %c0_77 = arith.constant 0 : index
    %130 = vector.load %arg2[%c2_75, %c0_76, %c0_77] : memref<9x256x1xf32, #tpu.memory_space<vmem>>, vector<1x256x1xf32>
    %131 = vector.shape_cast %130 : vector<1x256x1xf32> to vector<256x1xf32>
    %132 = vector.broadcast %131 : vector<256x1xf32> to vector<256x128xf32>
    %133 = arith.mulf %129, %132 : vector<256x128xf32>
    %c2_78 = arith.constant 2 : index
    %c0_79 = arith.constant 0 : index
    %c0_80 = arith.constant 0 : index
    %134 = vector.load %arg5[%c2_78, %c0_79, %c0_80] : memref<9x128x128xf32, #tpu.memory_space<vmem>>, vector<1x128x128xf32>
    %135 = vector.shape_cast %134 : vector<1x128x128xf32> to vector<128x128xf32>
    %cst_81 = arith.constant dense<0.000000e+00> : vector<256x128xf32>
    %136 = tpu.matmul %133, %135, %cst_81 {dimension_numbers = #tpu.dot_dimension_numbers<[1], [0], [0], [1], [0, 0, 1, 1], [], []>} : vector<256x128xf32>, vector<128x128xf32>, vector<256x128xf32> -> vector<256x128xf32>
    %137 = arith.addf %126, %136 : vector<256x128xf32>
    %138 = vector.extract_strided_slice %103 {offsets = [255, 0], sizes = [1, 128], strides = [1, 1]} : vector<256x128xf32> to vector<1x128xf32>
    %139 = vector.extract_strided_slice %103 {offsets = [0, 0], sizes = [255, 128], strides = [1, 1]} : vector<256x128xf32> to vector<255x128xf32>
    %140 = tpu.concatenate %138, %139 in 0 : vector<1x128xf32>, vector<255x128xf32> -> vector<256x128xf32>
    %c3_82 = arith.constant 3 : index
    %c0_83 = arith.constant 0 : index
    %c0_84 = arith.constant 0 : index
    %141 = vector.load %arg2[%c3_82, %c0_83, %c0_84] : memref<9x256x1xf32, #tpu.memory_space<vmem>>, vector<1x256x1xf32>
    %142 = vector.shape_cast %141 : vector<1x256x1xf32> to vector<256x1xf32>
    %143 = vector.broadcast %142 : vector<256x1xf32> to vector<256x128xf32>
    %144 = arith.mulf %140, %143 : vector<256x128xf32>
    %c3_85 = arith.constant 3 : index
    %c0_86 = arith.constant 0 : index
    %c0_87 = arith.constant 0 : index
    %145 = vector.load %arg5[%c3_85, %c0_86, %c0_87] : memref<9x128x128xf32, #tpu.memory_space<vmem>>, vector<1x128x128xf32>
    %146 = vector.shape_cast %145 : vector<1x128x128xf32> to vector<128x128xf32>
    %cst_88 = arith.constant dense<0.000000e+00> : vector<256x128xf32>
    %147 = tpu.matmul %144, %146, %cst_88 {dimension_numbers = #tpu.dot_dimension_numbers<[1], [0], [0], [1], [0, 0, 1, 1], [], []>} : vector<256x128xf32>, vector<128x128xf32>, vector<256x128xf32> -> vector<256x128xf32>
    %148 = arith.addf %137, %147 : vector<256x128xf32>
    %c4_89 = arith.constant 4 : index
    %c0_90 = arith.constant 0 : index
    %c0_91 = arith.constant 0 : index
    %149 = vector.load %arg2[%c4_89, %c0_90, %c0_91] : memref<9x256x1xf32, #tpu.memory_space<vmem>>, vector<1x256x1xf32>
    %150 = vector.shape_cast %149 : vector<1x256x1xf32> to vector<256x1xf32>
    %151 = vector.broadcast %150 : vector<256x1xf32> to vector<256x128xf32>
    %152 = arith.mulf %103, %151 : vector<256x128xf32>
    %c4_92 = arith.constant 4 : index
    %c0_93 = arith.constant 0 : index
    %c0_94 = arith.constant 0 : index
    %153 = vector.load %arg5[%c4_92, %c0_93, %c0_94] : memref<9x128x128xf32, #tpu.memory_space<vmem>>, vector<1x128x128xf32>
    %154 = vector.shape_cast %153 : vector<1x128x128xf32> to vector<128x128xf32>
    %cst_95 = arith.constant dense<0.000000e+00> : vector<256x128xf32>
    %155 = tpu.matmul %152, %154, %cst_95 {dimension_numbers = #tpu.dot_dimension_numbers<[1], [0], [0], [1], [0, 0, 1, 1], [], []>} : vector<256x128xf32>, vector<128x128xf32>, vector<256x128xf32> -> vector<256x128xf32>
    %156 = arith.addf %148, %155 : vector<256x128xf32>
    %157 = vector.extract_strided_slice %103 {offsets = [1, 0], sizes = [255, 128], strides = [1, 1]} : vector<256x128xf32> to vector<255x128xf32>
    %158 = vector.extract_strided_slice %103 {offsets = [0, 0], sizes = [1, 128], strides = [1, 1]} : vector<256x128xf32> to vector<1x128xf32>
    %159 = tpu.concatenate %157, %158 in 0 : vector<255x128xf32>, vector<1x128xf32> -> vector<256x128xf32>
    %c5_96 = arith.constant 5 : index
    %c0_97 = arith.constant 0 : index
    %c0_98 = arith.constant 0 : index
    %160 = vector.load %arg2[%c5_96, %c0_97, %c0_98] : memref<9x256x1xf32, #tpu.memory_space<vmem>>, vector<1x256x1xf32>
    %161 = vector.shape_cast %160 : vector<1x256x1xf32> to vector<256x1xf32>
    %162 = vector.broadcast %161 : vector<256x1xf32> to vector<256x128xf32>
    %163 = arith.mulf %159, %162 : vector<256x128xf32>
    %c5_99 = arith.constant 5 : index
    %c0_100 = arith.constant 0 : index
    %c0_101 = arith.constant 0 : index
    %164 = vector.load %arg5[%c5_99, %c0_100, %c0_101] : memref<9x128x128xf32, #tpu.memory_space<vmem>>, vector<1x128x128xf32>
    %165 = vector.shape_cast %164 : vector<1x128x128xf32> to vector<128x128xf32>
    %cst_102 = arith.constant dense<0.000000e+00> : vector<256x128xf32>
    %166 = tpu.matmul %163, %165, %cst_102 {dimension_numbers = #tpu.dot_dimension_numbers<[1], [0], [0], [1], [0, 0, 1, 1], [], []>} : vector<256x128xf32>, vector<128x128xf32>, vector<256x128xf32> -> vector<256x128xf32>
    %167 = arith.addf %156, %166 : vector<256x128xf32>
    %168 = vector.extract_strided_slice %103 {offsets = [15, 0], sizes = [241, 128], strides = [1, 1]} : vector<256x128xf32> to vector<241x128xf32>
    %169 = vector.extract_strided_slice %103 {offsets = [0, 0], sizes = [15, 128], strides = [1, 1]} : vector<256x128xf32> to vector<15x128xf32>
    %170 = tpu.concatenate %168, %169 in 0 : vector<241x128xf32>, vector<15x128xf32> -> vector<256x128xf32>
    %c6_103 = arith.constant 6 : index
    %c0_104 = arith.constant 0 : index
    %c0_105 = arith.constant 0 : index
    %171 = vector.load %arg2[%c6_103, %c0_104, %c0_105] : memref<9x256x1xf32, #tpu.memory_space<vmem>>, vector<1x256x1xf32>
    %172 = vector.shape_cast %171 : vector<1x256x1xf32> to vector<256x1xf32>
    %173 = vector.broadcast %172 : vector<256x1xf32> to vector<256x128xf32>
    %174 = arith.mulf %170, %173 : vector<256x128xf32>
    %c6_106 = arith.constant 6 : index
    %c0_107 = arith.constant 0 : index
    %c0_108 = arith.constant 0 : index
    %175 = vector.load %arg5[%c6_106, %c0_107, %c0_108] : memref<9x128x128xf32, #tpu.memory_space<vmem>>, vector<1x128x128xf32>
    %176 = vector.shape_cast %175 : vector<1x128x128xf32> to vector<128x128xf32>
    %cst_109 = arith.constant dense<0.000000e+00> : vector<256x128xf32>
    %177 = tpu.matmul %174, %176, %cst_109 {dimension_numbers = #tpu.dot_dimension_numbers<[1], [0], [0], [1], [0, 0, 1, 1], [], []>} : vector<256x128xf32>, vector<128x128xf32>, vector<256x128xf32> -> vector<256x128xf32>
    %178 = arith.addf %167, %177 : vector<256x128xf32>
    %179 = vector.extract_strided_slice %103 {offsets = [16, 0], sizes = [240, 128], strides = [1, 1]} : vector<256x128xf32> to vector<240x128xf32>
    %180 = vector.extract_strided_slice %103 {offsets = [0, 0], sizes = [16, 128], strides = [1, 1]} : vector<256x128xf32> to vector<16x128xf32>
    %181 = tpu.concatenate %179, %180 in 0 : vector<240x128xf32>, vector<16x128xf32> -> vector<256x128xf32>
    %c7_110 = arith.constant 7 : index
    %c0_111 = arith.constant 0 : index
    %c0_112 = arith.constant 0 : index
    %182 = vector.load %arg2[%c7_110, %c0_111, %c0_112] : memref<9x256x1xf32, #tpu.memory_space<vmem>>, vector<1x256x1xf32>
    %183 = vector.shape_cast %182 : vector<1x256x1xf32> to vector<256x1xf32>
    %184 = vector.broadcast %183 : vector<256x1xf32> to vector<256x128xf32>
    %185 = arith.mulf %181, %184 : vector<256x128xf32>
    %c7_113 = arith.constant 7 : index
    %c0_114 = arith.constant 0 : index
    %c0_115 = arith.constant 0 : index
    %186 = vector.load %arg5[%c7_113, %c0_114, %c0_115] : memref<9x128x128xf32, #tpu.memory_space<vmem>>, vector<1x128x128xf32>
    %187 = vector.shape_cast %186 : vector<1x128x128xf32> to vector<128x128xf32>
    %cst_116 = arith.constant dense<0.000000e+00> : vector<256x128xf32>
    %188 = tpu.matmul %185, %187, %cst_116 {dimension_numbers = #tpu.dot_dimension_numbers<[1], [0], [0], [1], [0, 0, 1, 1], [], []>} : vector<256x128xf32>, vector<128x128xf32>, vector<256x128xf32> -> vector<256x128xf32>
    %189 = arith.addf %178, %188 : vector<256x128xf32>
    %190 = vector.extract_strided_slice %103 {offsets = [17, 0], sizes = [239, 128], strides = [1, 1]} : vector<256x128xf32> to vector<239x128xf32>
    %191 = vector.extract_strided_slice %103 {offsets = [0, 0], sizes = [17, 128], strides = [1, 1]} : vector<256x128xf32> to vector<17x128xf32>
    %192 = tpu.concatenate %190, %191 in 0 : vector<239x128xf32>, vector<17x128xf32> -> vector<256x128xf32>
    %c8_117 = arith.constant 8 : index
    %c0_118 = arith.constant 0 : index
    %c0_119 = arith.constant 0 : index
    %193 = vector.load %arg2[%c8_117, %c0_118, %c0_119] : memref<9x256x1xf32, #tpu.memory_space<vmem>>, vector<1x256x1xf32>
    %194 = vector.shape_cast %193 : vector<1x256x1xf32> to vector<256x1xf32>
    %195 = vector.broadcast %194 : vector<256x1xf32> to vector<256x128xf32>
    %196 = arith.mulf %192, %195 : vector<256x128xf32>
    %c8_120 = arith.constant 8 : index
    %c0_121 = arith.constant 0 : index
    %c0_122 = arith.constant 0 : index
    %197 = vector.load %arg5[%c8_120, %c0_121, %c0_122] : memref<9x128x128xf32, #tpu.memory_space<vmem>>, vector<1x128x128xf32>
    %198 = vector.shape_cast %197 : vector<1x128x128xf32> to vector<128x128xf32>
    %cst_123 = arith.constant dense<0.000000e+00> : vector<256x128xf32>
    %199 = tpu.matmul %196, %198, %cst_123 {dimension_numbers = #tpu.dot_dimension_numbers<[1], [0], [0], [1], [0, 0, 1, 1], [], []>} : vector<256x128xf32>, vector<128x128xf32>, vector<256x128xf32> -> vector<256x128xf32>
    %200 = arith.addf %189, %199 : vector<256x128xf32>
    %c0_124 = arith.constant 0 : index
    %c0_125 = arith.constant 0 : index
    %201 = vector.load %arg6[%c0_124, %c0_125] : memref<1x128xf32, #tpu.memory_space<vmem>>, vector<1x128xf32>
    %202 = vector.broadcast %201 : vector<1x128xf32> to vector<256x128xf32>
    %203 = arith.addf %200, %202 : vector<256x128xf32>
    %cst_126 = arith.constant 0.000000e+00 : f32
    %204 = vector.broadcast %cst_126 : f32 to vector<256x128xf32>
    %205 = arith.maximumf %203, %204 : vector<256x128xf32>
    %cst_127 = arith.constant dense<0.000000e+00> : vector<128xf32>
    %206 = vector.multi_reduction <add>, %205, %cst_127 [0] : vector<256x128xf32> to vector<128xf32>
    %207 = vector.shape_cast %206 : vector<128xf32> to vector<1x128xf32>
    %cst_128 = arith.constant 2.560000e+02 : f32
    %208 = vector.broadcast %cst_128 : f32 to vector<1x128xf32>
    %209 = arith.divf %207, %208 : vector<1x128xf32>
    %210 = vector.shape_cast %209 : vector<1x128xf32> to vector<1x1x128xf32>
    %211 = vector.shape_cast %210 : vector<1x1x128xf32> to vector<1x1x128xf32>
    %212 = vector.broadcast %211 : vector<1x1x128xf32> to vector<1x8x128xf32>
    %c0_129 = arith.constant 0 : index
    %c0_130 = arith.constant 0 : index
    %c0_131 = arith.constant 0 : index
    %213 = vector.load %arg7[%c0_129, %c0_130, %c0_131] : memref<1x8x128xf32, #tpu.memory_space<vmem>>, vector<1x8x128xf32>
    tpu.vector_store %arg7[%c0_129, %c0_130, %c0_131], %212 {strides = array<i32>} : memref<1x8x128xf32, #tpu.memory_space<vmem>>, vector<1x8x128xf32>,
    return
  }
  func.func @transform_0(%arg0: i32) -> (i32, i32, i32) {
    %c0_i32 = arith.constant 0 : i32
    %c0_i32_0 = arith.constant 0 : i32
    %c0_i32_1 = arith.constant 0 : i32
    return %arg0, %c0_i32, %c0_i32_0 : i32, i32, i32
  }
  func.func @transform_1(%arg0: i32) -> (i32, i32, i32) {
    %c0_i32 = arith.constant 0 : i32
    %c0_i32_0 = arith.constant 0 : i32
    %c0_i32_1 = arith.constant 0 : i32
    %c0_i32_2 = arith.constant 0 : i32
    return %c0_i32, %c0_i32_0, %c0_i32_1 : i32, i32, i32
  }
  func.func @transform_2(%arg0: i32) -> (i32, i32, i32) {
    %c0_i32 = arith.constant 0 : i32
    %c0_i32_0 = arith.constant 0 : i32
    %c0_i32_1 = arith.constant 0 : i32
    %c0_i32_2 = arith.constant 0 : i32
    return %c0_i32, %c0_i32_0, %c0_i32_1 : i32, i32, i32
  }
  func.func @transform_3(%arg0: i32) -> (i32, i32) {
    %c0_i32 = arith.constant 0 : i32
    %c0_i32_0 = arith.constant 0 : i32
    %c0_i32_1 = arith.constant 0 : i32
    return %c0_i32, %c0_i32_0 : i32, i32
  }
  func.func @transform_4(%arg0: i32) -> (i32, i32, i32) {
    %c0_i32 = arith.constant 0 : i32
    %c0_i32_0 = arith.constant 0 : i32
    %c0_i32_1 = arith.constant 0 : i32
    %c0_i32_2 = arith.constant 0 : i32
    return %c0_i32, %c0_i32_0, %c0_i32_1 : i32, i32, i32
  }
  func.func @transform_5(%arg0: i32) -> (i32, i32) {
    %c0_i32 = arith.constant 0 : i32
    %c0_i32_0 = arith.constant 0 : i32
    %c0_i32_1 = arith.constant 0 : i32
    return %c0_i32, %c0_i32_0 : i32, i32
  }
  func.func @transform_6(%arg0: i32) -> (i32, i32, i32) {
    %c0_i32 = arith.constant 0 : i32
    %c0_i32_0 = arith.constant 0 : i32
    %c0_i32_1 = arith.constant 0 : i32
    return %arg0, %c0_i32, %c0_i32_0 : i32, i32, i32
  }
}

</mosaic_0001>

<bundles_post_ra>
// kernel: siamese_net_sync_forward.1
= control target key start
LH: loop header
LB: loop body
LE: loop exit
PB: predicated region body
PF: predicated region fallthrough
CT: control target
= control target key end

     0   :  { %s12121_s21 = smov 0   ;;  %s16505_s0 = inlined_call_operand.vmem [shape: f32[4,256,128], index: 0, kind: input, shape index: {}]   ;;  %s16506_s1 = inlined_call_operand.vmem [shape: f32[9,256,1], index: 1, kind: input, shape index: {}]   ;;  %s16507_s2 = inlined_call_operand.vmem [shape: f32[9,128,128], index: 2, kind: input, shape index: {}]   ;;  %s16508_s3 = inlined_call_operand.vmem [shape: f32[1,128], index: 3, kind: input, shape index: {}]   ;;  %s16509_s4 = inlined_call_operand.vmem [shape: f32[9,128,128], index: 4, kind: input, shape index: {}]   ;;  %s16510_s5 = inlined_call_operand.vmem [shape: f32[1,128], index: 5, kind: input, shape index: {}]   ;;  %s16511_s6 = inlined_call_operand.vmem [shape: f32[4,8,128], index: 6, kind: output, shape index: {}]  }
   0x1 LB: > { %s8085_s22 = sadd.s32 4294967295, %s12083_s21   ;;  %p8089_p0 = scmp.ge.s32.totalorder %s12083_s21, 1  ;;  %s12083_s21 = sphi %s12121_s21, %s16_s21  }
   0x2   : > { %p212_p1 = scmp.lt.s32.totalorder %s12083_s21, 5 }
   0x4   : > { %p213_p2 = pnand %p8089_p0, %p212_p1 }
   0x6   : > { %216 = sbr.rel (%p213_p2) target bundleno = 1749 (0x6d5), region = 44 }
   0xd   : > { %v8095_v0 = vld [vmem:[%s16506_s1 + $0x110] sm:$0xff]  ;;  %v8093_v1 = vld [vmem:[%s16506_s1 + $0x100] sm:$0xff]  ;;  %v12085_v2 = vmov 0   ;;  %v8096_v3 = vld [vmem:[%s16506_s1 + $0x118] sm:$0xff]  ;;  %p241_p3 = scmp.lt.s32.totalorder %s8085_s22, 3  ;;  %vm285_vm0 = vcmask 1040384  }
   0xe   : > { %12012 = vset.pattern.permute.xlu1 %v12085_v2  ;;  %12011 = vset.pattern.permute.xlu0 %v12085_v2  ;;  %v8094_v4 = vld [vmem:[%s16506_s1 + $0x108] sm:$0xff]  ;;  %v8097_v6 = vld [vmem:[%s16506_s1 + $0x120] sm:$0xff]  ;;  %v8100_v7 = vld [vmem:[%s16506_s1 + $0x138] sm:$0xff]  ;;  %vm1344_vm1 = vcmask 1046528  }
   0xf   : > { %697 = vperm.xlu1 %12012, %v8095_v0   ;;  %687 = vperm.xlu0 %12011, %v8093_v1   ;;  %v8098_v5 = vld [vmem:[%s16506_s1 + $0x128] sm:$0xff]  ;;  %v8099_v8 = vld [vmem:[%s16506_s1 + $0x130] sm:$0xff]  ;;  %v8101_v10 = vld [vmem:[%s16506_s1 + $0x140] sm:$0xff]  ;;  %s17747_s22 = smov (!%p241_p3, %s8085_s22), 3 }
  0x10   : > { %v8102_v9 = vld [vmem:[%s16506_s1 + $0x148] sm:$0xff]  ;;  %v8125_v11 = vld [vmem:[%s16507_s2 + $0x80] sm:$0xff]  ;;  %v8127_v14 = vld [vmem:[%s16507_s2 + $0x90] sm:$0xff]  ;;  %s8609_s29 = sshll.u32 %s17747_s22, 8  ;;  %s8092_s27 = sshll.u32 %s17747_s22, 3 }
  0x11   : > { %v8126_v12 = vld [vmem:[%s16507_s2 + $0x88] sm:$0xff]  ;;  %v8104_v15 = vld [vmem:[%s16506_s1 + $0x158] sm:$0xff]  ;;  %v8103_v16 = vld [vmem:[%s16506_s1 + $0x150] sm:$0xff]  ;;  %s12388_s12 = scalar_lea.vmem %s16505_s0, %s8609_s29  ;;  %s249_s30 = scalar_lea.vmem %s16511_s6, %s8092_s27 }
  0x12   : > { %v10914_v13 = vpack.c.bf16 %v8126_v12, %v8125_v11  ;;  %v8128_v17 = vld [vmem:[%s16507_s2 + $0x98] sm:$0xff]  ;;  %v8129_v19 = vld [vmem:[%s16507_s2 + $0xa0] sm:$0xff]  ;;  %v8130_v20 = vld [vmem:[%s16507_s2 + $0xa8] sm:$0xff] }
  0x13   : > { %702 = vperm.xlu1 %12012, %v8096_v3   ;;  %692 = vperm.xlu0 %12011, %v8094_v4   ;;  %v10918_v18 = vpack.c.bf16 %v8128_v17, %v8127_v14  ;;  %v8106_v21 = vld [vmem:[%s16506_s1 + $0x168] sm:$0xff]  ;;  %v8105_v22 = vld [vmem:[%s16506_s1 + $0x160] sm:$0xff]  ;;  %v10922_v23 = vpack.c.bf16 %v8130_v20, %v8129_v19  ;;  %v8131_v24 = vld [vmem:[%s16507_s2 + $0xb0] sm:$0xff] }
  0x14   : > { %10915 = vmatprep.subr.bf16.mxu0 %v10914_v13  ;;  %v8132_v25 = vld [vmem:[%s16507_s2 + $0xb8] sm:$0xff]  ;;  %v8107_v27 = vld [vmem:[%s16506_s1 + $0x170] sm:$0xff]  ;;  %v8133_v29 = vld [vmem:[%s16507_s2 + $0xc0] sm:$0xff] }
  0x15   : > { %10917 = vmatpush3.bf16.msra.mxu0 %v10914_v13  ;;  %v8108_v26 = vld [vmem:[%s16506_s1 + $0x178] sm:$0xff]  ;;  %v10926_v28 = vpack.c.bf16 %v8132_v25, %v8131_v24  ;;  %v8134_v30 = vld [vmem:[%s16507_s2 + $0xc8] sm:$0xff]  ;;  %v8109_v32 = vld [vmem:[%s16506_s1 + $0x180] sm:$0xff] }
  0x16   : > { %10919 = vmatprep.subr.bf16.mxu0 %v10918_v18  ;;  %v8110_v31 = vld [vmem:[%s16506_s1 + $0x188] sm:$0xff]  ;;  %v10930_v33 = vpack.c.bf16 %v8134_v30, %v8133_v29  ;;  %v8135_v34 = vld [vmem:[%s16507_s2 + $0xd0] sm:$0xff]  ;;  %v8136_v35 = vld [vmem:[%s16507_s2 + $0xd8] sm:$0xff] }
  0x17   : > { %712 = vperm.xlu1 %12012, %v8098_v5   ;;  %707 = vperm.xlu0 %12011, %v8097_v6   ;;  %v8112_v36 = vld [vmem:[%s16506_s1 + $0x198] sm:$0xff]  ;;  %v8111_v37 = vld [vmem:[%s16506_s1 + $0x190] sm:$0xff]  ;;  %v10934_v38 = vpack.c.bf16 %v8136_v35, %v8135_v34  ;;  %v8137_v39 = vld [vmem:[%s16507_s2 + $0xe0] sm:$0xff] }
  0x18   : > { %v8138_v40 = vld [vmem:[%s16507_s2 + $0xe8] sm:$0xff]  ;;  %v8113_v42 = vld [vmem:[%s16506_s1 + $0x1a0] sm:$0xff]  ;;  %v8139_v44 = vld [vmem:[%s16507_s2 + $0xf0] sm:$0xff] }
  0x19   : > { %10921 = vmatpush3.bf16.msra.mxu0 %v10918_v18  ;;  %v8114_v41 = vld [vmem:[%s16506_s1 + $0x1a8] sm:$0xff]  ;;  %v10938_v43 = vpack.c.bf16 %v8138_v40, %v8137_v39  ;;  %v8140_v45 = vld [vmem:[%s16507_s2 + $0xf8] sm:$0xff]  ;;  %v8115_v47 = vld [vmem:[%s16506_s1 + $0x1b0] sm:$0xff] }
  0x1a   : > { %10923 = vmatprep.subr.bf16.mxu0 %v10922_v23  ;;  %v8116_v46 = vld [vmem:[%s16506_s1 + $0x1b8] sm:$0xff]  ;;  %v10942_v48 = vpack.c.bf16 %v8140_v45, %v8139_v44  ;;  %v636_v49 = vld [vmem:[%s16507_s2] sm:$0xff]  ;;  %v637_v50 = vld [vmem:[%s16507_s2 + $0x8] sm:$0xff] }
  0x1b   : > { %722 = vperm.xlu1 %12012, %v8100_v7   ;;  %717 = vperm.xlu0 %12011, %v8099_v8   ;;  %v8118_v51 = vld [vmem:[%s16506_s1 + $0x1c8] sm:$0xff]  ;;  %v8117_v52 = vld [vmem:[%s16506_s1 + $0x1c0] sm:$0xff]  ;;  %v12261_v53 = vpack.c.bf16 %v637_v50, %v636_v49  ;;  %v8120_v54 = vld [vmem:[%s16506_s1 + $0x1d8] sm:$0xff] }
  0x1c   : > { %v8119_v55 = vld [vmem:[%s16506_s1 + $0x1d0] sm:$0xff]  ;;  %v8122_v56 = vld [vmem:[%s16506_s1 + $0x1e8] sm:$0xff]  ;;  %v8121_v57 = vld [vmem:[%s16506_s1 + $0x1e0] sm:$0xff] }
  0x1d   : > { %10925 = vmatpush3.bf16.msra.mxu0 %v10922_v23  ;;  %v8124_v58 = vld [vmem:[%s16506_s1 + $0x1f8] sm:$0xff]  ;;  %v8123_v59 = vld [vmem:[%s16506_s1 + $0x1f0] sm:$0xff]  ;;  %v413_v60 = vld [vmem:[%s16506_s1 + $0x8] sm:$0xff] }
  0x1e   : > { %10927 = vmatprep.subr.bf16.mxu0 %v10926_v28  ;;  %v412_v61 = vld [vmem:[%s16506_s1] sm:$0xff]  ;;  %v415_v62 = vld [vmem:[%s16506_s1 + $0x18] sm:$0xff]  ;;  %v414_v63 = vld [vmem:[%s16506_s1 + $0x10] sm:$0xff] }
  0x1f   : > { %732 = vperm.xlu1 %12012, %v8102_v9   ;;  %727 = vperm.xlu0 %12011, %v8101_v10   ;;  %v417_v0 = vld [vmem:[%s16506_s1 + $0x28] sm:$0xff]  ;;  %v416_v1 = vld [vmem:[%s16506_s1 + $0x20] sm:$0xff]  ;;  %v419_v2 = vld [vmem:[%s16506_s1 + $0x38] sm:$0xff] }
  0x20   : > { %v418_v3 = vld [vmem:[%s16506_s1 + $0x30] sm:$0xff]  ;;  %v421_v4 = vld [vmem:[%s16506_s1 + $0x48] sm:$0xff]  ;;  %v420_v5 = vld [vmem:[%s16506_s1 + $0x40] sm:$0xff] }
  0x21   : > { %10929 = vmatpush3.bf16.msra.mxu0 %v10926_v28  ;;  %v423_v6 = vld [vmem:[%s16506_s1 + $0x58] sm:$0xff]  ;;  %v422_v7 = vld [vmem:[%s16506_s1 + $0x50] sm:$0xff]  ;;  %v425_v8 = vld [vmem:[%s16506_s1 + $0x68] sm:$0xff] }
  0x22   : > { %10931 = vmatprep.subr.bf16.mxu0 %v10930_v33  ;;  %v424_v9 = vld [vmem:[%s16506_s1 + $0x60] sm:$0xff]  ;;  %v427_v10 = vld [vmem:[%s16506_s1 + $0x78] sm:$0xff]  ;;  %v426_v11 = vld [vmem:[%s16506_s1 + $0x70] sm:$0xff] }
  0x23   : > { %742 = vperm.xlu1 %12012, %v8104_v15   ;;  %737 = vperm.xlu0 %12011, %v8103_v16   ;;  %v429_v12 = vld [vmem:[%s16506_s1 + $0x88] sm:$0xff]  ;;  %v428_v13 = vld [vmem:[%s16506_s1 + $0x80] sm:$0xff]  ;;  %v431_v14 = vld [vmem:[%s16506_s1 + $0x98] sm:$0xff] }
  0x24   : > { %v430_v15 = vld [vmem:[%s16506_s1 + $0x90] sm:$0xff]  ;;  %v433_v16 = vld [vmem:[%s16506_s1 + $0xa8] sm:$0xff]  ;;  %v432_v17 = vld [vmem:[%s16506_s1 + $0xa0] sm:$0xff] }
  0x25   : > { %10933 = vmatpush3.bf16.msra.mxu0 %v10930_v33  ;;  %v435_v18 = vld [vmem:[%s16506_s1 + $0xb8] sm:$0xff]  ;;  %v434_v19 = vld [vmem:[%s16506_s1 + $0xb0] sm:$0xff]  ;;  %v437_v20 = vld [vmem:[%s16506_s1 + $0xc8] sm:$0xff] }
  0x26   : > { %10935 = vmatprep.subr.bf16.mxu0 %v10934_v38  ;;  %v438_v23 = vld [vmem:[%s16506_s1 + $0xd0] sm:$0xff]  ;;  %v441_v24 = vld [vmem:[%s16506_s1 + $0xe8] sm:$0xff]  ;;  %v440_v25 = vld [vmem:[%s16506_s1 + $0xe0] sm:$0xff] }
  0x27   : > { %752 = vperm.xlu1 %12012, %v8106_v21   ;;  %747 = vperm.xlu0 %12011, %v8105_v22   ;;  %v436_v21 = vld [vmem:[%s16506_s1 + $0xc0] sm:$0xff]  ;;  %v439_v22 = vld [vmem:[%s16506_s1 + $0xd8] sm:$0xff]  ;;  %v8142_v28 = vld [vmem:[%s16506_s1 + $0x208] sm:$0xff] }
  0x28   : > { %v8141_v29 = vld [vmem:[%s16506_s1 + $0x200] sm:$0xff]  ;;  %v12397_v30 = vld [vmem:[%s12388_s12 + $0xf0] sm:$0xff]  ;;  %v12409_v35 = vld [vmem:[%s12388_s12 + $0xf8] sm:$0xff] }
  0x29   : > { %10937 = vmatpush3.bf16.msra.mxu0 %v10934_v38  ;;  %v12404_v33 = vld [vmem:[%s12388_s12] sm:$0xff]  ;;  %v638_v38 = vld [vmem:[%s16507_s2 + $0x10] sm:$0xff]  ;;  %v639_v39 = vld [vmem:[%s16507_s2 + $0x18] sm:$0xff] }
  0x2a   : > { %10939 = vmatprep.subr.bf16.mxu0 %v10938_v43  ;;  %v12435_v45 = vld [vmem:[%s12388_s12 + $0x10] sm:$0xff]  ;;  %v640_v49 = vld [vmem:[%s16507_s2 + $0x20] sm:$0xff]  ;;  %v641_v50 = vld [vmem:[%s16507_s2 + $0x28] sm:$0xff] }
  0x2b   : > { %762 = vperm.xlu1 %12012, %v8108_v26   ;;  %757 = vperm.xlu0 %12011, %v8107_v27   ;;  %v443_v26 = vld [vmem:[%s16506_s1 + $0xf8] sm:$0xff]  ;;  %v442_v27 = vld [vmem:[%s16506_s1 + $0xf0] sm:$0xff] }
  0x2d   : > { %10941 = vmatpush3.bf16.msra.mxu0 %v10938_v43  ;;  %v12430_v43 = vld [vmem:[%s12388_s12 + $0x8] sm:$0xff] }
  0x2e   : > { %10943 = vmatprep.subr.bf16.mxu0 %v10942_v48 }
  0x2f   : > { %772 = vperm.xlu1 %12012, %v8110_v31   ;;  %767 = vperm.xlu0 %12011, %v8109_v32  }
  0x31   : > { %10945 = vmatpush3.bf16.msra.mxu0 %v10942_v48  ;;  %v10950_v48 = vpack.c.bf16 %v639_v39, %v638_v38  ;;  %v12561_v39 = vld [vmem:[%s12388_s12 + $0x58] sm:$0xff] }
  0x32   : > { %10947 = vmatprep.subr.bf16.mxu0 %v12261_v53 }
  0x33   : > { %782 = vperm.xlu1 %12012, %v8112_v36   ;;  %777 = vperm.xlu0 %12011, %v8111_v37   ;;  %v8144_v36 = vld [vmem:[%s16506_s1 + $0x218] sm:$0xff]  ;;  %v8143_v37 = vld [vmem:[%s16506_s1 + $0x210] sm:$0xff] }
  0x37   : > { %792 = vperm.xlu1 %12012, %v8114_v41   ;;  %787 = vperm.xlu0 %12011, %v8113_v42  }
  0x3b   : > { %802 = vperm.xlu1 %12012, %v8116_v46   ;;  %797 = vperm.xlu0 %12011, %v8115_v47   ;;  %v8146_v46 = vld [vmem:[%s16506_s1 + $0x228] sm:$0xff]  ;;  %v8145_v47 = vld [vmem:[%s16506_s1 + $0x220] sm:$0xff] }
  0x3f   : > { %812 = vperm.xlu1 %12012, %v8118_v51   ;;  %807 = vperm.xlu0 %12011, %v8117_v52  }
  0x43   : > { %822 = vperm.xlu1 %12012, %v8120_v54   ;;  %817 = vperm.xlu0 %12011, %v8119_v55   ;;  %v12457_v55 = vld [vmem:[%s12388_s12 + $0x18] sm:$0xff] }
  0x47   : > { %832 = vperm.xlu1 %12012, %v8122_v56   ;;  %827 = vperm.xlu0 %12011, %v8121_v57   ;;  %v12462_v57 = vld [vmem:[%s12388_s12 + $0x20] sm:$0xff] }
  0x4b   : > { %842 = vperm.xlu1 %12012, %v8124_v58   ;;  %837 = vperm.xlu0 %12011, %v8123_v59   ;;  %v8147_v58 = vld [vmem:[%s16506_s1 + $0x230] sm:$0xff]  ;;  %v10954_v59 = vpack.c.bf16 %v641_v50, %v640_v49  ;;  %v651_v50 = vld [vmem:[%s16507_s2 + $0x78] sm:$0xff] }
  0x4c   : > { %v650_v49 = vld [vmem:[%s16507_s2 + $0x70] sm:$0xff] }
  0x4f   : > { %451 = vperm.xlu1 %12012, %v413_v60   ;;  %446 = vperm.xlu0 %12011, %v412_v61   ;;  %v642_v60 = vld [vmem:[%s16507_s2 + $0x30] sm:$0xff]  ;;  %v643_v61 = vld [vmem:[%s16507_s2 + $0x38] sm:$0xff] }
  0x53   : > { %461 = vperm.xlu1 %12012, %v415_v62   ;;  %456 = vperm.xlu0 %12011, %v414_v63  }
  0x57   : > { %471 = vperm.xlu1 %12012, %v417_v0   ;;  %466 = vperm.xlu0 %12011, %v416_v1   ;;  %v12483_v1 = vld [vmem:[%s12388_s12 + $0x28] sm:$0xff] }
  0x5b   : > { %481 = vperm.xlu1 %12012, %v419_v2   ;;  %476 = vperm.xlu0 %12011, %v418_v3   ;;  %v12488_v3 = vld [vmem:[%s12388_s12 + $0x30] sm:$0xff] }
  0x5f   : > { %491 = vperm.xlu1 %12012, %v421_v4   ;;  %486 = vperm.xlu0 %12011, %v420_v5   ;;  %v8150_v4 = vld [vmem:[%s16506_s1 + $0x248] sm:$0xff]  ;;  %v8149_v5 = vld [vmem:[%s16506_s1 + $0x240] sm:$0xff] }
  0x63   : > { %501 = vperm.xlu1 %12012, %v423_v6   ;;  %496 = vperm.xlu0 %12011, %v422_v7   ;;  %v10958_v6 = vpack.c.bf16 %v643_v61, %v642_v60  ;;  %v644_v7 = vld [vmem:[%s16507_s2 + $0x40] sm:$0xff]  ;;  %v12592_v60 = vld [vmem:[%s12388_s12 + $0x70] sm:$0xff]  ;;  %v8158_v61 = vld [vmem:[%s16506_s1 + $0x288] sm:$0xff] }
  0x67   : > { %511 = vperm.xlu1 %12012, %v425_v8   ;;  %506 = vperm.xlu0 %12011, %v424_v9   ;;  %v645_v8 = vld [vmem:[%s16507_s2 + $0x48] sm:$0xff] }
  0x6b   : > { %521 = vperm.xlu1 %12012, %v427_v10   ;;  %516 = vperm.xlu0 %12011, %v426_v11  }
  0x6f   : > { %531 = vperm.xlu1 %12012, %v429_v12   ;;  %526 = vperm.xlu0 %12011, %v428_v13   ;;  %v12509_v12 = vld [vmem:[%s12388_s12 + $0x38] sm:$0xff] }
  0x73   : > { %541 = vperm.xlu1 %12012, %v431_v14   ;;  %536 = vperm.xlu0 %12011, %v430_v15   ;;  %v12514_v14 = vld [vmem:[%s12388_s12 + $0x40] sm:$0xff]  ;;  %v8152_v15 = vld [vmem:[%s16506_s1 + $0x258] sm:$0xff] }
  0x77   : > { %551 = vperm.xlu1 %12012, %v433_v16   ;;  %546 = vperm.xlu0 %12011, %v432_v17   ;;  %v8151_v16 = vld [vmem:[%s16506_s1 + $0x250] sm:$0xff]  ;;  %v10962_v17 = vpack.c.bf16 %v645_v8, %v644_v7 }
  0x7b   : > { %561 = vperm.xlu1 %12012, %v435_v18   ;;  %556 = vperm.xlu0 %12011, %v434_v19   ;;  %v646_v18 = vld [vmem:[%s16507_s2 + $0x50] sm:$0xff]  ;;  %v647_v19 = vld [vmem:[%s16507_s2 + $0x58] sm:$0xff] }
  0x7f   : > { %571 = vperm.xlu1 %12012, %v437_v20   ;;  %566 = vperm.xlu0 %12011, %v436_v21  }
  0x83   : > { %581 = vperm.xlu1 %12012, %v439_v22   ;;  %576 = vperm.xlu0 %12011, %v438_v23   ;;  %v12535_v23 = vld [vmem:[%s12388_s12 + $0x48] sm:$0xff] }
  0x87   : > { %591 = vperm.xlu1 %12012, %v441_v24   ;;  %586 = vperm.xlu0 %12011, %v440_v25   ;;  %v12540_v25 = vld [vmem:[%s12388_s12 + $0x50] sm:$0xff] }
  0x8b   : > { %601 = vperm.xlu1 %12012, %v443_v26   ;;  %596 = vperm.xlu0 %12011, %v442_v27   ;;  %v8154_v26 = vld [vmem:[%s16506_s1 + $0x268] sm:$0xff]  ;;  %v8153_v27 = vld [vmem:[%s16506_s1 + $0x260] sm:$0xff] }
  0x8e   : > { %v12399_v31 = vpop.permute.xlu1 %697  ;;  %v12401_v32 = vpop.permute.xlu0 %687 }
  0x8f   : > { %16955 = vst [vmem:[#allocation2_spill] sm:$0xff] %v12399_v31  ;;  %16956 = vst [vmem:[#allocation3_spill] sm:$0xff] %v12401_v32  ;;  %1482 = vperm.xlu1 %12012, %v8142_v28   ;;  %1477 = vperm.xlu0 %12011, %v8141_v29   ;;  %v845_v34 = vmul.f32 %v12401_v32, %v12397_v30  ;;  %v847_v40 = vmul.f32 %v12399_v31, %v12404_v33  ;;  %v648_v29 = vld [vmem:[%s16507_s2 + $0x60] sm:$0xff] }
  0x90   : > { %v10966_v28 = vpack.c.bf16 %v647_v19, %v646_v18 }
  0x91   : > { %9506 = vmatprep.mubr.f32.mxu0 %v845_v34  ;;  %v649_v34 = vld [vmem:[%s16507_s2 + $0x68] sm:$0xff] }
  0x92   : > { %v12425_v41 = vpop.permute.xlu1 %702  ;;  %v12427_v42 = vpop.permute.xlu0 %692 }
  0x93   : > { %16957 = vst [vmem:[#allocation4_spill] sm:$0xff] %v12425_v41  ;;  %16958 = vst [vmem:[#allocation5_spill] sm:$0xff] %v12427_v42  ;;  %v846_v44 = vmul.f32 %v12427_v42, %v12409_v35  ;;  %1492 = vperm.xlu1 %12012, %v8144_v36   ;;  %1487 = vperm.xlu0 %12011, %v8143_v37   ;;  %v848_v54 = vmul.f32 %v12425_v41, %v12430_v43 }
  0x95   : > { %9507 = vmatmul.mubr.f32.vlgmr.msra.gmra.mrb[0].mxu0 %v846_v44  ;;  %v12566_v44 = vld [vmem:[%s12388_s12 + $0x60] sm:$0xff] }
  0x96   : > { %10949 = vmatpush3.bf16.msra.mxu0 %v12261_v53  ;;  %v12450_v51 = vpop.permute.xlu1 %712  ;;  %v12452_v52 = vpop.permute.xlu0 %707  ;;  %9509 = vmatprep.mubr.f32.mxu0 %v847_v40  ;;  %v8148_v53 = vld [vmem:[%s16506_s1 + $0x238] sm:$0xff] }
  0x97   : > { %16959 = vst [vmem:[#allocation6_spill] sm:$0xff] %v12450_v51  ;;  %16960 = vst [vmem:[#allocation7_spill] sm:$0xff] %v12452_v52  ;;  %v849_v56 = vmul.f32 %v12452_v52, %v12435_v45  ;;  %1502 = vperm.xlu1 %12012, %v8146_v46   ;;  %1497 = vperm.xlu0 %12011, %v8145_v47   ;;  %v850_v0 = vmul.f32 %v12450_v51, %v12457_v55  ;;  %v8156_v46 = vld [vmem:[%s16506_s1 + $0x278] sm:$0xff]  ;;  %v8155_v47 = vld [vmem:[%s16506_s1 + $0x270] sm:$0xff] }
  0x98   : > { %10951 = vmatprep.subr.bf16.mxu0 %v10950_v48 }
  0x99   : > { %9510 = vmatmul.mubr.f32.gmra.mrb[2].mxu0 %v848_v54 }
  0x9a   : > { %v12476_v62 = vpop.permute.xlu1 %722  ;;  %v12478_v63 = vpop.permute.xlu0 %717  ;;  %9512 = vmatprep.mubr.f32.mxu0 %v849_v56  ;;  %10953 = vmatpush3.bf16.msra.mxu0 %v10950_v48  ;;  %v10970_v48 = vpack.c.bf16 %v649_v34, %v648_v29  ;;  %v8162_v29 = vld [vmem:[%s16506_s1 + $0x2a8] sm:$0xff]  ;;  %v8161_v34 = vld [vmem:[%s16506_s1 + $0x2a0] sm:$0xff] }
  0x9b   : > { %16961 = vst [vmem:[#allocation8_spill] sm:$0xff] %v12476_v62  ;;  %16962 = vst [vmem:[#allocation9_spill] sm:$0xff] %v12478_v63  ;;  %v851_v2 = vmul.f32 %v12478_v63, %v12462_v57  ;;  %1512 = vperm.xlu1 %12012, %v8148_v53   ;;  %1507 = vperm.xlu0 %12011, %v8147_v58   ;;  %v852_v11 = vmul.f32 %v12476_v62, %v12483_v1  ;;  %v12587_v58 = vld [vmem:[%s12388_s12 + $0x68] sm:$0xff] }
  0x9c   : > { %10955 = vmatprep.subr.bf16.mxu0 %v10954_v59 }
  0x9d   : > { %9513 = vmatmul.mubr.f32.gmra.mrb[4].mxu0 %v850_v0  ;;  %v8157_v0 = vld [vmem:[%s16506_s1 + $0x280] sm:$0xff] }
  0x9e   : > { %v12502_v9 = vpop.permute.xlu1 %732  ;;  %v12504_v10 = vpop.permute.xlu0 %727  ;;  %9515 = vmatprep.mubr.f32.mxu0 %v851_v2  ;;  %10957 = vmatpush3.bf16.msra.mxu0 %v10954_v59  ;;  %v10974_v2 = vpack.c.bf16 %v651_v50, %v650_v49  ;;  %v12661_v49 = vld [vmem:[%s12388_s12 + $0xa0] sm:$0xff]  ;;  %v8164_v50 = vld [vmem:[%s16506_s1 + $0x2b8] sm:$0xff] }
  0x9f   : > { %16963 = vst [vmem:[#allocation10_spill] sm:$0xff] %v12502_v9  ;;  %16964 = vst [vmem:[#allocation11_spill] sm:$0xff] %v12504_v10  ;;  %v853_v13 = vmul.f32 %v12504_v10, %v12488_v3  ;;  %1522 = vperm.xlu1 %12012, %v8150_v4   ;;  %1517 = vperm.xlu0 %12011, %v8149_v5   ;;  %v854_v22 = vmul.f32 %v12502_v9, %v12509_v12  ;;  %v8173_v4 = vld [vmem:[%s16507_s2 + $0x100] sm:$0xff]  ;;  %v8174_v5 = vld [vmem:[%s16507_s2 + $0x108] sm:$0xff] }
  0xa0   : > { %10959 = vmatprep.subr.bf16.mxu0 %v10958_v6  ;;  %v12626_v18 = vpack.c.bf16 %v8174_v5, %v8173_v4  ;;  %v12681_v5 = vld [vmem:[%s12388_s12 + $0xb0] sm:$0xff] }
  0xa1   : > { %9516 = vmatmul.mubr.f32.gmra.mrb[6].mxu0 %v852_v11  ;;  %v12613_v11 = vld [vmem:[%s12388_s12 + $0x78] sm:$0xff] }
  0xa2   : > { %v12528_v20 = vpop.permute.xlu1 %742  ;;  %v12530_v21 = vpop.permute.xlu0 %737  ;;  %9518 = vmatprep.mubr.f32.mxu0 %v853_v13  ;;  %10961 = vmatpush3.bf16.msra.mxu0 %v10958_v6 }
  0xa3   : > { %16965 = vst [vmem:[#allocation12_spill] sm:$0xff] %v12528_v20  ;;  %16966 = vst [vmem:[#allocation13_spill] sm:$0xff] %v12530_v21  ;;  %v855_v24 = vmul.f32 %v12530_v21, %v12514_v14  ;;  %1532 = vperm.xlu1 %12012, %v8152_v15   ;;  %1527 = vperm.xlu0 %12011, %v8151_v16   ;;  %v856_v38 = vmul.f32 %v12528_v20, %v12535_v23  ;;  %v12618_v15 = vld [vmem:[%s12388_s12 + $0x80] sm:$0xff]  ;;  %v8160_v16 = vld [vmem:[%s16506_s1 + $0x298] sm:$0xff] }
  0xa4   : > { %10963 = vmatprep.subr.bf16.mxu0 %v10962_v17 }
  0xa5   : > { %9519 = vmatmul.mubr.f32.gmra.mrb[8].mxu0 %v854_v22 }
  0xa6   : > { %v12554_v36 = vpop.permute.xlu1 %752  ;;  %v12556_v37 = vpop.permute.xlu0 %747  ;;  %9521 = vmatprep.mubr.f32.mxu0 %v855_v24  ;;  %10965 = vmatpush3.bf16.msra.mxu0 %v10962_v17  ;;  %v8159_v17 = vld [vmem:[%s16506_s1 + $0x290] sm:$0xff] }
  0xa7   : > { %16967 = vst [vmem:[#allocation14_spill] sm:$0xff] %v12554_v36  ;;  %16968 = vst [vmem:[#allocation15_spill] sm:$0xff] %v12556_v37  ;;  %v857_v40 = vmul.f32 %v12556_v37, %v12540_v25  ;;  %1542 = vperm.xlu1 %12012, %v8154_v26   ;;  %1537 = vperm.xlu0 %12011, %v8153_v27   ;;  %v858_v53 = vmul.f32 %v12554_v36, %v12561_v39  ;;  %v12635_v26 = vld [vmem:[%s12388_s12 + $0x88] sm:$0xff] }
  0xa8   : > { %10967 = vmatprep.subr.bf16.mxu0 %v10966_v28 }
  0xa9   : > { %9522 = vmatmul.mubr.f32.gmra.mrb[10].mxu0 %v856_v38 }
  0xaa   : > { %v12580_v54 = vpop.permute.xlu1 %762  ;;  %v12582_v56 = vpop.permute.xlu0 %757  ;;  %9524 = vmatprep.mubr.f32.mxu0 %v857_v40  ;;  %10969 = vmatpush3.bf16.msra.mxu0 %v10966_v28  ;;  %v12640_v28 = vld [vmem:[%s12388_s12 + $0x90] sm:$0xff] }
  0xab   : > { %16969 = vst [vmem:[#allocation16_spill] sm:$0xff] %v12580_v54  ;;  %16970 = vst [vmem:[#allocation17_spill] sm:$0xff] %v12582_v56  ;;  %v859_v59 = vmul.f32 %v12582_v56, %v12566_v44  ;;  %1552 = vperm.xlu1 %12012, %v8156_v46   ;;  %1547 = vperm.xlu0 %12011, %v8155_v47   ;;  %v860_v8 = vmul.f32 %v12580_v54, %v12587_v58  ;;  %v12656_v47 = vld [vmem:[%s12388_s12 + $0x98] sm:$0xff] }
  0xac   : > { %10971 = vmatprep.subr.bf16.mxu0 %v10970_v48 }
  0xad   : > { %9525 = vmatmul.mubr.f32.gmra.mrb[12].mxu0 %v858_v53  ;;  %v8163_v53 = vld [vmem:[%s16506_s1 + $0x2b0] sm:$0xff] }
  0xae   : > { %v12606_v6 = vpop.permute.xlu1 %772  ;;  %v12608_v7 = vpop.permute.xlu0 %767  ;;  %9527 = vmatprep.mubr.f32.mxu0 %v859_v59  ;;  %10973 = vmatpush3.bf16.msra.mxu0 %v10970_v48 }
  0xaf   : > { %16971 = vst [vmem:[#allocation18_spill] sm:$0xff] %v12606_v6  ;;  %16972 = vst [vmem:[#allocation19_spill] sm:$0xff] %v12608_v7  ;;  %v861_v13 = vmul.f32 %v12608_v7, %v12592_v60  ;;  %1562 = vperm.xlu1 %12012, %v8158_v61   ;;  %1557 = vperm.xlu0 %12011, %v8157_v0   ;;  %v862_v24 = vmul.f32 %v12606_v6, %v12613_v11  ;;  %v324_v7 = vrot.slane %v12430_v43, 7 }
  0xb0   : > { %10975 = vmatprep.subr.bf16.mxu0 %v10974_v2 }
  0xb1   : > { %9528 = vmatmul.mubr.f32.gmra.mrb[14].mxu0 %v860_v8  ;;  %v8166_v8 = vld [vmem:[%s16506_s1 + $0x2c8] sm:$0xff] }
  0xb2   : > { %v12628_v19 = vpop.permute.xlu1 %782  ;;  %v12630_v22 = vpop.permute.xlu0 %777  ;;  %9530 = vmatprep.mubr.f32.mxu0 %v861_v13  ;;  %10977 = vmatpush3.bf16.msra.mxu0 %v10974_v2  ;;  %v12676_v2 = vld [vmem:[%s12388_s12 + $0xa8] sm:$0xff]  ;;  %v8165_v13 = vld [vmem:[%s16506_s1 + $0x2c0] sm:$0xff] }
  0xb3   : > { %16973 = vst [vmem:[#allocation20_spill] sm:$0xff] %v12628_v19  ;;  %16974 = vst [vmem:[#allocation21_spill] sm:$0xff] %v12630_v22  ;;  %v863_v27 = vmul.f32 %v12630_v22, %v12618_v15  ;;  %1572 = vperm.xlu1 %12012, %v8160_v16   ;;  %1567 = vperm.xlu0 %12011, %v8159_v17   ;;  %v864_v46 = vmul.f32 %v12628_v19, %v12635_v26  ;;  %v289_v19 = vrot.slane %v12409_v35, 7  ;;  %v8190_v22 = vld [vmem:[%s16506_s1 + $0x308] sm:$0xff] }
  0xb4   : > { %10979 = vmatprep.subr.bf16.mxu0 %v12626_v18 }
  0xb5   : > { %9531 = vmatmul.mubr.f32.gmra.mrb[16].mxu0 %v862_v24 }
  0xb6   : > { %v12649_v38 = vpop.permute.xlu1 %792  ;;  %v12651_v40 = vpop.permute.xlu0 %787  ;;  %9533 = vmatprep.mubr.f32.mxu0 %v863_v27  ;;  %v12696_v27 = vld [vmem:[%s12388_s12 + $0xb8] sm:$0xff] }
  0xb7   : > { %16975 = vst [vmem:[#allocation22_spill] sm:$0xff] %v12649_v38  ;;  %16976 = vst [vmem:[#allocation23_spill] sm:$0xff] %v12651_v40  ;;  %v865_v48 = vmul.f32 %v12651_v40, %v12640_v28  ;;  %1582 = vperm.xlu1 %12012, %v8162_v29   ;;  %1577 = vperm.xlu0 %12011, %v8161_v34   ;;  %v866_v0 = vmul.f32 %v12649_v38, %v12656_v47  ;;  %v12701_v34 = vld [vmem:[%s12388_s12 + $0xc0] sm:$0xff]  ;;  %v287_v38 = vrot.slane %v12397_v30, 7 }
  0xb9   : > { %9534 = vmatmul.mubr.f32.gmra.mrb[18].mxu0 %v864_v46  ;;  %v8168_v46 = vld [vmem:[%s16506_s1 + $0x2d8] sm:$0xff]  ;;  %v12784_v6 = vsel %vm285_vm0, %v287_v38, %v289_v19 }
  0xba   : > { %v12669_v59 = vpop.permute.xlu1 %802  ;;  %v12671_v61 = vpop.permute.xlu0 %797  ;;  %9536 = vmatprep.mubr.f32.mxu0 %v865_v48  ;;  %v8167_v48 = vld [vmem:[%s16506_s1 + $0x2d0] sm:$0xff]  ;;  %16990 = vst [vmem:[#allocation37_spill] sm:$0xff] %v12784_v6 }
  0xbb   : > { %16977 = vst [vmem:[#allocation24_spill] sm:$0xff] %v12669_v59  ;;  %16978 = vst [vmem:[#allocation25_spill] sm:$0xff] %v12671_v61  ;;  %v867_v4 = vmul.f32 %v12671_v61, %v12661_v49  ;;  %1592 = vperm.xlu1 %12012, %v8164_v50   ;;  %1587 = vperm.xlu0 %12011, %v8163_v53   ;;  %v868_v24 = vmul.f32 %v12669_v59, %v12676_v2  ;;  %v12744_v61 = vld [vmem:[%s12388_s12 + $0xe0] sm:$0xff] }
  0xbd   : > { %9537 = vmatmul.mubr.f32.gmra.mrb[20].mxu0 %v866_v0 }
  0xbe   : > { %v12689_v16 = vpop.permute.xlu1 %812  ;;  %v12691_v17 = vpop.permute.xlu0 %807  ;;  %9539 = vmatprep.mubr.f32.mxu0 %v867_v4  ;;  %v12716_v4 = vld [vmem:[%s12388_s12 + $0xc8] sm:$0xff] }
  0xbf   : > { %16979 = vst [vmem:[#allocation26_spill] sm:$0xff] %v12689_v16  ;;  %16980 = vst [vmem:[#allocation27_spill] sm:$0xff] %v12691_v17  ;;  %v869_v29 = vmul.f32 %v12691_v17, %v12681_v5  ;;  %1602 = vperm.xlu1 %12012, %v8166_v8   ;;  %1597 = vperm.xlu0 %12011, %v8165_v13   ;;  %v870_v0 = vmul.f32 %v12689_v16, %v12696_v27  ;;  %v12721_v13 = vld [vmem:[%s12388_s12 + $0xd0] sm:$0xff]  ;;  %v12730_v16 = vld [vmem:[%s12388_s12 + $0xe8] sm:$0xff] }
  0xc1   : > { %9540 = vmatmul.mubr.f32.gmra.mrb[22].mxu0 %v868_v24  ;;  %v8170_v24 = vld [vmem:[%s16506_s1 + $0x2e8] sm:$0xff] }
  0xc2   : > { %v12709_v50 = vpop.permute.xlu1 %822  ;;  %v12711_v53 = vpop.permute.xlu0 %817  ;;  %9542 = vmatprep.mubr.f32.mxu0 %v869_v29  ;;  %v8169_v29 = vld [vmem:[%s16506_s1 + $0x2e0] sm:$0xff] }
  0xc3   : > { %16981 = vst [vmem:[#allocation28_spill] sm:$0xff] %v12709_v50  ;;  %16982 = vst [vmem:[#allocation29_spill] sm:$0xff] %v12711_v53  ;;  %v871_v8 = vmul.f32 %v12711_v53, %v12701_v34  ;;  %1612 = vperm.xlu1 %12012, %v8168_v46   ;;  %1607 = vperm.xlu0 %12011, %v8167_v48   ;;  %v872_v46 = vmul.f32 %v12709_v50, %v12716_v4  ;;  %v12739_v48 = vld [vmem:[%s12388_s12 + $0xd8] sm:$0xff]  ;;  %v16524_v50 = vrot.slane %v12730_v16, 7 }
  0xc5   : > { %9543 = vmatmul.mubr.f32.gmra.mrb[24].mxu0 %v870_v0  ;;  %v8172_v0 = vld [vmem:[%s16506_s1 + $0x2f8] sm:$0xff] }
  0xc6   : > { %v12732_v17 = vpop.permute.xlu1 %832  ;;  %v12734_v59 = vpop.permute.xlu0 %827  ;;  %9545 = vmatprep.mubr.f32.mxu0 %v871_v8  ;;  %v8171_v8 = vld [vmem:[%s16506_s1 + $0x2f0] sm:$0xff] }
  0xc7   : > { %16983 = vst [vmem:[#allocation30_spill] sm:$0xff] %v12732_v17  ;;  %16984 = vst [vmem:[#allocation31_spill] sm:$0xff] %v12734_v59  ;;  %v873_v53 = vmul.f32 %v12734_v59, %v12721_v13  ;;  %1622 = vperm.xlu1 %12012, %v8170_v24   ;;  %1617 = vperm.xlu0 %12011, %v8169_v29   ;;  %v874_v29 = vmul.f32 %v12732_v17, %v12739_v48  ;;  %v323_v17 = vrot.slane %v12404_v33, 7 }
  0xc9   : > { %9546 = vmatmul.mubr.f32.gmra.mrb[26].mxu0 %v872_v46  ;;  %v12766_v46 = vsel %vm285_vm0, %v16524_v50, %v287_v38  ;;  %v12813_v36 = vsel %vm285_vm0, %v323_v17, %v324_v7 }
  0xca   : > { %v12754_v40 = vpop.permute.xlu1 %842  ;;  %v12756_v24 = vpop.permute.xlu0 %837  ;;  %9548 = vmatprep.mubr.f32.mxu0 %v873_v53  ;;  %16987 = vst [vmem:[#allocation34_spill] sm:$0xff] %v12766_v46  ;;  %v8189_v53 = vld [vmem:[%s16506_s1 + $0x300] sm:$0xff]  ;;  %16994 = vst [vmem:[#allocation41_spill] sm:$0xff] %v12813_v36 }
  0xcb   : > { %16985 = vst [vmem:[#allocation32_spill] sm:$0xff] %v12754_v40  ;;  %16986 = vst [vmem:[#allocation33_spill] sm:$0xff] %v12756_v24  ;;  %v875_v59 = vmul.f32 %v12756_v24, %v12744_v61  ;;  %1632 = vperm.xlu1 %12012, %v8172_v0   ;;  %1627 = vperm.xlu0 %12011, %v8171_v8   ;;  %v876_v50 = vmul.f32 %v12754_v40, %v12730_v16  ;;  %v8191_v40 = vld [vmem:[%s16506_s1 + $0x310] sm:$0xff] }
  0xcd   : > { %9549 = vmatmul.mubr.f32.gmra.mrb[28].mxu0 %v874_v29  ;;  %v12788_v29 = vsel %vm285_vm0, %v289_v19, %v323_v17  ;;  %v8176_v19 = vld [vmem:[%s16507_s2 + $0x118] sm:$0xff] }
  0xce   : > { %v12775_v0 = vpop.permute.xlu1 %451  ;;  %v12777_v8 = vpop.permute.xlu0 %446  ;;  %9551 = vmatprep.mubr.f32.mxu0 %v875_v59  ;;  %16991 = vst [vmem:[#allocation38_spill] sm:$0xff] %v12788_v29  ;;  %v8192_v59 = vld [vmem:[%s16506_s1 + $0x318] sm:$0xff] }
  0xcf   : > { %16988 = vst [vmem:[#allocation35_spill] sm:$0xff] %v12775_v0  ;;  %16989 = vst [vmem:[#allocation36_spill] sm:$0xff] %v12777_v8  ;;  %v604_v24 = vmul.f32 %v12777_v8, %v12766_v46  ;;  %1981 = vperm.xlu1 %12012, %v8190_v22   ;;  %1976 = vperm.xlu0 %12011, %v8189_v53   ;;  %v326_v8 = vrot.slane %v12435_v45, 7  ;;  %v8175_v22 = vld [vmem:[%s16507_s2 + $0x110] sm:$0xff]  ;;  %v605_v54 = vmul.f32 %v12775_v0, %v12784_v6  ;;  %v8193_v0 = vld [vmem:[%s16506_s1 + $0x320] sm:$0xff] }
  0xd1   : > { %9552 = vmatmul.mubr.f32.gmra.mrb[30].mxu0 %v876_v50  ;;  %v328_v50 = vrot.slane %v12457_v55, 7  ;;  %v12816_v37 = vsel %vm285_vm0, %v324_v7, %v326_v8  ;;  %v8178_v7 = vld [vmem:[%s16507_s2 + $0x128] sm:$0xff] }
  0xd2   : > { %v12803_v38 = vpop.permute.xlu1 %461  ;;  %v12805_v53 = vpop.permute.xlu0 %456  ;;  %9586 = vmatprep.mubr.f32.mxu0 %v604_v24  ;;  %v8194_v24 = vld [vmem:[%s16506_s1 + $0x328] sm:$0xff] }
  0xd3   : > { %16992 = vst [vmem:[#allocation39_spill] sm:$0xff] %v12803_v38  ;;  %16993 = vst [vmem:[#allocation40_spill] sm:$0xff] %v12805_v53  ;;  %v606_v56 = vmul.f32 %v12805_v53, %v12788_v29  ;;  %1991 = vperm.xlu1 %12012, %v8192_v59   ;;  %1986 = vperm.xlu0 %12011, %v8191_v40   ;;  %v330_v53 = vrot.slane %v12462_v57, 7  ;;  %v10982_v59 = vpack.c.bf16 %v8176_v19, %v8175_v22  ;;  %v8177_v40 = vld [vmem:[%s16507_s2 + $0x120] sm:$0xff] }
  0xd4   : > { %v607_v21 = vmul.f32 %v12803_v38, %v12813_v36  ;;  %v332_v19 = vrot.slane %v12483_v1, 7  ;;  %v8195_v38 = vld [vmem:[%s16506_s1 + $0x330] sm:$0xff]  ;;  %v10986_v9 = vpack.c.bf16 %v8178_v7, %v8177_v40  ;;  %v336_v40 = vrot.slane %v12509_v12, 7 }
  0xd5   : > { %9587 = vmatmul.mubr.f32.vlgmr.msra.gmra.mrb[0].mxu0 %v605_v54  ;;  %v12839_v54 = vsel %vm285_vm0, %v326_v8, %v328_v50  ;;  %v334_v8 = vrot.slane %v12488_v3, 7 }
  0xd6   : > { %10981 = vmatpush3.bf16.msra.mxu0 %v12626_v18  ;;  %v12832_v17 = vpop.permute.xlu1 %471  ;;  %v12834_v20 = vpop.permute.xlu0 %466  ;;  %9589 = vmatprep.mubr.f32.mxu0 %v606_v56  ;;  %v12845_v18 = vsel %vm285_vm0, %v328_v50, %v330_v53  ;;  %v8196_v56 = vld [vmem:[%s16506_s1 + $0x338] sm:$0xff]  ;;  %v12870_v7 = vsel %vm285_vm0, %v330_v53, %v332_v19  ;;  %v8181_v53 = vld [vmem:[%s16507_s2 + $0x140] sm:$0xff] }
  0xd7   : > { %16995 = vst [vmem:[#allocation42_spill] sm:$0xff] %v12832_v17  ;;  %16996 = vst [vmem:[#allocation43_spill] sm:$0xff] %v12834_v20  ;;  %v608_v22 = vmul.f32 %v12834_v20, %v12816_v37  ;;  %2001 = vperm.xlu1 %12012, %v8194_v24   ;;  %1996 = vperm.xlu0 %12011, %v8193_v0   ;;  %v8179_v0 = vld [vmem:[%s16507_s2 + $0x130] sm:$0xff]  ;;  %v8180_v50 = vld [vmem:[%s16507_s2 + $0x138] sm:$0xff]  ;;  %v609_v10 = vmul.f32 %v12832_v17, %v12839_v54 }
  0xd8   : > { %10983 = vmatprep.subr.bf16.mxu0 %v10982_v59  ;;  %v12873_v62 = vsel %vm285_vm0, %v332_v19, %v334_v8  ;;  %v8182_v19 = vld [vmem:[%s16507_s2 + $0x148] sm:$0xff] }
  0xd9   : > { %9590 = vmatmul.mubr.f32.gmra.mrb[2].mxu0 %v607_v21 }
  0xda   : > { %v12860_v24 = vpop.permute.xlu1 %481  ;;  %v12862_v20 = vpop.permute.xlu0 %476  ;;  %9592 = vmatprep.mubr.f32.mxu0 %v608_v22  ;;  %10985 = vmatpush3.bf16.msra.mxu0 %v10982_v59  ;;  %v8198_v59 = vld [vmem:[%s16506_s1 + $0x348] sm:$0xff]  ;;  %v8197_v22 = vld [vmem:[%s16506_s1 + $0x340] sm:$0xff] }
  0xdb   : > { %16997 = vst [vmem:[#allocation44_spill] sm:$0xff] %v12860_v24  ;;  %16998 = vst [vmem:[#allocation45_spill] sm:$0xff] %v12862_v20  ;;  %v610_v21 = vmul.f32 %v12862_v20, %v12845_v18  ;;  %2011 = vperm.xlu1 %12012, %v8196_v56   ;;  %2006 = vperm.xlu0 %12011, %v8195_v38   ;;  %v338_v20 = vrot.slane %v12514_v14, 7  ;;  %v10990_v38 = vpack.c.bf16 %v8180_v50, %v8179_v0 }
  0xdc   : > { %10987 = vmatprep.subr.bf16.mxu0 %v10986_v9  ;;  %v611_v63 = vmul.f32 %v12860_v24, %v12870_v7  ;;  %v12895_v0 = vsel %vm285_vm0, %v334_v8, %v336_v40  ;;  %v340_v50 = vrot.slane %v12535_v23, 7  ;;  %v342_v8 = vrot.slane %v12540_v25, 7 }
  0xdd   : > { %9593 = vmatmul.mubr.f32.gmra.mrb[4].mxu0 %v609_v10  ;;  %v12901_v51 = vsel %vm285_vm0, %v336_v40, %v338_v20  ;;  %v10994_v24 = vpack.c.bf16 %v8182_v19, %v8181_v53  ;;  %v8184_v40 = vld [vmem:[%s16507_s2 + $0x158] sm:$0xff]  ;;  %v344_v53 = vrot.slane %v12561_v39, 7 }
  0xde   : > { %v12888_v56 = vpop.permute.xlu1 %491  ;;  %v12890_v17 = vpop.permute.xlu0 %486  ;;  %9595 = vmatprep.mubr.f32.mxu0 %v610_v21  ;;  %10989 = vmatpush3.bf16.msra.mxu0 %v10986_v9  ;;  %v8200_v9 = vld [vmem:[%s16506_s1 + $0x358] sm:$0xff]  ;;  %v8199_v21 = vld [vmem:[%s16506_s1 + $0x350] sm:$0xff]  ;;  %v12926_v19 = vsel %vm285_vm0, %v338_v20, %v340_v50  ;;  %v12929_v41 = vsel %vm285_vm0, %v340_v50, %v342_v8  ;;  %v8185_v20 = vld [vmem:[%s16507_s2 + $0x160] sm:$0xff] }
  0xdf   : > { %16999 = vst [vmem:[#allocation46_spill] sm:$0xff] %v12888_v56  ;;  %17000 = vst [vmem:[#allocation47_spill] sm:$0xff] %v12890_v17  ;;  %v612_v10 = vmul.f32 %v12890_v17, %v12873_v62  ;;  %2021 = vperm.xlu1 %12012, %v8198_v59   ;;  %2016 = vperm.xlu0 %12011, %v8197_v22   ;;  %v8183_v59 = vld [vmem:[%s16507_s2 + $0x150] sm:$0xff]  ;;  %v613_v52 = vmul.f32 %v12888_v56, %v12895_v0  ;;  %v8186_v50 = vld [vmem:[%s16507_s2 + $0x168] sm:$0xff] }
  0xe0   : > { %10991 = vmatprep.subr.bf16.mxu0 %v10990_v38 }
  0xe1   : > { %9596 = vmatmul.mubr.f32.gmra.mrb[6].mxu0 %v611_v63 }
  0xe2   : > { %v12916_v22 = vpop.permute.xlu1 %501  ;;  %v12918_v17 = vpop.permute.xlu0 %496  ;;  %9598 = vmatprep.mubr.f32.mxu0 %v612_v10  ;;  %10993 = vmatpush3.bf16.msra.mxu0 %v10990_v38  ;;  %v8202_v38 = vld [vmem:[%s16506_s1 + $0x368] sm:$0xff]  ;;  %v8201_v10 = vld [vmem:[%s16506_s1 + $0x360] sm:$0xff] }
  0xe3   : > { %17001 = vst [vmem:[#allocation48_spill] sm:$0xff] %v12916_v22  ;;  %17002 = vst [vmem:[#allocation49_spill] sm:$0xff] %v12918_v17  ;;  %v614_v63 = vmul.f32 %v12918_v17, %v12901_v51  ;;  %2031 = vperm.xlu1 %12012, %v8200_v9   ;;  %2026 = vperm.xlu0 %12011, %v8199_v21   ;;  %v346_v17 = vrot.slane %v12566_v44, 7  ;;  %v10998_v9 = vpack.c.bf16 %v8184_v40, %v8183_v59 }
  0xe4   : > { %10995 = vmatprep.subr.bf16.mxu0 %v10994_v24  ;;  %v615_v31 = vmul.f32 %v12916_v22, %v12926_v19  ;;  %v12951_v59 = vsel %vm285_vm0, %v342_v8, %v344_v53  ;;  %v348_v40 = vrot.slane %v12587_v58, 7  ;;  %v350_v8 = vrot.slane %v12592_v60, 7 }
  0xe5   : > { %9599 = vmatmul.mubr.f32.gmra.mrb[8].mxu0 %v613_v52  ;;  %v12957_v42 = vsel %vm285_vm0, %v344_v53, %v346_v17  ;;  %v11002_v22 = vpack.c.bf16 %v8186_v50, %v8185_v20  ;;  %v8188_v53 = vld [vmem:[%s16507_s2 + $0x178] sm:$0xff]  ;;  %v352_v20 = vrot.slane %v12613_v11, 7 }
  0xe6   : > { %v12944_v21 = vpop.permute.xlu1 %511  ;;  %v12946_v56 = vpop.permute.xlu0 %506  ;;  %9601 = vmatprep.mubr.f32.mxu0 %v614_v63  ;;  %10997 = vmatpush3.bf16.msra.mxu0 %v10994_v24  ;;  %17005 = vst [vmem:[#allocation52_spill] sm:$0xff] %v12957_v42  ;;  %v8204_v24 = vld [vmem:[%s16506_s1 + $0x378] sm:$0xff]  ;;  %v8203_v63 = vld [vmem:[%s16506_s1 + $0x370] sm:$0xff]  ;;  %v12982_v50 = vsel %vm285_vm0, %v346_v17, %v348_v40  ;;  %v12985_v6 = vsel %vm285_vm0, %v348_v40, %v350_v8  ;;  %v8221_v17 = vld [vmem:[%s16507_s2 + $0x180] sm:$0xff] }
  0xe7   : > { %17003 = vst [vmem:[#allocation50_spill] sm:$0xff] %v12944_v21  ;;  %17004 = vst [vmem:[#allocation51_spill] sm:$0xff] %v12946_v56  ;;  %v616_v52 = vmul.f32 %v12946_v56, %v12929_v41  ;;  %2041 = vperm.xlu1 %12012, %v8202_v38   ;;  %2036 = vperm.xlu0 %12011, %v8201_v10   ;;  %v8187_v38 = vld [vmem:[%s16507_s2 + $0x170] sm:$0xff]  ;;  %v617_v32 = vmul.f32 %v12944_v21, %v12951_v59  ;;  %v8222_v40 = vld [vmem:[%s16507_s2 + $0x188] sm:$0xff] }
  0xe8   : > { %10999 = vmatprep.subr.bf16.mxu0 %v10998_v9  ;;  %17008 = vst [vmem:[#allocation55_spill] sm:$0xff] %v12985_v6 }
  0xe9   : > { %9602 = vmatmul.mubr.f32.gmra.mrb[10].mxu0 %v615_v31 }
  0xea   : > { %v12972_v10 = vpop.permute.xlu1 %521  ;;  %v12974_v56 = vpop.permute.xlu0 %516  ;;  %9604 = vmatprep.mubr.f32.mxu0 %v616_v52  ;;  %11001 = vmatpush3.bf16.msra.mxu0 %v10998_v9  ;;  %v8206_v9 = vld [vmem:[%s16506_s1 + $0x388] sm:$0xff]  ;;  %v8205_v52 = vld [vmem:[%s16506_s1 + $0x380] sm:$0xff] }
  0xeb   : > { %17006 = vst [vmem:[#allocation53_spill] sm:$0xff] %v12972_v10  ;;  %17007 = vst [vmem:[#allocation54_spill] sm:$0xff] %v12974_v56  ;;  %v618_v31 = vmul.f32 %v12974_v56, %v12957_v42  ;;  %2051 = vperm.xlu1 %12012, %v8204_v24   ;;  %2046 = vperm.xlu0 %12011, %v8203_v63   ;;  %v354_v56 = vrot.slane %v12618_v15, 7  ;;  %v11006_v24 = vpack.c.bf16 %v8188_v53, %v8187_v38 }
  0xec   : > { %11003 = vmatprep.subr.bf16.mxu0 %v11002_v22  ;;  %v619_v46 = vmul.f32 %v12972_v10, %v12982_v50  ;;  %v13007_v38 = vsel %vm285_vm0, %v350_v8, %v352_v20  ;;  %v356_v53 = vrot.slane %v12635_v26, 7  ;;  %v358_v8 = vrot.slane %v12640_v28, 7 }
  0xed   : > { %9605 = vmatmul.mubr.f32.gmra.mrb[12].mxu0 %v617_v32  ;;  %v13013_v42 = vsel %vm285_vm0, %v352_v20, %v354_v56  ;;  %v13022_v10 = vpack.c.bf16 %v8222_v40, %v8221_v17  ;;  %v360_v17 = vrot.slane %v12656_v47, 7  ;;  %v8209_v40 = vld [vmem:[%s16506_s1 + $0x3a0] sm:$0xff] }
  0xee   : > { %v13000_v63 = vpop.permute.xlu1 %531  ;;  %v13002_v21 = vpop.permute.xlu0 %526  ;;  %9607 = vmatprep.mubr.f32.mxu0 %v618_v31  ;;  %11005 = vmatpush3.bf16.msra.mxu0 %v11002_v22  ;;  %v8208_v22 = vld [vmem:[%s16506_s1 + $0x398] sm:$0xff]  ;;  %v8207_v31 = vld [vmem:[%s16506_s1 + $0x390] sm:$0xff] }
  0xef   : > { %17009 = vst [vmem:[#allocation56_spill] sm:$0xff] %v13000_v63  ;;  %17010 = vst [vmem:[#allocation57_spill] sm:$0xff] %v13002_v21  ;;  %v620_v32 = vmul.f32 %v13002_v21, %v12985_v6  ;;  %2061 = vperm.xlu1 %12012, %v8206_v9   ;;  %2056 = vperm.xlu0 %12011, %v8205_v52   ;;  %v621_v20 = vmul.f32 %v13000_v63, %v13007_v38  ;;  %v364_v63 = vrot.slane %v12676_v2, 7 }
  0xf0   : > { %11007 = vmatprep.subr.bf16.mxu0 %v11006_v24  ;;  %v13033_v6 = vsel %vm285_vm0, %v354_v56, %v356_v53 }
  0xf1   : > { %9608 = vmatmul.mubr.f32.gmra.mrb[14].mxu0 %v619_v46  ;;  %17013 = vst [vmem:[#allocation60_spill] sm:$0xff] %v13033_v6  ;;  %v13037_v46 = vsel %vm285_vm0, %v356_v53, %v358_v8 }
  0xf2   : > { %v13024_v9 = vpop.permute.xlu1 %541  ;;  %v13026_v52 = vpop.permute.xlu0 %536  ;;  %9610 = vmatprep.mubr.f32.mxu0 %v620_v32  ;;  %11009 = vmatpush3.bf16.msra.mxu0 %v11006_v24  ;;  %17014 = vst [vmem:[#allocation61_spill] sm:$0xff] %v13037_v46  ;;  %v8210_v24 = vld [vmem:[%s16506_s1 + $0x3a8] sm:$0xff]  ;;  %v362_v32 = vrot.slane %v12661_v49, 7 }
  0xf3   : > { %17011 = vst [vmem:[#allocation58_spill] sm:$0xff] %v13024_v9  ;;  %17012 = vst [vmem:[#allocation59_spill] sm:$0xff] %v13026_v52  ;;  %v622_v21 = vmul.f32 %v13026_v52, %v13013_v42  ;;  %2071 = vperm.xlu1 %12012, %v8208_v22   ;;  %2066 = vperm.xlu0 %12011, %v8207_v31   ;;  %v623_v53 = vmul.f32 %v13024_v9, %v13033_v6  ;;  %v8211_v9 = vld [vmem:[%s16506_s1 + $0x3b0] sm:$0xff]  ;;  %v368_v6 = vrot.slane %v12696_v27, 7 }
  0xf4   : > { %11011 = vmatprep.subr.bf16.mxu0 %v13022_v10  ;;  %v13056_v52 = vsel %vm285_vm0, %v358_v8, %v360_v17 }
  0xf5   : > { %9611 = vmatmul.mubr.f32.gmra.mrb[16].mxu0 %v621_v20  ;;  %17017 = vst [vmem:[#allocation64_spill] sm:$0xff] %v13056_v52  ;;  %v13060_v20 = vsel %vm285_vm0, %v360_v17, %v362_v32 }
  0xf6   : > { %v13047_v56 = vpop.permute.xlu1 %551  ;;  %v13049_v22 = vpop.permute.xlu0 %546  ;;  %9613 = vmatprep.mubr.f32.mxu0 %v622_v21  ;;  %17018 = vst [vmem:[#allocation65_spill] sm:$0xff] %v13060_v20  ;;  %v8212_v21 = vld [vmem:[%s16506_s1 + $0x3b8] sm:$0xff] }
  0xf7   : > { %17015 = vst [vmem:[#allocation62_spill] sm:$0xff] %v13047_v56  ;;  %17016 = vst [vmem:[#allocation63_spill] sm:$0xff] %v13049_v22  ;;  %v624_v31 = vmul.f32 %v13049_v22, %v13037_v46  ;;  %2081 = vperm.xlu1 %12012, %v8210_v24   ;;  %2076 = vperm.xlu0 %12011, %v8209_v40   ;;  %v366_v22 = vrot.slane %v12681_v5, 7  ;;  %v625_v17 = vmul.f32 %v13047_v56, %v13056_v52  ;;  %v8213_v56 = vld [vmem:[%s16506_s1 + $0x3c0] sm:$0xff] }
  0xf8   : > { %v13078_v46 = vsel %vm285_vm0, %v362_v32, %v364_v63  ;;  %v372_v52 = vrot.slane %v12716_v4, 7 }
  0xf9   : > { %9614 = vmatmul.mubr.f32.gmra.mrb[18].mxu0 %v623_v53  ;;  %v13082_v53 = vsel %vm285_vm0, %v364_v63, %v366_v22 }
  0xfa   : > { %v13069_v24 = vpop.permute.xlu1 %561  ;;  %v13071_v8 = vpop.permute.xlu0 %556  ;;  %9616 = vmatprep.mubr.f32.mxu0 %v624_v31  ;;  %17021 = vst [vmem:[#allocation68_spill] sm:$0xff] %v13082_v53  ;;  %v8214_v31 = vld [vmem:[%s16506_s1 + $0x3c8] sm:$0xff] }
  0xfb   : > { %17019 = vst [vmem:[#allocation66_spill] sm:$0xff] %v13069_v24  ;;  %17020 = vst [vmem:[#allocation67_spill] sm:$0xff] %v13071_v8  ;;  %v626_v40 = vmul.f32 %v13071_v8, %v13060_v20  ;;  %2091 = vperm.xlu1 %12012, %v8212_v21   ;;  %2086 = vperm.xlu0 %12011, %v8211_v9   ;;  %v370_v8 = vrot.slane %v12701_v34, 7  ;;  %v627_v63 = vmul.f32 %v13069_v24, %v13078_v46 }
  0xfc   : > { %v13100_v20 = vsel %vm285_vm0, %v366_v22, %v368_v6 }
  0xfd   : > { %9617 = vmatmul.mubr.f32.gmra.mrb[20].mxu0 %v625_v17  ;;  %v13104_v34 = vsel %vm285_vm0, %v368_v6, %v370_v8  ;;  %v8216_v17 = vld [vmem:[%s16506_s1 + $0x3d8] sm:$0xff]  ;;  %v13122_v24 = vsel %vm285_vm0, %v370_v8, %v372_v52 }
  0xfe   : > { %v13091_v9 = vpop.permute.xlu1 %571  ;;  %v13093_v32 = vpop.permute.xlu0 %566  ;;  %9619 = vmatprep.mubr.f32.mxu0 %v626_v40  ;;  %17024 = vst [vmem:[#allocation71_spill] sm:$0xff] %v13104_v34  ;;  %v8215_v40 = vld [vmem:[%s16506_s1 + $0x3d0] sm:$0xff] }
  0xff   : > { %17022 = vst [vmem:[#allocation69_spill] sm:$0xff] %v13091_v9  ;;  %17023 = vst [vmem:[#allocation70_spill] sm:$0xff] %v13093_v32  ;;  %v628_v21 = vmul.f32 %v13093_v32, %v13082_v53  ;;  %2101 = vperm.xlu1 %12012, %v8214_v31   ;;  %2096 = vperm.xlu0 %12011, %v8213_v56   ;;  %v374_v32 = vrot.slane %v12721_v13, 7  ;;  %v629_v6 = vmul.f32 %v13091_v9, %v13100_v20 }
 0x100   : > { %v376_v53 = vrot.slane %v12739_v48, 7 }
 0x101   : > { %9620 = vmatmul.mubr.f32.gmra.mrb[22].mxu0 %v627_v63  ;;  %v13126_v13 = vsel %vm285_vm0, %v372_v52, %v374_v32  ;;  %v8218_v63 = vld [vmem:[%s16506_s1 + $0x3e8] sm:$0xff] }
 0x102   : > { %v13113_v56 = vpop.permute.xlu1 %581  ;;  %v13115_v22 = vpop.permute.xlu0 %576  ;;  %9622 = vmatprep.mubr.f32.mxu0 %v628_v21  ;;  %17027 = vst [vmem:[#allocation74_spill] sm:$0xff] %v13126_v13  ;;  %v8217_v21 = vld [vmem:[%s16506_s1 + $0x3e0] sm:$0xff]  ;;  %v13144_v9 = vsel %vm285_vm0, %v374_v32, %v376_v53 }
 0x103   : > { %17025 = vst [vmem:[#allocation72_spill] sm:$0xff] %v13113_v56  ;;  %17026 = vst [vmem:[#allocation73_spill] sm:$0xff] %v13115_v22  ;;  %v630_v31 = vmul.f32 %v13115_v22, %v13104_v34  ;;  %2111 = vperm.xlu1 %12012, %v8216_v17   ;;  %2106 = vperm.xlu0 %12011, %v8215_v40   ;;  %v378_v22 = vrot.slane %v12744_v61, 7  ;;  %v631_v52 = vmul.f32 %v13113_v56, %v13122_v24  ;;  %v8220_v61 = vld [vmem:[%s16506_s1 + $0x3f8] sm:$0xff] }
 0x104   : > { %17030 = vst [vmem:[#allocation77_spill] sm:$0xff] %v13144_v9  ;;  %v17034_v56 = vrot.slane %v12730_v16, 7  ;;  %v1351_v16 = vrot.slane %v12430_v43, 1 }
 0x105   : > { %9623 = vmatmul.mubr.f32.gmra.mrb[24].mxu0 %v629_v6  ;;  %v13147_v34 = vsel %vm285_vm0, %v376_v53, %v378_v22  ;;  %v8219_v6 = vld [vmem:[%s16506_s1 + $0x3f0] sm:$0xff] }
 0x106   : > { %v13135_v17 = vpop.permute.xlu1 %591  ;;  %v13137_v8 = vpop.permute.xlu0 %586  ;;  %9625 = vmatprep.mubr.f32.mxu0 %v630_v31  ;;  %17031 = vst [vmem:[#allocation78_spill] sm:$0xff] %v13147_v34  ;;  %v1346_v31 = vrot.slane %v12409_v35, 1  ;;  %v13168_v35 = vsel %vm285_vm0, %v378_v22, %v17034_v56 }
 0x107   : > { %17028 = vst [vmem:[#allocation75_spill] sm:$0xff] %v13135_v17  ;;  %17029 = vst [vmem:[#allocation76_spill] sm:$0xff] %v13137_v8  ;;  %v632_v40 = vmul.f32 %v13137_v8, %v13126_v13  ;;  %2121 = vperm.xlu1 %12012, %v8218_v63   ;;  %2116 = vperm.xlu0 %12011, %v8217_v21   ;;  %v16596_v8 = vrot.slane %v12397_v30, 1  ;;  %v633_v53 = vmul.f32 %v13135_v17, %v13144_v9 }
 0x108   : > { %17035 = vst [vmem:[#allocation81_spill] sm:$0xff] %v13168_v35 }
 0x109   : > { %9626 = vmatmul.mubr.f32.gmra.mrb[26].mxu0 %v631_v52  ;;  %v1350_v52 = vrot.slane %v12404_v33, 1  ;;  %v13174_v13 = vsel %vm1344_vm1, %v16596_v8, %v1346_v31 }
 0x10a   : > { %v13157_v63 = vpop.permute.xlu1 %601  ;;  %v13159_v32 = vpop.permute.xlu0 %596  ;;  %9628 = vmatprep.mubr.f32.mxu0 %v632_v40  ;;  %17036 = vst [vmem:[#allocation82_spill] sm:$0xff] %v13174_v13  ;;  %v8238_v40 = vld [vmem:[%s16506_s1 + $0x408] sm:$0xff] }
 0x10b   : > { %17032 = vst [vmem:[#allocation79_spill] sm:$0xff] %v13157_v63  ;;  %17033 = vst [vmem:[#allocation80_spill] sm:$0xff] %v13159_v32  ;;  %v634_v21 = vmul.f32 %v13159_v32, %v13147_v34  ;;  %2131 = vperm.xlu1 %12012, %v8220_v61   ;;  %2126 = vperm.xlu0 %12011, %v8219_v6   ;;  %v8237_v61 = vld [vmem:[%s16506_s1 + $0x400] sm:$0xff]  ;;  %v635_v33 = vmul.f32 %v13157_v63, %v13168_v35  ;;  %v1353_v32 = vrot.slane %v12435_v45, 1  ;;  %v8224_v45 = vld [vmem:[%s16507_s2 + $0x198] sm:$0xff] }
 0x10c   : > { %v13192_v8 = vsel %vm1344_vm1, %v1346_v31, %v1350_v52  ;;  %v13196_v43 = vsel %vm1344_vm1, %v1350_v52, %v1351_v16  ;;  %v8223_v31 = vld [vmem:[%s16507_s2 + $0x190] sm:$0xff] }
 0x10d   : > { %9629 = vmatmul.mubr.f32.gmra.mrb[28].mxu0 %v633_v53  ;;  %17039 = vst [vmem:[#allocation85_spill] sm:$0xff] %v13192_v8  ;;  %v8240_v53 = vld [vmem:[%s16506_s1 + $0x418] sm:$0xff]  ;;  %v13221_v63 = vsel %vm1344_vm1, %v1351_v16, %v1353_v32 }
 0x10e   : > { %v13183_v56 = vpop.permute.xlu1 %1482  ;;  %v13185_v22 = vpop.permute.xlu0 %1477  ;;  %9631 = vmatprep.mubr.f32.mxu0 %v634_v21  ;;  %v8239_v21 = vld [vmem:[%s16506_s1 + $0x410] sm:$0xff] }
 0x10f   : > { %17037 = vst [vmem:[#allocation83_spill] sm:$0xff] %v13183_v56  ;;  %17038 = vst [vmem:[#allocation84_spill] sm:$0xff] %v13185_v22  ;;  %v1635_v6 = vmul.f32 %v13185_v22, %v13174_v13  ;;  %2480 = vperm.xlu1 %12012, %v8238_v40   ;;  %2475 = vperm.xlu0 %12011, %v8237_v61   ;;  %v1355_v22 = vrot.slane %v12457_v55, 1  ;;  %v1636_v61 = vmul.f32 %v13183_v56, %v13192_v8  ;;  %v8241_v56 = vld [vmem:[%s16506_s1 + $0x420] sm:$0xff] }
 0x111   : > { %9632 = vmatmul.mubr.f32.gmra.mrb[30].mxu0 %v635_v33  ;;  %v1357_v33 = vrot.slane %v12462_v57, 1  ;;  %v13224_v17 = vsel %vm1344_vm1, %v1353_v32, %v1355_v22  ;;  %v8225_v57 = vld [vmem:[%s16507_s2 + $0x1a0] sm:$0xff]  ;;  %v8226_v32 = vld [vmem:[%s16507_s2 + $0x1a8] sm:$0xff] }
 0x112   : > { %v13211_v52 = vpop.permute.xlu1 %1492  ;;  %v13213_v40 = vpop.permute.xlu0 %1487  ;;  %9666 = vmatprep.mubr.f32.mxu0 %v1635_v6  ;;  %v8242_v6 = vld [vmem:[%s16506_s1 + $0x428] sm:$0xff]  ;;  %v11018_v8 = vpack.c.bf16 %v8226_v32, %v8225_v57  ;;  %v1365_v57 = vrot.slane %v12514_v14, 1  ;;  %v8229_v14 = vld [vmem:[%s16507_s2 + $0x1c0] sm:$0xff] }
 0x113   : > { %17040 = vst [vmem:[#allocation86_spill] sm:$0xff] %v13211_v52  ;;  %17041 = vst [vmem:[#allocation87_spill] sm:$0xff] %v13213_v40  ;;  %v1637_v55 = vmul.f32 %v13213_v40, %v13196_v43  ;;  %2490 = vperm.xlu1 %12012, %v8240_v53   ;;  %2485 = vperm.xlu0 %12011, %v8239_v21   ;;  %v1359_v40 = vrot.slane %v12483_v1, 1  ;;  %v11014_v53 = vpack.c.bf16 %v8224_v45, %v8223_v31 }
 0x114   : > { %v1638_v1 = vmul.f32 %v13211_v52, %v13221_v63  ;;  %v13247_v31 = vsel %vm1344_vm1, %v1355_v22, %v1357_v33  ;;  %v8243_v52 = vld [vmem:[%s16506_s1 + $0x430] sm:$0xff]  ;;  %v1363_v22 = vrot.slane %v12509_v12, 1 }
 0x115   : > { %9667 = vmatmul.mubr.f32.vlgmr.msra.gmra.mrb[0].mxu0 %v1636_v61  ;;  %v1361_v61 = vrot.slane %v12488_v3, 1  ;;  %v8227_v3 = vld [vmem:[%s16507_s2 + $0x1b0] sm:$0xff] }
 0x116   : > { %11013 = vmatpush3.bf16.msra.mxu0 %v13022_v10  ;;  %v13240_v16 = vpop.permute.xlu1 %1502  ;;  %v13242_v21 = vpop.permute.xlu0 %1497  ;;  %9669 = vmatprep.mubr.f32.mxu0 %v1637_v55  ;;  %v13253_v10 = vsel %vm1344_vm1, %v1357_v33, %v1359_v40  ;;  %v8244_v55 = vld [vmem:[%s16506_s1 + $0x438] sm:$0xff] }
 0x117   : > { %17042 = vst [vmem:[#allocation88_spill] sm:$0xff] %v13240_v16  ;;  %17043 = vst [vmem:[#allocation89_spill] sm:$0xff] %v13242_v21  ;;  %v1639_v45 = vmul.f32 %v13242_v21, %v13224_v17  ;;  %2500 = vperm.xlu1 %12012, %v8242_v6   ;;  %2495 = vperm.xlu0 %12011, %v8241_v56   ;;  %v8228_v56 = vld [vmem:[%s16507_s2 + $0x1b8] sm:$0xff]  ;;  %v1640_v21 = vmul.f32 %v13240_v16, %v13247_v31 }
 0x118   : > { %11015 = vmatprep.subr.bf16.mxu0 %v11014_v53  ;;  %v13278_v32 = vsel %vm1344_vm1, %v1359_v40, %v1361_v61  ;;  %v8230_v40 = vld [vmem:[%s16507_s2 + $0x1c8] sm:$0xff] }
 0x119   : > { %9670 = vmatmul.mubr.f32.gmra.mrb[2].mxu0 %v1638_v1  ;;  %v13281_v1 = vsel %vm1344_vm1, %v1361_v61, %v1363_v22 }
 0x11a   : > { %v13268_v33 = vpop.permute.xlu1 %1512  ;;  %v13270_v6 = vpop.permute.xlu0 %1507  ;;  %9672 = vmatprep.mubr.f32.mxu0 %v1639_v45  ;;  %11017 = vmatpush3.bf16.msra.mxu0 %v11014_v53  ;;  %v8246_v53 = vld [vmem:[%s16506_s1 + $0x448] sm:$0xff]  ;;  %v8245_v45 = vld [vmem:[%s16506_s1 + $0x440] sm:$0xff] }
 0x11b   : > { %17044 = vst [vmem:[#allocation90_spill] sm:$0xff] %v13268_v33  ;;  %17045 = vst [vmem:[#allocation91_spill] sm:$0xff] %v13270_v6  ;;  %v1641_v12 = vmul.f32 %v13270_v6, %v13253_v10  ;;  %2510 = vperm.xlu1 %12012, %v8244_v55   ;;  %2505 = vperm.xlu0 %12011, %v8243_v52   ;;  %v1367_v6 = vrot.slane %v12535_v23, 1  ;;  %v11022_v52 = vpack.c.bf16 %v8228_v56, %v8227_v3 }
 0x11c   : > { %11019 = vmatprep.subr.bf16.mxu0 %v11018_v8  ;;  %v1642_v23 = vmul.f32 %v13268_v33, %v13278_v32  ;;  %v13303_v3 = vsel %vm1344_vm1, %v1363_v22, %v1365_v57  ;;  %v1369_v56 = vrot.slane %v12540_v25, 1  ;;  %v1371_v22 = vrot.slane %v12561_v39, 1  ;;  %v8231_v25 = vld [vmem:[%s16507_s2 + $0x1d0] sm:$0xff] }
 0x11d   : > { %9673 = vmatmul.mubr.f32.gmra.mrb[4].mxu0 %v1640_v21  ;;  %v13309_v16 = vsel %vm1344_vm1, %v1365_v57, %v1367_v6  ;;  %v11026_v33 = vpack.c.bf16 %v8230_v40, %v8229_v14  ;;  %v8232_v57 = vld [vmem:[%s16507_s2 + $0x1d8] sm:$0xff]  ;;  %v1373_v40 = vrot.slane %v12566_v44, 1  ;;  %v8233_v44 = vld [vmem:[%s16507_s2 + $0x1e0] sm:$0xff] }
 0x11e   : > { %v13296_v61 = vpop.permute.xlu1 %1522  ;;  %v13298_v55 = vpop.permute.xlu0 %1517  ;;  %9675 = vmatprep.mubr.f32.mxu0 %v1641_v12  ;;  %11021 = vmatpush3.bf16.msra.mxu0 %v11018_v8  ;;  %v8248_v8 = vld [vmem:[%s16506_s1 + $0x458] sm:$0xff]  ;;  %v8247_v12 = vld [vmem:[%s16506_s1 + $0x450] sm:$0xff] }
 0x11f   : > { %17046 = vst [vmem:[#allocation92_spill] sm:$0xff] %v13296_v61  ;;  %17047 = vst [vmem:[#allocation93_spill] sm:$0xff] %v13298_v55  ;;  %v1643_v21 = vmul.f32 %v13298_v55, %v13281_v1  ;;  %2520 = vperm.xlu1 %12012, %v8246_v53   ;;  %2515 = vperm.xlu0 %12011, %v8245_v45   ;;  %v1644_v39 = vmul.f32 %v13296_v61, %v13303_v3 }
 0x120   : > { %11023 = vmatprep.subr.bf16.mxu0 %v11022_v52  ;;  %v13337_v55 = vsel %vm1344_vm1, %v1369_v56, %v1371_v22 }
 0x121   : > { %9676 = vmatmul.mubr.f32.gmra.mrb[6].mxu0 %v1642_v23  ;;  %v13334_v23 = vsel %vm1344_vm1, %v1367_v6, %v1369_v56  ;;  %v8234_v6 = vld [vmem:[%s16507_s2 + $0x1e8] sm:$0xff] }
 0x122   : > { %v13324_v53 = vpop.permute.xlu1 %1532  ;;  %v13326_v45 = vpop.permute.xlu0 %1527  ;;  %9678 = vmatprep.mubr.f32.mxu0 %v1643_v21  ;;  %11025 = vmatpush3.bf16.msra.mxu0 %v11022_v52  ;;  %v8250_v52 = vld [vmem:[%s16506_s1 + $0x468] sm:$0xff]  ;;  %v8249_v21 = vld [vmem:[%s16506_s1 + $0x460] sm:$0xff] }
 0x123   : > { %17048 = vst [vmem:[#allocation94_spill] sm:$0xff] %v13324_v53  ;;  %17049 = vst [vmem:[#allocation95_spill] sm:$0xff] %v13326_v45  ;;  %v1645_v14 = vmul.f32 %v13326_v45, %v13309_v16  ;;  %2530 = vperm.xlu1 %12012, %v8248_v8   ;;  %2525 = vperm.xlu0 %12011, %v8247_v12   ;;  %v1375_v45 = vrot.slane %v12587_v58, 1  ;;  %v11030_v8 = vpack.c.bf16 %v8232_v57, %v8231_v25 }
 0x124   : > { %11027 = vmatprep.subr.bf16.mxu0 %v11026_v33  ;;  %v1646_v58 = vmul.f32 %v13324_v53, %v13334_v23  ;;  %v13359_v25 = vsel %vm1344_vm1, %v1371_v22, %v1373_v40  ;;  %v1379_v22 = vrot.slane %v12613_v11, 1  ;;  %v11034_v53 = vpack.c.bf16 %v8234_v6, %v8233_v44 }
 0x125   : > { %9679 = vmatmul.mubr.f32.gmra.mrb[8].mxu0 %v1644_v39  ;;  %v1377_v39 = vrot.slane %v12592_v60, 1  ;;  %v13365_v61 = vsel %vm1344_vm1, %v1373_v40, %v1375_v45  ;;  %v8235_v60 = vld [vmem:[%s16507_s2 + $0x1f0] sm:$0xff]  ;;  %v8236_v40 = vld [vmem:[%s16507_s2 + $0x1f8] sm:$0xff]  ;;  %v1381_v6 = vrot.slane %v12618_v15, 1  ;;  %v8269_v15 = vld [vmem:[%s16507_s2 + $0x200] sm:$0xff] }
 0x126   : > { %v13352_v56 = vpop.permute.xlu1 %1542  ;;  %v13354_v12 = vpop.permute.xlu0 %1537  ;;  %9681 = vmatprep.mubr.f32.mxu0 %v1645_v14  ;;  %11029 = vmatpush3.bf16.msra.mxu0 %v11026_v33  ;;  %v8252_v33 = vld [vmem:[%s16506_s1 + $0x478] sm:$0xff]  ;;  %v8251_v14 = vld [vmem:[%s16506_s1 + $0x470] sm:$0xff] }
 0x127   : > { %17050 = vst [vmem:[#allocation96_spill] sm:$0xff] %v13352_v56  ;;  %17051 = vst [vmem:[#allocation97_spill] sm:$0xff] %v13354_v12  ;;  %v1647_v57 = vmul.f32 %v13354_v12, %v13337_v55  ;;  %2540 = vperm.xlu1 %12012, %v8250_v52   ;;  %2535 = vperm.xlu0 %12011, %v8249_v21   ;;  %v1648_v11 = vmul.f32 %v13352_v56, %v13359_v25 }
 0x128   : > { %11031 = vmatprep.subr.bf16.mxu0 %v11030_v8  ;;  %v13393_v12 = vsel %vm1344_vm1, %v1377_v39, %v1379_v22 }
 0x129   : > { %9682 = vmatmul.mubr.f32.gmra.mrb[10].mxu0 %v1646_v58  ;;  %v13390_v58 = vsel %vm1344_vm1, %v1375_v45, %v1377_v39  ;;  %v8270_v45 = vld [vmem:[%s16507_s2 + $0x208] sm:$0xff] }
 0x12a   : > { %v13380_v52 = vpop.permute.xlu1 %1552  ;;  %v13382_v21 = vpop.permute.xlu0 %1547  ;;  %9684 = vmatprep.mubr.f32.mxu0 %v1647_v57  ;;  %11033 = vmatpush3.bf16.msra.mxu0 %v11030_v8  ;;  %v8254_v8 = vld [vmem:[%s16506_s1 + $0x488] sm:$0xff]  ;;  %v8253_v57 = vld [vmem:[%s16506_s1 + $0x480] sm:$0xff] }
 0x12b   : > { %17052 = vst [vmem:[#allocation98_spill] sm:$0xff] %v13380_v52  ;;  %17053 = vst [vmem:[#allocation99_spill] sm:$0xff] %v13382_v21  ;;  %v1649_v44 = vmul.f32 %v13382_v21, %v13365_v61  ;;  %2550 = vperm.xlu1 %12012, %v8252_v33   ;;  %2545 = vperm.xlu0 %12011, %v8251_v14   ;;  %v1383_v21 = vrot.slane %v12635_v26, 1  ;;  %v11038_v33 = vpack.c.bf16 %v8236_v40, %v8235_v60 }
 0x12c   : > { %11035 = vmatprep.subr.bf16.mxu0 %v11034_v53  ;;  %v1650_v26 = vmul.f32 %v13380_v52, %v13390_v58  ;;  %v13415_v60 = vsel %vm1344_vm1, %v1379_v22, %v1381_v6  ;;  %v1387_v22 = vrot.slane %v12656_v47, 1  ;;  %v13430_v52 = vpack.c.bf16 %v8270_v45, %v8269_v15 }
 0x12d   : > { %9685 = vmatmul.mubr.f32.gmra.mrb[12].mxu0 %v1648_v11  ;;  %v1385_v11 = vrot.slane %v12640_v28, 1  ;;  %v13421_v56 = vsel %vm1344_vm1, %v1381_v6, %v1383_v21  ;;  %v1389_v15 = vrot.slane %v12661_v49, 1 }
 0x12e   : > { %v13408_v39 = vpop.permute.xlu1 %1562  ;;  %v13410_v14 = vpop.permute.xlu0 %1557  ;;  %9687 = vmatprep.mubr.f32.mxu0 %v1649_v44  ;;  %11037 = vmatpush3.bf16.msra.mxu0 %v11034_v53  ;;  %v8256_v53 = vld [vmem:[%s16506_s1 + $0x498] sm:$0xff]  ;;  %v8255_v44 = vld [vmem:[%s16506_s1 + $0x490] sm:$0xff] }
 0x12f   : > { %17054 = vst [vmem:[#allocation100_spill] sm:$0xff] %v13408_v39  ;;  %17055 = vst [vmem:[#allocation101_spill] sm:$0xff] %v13410_v14  ;;  %v1651_v40 = vmul.f32 %v13410_v14, %v13393_v12  ;;  %2560 = vperm.xlu1 %12012, %v8254_v8   ;;  %2555 = vperm.xlu0 %12011, %v8253_v57   ;;  %v1652_v6 = vmul.f32 %v13408_v39, %v13415_v60  ;;  %v13514_v14 = vld [vmem:[%s12388_s12 + $0xd0] sm:$0xff] }
 0x130   : > { %11039 = vmatprep.subr.bf16.mxu0 %v11038_v33  ;;  %v13441_v47 = vsel %vm1344_vm1, %v1383_v21, %v1385_v11  ;;  %v13445_v45 = vsel %vm1344_vm1, %v1385_v11, %v1387_v22 }
 0x131   : > { %9688 = vmatmul.mubr.f32.gmra.mrb[14].mxu0 %v1650_v26  ;;  %v8257_v26 = vld [vmem:[%s16506_s1 + $0x4a0] sm:$0xff] }
 0x132   : > { %v13432_v8 = vpop.permute.xlu1 %1572  ;;  %v13434_v28 = vpop.permute.xlu0 %1567  ;;  %9690 = vmatprep.mubr.f32.mxu0 %v1651_v40  ;;  %11041 = vmatpush3.bf16.msra.mxu0 %v11038_v33  ;;  %v8258_v33 = vld [vmem:[%s16506_s1 + $0x4a8] sm:$0xff]  ;;  %v1391_v40 = vrot.slane %v12676_v2, 1  ;;  %v1393_v2 = vrot.slane %v12681_v5, 1 }
 0x133   : > { %17056 = vst [vmem:[#allocation102_spill] sm:$0xff] %v13432_v8  ;;  %17057 = vst [vmem:[#allocation103_spill] sm:$0xff] %v13434_v28  ;;  %v1653_v57 = vmul.f32 %v13434_v28, %v13421_v56  ;;  %2570 = vperm.xlu1 %12012, %v8256_v53   ;;  %2565 = vperm.xlu0 %12011, %v8255_v44   ;;  %v1654_v49 = vmul.f32 %v13432_v8, %v13441_v47  ;;  %v8259_v8 = vld [vmem:[%s16506_s1 + $0x4b0] sm:$0xff]  ;;  %v13489_v28 = vld [vmem:[%s12388_s12 + $0xc0] sm:$0xff] }
 0x134   : > { %11043 = vmatprep.subr.bf16.mxu0 %v13430_v52  ;;  %v13464_v44 = vsel %vm1344_vm1, %v1387_v22, %v1389_v15 }
 0x135   : > { %9691 = vmatmul.mubr.f32.gmra.mrb[16].mxu0 %v1652_v6  ;;  %v13468_v6 = vsel %vm1344_vm1, %v1389_v15, %v1391_v40 }
 0x136   : > { %v13455_v21 = vpop.permute.xlu1 %1582  ;;  %v13457_v53 = vpop.permute.xlu0 %1577  ;;  %9693 = vmatprep.mubr.f32.mxu0 %v1653_v57  ;;  %v8260_v57 = vld [vmem:[%s16506_s1 + $0x4b8] sm:$0xff] }
 0x137   : > { %17058 = vst [vmem:[#allocation104_spill] sm:$0xff] %v13455_v21  ;;  %17059 = vst [vmem:[#allocation105_spill] sm:$0xff] %v13457_v53  ;;  %v1655_v11 = vmul.f32 %v13457_v53, %v13445_v45  ;;  %2580 = vperm.xlu1 %12012, %v8258_v33   ;;  %2575 = vperm.xlu0 %12011, %v8257_v26   ;;  %v1395_v33 = vrot.slane %v12696_v27, 1  ;;  %v1656_v5 = vmul.f32 %v13455_v21, %v13464_v44 }
 0x138   : > { %v13486_v53 = vsel %vm1344_vm1, %v1391_v40, %v1393_v2  ;;  %v1397_v27 = vrot.slane %v13489_v28, 1 }
 0x139   : > { %9694 = vmatmul.mubr.f32.gmra.mrb[18].mxu0 %v1654_v49  ;;  %17062 = vst [vmem:[#allocation108_spill] sm:$0xff] %v13486_v53  ;;  %v13493_v49 = vsel %vm1344_vm1, %v1393_v2, %v1395_v33 }
 0x13a   : > { %v13477_v26 = vpop.permute.xlu1 %1592  ;;  %v13479_v22 = vpop.permute.xlu0 %1587  ;;  %9696 = vmatprep.mubr.f32.mxu0 %v1655_v11  ;;  %17063 = vst [vmem:[#allocation109_spill] sm:$0xff] %v13493_v49  ;;  %v8262_v11 = vld [vmem:[%s16506_s1 + $0x4c8] sm:$0xff]  ;;  %v13511_v39 = vsel %vm1344_vm1, %v1395_v33, %v1397_v27  ;;  %v1403_v33 = vrot.slane %v12739_v48, 1 }
 0x13b   : > { %17060 = vst [vmem:[#allocation106_spill] sm:$0xff] %v13477_v26  ;;  %17061 = vst [vmem:[#allocation107_spill] sm:$0xff] %v13479_v22  ;;  %v1657_v15 = vmul.f32 %v13479_v22, %v13468_v6  ;;  %2590 = vperm.xlu1 %12012, %v8260_v57   ;;  %2585 = vperm.xlu0 %12011, %v8259_v8   ;;  %v8261_v57 = vld [vmem:[%s16506_s1 + $0x4c0] sm:$0xff]  ;;  %v1399_v8 = vrot.slane %v12716_v4, 1  ;;  %v1658_v2 = vmul.f32 %v13477_v26, %v13486_v53 }
 0x13c   : > { %17066 = vst [vmem:[#allocation112_spill] sm:$0xff] %v13511_v39  ;;  %v1401_v4 = vrot.slane %v13514_v14, 1 }
 0x13d   : > { %9697 = vmatmul.mubr.f32.gmra.mrb[20].mxu0 %v1656_v5  ;;  %v13518_v5 = vsel %vm1344_vm1, %v1397_v27, %v1399_v8 }
 0x13e   : > { %v13502_v40 = vpop.permute.xlu1 %1602  ;;  %v13504_v22 = vpop.permute.xlu0 %1597  ;;  %9699 = vmatprep.mubr.f32.mxu0 %v1657_v15  ;;  %17067 = vst [vmem:[#allocation113_spill] sm:$0xff] %v13518_v5  ;;  %v8264_v15 = vld [vmem:[%s16506_s1 + $0x4d8] sm:$0xff]  ;;  %v13536_v13 = vsel %vm1344_vm1, %v1399_v8, %v1401_v4 }
 0x13f   : > { %17064 = vst [vmem:[#allocation110_spill] sm:$0xff] %v13502_v40  ;;  %17065 = vst [vmem:[#allocation111_spill] sm:$0xff] %v13504_v22  ;;  %v1659_v21 = vmul.f32 %v13504_v22, %v13493_v49  ;;  %2600 = vperm.xlu1 %12012, %v8262_v11   ;;  %2595 = vperm.xlu0 %12011, %v8261_v57   ;;  %v8263_v11 = vld [vmem:[%s16506_s1 + $0x4d0] sm:$0xff]  ;;  %v1660_v27 = vmul.f32 %v13502_v40, %v13511_v39  ;;  %v13539_v49 = vld [vmem:[%s12388_s12 + $0xe0] sm:$0xff] }
 0x140   : > { %v1405_v48 = vrot.slane %v13539_v49, 1 }
 0x141   : > { %9700 = vmatmul.mubr.f32.gmra.mrb[22].mxu0 %v1658_v2  ;;  %v13543_v2 = vsel %vm1344_vm1, %v1401_v4, %v1403_v33 }
 0x142   : > { %v13527_v57 = vpop.permute.xlu1 %1612  ;;  %v13529_v22 = vpop.permute.xlu0 %1607  ;;  %9702 = vmatprep.mubr.f32.mxu0 %v1659_v21  ;;  %v8266_v21 = vld [vmem:[%s16506_s1 + $0x4e8] sm:$0xff]  ;;  %v13564_v39 = vsel %vm1344_vm1, %v1403_v33, %v1405_v48 }
 0x143   : > { %17068 = vst [vmem:[#allocation114_spill] sm:$0xff] %v13527_v57  ;;  %17069 = vst [vmem:[#allocation115_spill] sm:$0xff] %v13529_v22  ;;  %v1661_v26 = vmul.f32 %v13529_v22, %v13518_v5  ;;  %2610 = vperm.xlu1 %12012, %v8264_v15   ;;  %2605 = vperm.xlu0 %12011, %v8263_v11   ;;  %v8265_v22 = vld [vmem:[%s16506_s1 + $0x4e0] sm:$0xff]  ;;  %v13552_v15 = vld [vmem:[%s12388_s12 + $0xe8] sm:$0xff]  ;;  %v1662_v4 = vmul.f32 %v13527_v57, %v13536_v13 }
 0x144   : > { %v1407_v8 = vrot.slane %v13552_v15, 1  ;;  %17072 = vst [vmem:[#allocation118_spill] sm:$0xff] %v13564_v39 }
 0x145   : > { %9703 = vmatmul.mubr.f32.gmra.mrb[24].mxu0 %v1660_v27  ;;  %v8268_v27 = vld [vmem:[%s16506_s1 + $0x4f8] sm:$0xff] }
 0x146   : > { %v13555_v11 = vpop.permute.xlu1 %1622  ;;  %v13557_v40 = vpop.permute.xlu0 %1617  ;;  %9705 = vmatprep.mubr.f32.mxu0 %v1661_v26  ;;  %v13567_v53 = vsel %vm1344_vm1, %v1405_v48, %v1407_v8  ;;  %v8267_v26 = vld [vmem:[%s16506_s1 + $0x4f0] sm:$0xff]  ;;  %v17075_v48 = vrot.slane %v12397_v30, 1 }
 0x147   : > { %17070 = vst [vmem:[#allocation116_spill] sm:$0xff] %v13555_v11  ;;  %17071 = vst [vmem:[#allocation117_spill] sm:$0xff] %v13557_v40  ;;  %v1663_v5 = vmul.f32 %v13557_v40, %v13543_v2  ;;  %2620 = vperm.xlu1 %12012, %v8266_v21   ;;  %2615 = vperm.xlu0 %12011, %v8265_v22   ;;  %v1664_v22 = vmul.f32 %v13555_v11, %v13564_v39 }
 0x148   : > { %v13586_v21 = vsel %vm1344_vm1, %v1407_v8, %v17075_v48 }
 0x149   : > { %9706 = vmatmul.mubr.f32.gmra.mrb[26].mxu0 %v1662_v4  ;;  %v8286_v4 = vld [vmem:[%s16506_s1 + $0x508] sm:$0xff] }
 0x14a   : > { %v13575_v57 = vpop.permute.xlu1 %1632  ;;  %v13577_v40 = vpop.permute.xlu0 %1627  ;;  %9708 = vmatprep.mubr.f32.mxu0 %v1663_v5  ;;  %v8285_v5 = vld [vmem:[%s16506_s1 + $0x500] sm:$0xff] }
 0x14b   : > { %17073 = vst [vmem:[#allocation119_spill] sm:$0xff] %v13575_v57  ;;  %17074 = vst [vmem:[#allocation120_spill] sm:$0xff] %v13577_v40  ;;  %v1665_v33 = vmul.f32 %v13577_v40, %v13567_v53  ;;  %2630 = vperm.xlu1 %12012, %v8268_v27   ;;  %2625 = vperm.xlu0 %12011, %v8267_v26   ;;  %v1666_v30 = vmul.f32 %v13575_v57, %v13586_v21  ;;  %v8288_v27 = vld [vmem:[%s16506_s1 + $0x518] sm:$0xff]  ;;  %v8287_v26 = vld [vmem:[%s16506_s1 + $0x510] sm:$0xff] }
 0x14c   : > { %v8289_v57 = vld [vmem:[%s16506_s1 + $0x520] sm:$0xff] }
 0x14d   : > { %9709 = vmatmul.mubr.f32.gmra.mrb[28].mxu0 %v1664_v22  ;;  %v8271_v22 = vld [vmem:[%s16507_s2 + $0x210] sm:$0xff] }
 0x14e   : > { %v13594_v11 = vpop.permute.xlu1 %1981  ;;  %v13596_v39 = vpop.permute.xlu0 %1976  ;;  %9711 = vmatprep.mubr.f32.mxu0 %v1665_v33  ;;  %v8272_v33 = vld [vmem:[%s16507_s2 + $0x218] sm:$0xff] }
 0x14f   : > { %17076 = vst [vmem:[#allocation121_spill] sm:$0xff] %v13594_v11  ;;  %17077 = vst [vmem:[#allocation122_spill] sm:$0xff] %v13596_v39  ;;  %v2134_v8 = vmul.f32 %v13596_v39, %v12788_v29  ;;  %2979 = vperm.xlu1 %12012, %v8286_v4   ;;  %2974 = vperm.xlu0 %12011, %v8285_v5   ;;  %v2135_v5 = vmul.f32 %v13594_v11, %v12813_v36 }
 0x150   : > { %v11046_v40 = vpack.c.bf16 %v8272_v33, %v8271_v22  ;;  %v8292_v33 = vld [vmem:[%s16506_s1 + $0x538] sm:$0xff] }
 0x151   : > { %9712 = vmatmul.mubr.f32.gmra.mrb[30].mxu0 %v1666_v30  ;;  %v8290_v30 = vld [vmem:[%s16506_s1 + $0x528] sm:$0xff] }
 0x152   : > { %v13614_v48 = vpop.permute.xlu1 %1991  ;;  %v13616_v4 = vpop.permute.xlu0 %1986  ;;  %9746 = vmatprep.mubr.f32.mxu0 %v2134_v8  ;;  %v8273_v8 = vld [vmem:[%s16507_s2 + $0x220] sm:$0xff] }
 0x153   : > { %17078 = vst [vmem:[#allocation123_spill] sm:$0xff] %v13614_v48  ;;  %17079 = vst [vmem:[#allocation124_spill] sm:$0xff] %v13616_v4  ;;  %v2136_v39 = vmul.f32 %v13616_v4, %v12816_v37  ;;  %2989 = vperm.xlu1 %12012, %v8288_v27   ;;  %2984 = vperm.xlu0 %12011, %v8287_v26   ;;  %v8274_v4 = vld [vmem:[%s16507_s2 + $0x228] sm:$0xff]  ;;  %v2137_v11 = vmul.f32 %v13614_v48, %v12839_v54 }
 0x155   : > { %9747 = vmatmul.mubr.f32.vlgmr.msra.gmra.mrb[0].mxu0 %v2135_v5  ;;  %v11050_v5 = vpack.c.bf16 %v8274_v4, %v8273_v8  ;;  %v8294_v4 = vld [vmem:[%s16506_s1 + $0x548] sm:$0xff]  ;;  %v8293_v8 = vld [vmem:[%s16506_s1 + $0x540] sm:$0xff] }
 0x156   : > { %11045 = vmatpush3.bf16.msra.mxu0 %v13430_v52  ;;  %v13635_v27 = vpop.permute.xlu1 %2001  ;;  %v13637_v26 = vpop.permute.xlu0 %1996  ;;  %9749 = vmatprep.mubr.f32.mxu0 %v2136_v39  ;;  %v8291_v52 = vld [vmem:[%s16506_s1 + $0x530] sm:$0xff] }
 0x157   : > { %17080 = vst [vmem:[#allocation125_spill] sm:$0xff] %v13635_v27  ;;  %17081 = vst [vmem:[#allocation126_spill] sm:$0xff] %v13637_v26  ;;  %v2138_v22 = vmul.f32 %v13637_v26, %v12845_v18  ;;  %2999 = vperm.xlu1 %12012, %v8290_v30   ;;  %2994 = vperm.xlu0 %12011, %v8289_v57   ;;  %v8275_v39 = vld [vmem:[%s16507_s2 + $0x230] sm:$0xff]  ;;  %v8276_v30 = vld [vmem:[%s16507_s2 + $0x238] sm:$0xff]  ;;  %v2139_v48 = vmul.f32 %v13635_v27, %v12870_v7 }
 0x158   : > { %11047 = vmatprep.subr.bf16.mxu0 %v11046_v40  ;;  %v11054_v36 = vpack.c.bf16 %v8276_v30, %v8275_v39  ;;  %v8296_v39 = vld [vmem:[%s16506_s1 + $0x558] sm:$0xff]  ;;  %v8295_v30 = vld [vmem:[%s16506_s1 + $0x550] sm:$0xff] }
 0x159   : > { %9750 = vmatmul.mubr.f32.gmra.mrb[2].mxu0 %v2137_v11 }
 0x15a   : > { %v13655_v57 = vpop.permute.xlu1 %2011  ;;  %v13657_v26 = vpop.permute.xlu0 %2006  ;;  %9752 = vmatprep.mubr.f32.mxu0 %v2138_v22  ;;  %11049 = vmatpush3.bf16.msra.mxu0 %v11046_v40  ;;  %v8277_v40 = vld [vmem:[%s16507_s2 + $0x240] sm:$0xff]  ;;  %v8278_v22 = vld [vmem:[%s16507_s2 + $0x248] sm:$0xff] }
 0x15b   : > { %17082 = vst [vmem:[#allocation127_spill] sm:$0xff] %v13655_v57  ;;  %17083 = vst [vmem:[#allocation128_spill] sm:$0xff] %v13657_v26  ;;  %v2140_v11 = vmul.f32 %v13657_v26, %v12873_v62  ;;  %3009 = vperm.xlu1 %12012, %v8292_v33   ;;  %3004 = vperm.xlu0 %12011, %v8291_v52   ;;  %v2141_v26 = vmul.f32 %v13655_v57, %v12895_v0 }
 0x15c   : > { %11051 = vmatprep.subr.bf16.mxu0 %v11050_v5  ;;  %v11058_v27 = vpack.c.bf16 %v8278_v22, %v8277_v40  ;;  %v8298_v40 = vld [vmem:[%s16506_s1 + $0x568] sm:$0xff]  ;;  %v8297_v22 = vld [vmem:[%s16506_s1 + $0x560] sm:$0xff] }
 0x15d   : > { %9753 = vmatmul.mubr.f32.gmra.mrb[4].mxu0 %v2139_v48 }
 0x15e   : > { %v13675_v33 = vpop.permute.xlu1 %2021  ;;  %v13677_v52 = vpop.permute.xlu0 %2016  ;;  %9755 = vmatprep.mubr.f32.mxu0 %v2140_v11  ;;  %11053 = vmatpush3.bf16.msra.mxu0 %v11050_v5  ;;  %v8279_v5 = vld [vmem:[%s16507_s2 + $0x250] sm:$0xff]  ;;  %v8280_v11 = vld [vmem:[%s16507_s2 + $0x258] sm:$0xff] }
 0x15f   : > { %17084 = vst [vmem:[#allocation129_spill] sm:$0xff] %v13675_v33  ;;  %17085 = vst [vmem:[#allocation130_spill] sm:$0xff] %v13677_v52  ;;  %v2142_v48 = vmul.f32 %v13677_v52, %v12901_v51  ;;  %3019 = vperm.xlu1 %12012, %v8294_v4   ;;  %3014 = vperm.xlu0 %12011, %v8293_v8   ;;  %v2143_v52 = vmul.f32 %v13675_v33, %v12926_v19  ;;  %v17090_v33 = vld [vmem:[#allocation52_spill] sm:$0xff] }
 0x160   : > { %11055 = vmatprep.subr.bf16.mxu0 %v11054_v36  ;;  %v11062_v57 = vpack.c.bf16 %v8280_v11, %v8279_v5  ;;  %v8300_v5 = vld [vmem:[%s16506_s1 + $0x578] sm:$0xff]  ;;  %v8299_v11 = vld [vmem:[%s16506_s1 + $0x570] sm:$0xff] }
 0x161   : > { %9756 = vmatmul.mubr.f32.gmra.mrb[6].mxu0 %v2141_v26 }
 0x162   : > { %v13695_v4 = vpop.permute.xlu1 %2031  ;;  %v13697_v8 = vpop.permute.xlu0 %2026  ;;  %9758 = vmatprep.mubr.f32.mxu0 %v2142_v48  ;;  %11057 = vmatpush3.bf16.msra.mxu0 %v11054_v36  ;;  %v8281_v36 = vld [vmem:[%s16507_s2 + $0x260] sm:$0xff]  ;;  %v8282_v48 = vld [vmem:[%s16507_s2 + $0x268] sm:$0xff] }
 0x163   : > { %17086 = vst [vmem:[#allocation131_spill] sm:$0xff] %v13695_v4  ;;  %17087 = vst [vmem:[#allocation132_spill] sm:$0xff] %v13697_v8  ;;  %v2144_v26 = vmul.f32 %v13697_v8, %v12929_v41  ;;  %3029 = vperm.xlu1 %12012, %v8296_v39   ;;  %3024 = vperm.xlu0 %12011, %v8295_v30   ;;  %v2145_v8 = vmul.f32 %v13695_v4, %v12951_v59  ;;  %v17093_v4 = vld [vmem:[#allocation55_spill] sm:$0xff] }
 0x164   : > { %11059 = vmatprep.subr.bf16.mxu0 %v11058_v27  ;;  %v11066_v29 = vpack.c.bf16 %v8282_v48, %v8281_v36  ;;  %v8302_v36 = vld [vmem:[%s16506_s1 + $0x588] sm:$0xff]  ;;  %v8301_v48 = vld [vmem:[%s16506_s1 + $0x580] sm:$0xff] }
 0x165   : > { %9759 = vmatmul.mubr.f32.gmra.mrb[8].mxu0 %v2143_v52 }
 0x166   : > { %v13715_v39 = vpop.permute.xlu1 %2041  ;;  %v13717_v30 = vpop.permute.xlu0 %2036  ;;  %9761 = vmatprep.mubr.f32.mxu0 %v2144_v26  ;;  %11061 = vmatpush3.bf16.msra.mxu0 %v11058_v27  ;;  %v8283_v27 = vld [vmem:[%s16507_s2 + $0x270] sm:$0xff]  ;;  %v8284_v26 = vld [vmem:[%s16507_s2 + $0x278] sm:$0xff] }
 0x167   : > { %17088 = vst [vmem:[#allocation133_spill] sm:$0xff] %v13715_v39  ;;  %17089 = vst [vmem:[#allocation134_spill] sm:$0xff] %v13717_v30  ;;  %v2146_v52 = vmul.f32 %v13717_v30, %v17090_v33  ;;  %3039 = vperm.xlu1 %12012, %v8298_v40   ;;  %3034 = vperm.xlu0 %12011, %v8297_v22   ;;  %v2147_v30 = vmul.f32 %v13715_v39, %v12982_v50 }
 0x168   : > { %11063 = vmatprep.subr.bf16.mxu0 %v11062_v57  ;;  %v11070_v33 = vpack.c.bf16 %v8284_v26, %v8283_v27  ;;  %v8304_v27 = vld [vmem:[%s16506_s1 + $0x598] sm:$0xff]  ;;  %v8303_v26 = vld [vmem:[%s16506_s1 + $0x590] sm:$0xff] }
 0x169   : > { %9762 = vmatmul.mubr.f32.gmra.mrb[10].mxu0 %v2145_v8 }
 0x16a   : > { %v13735_v40 = vpop.permute.xlu1 %2051  ;;  %v13737_v22 = vpop.permute.xlu0 %2046  ;;  %9764 = vmatprep.mubr.f32.mxu0 %v2146_v52  ;;  %11065 = vmatpush3.bf16.msra.mxu0 %v11062_v57  ;;  %v8317_v57 = vld [vmem:[%s16507_s2 + $0x280] sm:$0xff]  ;;  %v8318_v52 = vld [vmem:[%s16507_s2 + $0x288] sm:$0xff] }
 0x16b   : > { %17091 = vst [vmem:[#allocation135_spill] sm:$0xff] %v13735_v40  ;;  %17092 = vst [vmem:[#allocation136_spill] sm:$0xff] %v13737_v22  ;;  %v2148_v8 = vmul.f32 %v13737_v22, %v17093_v4  ;;  %3049 = vperm.xlu1 %12012, %v8300_v5   ;;  %3044 = vperm.xlu0 %12011, %v8299_v11   ;;  %v2149_v22 = vmul.f32 %v13735_v40, %v13007_v38 }
 0x16c   : > { %11067 = vmatprep.subr.bf16.mxu0 %v11066_v29  ;;  %v13769_v39 = vpack.c.bf16 %v8318_v52, %v8317_v57  ;;  %v8306_v57 = vld [vmem:[%s16506_s1 + $0x5a8] sm:$0xff] }
 0x16d   : > { %9765 = vmatmul.mubr.f32.gmra.mrb[12].mxu0 %v2147_v30 }
 0x16e   : > { %v13755_v5 = vpop.permute.xlu1 %2061  ;;  %v13757_v11 = vpop.permute.xlu0 %2056  ;;  %9767 = vmatprep.mubr.f32.mxu0 %v2148_v8  ;;  %11069 = vmatpush3.bf16.msra.mxu0 %v11066_v29 }
 0x16f   : > { %17094 = vst [vmem:[#allocation55_spill] sm:$0xff] %v13755_v5  ;;  %17095 = vst [vmem:[#allocation137_spill] sm:$0xff] %v13757_v11  ;;  %v2150_v30 = vmul.f32 %v13757_v11, %v13013_v42  ;;  %3059 = vperm.xlu1 %12012, %v8302_v36   ;;  %3054 = vperm.xlu0 %12011, %v8301_v48   ;;  %v17098_v36 = vld [vmem:[#allocation60_spill] sm:$0xff]  ;;  %v17099_v11 = vld [vmem:[#allocation61_spill] sm:$0xff] }
 0x170   : > { %11071 = vmatprep.subr.bf16.mxu0 %v11070_v33  ;;  %v2151_v48 = vmul.f32 %v13755_v5, %v17098_v36  ;;  %v8308_v5 = vld [vmem:[%s16506_s1 + $0x5b8] sm:$0xff] }
 0x171   : > { %9768 = vmatmul.mubr.f32.gmra.mrb[14].mxu0 %v2149_v22  ;;  %v8305_v22 = vld [vmem:[%s16506_s1 + $0x5a0] sm:$0xff] }
 0x172   : > { %v13771_v29 = vpop.permute.xlu1 %2071  ;;  %v13773_v8 = vpop.permute.xlu0 %2066  ;;  %9770 = vmatprep.mubr.f32.mxu0 %v2150_v30  ;;  %11073 = vmatpush3.bf16.msra.mxu0 %v11070_v33  ;;  %v17102_v30 = vld [vmem:[#allocation64_spill] sm:$0xff] }
 0x173   : > { %17096 = vst [vmem:[#allocation138_spill] sm:$0xff] %v13771_v29  ;;  %17097 = vst [vmem:[#allocation139_spill] sm:$0xff] %v13773_v8  ;;  %v2152_v40 = vmul.f32 %v13773_v8, %v17099_v11  ;;  %3069 = vperm.xlu1 %12012, %v8304_v27   ;;  %3064 = vperm.xlu0 %12011, %v8303_v26   ;;  %v2153_v27 = vmul.f32 %v13771_v29, %v17102_v30  ;;  %v17103_v26 = vld [vmem:[#allocation65_spill] sm:$0xff] }
 0x174   : > { %11075 = vmatprep.subr.bf16.mxu0 %v13769_v39 }
 0x175   : > { %9771 = vmatmul.mubr.f32.gmra.mrb[16].mxu0 %v2151_v48  ;;  %v8307_v48 = vld [vmem:[%s16506_s1 + $0x5b0] sm:$0xff] }
 0x176   : > { %v13786_v33 = vpop.permute.xlu1 %2081  ;;  %v13788_v52 = vpop.permute.xlu0 %2076  ;;  %9773 = vmatprep.mubr.f32.mxu0 %v2152_v40 }
 0x177   : > { %17100 = vst [vmem:[#allocation60_spill] sm:$0xff] %v13786_v33  ;;  %17101 = vst [vmem:[#allocation140_spill] sm:$0xff] %v13788_v52  ;;  %v2154_v8 = vmul.f32 %v13788_v52, %v17103_v26  ;;  %3079 = vperm.xlu1 %12012, %v8306_v57   ;;  %3074 = vperm.xlu0 %12011, %v8305_v22   ;;  %v2155_v29 = vmul.f32 %v13786_v33, %v13078_v46  ;;  %v17106_v52 = vld [vmem:[#allocation68_spill] sm:$0xff]  ;;  %v8310_v22 = vld [vmem:[%s16506_s1 + $0x5c8] sm:$0xff] }
 0x179   : > { %9774 = vmatmul.mubr.f32.gmra.mrb[18].mxu0 %v2153_v27  ;;  %v8309_v27 = vld [vmem:[%s16506_s1 + $0x5c0] sm:$0xff] }
 0x17a   : > { %v13800_v11 = vpop.permute.xlu1 %2091  ;;  %v13802_v40 = vpop.permute.xlu0 %2086  ;;  %9776 = vmatprep.mubr.f32.mxu0 %v2154_v8 }
 0x17b   : > { %17104 = vst [vmem:[#allocation64_spill] sm:$0xff] %v13800_v11  ;;  %17105 = vst [vmem:[#allocation141_spill] sm:$0xff] %v13802_v40  ;;  %v2156_v57 = vmul.f32 %v13802_v40, %v17106_v52  ;;  %3089 = vperm.xlu1 %12012, %v8308_v5   ;;  %3084 = vperm.xlu0 %12011, %v8307_v48   ;;  %v2157_v33 = vmul.f32 %v13800_v11, %v13100_v20  ;;  %v17109_v40 = vld [vmem:[#allocation71_spill] sm:$0xff]  ;;  %v8312_v48 = vld [vmem:[%s16506_s1 + $0x5d8] sm:$0xff] }
 0x17d   : > { %9777 = vmatmul.mubr.f32.gmra.mrb[20].mxu0 %v2155_v29  ;;  %v8311_v29 = vld [vmem:[%s16506_s1 + $0x5d0] sm:$0xff] }
 0x17e   : > { %v13814_v26 = vpop.permute.xlu1 %2101  ;;  %v13816_v8 = vpop.permute.xlu0 %2096  ;;  %9779 = vmatprep.mubr.f32.mxu0 %v2156_v57 }
 0x17f   : > { %17107 = vst [vmem:[#allocation142_spill] sm:$0xff] %v13814_v26  ;;  %17108 = vst [vmem:[#allocation143_spill] sm:$0xff] %v13816_v8  ;;  %v2158_v5 = vmul.f32 %v13816_v8, %v17109_v40  ;;  %3099 = vperm.xlu1 %12012, %v8310_v22   ;;  %3094 = vperm.xlu0 %12011, %v8309_v27   ;;  %v2159_v11 = vmul.f32 %v13814_v26, %v13122_v24  ;;  %v17112_v8 = vld [vmem:[#allocation74_spill] sm:$0xff]  ;;  %v8314_v27 = vld [vmem:[%s16506_s1 + $0x5e8] sm:$0xff] }
 0x181   : > { %9780 = vmatmul.mubr.f32.gmra.mrb[22].mxu0 %v2157_v33  ;;  %v8313_v33 = vld [vmem:[%s16506_s1 + $0x5e0] sm:$0xff] }
 0x182   : > { %v13828_v52 = vpop.permute.xlu1 %2111  ;;  %v13830_v57 = vpop.permute.xlu0 %2106  ;;  %9782 = vmatprep.mubr.f32.mxu0 %v2158_v5 }
 0x183   : > { %17110 = vst [vmem:[#allocation144_spill] sm:$0xff] %v13828_v52  ;;  %17111 = vst [vmem:[#allocation145_spill] sm:$0xff] %v13830_v57  ;;  %v2160_v22 = vmul.f32 %v13830_v57, %v17112_v8  ;;  %3109 = vperm.xlu1 %12012, %v8312_v48   ;;  %3104 = vperm.xlu0 %12011, %v8311_v29   ;;  %v2161_v26 = vmul.f32 %v13828_v52, %v13144_v9  ;;  %v8316_v29 = vld [vmem:[%s16506_s1 + $0x5f8] sm:$0xff]  ;;  %v8334_v52 = vld [vmem:[%s16506_s1 + $0x608] sm:$0xff] }
 0x184   : > { %v8337_v9 = vld [vmem:[%s16506_s1 + $0x620] sm:$0xff] }
 0x185   : > { %9783 = vmatmul.mubr.f32.gmra.mrb[24].mxu0 %v2159_v11  ;;  %v8315_v11 = vld [vmem:[%s16506_s1 + $0x5f0] sm:$0xff] }
 0x186   : > { %v13842_v40 = vpop.permute.xlu1 %2121  ;;  %v13844_v5 = vpop.permute.xlu0 %2116  ;;  %9785 = vmatprep.mubr.f32.mxu0 %v2160_v22 }
 0x187   : > { %17113 = vst [vmem:[#allocation146_spill] sm:$0xff] %v13842_v40  ;;  %17114 = vst [vmem:[#allocation147_spill] sm:$0xff] %v13844_v5  ;;  %v2162_v48 = vmul.f32 %v13844_v5, %v13147_v34  ;;  %3119 = vperm.xlu1 %12012, %v8314_v27   ;;  %3114 = vperm.xlu0 %12011, %v8313_v33   ;;  %v2163_v5 = vmul.f32 %v13842_v40, %v13168_v35  ;;  %v17117_v27 = vld [vmem:[#allocation34_spill] sm:$0xff]  ;;  %v17120_v40 = vld [vmem:[#allocation37_spill] sm:$0xff] }
 0x188   : > { %v8338_v35 = vld [vmem:[%s16506_s1 + $0x628] sm:$0xff] }
 0x189   : > { %9786 = vmatmul.mubr.f32.gmra.mrb[26].mxu0 %v2161_v26  ;;  %v8333_v26 = vld [vmem:[%s16506_s1 + $0x600] sm:$0xff] }
 0x18a   : > { %v13856_v57 = vpop.permute.xlu1 %2131  ;;  %v13858_v22 = vpop.permute.xlu0 %2126  ;;  %9788 = vmatprep.mubr.f32.mxu0 %v2162_v48 }
 0x18b   : > { %17115 = vst [vmem:[#allocation148_spill] sm:$0xff] %v13856_v57  ;;  %17116 = vst [vmem:[#allocation149_spill] sm:$0xff] %v13858_v22  ;;  %v2164_v33 = vmul.f32 %v13858_v22, %v17117_v27  ;;  %3129 = vperm.xlu1 %12012, %v8316_v29   ;;  %3124 = vperm.xlu0 %12011, %v8315_v11   ;;  %v2165_v29 = vmul.f32 %v13856_v57, %v17120_v40  ;;  %v12017_v11 = vld [vmem:[%s12388_s12] sm:$0xff]  ;;  %v8336_v27 = vld [vmem:[%s16506_s1 + $0x618] sm:$0xff] }
 0x18c   : > { %v8320_v57 = vld [vmem:[%s16507_s2 + $0x298] sm:$0xff]  ;;  %v12019_v40 = vld [vmem:[%s12388_s12 + $0x10] sm:$0xff] }
 0x18d   : > { %9789 = vmatmul.mubr.f32.gmra.mrb[28].mxu0 %v2163_v5  ;;  %v8335_v5 = vld [vmem:[%s16506_s1 + $0x610] sm:$0xff] }
 0x18e   : > { %v13870_v34 = vpop.permute.xlu1 %2480  ;;  %v13872_v48 = vpop.permute.xlu0 %2475  ;;  %9791 = vmatprep.mubr.f32.mxu0 %v2164_v33  ;;  %v8319_v33 = vld [vmem:[%s16507_s2 + $0x290] sm:$0xff] }
 0x18f   : > { %17118 = vst [vmem:[#allocation150_spill] sm:$0xff] %v13870_v34  ;;  %17119 = vst [vmem:[#allocation151_spill] sm:$0xff] %v13872_v48  ;;  %v2633_v22 = vmul.f32 %v12017_v11, %v13872_v48  ;;  %3478 = vperm.xlu1 %12012, %v8334_v52   ;;  %3473 = vperm.xlu0 %12011, %v8333_v26   ;;  %v12018_v26 = vld [vmem:[%s12388_s12 + $0x8] sm:$0xff]  ;;  %v11078_v8 = vpack.c.bf16 %v8320_v57, %v8319_v33  ;;  %v12021_v57 = vld [vmem:[%s12388_s12 + $0x20] sm:$0xff] }
 0x190   : > { %v2634_v48 = vmul.f32 %v12018_v26, %v13870_v34  ;;  %v12020_v26 = vld [vmem:[%s12388_s12 + $0x18] sm:$0xff]  ;;  %v8341_v34 = vld [vmem:[%s16506_s1 + $0x640] sm:$0xff] }
 0x191   : > { %9792 = vmatmul.mubr.f32.gmra.mrb[30].mxu0 %v2165_v29  ;;  %v8340_v33 = vld [vmem:[%s16506_s1 + $0x638] sm:$0xff] }
 0x192   : > { %v13890_v11 = vpop.permute.xlu1 %2490  ;;  %v13892_v52 = vpop.permute.xlu0 %2485  ;;  %9826 = vmatprep.mubr.f32.mxu0 %v2633_v22  ;;  %v8321_v22 = vld [vmem:[%s16507_s2 + $0x2a0] sm:$0xff] }
 0x193   : > { %17121 = vst [vmem:[#allocation152_spill] sm:$0xff] %v13890_v11  ;;  %17122 = vst [vmem:[#allocation153_spill] sm:$0xff] %v13892_v52  ;;  %v2635_v29 = vmul.f32 %v12019_v40, %v13892_v52  ;;  %3488 = vperm.xlu1 %12012, %v8336_v27   ;;  %3483 = vperm.xlu0 %12011, %v8335_v5   ;;  %v8322_v40 = vld [vmem:[%s16507_s2 + $0x2a8] sm:$0xff]  ;;  %v2636_v52 = vmul.f32 %v12020_v26, %v13890_v11  ;;  %v8323_v26 = vld [vmem:[%s16507_s2 + $0x2b0] sm:$0xff] }
 0x195   : > { %9827 = vmatmul.mubr.f32.vlgmr.msra.gmra.mrb[0].mxu0 %v2634_v48 }
 0x196   : > { %11077 = vmatpush3.bf16.msra.mxu0 %v13769_v39  ;;  %v13911_v27 = vpop.permute.xlu1 %2500  ;;  %v13913_v5 = vpop.permute.xlu0 %2495  ;;  %9829 = vmatprep.mubr.f32.mxu0 %v2635_v29  ;;  %v8339_v39 = vld [vmem:[%s16506_s1 + $0x630] sm:$0xff]  ;;  %v11082_v29 = vpack.c.bf16 %v8322_v40, %v8321_v22  ;;  %v8342_v40 = vld [vmem:[%s16506_s1 + $0x648] sm:$0xff] }
 0x197   : > { %17123 = vst [vmem:[#allocation154_spill] sm:$0xff] %v13911_v27  ;;  %17124 = vst [vmem:[#allocation155_spill] sm:$0xff] %v13913_v5  ;;  %v2637_v48 = vmul.f32 %v12021_v57, %v13913_v5  ;;  %3498 = vperm.xlu1 %12012, %v8338_v35   ;;  %3493 = vperm.xlu0 %12011, %v8337_v9   ;;  %v8324_v35 = vld [vmem:[%s16507_s2 + $0x2b8] sm:$0xff]  ;;  %v12022_v5 = vld [vmem:[%s12388_s12 + $0x28] sm:$0xff] }
 0x198   : > { %11079 = vmatprep.subr.bf16.mxu0 %v11078_v8  ;;  %v2638_v11 = vmul.f32 %v12022_v5, %v13911_v27  ;;  %v12023_v22 = vld [vmem:[%s12388_s12 + $0x30] sm:$0xff]  ;;  %v8325_v5 = vld [vmem:[%s16507_s2 + $0x2c0] sm:$0xff] }
 0x199   : > { %9830 = vmatmul.mubr.f32.gmra.mrb[2].mxu0 %v2636_v52  ;;  %v8343_v27 = vld [vmem:[%s16506_s1 + $0x650] sm:$0xff] }
 0x19a   : > { %v13931_v9 = vpop.permute.xlu1 %2510  ;;  %v13933_v57 = vpop.permute.xlu0 %2505  ;;  %9832 = vmatprep.mubr.f32.mxu0 %v2637_v48  ;;  %11081 = vmatpush3.bf16.msra.mxu0 %v11078_v8  ;;  %v11086_v8 = vpack.c.bf16 %v8324_v35, %v8323_v26  ;;  %v8326_v48 = vld [vmem:[%s16507_s2 + $0x2c8] sm:$0xff]  ;;  %v12025_v26 = vld [vmem:[%s12388_s12 + $0x40] sm:$0xff]  ;;  %v8344_v35 = vld [vmem:[%s16506_s1 + $0x658] sm:$0xff] }
 0x19b   : > { %17125 = vst [vmem:[#allocation156_spill] sm:$0xff] %v13931_v9  ;;  %17126 = vst [vmem:[#allocation157_spill] sm:$0xff] %v13933_v57  ;;  %v2639_v52 = vmul.f32 %v12023_v22, %v13933_v57  ;;  %3508 = vperm.xlu1 %12012, %v8340_v33   ;;  %3503 = vperm.xlu0 %12011, %v8339_v39   ;;  %v12024_v22 = vld [vmem:[%s12388_s12 + $0x38] sm:$0xff] }
 0x19c   : > { %11083 = vmatprep.subr.bf16.mxu0 %v11082_v29  ;;  %v2640_v57 = vmul.f32 %v12024_v22, %v13931_v9  ;;  %v8345_v9 = vld [vmem:[%s16506_s1 + $0x660] sm:$0xff] }
 0x19d   : > { %9833 = vmatmul.mubr.f32.gmra.mrb[4].mxu0 %v2638_v11 }
 0x19e   : > { %v13951_v33 = vpop.permute.xlu1 %2520  ;;  %v13953_v39 = vpop.permute.xlu0 %2515  ;;  %9835 = vmatprep.mubr.f32.mxu0 %v2639_v52  ;;  %11085 = vmatpush3.bf16.msra.mxu0 %v11082_v29  ;;  %v11090_v29 = vpack.c.bf16 %v8326_v48, %v8325_v5  ;;  %v8327_v52 = vld [vmem:[%s16507_s2 + $0x2d0] sm:$0xff]  ;;  %v8346_v48 = vld [vmem:[%s16506_s1 + $0x668] sm:$0xff] }
 0x19f   : > { %17127 = vst [vmem:[#allocation158_spill] sm:$0xff] %v13951_v33  ;;  %17128 = vst [vmem:[#allocation159_spill] sm:$0xff] %v13953_v39  ;;  %v2641_v11 = vmul.f32 %v12025_v26, %v13953_v39  ;;  %3518 = vperm.xlu1 %12012, %v8342_v40   ;;  %3513 = vperm.xlu0 %12011, %v8341_v34   ;;  %v8328_v40 = vld [vmem:[%s16507_s2 + $0x2d8] sm:$0xff]  ;;  %v12026_v26 = vld [vmem:[%s12388_s12 + $0x48] sm:$0xff] }
 0x1a0   : > { %11087 = vmatprep.subr.bf16.mxu0 %v11086_v8  ;;  %v2642_v39 = vmul.f32 %v12026_v26, %v13951_v33  ;;  %v12027_v5 = vld [vmem:[%s12388_s12 + $0x50] sm:$0xff] }
 0x1a1   : > { %9836 = vmatmul.mubr.f32.gmra.mrb[6].mxu0 %v2640_v57  ;;  %v8347_v33 = vld [vmem:[%s16506_s1 + $0x670] sm:$0xff] }
 0x1a2   : > { %v13971_v34 = vpop.permute.xlu1 %2530  ;;  %v13973_v22 = vpop.permute.xlu0 %2525  ;;  %9838 = vmatprep.mubr.f32.mxu0 %v2641_v11  ;;  %11089 = vmatpush3.bf16.msra.mxu0 %v11086_v8  ;;  %v11094_v8 = vpack.c.bf16 %v8328_v40, %v8327_v52  ;;  %v8329_v11 = vld [vmem:[%s16507_s2 + $0x2e0] sm:$0xff]  ;;  %v8348_v40 = vld [vmem:[%s16506_s1 + $0x678] sm:$0xff] }
 0x1a3   : > { %17129 = vst [vmem:[#allocation160_spill] sm:$0xff] %v13971_v34  ;;  %17130 = vst [vmem:[#allocation161_spill] sm:$0xff] %v13973_v22  ;;  %v2643_v57 = vmul.f32 %v12027_v5, %v13973_v22  ;;  %3528 = vperm.xlu1 %12012, %v8344_v35   ;;  %3523 = vperm.xlu0 %12011, %v8343_v27   ;;  %v8330_v35 = vld [vmem:[%s16507_s2 + $0x2e8] sm:$0xff]  ;;  %v12028_v5 = vld [vmem:[%s12388_s12 + $0x58] sm:$0xff] }
 0x1a4   : > { %11091 = vmatprep.subr.bf16.mxu0 %v11090_v29  ;;  %v2644_v22 = vmul.f32 %v12028_v5, %v13971_v34  ;;  %v12029_v52 = vld [vmem:[%s12388_s12 + $0x60] sm:$0xff] }
 0x1a5   : > { %9839 = vmatmul.mubr.f32.gmra.mrb[8].mxu0 %v2642_v39  ;;  %v8349_v34 = vld [vmem:[%s16506_s1 + $0x680] sm:$0xff] }
 0x1a6   : > { %v13991_v27 = vpop.permute.xlu1 %2540  ;;  %v13993_v26 = vpop.permute.xlu0 %2535  ;;  %9841 = vmatprep.mubr.f32.mxu0 %v2643_v57  ;;  %11093 = vmatpush3.bf16.msra.mxu0 %v11090_v29  ;;  %v11098_v29 = vpack.c.bf16 %v8330_v35, %v8329_v11  ;;  %v8331_v57 = vld [vmem:[%s16507_s2 + $0x2f0] sm:$0xff]  ;;  %v8350_v35 = vld [vmem:[%s16506_s1 + $0x688] sm:$0xff] }
 0x1a7   : > { %17131 = vst [vmem:[#allocation162_spill] sm:$0xff] %v13991_v27  ;;  %17132 = vst [vmem:[#allocation163_spill] sm:$0xff] %v13993_v26  ;;  %v2645_v39 = vmul.f32 %v12029_v52, %v13993_v26  ;;  %3538 = vperm.xlu1 %12012, %v8346_v48   ;;  %3533 = vperm.xlu0 %12011, %v8345_v9   ;;  %v8332_v48 = vld [vmem:[%s16507_s2 + $0x2f8] sm:$0xff]  ;;  %v12030_v52 = vld [vmem:[%s12388_s12 + $0x68] sm:$0xff] }
 0x1a8   : > { %11095 = vmatprep.subr.bf16.mxu0 %v11094_v8  ;;  %v2646_v26 = vmul.f32 %v12030_v52, %v13991_v27  ;;  %v12031_v11 = vld [vmem:[%s12388_s12 + $0x70] sm:$0xff] }
 0x1a9   : > { %9842 = vmatmul.mubr.f32.gmra.mrb[10].mxu0 %v2644_v22  ;;  %v8351_v27 = vld [vmem:[%s16506_s1 + $0x690] sm:$0xff] }
 0x1aa   : > { %v14011_v9 = vpop.permute.xlu1 %2550  ;;  %v14013_v5 = vpop.permute.xlu0 %2545  ;;  %9844 = vmatprep.mubr.f32.mxu0 %v2645_v39  ;;  %11097 = vmatpush3.bf16.msra.mxu0 %v11094_v8  ;;  %v11102_v8 = vpack.c.bf16 %v8332_v48, %v8331_v57  ;;  %v8365_v39 = vld [vmem:[%s16507_s2 + $0x300] sm:$0xff]  ;;  %v8352_v48 = vld [vmem:[%s16506_s1 + $0x698] sm:$0xff] }
 0x1ab   : > { %17133 = vst [vmem:[#allocation164_spill] sm:$0xff] %v14011_v9  ;;  %17134 = vst [vmem:[#allocation165_spill] sm:$0xff] %v14013_v5  ;;  %v2647_v22 = vmul.f32 %v12031_v11, %v14013_v5  ;;  %3548 = vperm.xlu1 %12012, %v8348_v40   ;;  %3543 = vperm.xlu0 %12011, %v8347_v33   ;;  %v8366_v40 = vld [vmem:[%s16507_s2 + $0x308] sm:$0xff]  ;;  %v12032_v11 = vld [vmem:[%s12388_s12 + $0x78] sm:$0xff] }
 0x1ac   : > { %11099 = vmatprep.subr.bf16.mxu0 %v11098_v29  ;;  %v2648_v5 = vmul.f32 %v12032_v11, %v14011_v9 }
 0x1ad   : > { %9845 = vmatmul.mubr.f32.gmra.mrb[12].mxu0 %v2646_v26  ;;  %v12033_v26 = vld [vmem:[%s12388_s12 + $0x80] sm:$0xff] }
 0x1ae   : > { %v14031_v33 = vpop.permute.xlu1 %2560  ;;  %v14033_v52 = vpop.permute.xlu0 %2555  ;;  %9847 = vmatprep.mubr.f32.mxu0 %v2647_v22  ;;  %11101 = vmatpush3.bf16.msra.mxu0 %v11098_v29  ;;  %v14045_v29 = vpack.c.bf16 %v8366_v40, %v8365_v39  ;;  %v8353_v39 = vld [vmem:[%s16506_s1 + $0x6a0] sm:$0xff] }
 0x1af   : > { %17135 = vst [vmem:[#allocation166_spill] sm:$0xff] %v14031_v33  ;;  %17136 = vst [vmem:[#allocation167_spill] sm:$0xff] %v14033_v52  ;;  %v2649_v57 = vmul.f32 %v12033_v26, %v14033_v52  ;;  %3558 = vperm.xlu1 %12012, %v8350_v35   ;;  %3553 = vperm.xlu0 %12011, %v8349_v34   ;;  %v12034_v34 = vld [vmem:[%s12388_s12 + $0x88] sm:$0xff]  ;;  %v12035_v26 = vld [vmem:[%s12388_s12 + $0x90] sm:$0xff] }
 0x1b0   : > { %11103 = vmatprep.subr.bf16.mxu0 %v11102_v8  ;;  %v2650_v35 = vmul.f32 %v12034_v34, %v14031_v33 }
 0x1b1   : > { %9848 = vmatmul.mubr.f32.gmra.mrb[14].mxu0 %v2648_v5  ;;  %v8354_v5 = vld [vmem:[%s16506_s1 + $0x6a8] sm:$0xff] }
 0x1b2   : > { %v14047_v22 = vpop.permute.xlu1 %2570  ;;  %v14049_v11 = vpop.permute.xlu0 %2565  ;;  %9850 = vmatprep.mubr.f32.mxu0 %v2649_v57  ;;  %11105 = vmatpush3.bf16.msra.mxu0 %v11102_v8  ;;  %v12036_v57 = vld [vmem:[%s12388_s12 + $0x98] sm:$0xff] }
 0x1b3   : > { %17137 = vst [vmem:[#allocation168_spill] sm:$0xff] %v14047_v22  ;;  %17138 = vst [vmem:[#allocation169_spill] sm:$0xff] %v14049_v11  ;;  %v2651_v52 = vmul.f32 %v12035_v26, %v14049_v11  ;;  %3568 = vperm.xlu1 %12012, %v8352_v48   ;;  %3563 = vperm.xlu0 %12011, %v8351_v27   ;;  %v2652_v27 = vmul.f32 %v12036_v57, %v14047_v22  ;;  %v12037_v48 = vld [vmem:[%s12388_s12 + $0xa0] sm:$0xff]  ;;  %v8356_v26 = vld [vmem:[%s16506_s1 + $0x6b8] sm:$0xff] }
 0x1b4   : > { %11107 = vmatprep.subr.bf16.mxu0 %v14045_v29  ;;  %v12038_v57 = vld [vmem:[%s12388_s12 + $0xa8] sm:$0xff] }
 0x1b5   : > { %9851 = vmatmul.mubr.f32.gmra.mrb[16].mxu0 %v2650_v35  ;;  %v8355_v35 = vld [vmem:[%s16506_s1 + $0x6b0] sm:$0xff] }
 0x1b6   : > { %v14062_v8 = vpop.permute.xlu1 %2580  ;;  %v14064_v40 = vpop.permute.xlu0 %2575  ;;  %9853 = vmatprep.mubr.f32.mxu0 %v2651_v52 }
 0x1b7   : > { %17139 = vst [vmem:[#allocation170_spill] sm:$0xff] %v14062_v8  ;;  %17140 = vst [vmem:[#allocation171_spill] sm:$0xff] %v14064_v40  ;;  %v2653_v34 = vmul.f32 %v12037_v48, %v14064_v40  ;;  %3578 = vperm.xlu1 %12012, %v8354_v5   ;;  %3573 = vperm.xlu0 %12011, %v8353_v39   ;;  %v2654_v48 = vmul.f32 %v12038_v57, %v14062_v8  ;;  %v12039_v5 = vld [vmem:[%s12388_s12 + $0xb0] sm:$0xff]  ;;  %v8358_v40 = vld [vmem:[%s16506_s1 + $0x6c8] sm:$0xff] }
 0x1b8   : > { %v12040_v57 = vld [vmem:[%s12388_s12 + $0xb8] sm:$0xff] }
 0x1b9   : > { %9854 = vmatmul.mubr.f32.gmra.mrb[18].mxu0 %v2652_v27  ;;  %v8357_v27 = vld [vmem:[%s16506_s1 + $0x6c0] sm:$0xff] }
 0x1ba   : > { %v14076_v11 = vpop.permute.xlu1 %2590  ;;  %v14078_v52 = vpop.permute.xlu0 %2585  ;;  %9856 = vmatprep.mubr.f32.mxu0 %v2653_v34 }
 0x1bb   : > { %17141 = vst [vmem:[#allocation172_spill] sm:$0xff] %v14076_v11  ;;  %17142 = vst [vmem:[#allocation173_spill] sm:$0xff] %v14078_v52  ;;  %v2655_v39 = vmul.f32 %v12039_v5, %v14078_v52  ;;  %3588 = vperm.xlu1 %12012, %v8356_v26   ;;  %3583 = vperm.xlu0 %12011, %v8355_v35   ;;  %v2656_v5 = vmul.f32 %v12040_v57, %v14076_v11  ;;  %v8360_v35 = vld [vmem:[%s16506_s1 + $0x6d8] sm:$0xff]  ;;  %v12041_v57 = vld [vmem:[%s12388_s12 + $0xc8] sm:$0xff] }
 0x1bd   : > { %9857 = vmatmul.mubr.f32.gmra.mrb[20].mxu0 %v2654_v48  ;;  %v8359_v48 = vld [vmem:[%s16506_s1 + $0x6d0] sm:$0xff] }
 0x1be   : > { %v14090_v22 = vpop.permute.xlu1 %2600  ;;  %v14092_v34 = vpop.permute.xlu0 %2595  ;;  %9859 = vmatprep.mubr.f32.mxu0 %v2655_v39 }
 0x1bf   : > { %17143 = vst [vmem:[#allocation174_spill] sm:$0xff] %v14090_v22  ;;  %17144 = vst [vmem:[#allocation175_spill] sm:$0xff] %v14092_v34  ;;  %v2657_v26 = vmul.f32 %v13489_v28, %v14092_v34  ;;  %3598 = vperm.xlu1 %12012, %v8358_v40   ;;  %3593 = vperm.xlu0 %12011, %v8357_v27   ;;  %v2658_v28 = vmul.f32 %v12041_v57, %v14090_v22  ;;  %v8362_v27 = vld [vmem:[%s16506_s1 + $0x6e8] sm:$0xff]  ;;  %v12042_v57 = vld [vmem:[%s12388_s12 + $0xd8] sm:$0xff] }
 0x1c1   : > { %9860 = vmatmul.mubr.f32.gmra.mrb[22].mxu0 %v2656_v5  ;;  %v8361_v5 = vld [vmem:[%s16506_s1 + $0x6e0] sm:$0xff] }
 0x1c2   : > { %v14104_v52 = vpop.permute.xlu1 %2610  ;;  %v14106_v39 = vpop.permute.xlu0 %2605  ;;  %9862 = vmatprep.mubr.f32.mxu0 %v2657_v26 }
 0x1c3   : > { %17145 = vst [vmem:[#allocation176_spill] sm:$0xff] %v14104_v52  ;;  %17146 = vst [vmem:[#allocation177_spill] sm:$0xff] %v14106_v39  ;;  %v2659_v40 = vmul.f32 %v13514_v14, %v14106_v39  ;;  %3608 = vperm.xlu1 %12012, %v8360_v35   ;;  %3603 = vperm.xlu0 %12011, %v8359_v48   ;;  %v2660_v14 = vmul.f32 %v12042_v57, %v14104_v52  ;;  %v8364_v48 = vld [vmem:[%s16506_s1 + $0x6f8] sm:$0xff]  ;;  %v8382_v57 = vld [vmem:[%s16506_s1 + $0x708] sm:$0xff] }
 0x1c5   : > { %9863 = vmatmul.mubr.f32.gmra.mrb[24].mxu0 %v2658_v28  ;;  %v8363_v28 = vld [vmem:[%s16506_s1 + $0x6f0] sm:$0xff] }
 0x1c6   : > { %v14118_v34 = vpop.permute.xlu1 %2620  ;;  %v14120_v26 = vpop.permute.xlu0 %2615  ;;  %9865 = vmatprep.mubr.f32.mxu0 %v2659_v40 }
 0x1c7   : > { %17147 = vst [vmem:[#allocation178_spill] sm:$0xff] %v14118_v34  ;;  %17148 = vst [vmem:[#allocation179_spill] sm:$0xff] %v14120_v26  ;;  %v2661_v35 = vmul.f32 %v13539_v49, %v14120_v26  ;;  %3618 = vperm.xlu1 %12012, %v8362_v27   ;;  %3613 = vperm.xlu0 %12011, %v8361_v5   ;;  %v2662_v49 = vmul.f32 %v13552_v15, %v14118_v34  ;;  %v12043_v27 = vld [vmem:[%s12388_s12 + $0xf0] sm:$0xff]  ;;  %v12044_v15 = vld [vmem:[%s12388_s12 + $0xf8] sm:$0xff] }
 0x1c9   : > { %9866 = vmatmul.mubr.f32.gmra.mrb[26].mxu0 %v2660_v14  ;;  %v8381_v14 = vld [vmem:[%s16506_s1 + $0x700] sm:$0xff] }
 0x1ca   : > { %v14132_v39 = vpop.permute.xlu1 %2630  ;;  %v14134_v40 = vpop.permute.xlu0 %2625  ;;  %9868 = vmatprep.mubr.f32.mxu0 %v2661_v35 }
 0x1cb   : > { %17149 = vst [vmem:[#allocation180_spill] sm:$0xff] %v14132_v39  ;;  %17150 = vst [vmem:[#allocation181_spill] sm:$0xff] %v14134_v40  ;;  %v2663_v5 = vmul.f32 %v12043_v27, %v14134_v40  ;;  %3628 = vperm.xlu1 %12012, %v8364_v48   ;;  %3623 = vperm.xlu0 %12011, %v8363_v28   ;;  %v2664_v34 = vmul.f32 %v12044_v15, %v14132_v39  ;;  %v8384_v28 = vld [vmem:[%s16506_s1 + $0x718] sm:$0xff]  ;;  %v8367_v27 = vld [vmem:[%s16507_s2 + $0x310] sm:$0xff] }
 0x1cc   : > { %v8385_v39 = vld [vmem:[%s16506_s1 + $0x720] sm:$0xff] }
 0x1cd   : > { %9869 = vmatmul.mubr.f32.gmra.mrb[28].mxu0 %v2662_v49  ;;  %v8383_v49 = vld [vmem:[%s16506_s1 + $0x710] sm:$0xff] }
 0x1ce   : > { %v14146_v26 = vpop.permute.xlu1 %2979  ;;  %v14148_v35 = vpop.permute.xlu0 %2974  ;;  %9871 = vmatprep.mubr.f32.mxu0 %v2663_v5  ;;  %v8368_v5 = vld [vmem:[%s16507_s2 + $0x318] sm:$0xff] }
 0x1cf   : > { %17151 = vst [vmem:[#allocation182_spill] sm:$0xff] %v14146_v26  ;;  %17152 = vst [vmem:[#allocation183_spill] sm:$0xff] %v14148_v35  ;;  %v3132_v48 = vmul.f32 %v14148_v35, %v13196_v43  ;;  %3977 = vperm.xlu1 %12012, %v8382_v57   ;;  %3972 = vperm.xlu0 %12011, %v8381_v14   ;;  %v3133_v14 = vmul.f32 %v14146_v26, %v13221_v63 }
 0x1d0   : > { %v11110_v40 = vpack.c.bf16 %v8368_v5, %v8367_v27  ;;  %v8388_v5 = vld [vmem:[%s16506_s1 + $0x738] sm:$0xff] }
 0x1d1   : > { %9872 = vmatmul.mubr.f32.gmra.mrb[30].mxu0 %v2664_v34  ;;  %v8386_v34 = vld [vmem:[%s16506_s1 + $0x728] sm:$0xff] }
 0x1d2   : > { %v14166_v15 = vpop.permute.xlu1 %2989  ;;  %v14168_v57 = vpop.permute.xlu0 %2984  ;;  %9906 = vmatprep.mubr.f32.mxu0 %v3132_v48  ;;  %v8369_v48 = vld [vmem:[%s16507_s2 + $0x320] sm:$0xff] }
 0x1d3   : > { %17153 = vst [vmem:[#allocation184_spill] sm:$0xff] %v14166_v15  ;;  %17154 = vst [vmem:[#allocation185_spill] sm:$0xff] %v14168_v57  ;;  %v3134_v35 = vmul.f32 %v14168_v57, %v13224_v17  ;;  %3987 = vperm.xlu1 %12012, %v8384_v28   ;;  %3982 = vperm.xlu0 %12011, %v8383_v49   ;;  %v8370_v57 = vld [vmem:[%s16507_s2 + $0x328] sm:$0xff]  ;;  %v3135_v26 = vmul.f32 %v14166_v15, %v13247_v31 }
 0x1d5   : > { %9907 = vmatmul.mubr.f32.vlgmr.msra.gmra.mrb[0].mxu0 %v3133_v14  ;;  %v11114_v14 = vpack.c.bf16 %v8370_v57, %v8369_v48  ;;  %v8390_v57 = vld [vmem:[%s16506_s1 + $0x748] sm:$0xff]  ;;  %v8389_v48 = vld [vmem:[%s16506_s1 + $0x740] sm:$0xff] }
 0x1d6   : > { %11109 = vmatpush3.bf16.msra.mxu0 %v14045_v29  ;;  %v14187_v28 = vpop.permute.xlu1 %2999  ;;  %v14189_v49 = vpop.permute.xlu0 %2994  ;;  %9909 = vmatprep.mubr.f32.mxu0 %v3134_v35  ;;  %v8387_v29 = vld [vmem:[%s16506_s1 + $0x730] sm:$0xff] }
 0x1d7   : > { %17155 = vst [vmem:[#allocation186_spill] sm:$0xff] %v14187_v28  ;;  %17156 = vst [vmem:[#allocation187_spill] sm:$0xff] %v14189_v49  ;;  %v3136_v27 = vmul.f32 %v14189_v49, %v13253_v10  ;;  %3997 = vperm.xlu1 %12012, %v8386_v34   ;;  %3992 = vperm.xlu0 %12011, %v8385_v39   ;;  %v8371_v35 = vld [vmem:[%s16507_s2 + $0x330] sm:$0xff]  ;;  %v8372_v34 = vld [vmem:[%s16507_s2 + $0x338] sm:$0xff]  ;;  %v3137_v15 = vmul.f32 %v14187_v28, %v13278_v32 }
 0x1d8   : > { %11111 = vmatprep.subr.bf16.mxu0 %v11110_v40  ;;  %v11118_v52 = vpack.c.bf16 %v8372_v34, %v8371_v35  ;;  %v8392_v35 = vld [vmem:[%s16506_s1 + $0x758] sm:$0xff]  ;;  %v8391_v34 = vld [vmem:[%s16506_s1 + $0x750] sm:$0xff] }
 0x1d9   : > { %9910 = vmatmul.mubr.f32.gmra.mrb[2].mxu0 %v3135_v26 }
 0x1da   : > { %v14207_v39 = vpop.permute.xlu1 %3009  ;;  %v14209_v49 = vpop.permute.xlu0 %3004  ;;  %9912 = vmatprep.mubr.f32.mxu0 %v3136_v27  ;;  %11113 = vmatpush3.bf16.msra.mxu0 %v11110_v40  ;;  %v8373_v40 = vld [vmem:[%s16507_s2 + $0x340] sm:$0xff]  ;;  %v8374_v27 = vld [vmem:[%s16507_s2 + $0x348] sm:$0xff] }
 0x1db   : > { %17157 = vst [vmem:[#allocation188_spill] sm:$0xff] %v14207_v39  ;;  %17158 = vst [vmem:[#allocation189_spill] sm:$0xff] %v14209_v49  ;;  %v3138_v26 = vmul.f32 %v14209_v49, %v13281_v1  ;;  %4007 = vperm.xlu1 %12012, %v8388_v5   ;;  %4002 = vperm.xlu0 %12011, %v8387_v29   ;;  %v3139_v49 = vmul.f32 %v14207_v39, %v13303_v3 }
 0x1dc   : > { %11115 = vmatprep.subr.bf16.mxu0 %v11114_v14  ;;  %v11122_v28 = vpack.c.bf16 %v8374_v27, %v8373_v40  ;;  %v8394_v40 = vld [vmem:[%s16506_s1 + $0x768] sm:$0xff]  ;;  %v8393_v27 = vld [vmem:[%s16506_s1 + $0x760] sm:$0xff] }
 0x1dd   : > { %9913 = vmatmul.mubr.f32.gmra.mrb[4].mxu0 %v3137_v15 }
 0x1de   : > { %v14227_v5 = vpop.permute.xlu1 %3019  ;;  %v14229_v29 = vpop.permute.xlu0 %3014  ;;  %9915 = vmatprep.mubr.f32.mxu0 %v3138_v26  ;;  %11117 = vmatpush3.bf16.msra.mxu0 %v11114_v14  ;;  %v8375_v14 = vld [vmem:[%s16507_s2 + $0x350] sm:$0xff]  ;;  %v8376_v26 = vld [vmem:[%s16507_s2 + $0x358] sm:$0xff] }
 0x1df   : > { %17159 = vst [vmem:[#allocation190_spill] sm:$0xff] %v14227_v5  ;;  %17160 = vst [vmem:[#allocation191_spill] sm:$0xff] %v14229_v29  ;;  %v3140_v15 = vmul.f32 %v14229_v29, %v13309_v16  ;;  %4017 = vperm.xlu1 %12012, %v8390_v57   ;;  %4012 = vperm.xlu0 %12011, %v8389_v48   ;;  %v3141_v29 = vmul.f32 %v14227_v5, %v13334_v23 }
 0x1e0   : > { %11119 = vmatprep.subr.bf16.mxu0 %v11118_v52  ;;  %v11126_v39 = vpack.c.bf16 %v8376_v26, %v8375_v14  ;;  %v8396_v14 = vld [vmem:[%s16506_s1 + $0x778] sm:$0xff]  ;;  %v8395_v26 = vld [vmem:[%s16506_s1 + $0x770] sm:$0xff] }
 0x1e1   : > { %9916 = vmatmul.mubr.f32.gmra.mrb[6].mxu0 %v3139_v49 }
 0x1e2   : > { %v14247_v57 = vpop.permute.xlu1 %3029  ;;  %v14249_v48 = vpop.permute.xlu0 %3024  ;;  %9918 = vmatprep.mubr.f32.mxu0 %v3140_v15  ;;  %11121 = vmatpush3.bf16.msra.mxu0 %v11118_v52  ;;  %v8377_v52 = vld [vmem:[%s16507_s2 + $0x360] sm:$0xff]  ;;  %v8378_v15 = vld [vmem:[%s16507_s2 + $0x368] sm:$0xff] }
 0x1e3   : > { %17161 = vst [vmem:[#allocation192_spill] sm:$0xff] %v14247_v57  ;;  %17162 = vst [vmem:[#allocation193_spill] sm:$0xff] %v14249_v48  ;;  %v3142_v49 = vmul.f32 %v14249_v48, %v13337_v55  ;;  %4027 = vperm.xlu1 %12012, %v8392_v35   ;;  %4022 = vperm.xlu0 %12011, %v8391_v34   ;;  %v3143_v48 = vmul.f32 %v14247_v57, %v13359_v25 }
 0x1e4   : > { %11123 = vmatprep.subr.bf16.mxu0 %v11122_v28  ;;  %v11130_v5 = vpack.c.bf16 %v8378_v15, %v8377_v52  ;;  %v8398_v52 = vld [vmem:[%s16506_s1 + $0x788] sm:$0xff]  ;;  %v8397_v15 = vld [vmem:[%s16506_s1 + $0x780] sm:$0xff] }
 0x1e5   : > { %9919 = vmatmul.mubr.f32.gmra.mrb[8].mxu0 %v3141_v29 }
 0x1e6   : > { %v14267_v35 = vpop.permute.xlu1 %3039  ;;  %v14269_v34 = vpop.permute.xlu0 %3034  ;;  %9921 = vmatprep.mubr.f32.mxu0 %v3142_v49  ;;  %11125 = vmatpush3.bf16.msra.mxu0 %v11122_v28  ;;  %v8379_v28 = vld [vmem:[%s16507_s2 + $0x370] sm:$0xff]  ;;  %v8380_v49 = vld [vmem:[%s16507_s2 + $0x378] sm:$0xff] }
 0x1e7   : > { %17163 = vst [vmem:[#allocation194_spill] sm:$0xff] %v14267_v35  ;;  %17164 = vst [vmem:[#allocation195_spill] sm:$0xff] %v14269_v34  ;;  %v3144_v29 = vmul.f32 %v14269_v34, %v13365_v61  ;;  %4037 = vperm.xlu1 %12012, %v8394_v40   ;;  %4032 = vperm.xlu0 %12011, %v8393_v27   ;;  %v3145_v34 = vmul.f32 %v14267_v35, %v13390_v58 }
 0x1e8   : > { %11127 = vmatprep.subr.bf16.mxu0 %v11126_v39  ;;  %v11134_v57 = vpack.c.bf16 %v8380_v49, %v8379_v28  ;;  %v8400_v28 = vld [vmem:[%s16506_s1 + $0x798] sm:$0xff]  ;;  %v8399_v49 = vld [vmem:[%s16506_s1 + $0x790] sm:$0xff] }
 0x1e9   : > { %9922 = vmatmul.mubr.f32.gmra.mrb[10].mxu0 %v3143_v48 }
 0x1ea   : > { %v14287_v40 = vpop.permute.xlu1 %3049  ;;  %v14289_v27 = vpop.permute.xlu0 %3044  ;;  %9924 = vmatprep.mubr.f32.mxu0 %v3144_v29  ;;  %11129 = vmatpush3.bf16.msra.mxu0 %v11126_v39  ;;  %v8413_v39 = vld [vmem:[%s16507_s2 + $0x380] sm:$0xff]  ;;  %v8414_v29 = vld [vmem:[%s16507_s2 + $0x388] sm:$0xff] }
 0x1eb   : > { %17165 = vst [vmem:[#allocation196_spill] sm:$0xff] %v14287_v40  ;;  %17166 = vst [vmem:[#allocation197_spill] sm:$0xff] %v14289_v27  ;;  %v3146_v48 = vmul.f32 %v14289_v27, %v13393_v12  ;;  %4047 = vperm.xlu1 %12012, %v8396_v14   ;;  %4042 = vperm.xlu0 %12011, %v8395_v26   ;;  %v3147_v27 = vmul.f32 %v14287_v40, %v13415_v60 }
 0x1ec   : > { %11131 = vmatprep.subr.bf16.mxu0 %v11130_v5  ;;  %v14321_v35 = vpack.c.bf16 %v8414_v29, %v8413_v39  ;;  %v8402_v39 = vld [vmem:[%s16506_s1 + $0x7a8] sm:$0xff] }
 0x1ed   : > { %9925 = vmatmul.mubr.f32.gmra.mrb[12].mxu0 %v3145_v34 }
 0x1ee   : > { %v14307_v14 = vpop.permute.xlu1 %3059  ;;  %v14309_v26 = vpop.permute.xlu0 %3054  ;;  %9927 = vmatprep.mubr.f32.mxu0 %v3146_v48  ;;  %11133 = vmatpush3.bf16.msra.mxu0 %v11130_v5 }
 0x1ef   : > { %17167 = vst [vmem:[#allocation198_spill] sm:$0xff] %v14307_v14  ;;  %17168 = vst [vmem:[#allocation199_spill] sm:$0xff] %v14309_v26  ;;  %v3148_v34 = vmul.f32 %v14309_v26, %v13421_v56  ;;  %4057 = vperm.xlu1 %12012, %v8398_v52   ;;  %4052 = vperm.xlu0 %12011, %v8397_v15   ;;  %v3149_v52 = vmul.f32 %v14307_v14, %v13441_v47 }
 0x1f0   : > { %11135 = vmatprep.subr.bf16.mxu0 %v11134_v57 }
 0x1f1   : > { %9928 = vmatmul.mubr.f32.gmra.mrb[14].mxu0 %v3147_v27  ;;  %v8401_v27 = vld [vmem:[%s16506_s1 + $0x7a0] sm:$0xff] }
 0x1f2   : > { %v14323_v5 = vpop.permute.xlu1 %3069  ;;  %v14325_v48 = vpop.permute.xlu0 %3064  ;;  %9930 = vmatprep.mubr.f32.mxu0 %v3148_v34  ;;  %11137 = vmatpush3.bf16.msra.mxu0 %v11134_v57 }
 0x1f3   : > { %17169 = vst [vmem:[#allocation200_spill] sm:$0xff] %v14323_v5  ;;  %17170 = vst [vmem:[#allocation201_spill] sm:$0xff] %v14325_v48  ;;  %v3150_v15 = vmul.f32 %v14325_v48, %v13445_v45  ;;  %4067 = vperm.xlu1 %12012, %v8400_v28   ;;  %4062 = vperm.xlu0 %12011, %v8399_v49   ;;  %v3151_v34 = vmul.f32 %v14323_v5, %v13464_v44  ;;  %v8404_v49 = vld [vmem:[%s16506_s1 + $0x7b8] sm:$0xff]  ;;  %v17175_v5 = vld [vmem:[#allocation108_spill] sm:$0xff] }
 0x1f4   : > { %11139 = vmatprep.subr.bf16.mxu0 %v14321_v35 }
 0x1f5   : > { %9931 = vmatmul.mubr.f32.gmra.mrb[16].mxu0 %v3149_v52  ;;  %v8403_v52 = vld [vmem:[%s16506_s1 + $0x7b0] sm:$0xff] }
 0x1f6   : > { %v14338_v57 = vpop.permute.xlu1 %3079  ;;  %v14340_v29 = vpop.permute.xlu0 %3074  ;;  %9933 = vmatprep.mubr.f32.mxu0 %v3150_v15 }
 0x1f7   : > { %17171 = vst [vmem:[#allocation202_spill] sm:$0xff] %v14338_v57  ;;  %17172 = vst [vmem:[#allocation203_spill] sm:$0xff] %v14340_v29  ;;  %v3152_v28 = vmul.f32 %v14340_v29, %v13468_v6  ;;  %4077 = vperm.xlu1 %12012, %v8402_v39   ;;  %4072 = vperm.xlu0 %12011, %v8401_v27   ;;  %v3153_v14 = vmul.f32 %v14338_v57, %v17175_v5  ;;  %v17176_v29 = vld [vmem:[#allocation109_spill] sm:$0xff]  ;;  %v8406_v27 = vld [vmem:[%s16506_s1 + $0x7c8] sm:$0xff] }
 0x1f8   : > { %v17179_v57 = vld [vmem:[#allocation112_spill] sm:$0xff] }
 0x1f9   : > { %9934 = vmatmul.mubr.f32.gmra.mrb[18].mxu0 %v3151_v34  ;;  %v8405_v34 = vld [vmem:[%s16506_s1 + $0x7c0] sm:$0xff] }
 0x1fa   : > { %v14352_v48 = vpop.permute.xlu1 %3089  ;;  %v14354_v15 = vpop.permute.xlu0 %3084  ;;  %9936 = vmatprep.mubr.f32.mxu0 %v3152_v28 }
 0x1fb   : > { %17173 = vst [vmem:[#allocation204_spill] sm:$0xff] %v14352_v48  ;;  %17174 = vst [vmem:[#allocation205_spill] sm:$0xff] %v14354_v15  ;;  %v3154_v39 = vmul.f32 %v14354_v15, %v17176_v29  ;;  %4087 = vperm.xlu1 %12012, %v8404_v49   ;;  %4082 = vperm.xlu0 %12011, %v8403_v52   ;;  %v3155_v40 = vmul.f32 %v14352_v48, %v17179_v57  ;;  %v17180_v15 = vld [vmem:[#allocation113_spill] sm:$0xff] }
 0x1fc   : > { %v8408_v52 = vld [vmem:[%s16506_s1 + $0x7d8] sm:$0xff] }
 0x1fd   : > { %9937 = vmatmul.mubr.f32.gmra.mrb[20].mxu0 %v3153_v14  ;;  %v8407_v14 = vld [vmem:[%s16506_s1 + $0x7d0] sm:$0xff] }
 0x1fe   : > { %v14366_v26 = vpop.permute.xlu1 %3099  ;;  %v14368_v28 = vpop.permute.xlu0 %3094  ;;  %9939 = vmatprep.mubr.f32.mxu0 %v3154_v39 }
 0x1ff   : > { %17177 = vst [vmem:[#allocation108_spill] sm:$0xff] %v14366_v26  ;;  %17178 = vst [vmem:[#allocation109_spill] sm:$0xff] %v14368_v28  ;;  %v3156_v49 = vmul.f32 %v14368_v28, %v17180_v15  ;;  %4097 = vperm.xlu1 %12012, %v8406_v27   ;;  %4092 = vperm.xlu0 %12011, %v8405_v34   ;;  %v3157_v48 = vmul.f32 %v14366_v26, %v13536_v13  ;;  %v8410_v34 = vld [vmem:[%s16506_s1 + $0x7e8] sm:$0xff]  ;;  %v17185_v26 = vld [vmem:[#allocation118_spill] sm:$0xff] }
 0x201   : > { %9940 = vmatmul.mubr.f32.gmra.mrb[22].mxu0 %v3155_v40  ;;  %v8409_v40 = vld [vmem:[%s16506_s1 + $0x7e0] sm:$0xff] }
 0x202   : > { %v14380_v22 = vpop.permute.xlu1 %3109  ;;  %v14382_v39 = vpop.permute.xlu0 %3104  ;;  %9942 = vmatprep.mubr.f32.mxu0 %v3156_v49 }
 0x203   : > { %17181 = vst [vmem:[#allocation112_spill] sm:$0xff] %v14380_v22  ;;  %17182 = vst [vmem:[#allocation113_spill] sm:$0xff] %v14382_v39  ;;  %v3158_v27 = vmul.f32 %v14382_v39, %v13543_v2  ;;  %4107 = vperm.xlu1 %12012, %v8408_v52   ;;  %4102 = vperm.xlu0 %12011, %v8407_v14   ;;  %v3159_v11 = vmul.f32 %v14380_v22, %v17185_v26  ;;  %v8412_v14 = vld [vmem:[%s16506_s1 + $0x7f8] sm:$0xff] }
 0x205   : > { %9943 = vmatmul.mubr.f32.gmra.mrb[24].mxu0 %v3157_v48  ;;  %v8411_v48 = vld [vmem:[%s16506_s1 + $0x7f0] sm:$0xff] }
 0x206   : > { %v14394_v28 = vpop.permute.xlu1 %3119  ;;  %v14396_v49 = vpop.permute.xlu0 %3114  ;;  %9945 = vmatprep.mubr.f32.mxu0 %v3158_v27 }
 0x207   : > { %17183 = vst [vmem:[#allocation206_spill] sm:$0xff] %v14394_v28  ;;  %17184 = vst [vmem:[#allocation207_spill] sm:$0xff] %v14396_v49  ;;  %v3160_v52 = vmul.f32 %v14396_v49, %v13567_v53  ;;  %4117 = vperm.xlu1 %12012, %v8410_v34   ;;  %4112 = vperm.xlu0 %12011, %v8409_v40   ;;  %v3161_v22 = vmul.f32 %v14394_v28, %v13586_v21  ;;  %v17188_v49 = vld [vmem:[#allocation82_spill] sm:$0xff]  ;;  %v8430_v40 = vld [vmem:[%s16506_s1 + $0x808] sm:$0xff] }
 0x208   : > { %v17191_v28 = vld [vmem:[#allocation85_spill] sm:$0xff] }
 0x209   : > { %9946 = vmatmul.mubr.f32.gmra.mrb[26].mxu0 %v3159_v11  ;;  %v8429_v11 = vld [vmem:[%s16506_s1 + $0x800] sm:$0xff] }
 0x20a   : > { %v14408_v39 = vpop.permute.xlu1 %3129  ;;  %v14410_v27 = vpop.permute.xlu0 %3124  ;;  %9948 = vmatprep.mubr.f32.mxu0 %v3160_v52 }
 0x20b   : > { %17186 = vst [vmem:[#allocation118_spill] sm:$0xff] %v14408_v39  ;;  %17187 = vst [vmem:[#allocation208_spill] sm:$0xff] %v14410_v27  ;;  %v3162_v34 = vmul.f32 %v14410_v27, %v17188_v49  ;;  %4127 = vperm.xlu1 %12012, %v8412_v14   ;;  %4122 = vperm.xlu0 %12011, %v8411_v48   ;;  %v3163_v33 = vmul.f32 %v14408_v39, %v17191_v28  ;;  %v8432_v48 = vld [vmem:[%s16506_s1 + $0x818] sm:$0xff]  ;;  %v8433_v27 = vld [vmem:[%s16506_s1 + $0x820] sm:$0xff] }
 0x20c   : > { %v8416_v39 = vld [vmem:[%s16507_s2 + $0x398] sm:$0xff] }
 0x20d   : > { %9949 = vmatmul.mubr.f32.gmra.mrb[28].mxu0 %v3161_v22  ;;  %v8431_v22 = vld [vmem:[%s16506_s1 + $0x810] sm:$0xff] }
 0x20e   : > { %v14422_v8 = vpop.permute.xlu1 %3478  ;;  %v14424_v52 = vpop.permute.xlu0 %3473  ;;  %9951 = vmatprep.mubr.f32.mxu0 %v3162_v34  ;;  %v8415_v34 = vld [vmem:[%s16507_s2 + $0x390] sm:$0xff] }
 0x20f   : > { %17189 = vst [vmem:[#allocation82_spill] sm:$0xff] %v14422_v8  ;;  %17190 = vst [vmem:[#allocation209_spill] sm:$0xff] %v14424_v52  ;;  %v3631_v14 = vmul.f32 %v14424_v52, %v12816_v37  ;;  %4476 = vperm.xlu1 %12012, %v8430_v40   ;;  %4471 = vperm.xlu0 %12011, %v8429_v11   ;;  %v3632_v11 = vmul.f32 %v14422_v8, %v12839_v54  ;;  %v8418_v54 = vld [vmem:[%s16507_s2 + $0x3a8] sm:$0xff] }
 0x210   : > { %v11142_v9 = vpack.c.bf16 %v8416_v39, %v8415_v34  ;;  %v8436_v34 = vld [vmem:[%s16506_s1 + $0x838] sm:$0xff] }
 0x211   : > { %9952 = vmatmul.mubr.f32.gmra.mrb[30].mxu0 %v3163_v33  ;;  %v8434_v33 = vld [vmem:[%s16506_s1 + $0x828] sm:$0xff] }
 0x212   : > { %v14442_v37 = vpop.permute.xlu1 %3488  ;;  %v14444_v40 = vpop.permute.xlu0 %3483  ;;  %9986 = vmatprep.mubr.f32.mxu0 %v3631_v14  ;;  %v8417_v14 = vld [vmem:[%s16507_s2 + $0x3a0] sm:$0xff] }
 0x213   : > { %17192 = vst [vmem:[#allocation85_spill] sm:$0xff] %v14442_v37  ;;  %17193 = vst [vmem:[#allocation210_spill] sm:$0xff] %v14444_v40  ;;  %v3633_v52 = vmul.f32 %v14444_v40, %v12845_v18  ;;  %4486 = vperm.xlu1 %12012, %v8432_v48   ;;  %4481 = vperm.xlu0 %12011, %v8431_v22   ;;  %v3634_v22 = vmul.f32 %v14442_v37, %v12870_v7  ;;  %v8419_v7 = vld [vmem:[%s16507_s2 + $0x3b0] sm:$0xff] }
 0x215   : > { %9987 = vmatmul.mubr.f32.vlgmr.msra.gmra.mrb[0].mxu0 %v3632_v11  ;;  %v11146_v11 = vpack.c.bf16 %v8418_v54, %v8417_v14  ;;  %v8438_v54 = vld [vmem:[%s16506_s1 + $0x848] sm:$0xff] }
 0x216   : > { %11141 = vmatpush3.bf16.msra.mxu0 %v14321_v35  ;;  %v14463_v18 = vpop.permute.xlu1 %3498  ;;  %v14465_v48 = vpop.permute.xlu0 %3493  ;;  %9989 = vmatprep.mubr.f32.mxu0 %v3633_v52  ;;  %v8435_v35 = vld [vmem:[%s16506_s1 + $0x830] sm:$0xff] }
 0x217   : > { %17194 = vst [vmem:[#allocation211_spill] sm:$0xff] %v14463_v18  ;;  %17195 = vst [vmem:[#allocation212_spill] sm:$0xff] %v14465_v48  ;;  %v3635_v39 = vmul.f32 %v14465_v48, %v12873_v62  ;;  %4496 = vperm.xlu1 %12012, %v8434_v33   ;;  %4491 = vperm.xlu0 %12011, %v8433_v27   ;;  %v8420_v62 = vld [vmem:[%s16507_s2 + $0x3b8] sm:$0xff]  ;;  %v3636_v33 = vmul.f32 %v14463_v18, %v12895_v0  ;;  %v8421_v0 = vld [vmem:[%s16507_s2 + $0x3c0] sm:$0xff] }
 0x218   : > { %11143 = vmatprep.subr.bf16.mxu0 %v11142_v9  ;;  %v11150_v48 = vpack.c.bf16 %v8420_v62, %v8419_v7  ;;  %v8440_v7 = vld [vmem:[%s16506_s1 + $0x858] sm:$0xff]  ;;  %v8439_v62 = vld [vmem:[%s16506_s1 + $0x850] sm:$0xff] }
 0x219   : > { %9990 = vmatmul.mubr.f32.gmra.mrb[2].mxu0 %v3634_v22  ;;  %v8437_v22 = vld [vmem:[%s16506_s1 + $0x840] sm:$0xff] }
 0x21a   : > { %v14483_v27 = vpop.permute.xlu1 %3508  ;;  %v14485_v52 = vpop.permute.xlu0 %3503  ;;  %9992 = vmatprep.mubr.f32.mxu0 %v3635_v39  ;;  %11145 = vmatpush3.bf16.msra.mxu0 %v11142_v9 }
 0x21b   : > { %17196 = vst [vmem:[#allocation213_spill] sm:$0xff] %v14483_v27  ;;  %17197 = vst [vmem:[#allocation214_spill] sm:$0xff] %v14485_v52  ;;  %v3637_v14 = vmul.f32 %v14485_v52, %v12901_v51  ;;  %4506 = vperm.xlu1 %12012, %v8436_v34   ;;  %4501 = vperm.xlu0 %12011, %v8435_v35   ;;  %v8422_v51 = vld [vmem:[%s16507_s2 + $0x3c8] sm:$0xff]  ;;  %v3638_v34 = vmul.f32 %v14483_v27, %v12926_v19  ;;  %v8423_v19 = vld [vmem:[%s16507_s2 + $0x3d0] sm:$0xff] }
 0x21c   : > { %11147 = vmatprep.subr.bf16.mxu0 %v11146_v11  ;;  %v17326_v52 = vld [vmem:[#allocation11_spill] sm:$0xff] }
 0x21d   : > { %9993 = vmatmul.mubr.f32.gmra.mrb[4].mxu0 %v3636_v33  ;;  %v11154_v33 = vpack.c.bf16 %v8422_v51, %v8421_v0  ;;  %v8442_v51 = vld [vmem:[%s16506_s1 + $0x868] sm:$0xff] }
 0x21e   : > { %v14503_v9 = vpop.permute.xlu1 %3518  ;;  %v14505_v39 = vpop.permute.xlu0 %3513  ;;  %9995 = vmatprep.mubr.f32.mxu0 %v3637_v14  ;;  %11149 = vmatpush3.bf16.msra.mxu0 %v11146_v11 }
 0x21f   : > { %17198 = vst [vmem:[#allocation215_spill] sm:$0xff] %v14503_v9  ;;  %17199 = vst [vmem:[#allocation216_spill] sm:$0xff] %v14505_v39  ;;  %v3639_v35 = vmul.f32 %v14505_v39, %v12929_v41  ;;  %4516 = vperm.xlu1 %12012, %v8438_v54   ;;  %4511 = vperm.xlu0 %12011, %v8437_v22   ;;  %v8424_v41 = vld [vmem:[%s16507_s2 + $0x3d8] sm:$0xff]  ;;  %v3640_v54 = vmul.f32 %v14503_v9, %v12951_v59  ;;  %v17202_v22 = vld [vmem:[#allocation52_spill] sm:$0xff] }
 0x220   : > { %11151 = vmatprep.subr.bf16.mxu0 %v11150_v48  ;;  %v11158_v39 = vpack.c.bf16 %v8424_v41, %v8423_v19  ;;  %v8425_v59 = vld [vmem:[%s16507_s2 + $0x3e0] sm:$0xff]  ;;  %v8444_v41 = vld [vmem:[%s16506_s1 + $0x878] sm:$0xff] }
 0x221   : > { %9996 = vmatmul.mubr.f32.gmra.mrb[6].mxu0 %v3638_v34  ;;  %v8441_v34 = vld [vmem:[%s16506_s1 + $0x860] sm:$0xff] }
 0x222   : > { %v14523_v11 = vpop.permute.xlu1 %3528  ;;  %v14525_v14 = vpop.permute.xlu0 %3523  ;;  %9998 = vmatprep.mubr.f32.mxu0 %v3639_v35  ;;  %11153 = vmatpush3.bf16.msra.mxu0 %v11150_v48  ;;  %v8426_v48 = vld [vmem:[%s16507_s2 + $0x3e8] sm:$0xff] }
 0x223   : > { %17200 = vst [vmem:[#allocation217_spill] sm:$0xff] %v14523_v11  ;;  %17201 = vst [vmem:[#allocation218_spill] sm:$0xff] %v14525_v14  ;;  %v3641_v0 = vmul.f32 %v14525_v14, %v17202_v22  ;;  %4526 = vperm.xlu1 %12012, %v8440_v7   ;;  %4521 = vperm.xlu0 %12011, %v8439_v62   ;;  %v3642_v62 = vmul.f32 %v14523_v11, %v12982_v50  ;;  %v8427_v50 = vld [vmem:[%s16507_s2 + $0x3f0] sm:$0xff] }
 0x224   : > { %11155 = vmatprep.subr.bf16.mxu0 %v11154_v33  ;;  %v11162_v22 = vpack.c.bf16 %v8426_v48, %v8425_v59  ;;  %v8446_v59 = vld [vmem:[%s16506_s1 + $0x888] sm:$0xff]  ;;  %v8445_v48 = vld [vmem:[%s16506_s1 + $0x880] sm:$0xff] }
 0x225   : > { %9999 = vmatmul.mubr.f32.gmra.mrb[8].mxu0 %v3640_v54  ;;  %v8443_v54 = vld [vmem:[%s16506_s1 + $0x870] sm:$0xff] }
 0x226   : > { %v14543_v35 = vpop.permute.xlu1 %3538  ;;  %v14545_v7 = vpop.permute.xlu0 %3533  ;;  %10001 = vmatprep.mubr.f32.mxu0 %v3641_v0  ;;  %11157 = vmatpush3.bf16.msra.mxu0 %v11154_v33 }
 0x227   : > { %17203 = vst [vmem:[#allocation52_spill] sm:$0xff] %v14543_v35  ;;  %17204 = vst [vmem:[#allocation219_spill] sm:$0xff] %v14545_v7  ;;  %v3643_v19 = vmul.f32 %v14545_v7, %v17093_v4  ;;  %4536 = vperm.xlu1 %12012, %v8442_v51   ;;  %4531 = vperm.xlu0 %12011, %v8441_v34   ;;  %v8428_v4 = vld [vmem:[%s16507_s2 + $0x3f8] sm:$0xff]  ;;  %v3644_v51 = vmul.f32 %v14543_v35, %v13007_v38  ;;  %v8461_v38 = vld [vmem:[%s16507_s2 + $0x400] sm:$0xff] }
 0x228   : > { %11159 = vmatprep.subr.bf16.mxu0 %v11158_v39  ;;  %v17312_v35 = vld [vmem:[#allocation2_spill] sm:$0xff] }
 0x229   : > { %10002 = vmatmul.mubr.f32.gmra.mrb[10].mxu0 %v3642_v62  ;;  %v11166_v62 = vpack.c.bf16 %v8428_v4, %v8427_v50  ;;  %v8448_v4 = vld [vmem:[%s16506_s1 + $0x898] sm:$0xff] }
 0x22a   : > { %v14563_v33 = vpop.permute.xlu1 %3548  ;;  %v14565_v0 = vpop.permute.xlu0 %3543  ;;  %10004 = vmatprep.mubr.f32.mxu0 %v3643_v19  ;;  %11161 = vmatpush3.bf16.msra.mxu0 %v11158_v39 }
 0x22b   : > { %17205 = vst [vmem:[#allocation220_spill] sm:$0xff] %v14563_v33  ;;  %17206 = vst [vmem:[#allocation221_spill] sm:$0xff] %v14565_v0  ;;  %v3645_v34 = vmul.f32 %v14565_v0, %v13013_v42  ;;  %4546 = vperm.xlu1 %12012, %v8444_v41   ;;  %4541 = vperm.xlu0 %12011, %v8443_v54   ;;  %v8462_v42 = vld [vmem:[%s16507_s2 + $0x408] sm:$0xff]  ;;  %v3646_v41 = vmul.f32 %v14563_v33, %v17098_v36  ;;  %v17209_v54 = vld [vmem:[#allocation61_spill] sm:$0xff] }
 0x22c   : > { %11163 = vmatprep.subr.bf16.mxu0 %v11162_v22  ;;  %v14597_v0 = vpack.c.bf16 %v8462_v42, %v8461_v38  ;;  %v8450_v38 = vld [vmem:[%s16506_s1 + $0x8a8] sm:$0xff]  ;;  %v8449_v42 = vld [vmem:[%s16506_s1 + $0x8a0] sm:$0xff] }
 0x22d   : > { %10005 = vmatmul.mubr.f32.gmra.mrb[12].mxu0 %v3644_v51  ;;  %v8447_v51 = vld [vmem:[%s16506_s1 + $0x890] sm:$0xff] }
 0x22e   : > { %v14583_v39 = vpop.permute.xlu1 %3558  ;;  %v14585_v19 = vpop.permute.xlu0 %3553  ;;  %10007 = vmatprep.mubr.f32.mxu0 %v3645_v34  ;;  %11165 = vmatpush3.bf16.msra.mxu0 %v11162_v22 }
 0x22f   : > { %17207 = vst [vmem:[#allocation222_spill] sm:$0xff] %v14583_v39  ;;  %17208 = vst [vmem:[#allocation223_spill] sm:$0xff] %v14585_v19  ;;  %v3647_v50 = vmul.f32 %v14585_v19, %v17209_v54  ;;  %4556 = vperm.xlu1 %12012, %v8446_v59   ;;  %4551 = vperm.xlu0 %12011, %v8445_v48   ;;  %v3648_v34 = vmul.f32 %v14583_v39, %v17102_v30  ;;  %v17212_v59 = vld [vmem:[#allocation65_spill] sm:$0xff]  ;;  %v17215_v54 = vld [vmem:[#allocation68_spill] sm:$0xff] }
 0x230   : > { %11167 = vmatprep.subr.bf16.mxu0 %v11166_v62  ;;  %v17309_v39 = vld [vmem:[#allocation3_spill] sm:$0xff] }
 0x231   : > { %10008 = vmatmul.mubr.f32.gmra.mrb[14].mxu0 %v3646_v41 }
 0x232   : > { %v14599_v22 = vpop.permute.xlu1 %3568  ;;  %v14601_v36 = vpop.permute.xlu0 %3563  ;;  %10010 = vmatprep.mubr.f32.mxu0 %v3647_v50  ;;  %11169 = vmatpush3.bf16.msra.mxu0 %v11166_v62 }
 0x233   : > { %17210 = vst [vmem:[#allocation61_spill] sm:$0xff] %v14599_v22  ;;  %17211 = vst [vmem:[#allocation224_spill] sm:$0xff] %v14601_v36  ;;  %v3649_v48 = vmul.f32 %v14601_v36, %v17212_v59  ;;  %4566 = vperm.xlu1 %12012, %v8448_v4   ;;  %4561 = vperm.xlu0 %12011, %v8447_v51   ;;  %v3650_v30 = vmul.f32 %v14599_v22, %v13078_v46  ;;  %v8452_v4 = vld [vmem:[%s16506_s1 + $0x8b8] sm:$0xff]  ;;  %v8451_v51 = vld [vmem:[%s16506_s1 + $0x8b0] sm:$0xff] }
 0x234   : > { %11171 = vmatprep.subr.bf16.mxu0 %v14597_v0 }
 0x235   : > { %10011 = vmatmul.mubr.f32.gmra.mrb[16].mxu0 %v3648_v34 }
 0x236   : > { %v14614_v62 = vpop.permute.xlu1 %3578  ;;  %v14616_v41 = vpop.permute.xlu0 %3573  ;;  %10013 = vmatprep.mubr.f32.mxu0 %v3649_v48  ;;  %v17218_v48 = vld [vmem:[#allocation71_spill] sm:$0xff] }
 0x237   : > { %17213 = vst [vmem:[#allocation65_spill] sm:$0xff] %v14614_v62  ;;  %17214 = vst [vmem:[#allocation225_spill] sm:$0xff] %v14616_v41  ;;  %v3651_v50 = vmul.f32 %v14616_v41, %v17215_v54  ;;  %4576 = vperm.xlu1 %12012, %v8450_v38   ;;  %4571 = vperm.xlu0 %12011, %v8449_v42   ;;  %v3652_v46 = vmul.f32 %v14614_v62, %v13100_v20  ;;  %v8454_v42 = vld [vmem:[%s16506_s1 + $0x8c8] sm:$0xff] }
 0x239   : > { %10014 = vmatmul.mubr.f32.gmra.mrb[18].mxu0 %v3650_v30  ;;  %v8453_v30 = vld [vmem:[%s16506_s1 + $0x8c0] sm:$0xff] }
 0x23a   : > { %v14628_v34 = vpop.permute.xlu1 %3588  ;;  %v14630_v59 = vpop.permute.xlu0 %3583  ;;  %10016 = vmatprep.mubr.f32.mxu0 %v3651_v50 }
 0x23b   : > { %17216 = vst [vmem:[#allocation68_spill] sm:$0xff] %v14628_v34  ;;  %17217 = vst [vmem:[#allocation226_spill] sm:$0xff] %v14630_v59  ;;  %v3653_v38 = vmul.f32 %v14630_v59, %v17218_v48  ;;  %4586 = vperm.xlu1 %12012, %v8452_v4   ;;  %4581 = vperm.xlu0 %12011, %v8451_v51   ;;  %v3654_v20 = vmul.f32 %v14628_v34, %v13122_v24  ;;  %v17221_v48 = vld [vmem:[#allocation74_spill] sm:$0xff]  ;;  %v8456_v51 = vld [vmem:[%s16506_s1 + $0x8d8] sm:$0xff] }
 0x23c   : > { %v17224_v24 = vld [vmem:[#allocation77_spill] sm:$0xff] }
 0x23d   : > { %10017 = vmatmul.mubr.f32.gmra.mrb[20].mxu0 %v3652_v46  ;;  %v8455_v46 = vld [vmem:[%s16506_s1 + $0x8d0] sm:$0xff] }
 0x23e   : > { %v14642_v54 = vpop.permute.xlu1 %3598  ;;  %v14644_v50 = vpop.permute.xlu0 %3593  ;;  %10019 = vmatprep.mubr.f32.mxu0 %v3653_v38 }
 0x23f   : > { %17219 = vst [vmem:[#allocation71_spill] sm:$0xff] %v14642_v54  ;;  %17220 = vst [vmem:[#allocation227_spill] sm:$0xff] %v14644_v50  ;;  %v3655_v4 = vmul.f32 %v14644_v50, %v17221_v48  ;;  %4596 = vperm.xlu1 %12012, %v8454_v42   ;;  %4591 = vperm.xlu0 %12011, %v8453_v30   ;;  %v3656_v34 = vmul.f32 %v14642_v54, %v17224_v24  ;;  %v17225_v48 = vld [vmem:[#allocation78_spill] sm:$0xff]  ;;  %v8458_v30 = vld [vmem:[%s16506_s1 + $0x8e8] sm:$0xff] }
 0x240   : > { %v17228_v24 = vld [vmem:[#allocation81_spill] sm:$0xff] }
 0x241   : > { %10020 = vmatmul.mubr.f32.gmra.mrb[22].mxu0 %v3654_v20  ;;  %v8457_v20 = vld [vmem:[%s16506_s1 + $0x8e0] sm:$0xff] }
 0x242   : > { %v14656_v59 = vpop.permute.xlu1 %3608  ;;  %v14658_v38 = vpop.permute.xlu0 %3603  ;;  %10022 = vmatprep.mubr.f32.mxu0 %v3655_v4 }
 0x243   : > { %17222 = vst [vmem:[#allocation74_spill] sm:$0xff] %v14656_v59  ;;  %17223 = vst [vmem:[#allocation228_spill] sm:$0xff] %v14658_v38  ;;  %v3657_v42 = vmul.f32 %v14658_v38, %v17225_v48  ;;  %4606 = vperm.xlu1 %12012, %v8456_v51   ;;  %4601 = vperm.xlu0 %12011, %v8455_v46   ;;  %v3658_v54 = vmul.f32 %v14656_v59, %v17228_v24  ;;  %v17229_v48 = vld [vmem:[#allocation34_spill] sm:$0xff]  ;;  %v8460_v46 = vld [vmem:[%s16506_s1 + $0x8f8] sm:$0xff] }
 0x244   : > { %v17232_v24 = vld [vmem:[#allocation37_spill] sm:$0xff] }
 0x245   : > { %10023 = vmatmul.mubr.f32.gmra.mrb[24].mxu0 %v3656_v34  ;;  %v8459_v34 = vld [vmem:[%s16506_s1 + $0x8f0] sm:$0xff] }
 0x246   : > { %v14670_v50 = vpop.permute.xlu1 %3618  ;;  %v14672_v4 = vpop.permute.xlu0 %3613  ;;  %10025 = vmatprep.mubr.f32.mxu0 %v3657_v42 }
 0x247   : > { %17226 = vst [vmem:[#allocation77_spill] sm:$0xff] %v14670_v50  ;;  %17227 = vst [vmem:[#allocation78_spill] sm:$0xff] %v14672_v4  ;;  %v3659_v51 = vmul.f32 %v14672_v4, %v17229_v48  ;;  %4616 = vperm.xlu1 %12012, %v8458_v30   ;;  %4611 = vperm.xlu0 %12011, %v8457_v20   ;;  %v3660_v48 = vmul.f32 %v14670_v50, %v17232_v24  ;;  %v17233_v30 = vld [vmem:[#allocation38_spill] sm:$0xff]  ;;  %v8463_v24 = vld [vmem:[%s16507_s2 + $0x410] sm:$0xff] }
 0x248   : > { %v12060_v50 = vld [vmem:[%s12388_s12 + $0x88] sm:$0xff] }
 0x249   : > { %10026 = vmatmul.mubr.f32.gmra.mrb[26].mxu0 %v3658_v54  ;;  %v17236_v54 = vld [vmem:[#allocation41_spill] sm:$0xff] }
 0x24a   : > { %v14684_v38 = vpop.permute.xlu1 %3628  ;;  %v14686_v42 = vpop.permute.xlu0 %3623  ;;  %10028 = vmatprep.mubr.f32.mxu0 %v3659_v51  ;;  %v12045_v51 = vld [vmem:[%s12388_s12 + $0x10] sm:$0xff] }
 0x24b   : > { %17230 = vst [vmem:[#allocation81_spill] sm:$0xff] %v14684_v38  ;;  %17231 = vst [vmem:[#allocation34_spill] sm:$0xff] %v14686_v42  ;;  %v3661_v20 = vmul.f32 %v14686_v42, %v17233_v30  ;;  %4626 = vperm.xlu1 %12012, %v8460_v46   ;;  %4621 = vperm.xlu0 %12011, %v8459_v34   ;;  %v3662_v62 = vmul.f32 %v14684_v38, %v17236_v54  ;;  %v8464_v46 = vld [vmem:[%s16507_s2 + $0x418] sm:$0xff]  ;;  %v12047_v54 = vld [vmem:[%s12388_s12 + $0x20] sm:$0xff] }
 0x24c   : > { %v12046_v30 = vld [vmem:[%s12388_s12 + $0x18] sm:$0xff]  ;;  %v8465_v38 = vld [vmem:[%s16507_s2 + $0x420] sm:$0xff] }
 0x24d   : > { %10029 = vmatmul.mubr.f32.gmra.mrb[28].mxu0 %v3660_v48 }
 0x24e   : > { %v14692_v4 = vpop.permute.xlu1 %3977  ;;  %v14694_v59 = vpop.permute.xlu0 %3972  ;;  %10031 = vmatprep.mubr.f32.mxu0 %v3661_v20 }
 0x24f   : > { %17234 = vst [vmem:[#allocation37_spill] sm:$0xff] %v14692_v4  ;;  %17235 = vst [vmem:[#allocation38_spill] sm:$0xff] %v14694_v59  ;;  %v4130_v41 = vmul.f32 %v12045_v51, %v14694_v59  ;;  %v4131_v20 = vmul.f32 %v12046_v30, %v14692_v4  ;;  %v11174_v59 = vpack.c.bf16 %v8464_v46, %v8463_v24  ;;  %v12048_v30 = vld [vmem:[%s12388_s12 + $0x28] sm:$0xff]  ;;  %v12049_v46 = vld [vmem:[%s12388_s12 + $0x30] sm:$0xff] }
 0x251   : > { %10032 = vmatmul.mubr.f32.gmra.mrb[30].mxu0 %v3662_v62  ;;  %v8466_v62 = vld [vmem:[%s16507_s2 + $0x428] sm:$0xff] }
 0x252   : > { %v14706_v34 = vpop.permute.xlu1 %3987  ;;  %v14708_v48 = vpop.permute.xlu0 %3982  ;;  %10066 = vmatprep.mubr.f32.mxu0 %v4130_v41 }
 0x253   : > { %17237 = vst [vmem:[#allocation41_spill] sm:$0xff] %v14706_v34  ;;  %17238 = vst [vmem:[#allocation229_spill] sm:$0xff] %v14708_v48  ;;  %v4132_v51 = vmul.f32 %v12047_v54, %v14708_v48  ;;  %v4133_v24 = vmul.f32 %v12048_v30, %v14706_v34  ;;  %v11178_v48 = vpack.c.bf16 %v8466_v62, %v8465_v38  ;;  %v12050_v30 = vld [vmem:[%s12388_s12 + $0x38] sm:$0xff]  ;;  %v12051_v62 = vld [vmem:[%s12388_s12 + $0x40] sm:$0xff] }
 0x254   : > { %v8470_v34 = vld [vmem:[%s16507_s2 + $0x448] sm:$0xff] }
 0x255   : > { %10067 = vmatmul.mubr.f32.vlgmr.msra.gmra.mrb[0].mxu0 %v4131_v20  ;;  %v8467_v20 = vld [vmem:[%s16507_s2 + $0x430] sm:$0xff] }
 0x256   : > { %11173 = vmatpush3.bf16.msra.mxu0 %v14597_v0  ;;  %v14721_v42 = vpop.permute.xlu1 %3997  ;;  %v14723_v41 = vpop.permute.xlu0 %3992  ;;  %10069 = vmatprep.mubr.f32.mxu0 %v4132_v51  ;;  %v8468_v0 = vld [vmem:[%s16507_s2 + $0x438] sm:$0xff] }
 0x257   : > { %17239 = vst [vmem:[#allocation230_spill] sm:$0xff] %v14721_v42  ;;  %17240 = vst [vmem:[#allocation231_spill] sm:$0xff] %v14723_v41  ;;  %v4134_v54 = vmul.f32 %v12049_v46, %v14723_v41  ;;  %11175 = vmatprep.subr.bf16.mxu0 %v11174_v59  ;;  %v4135_v38 = vmul.f32 %v12050_v30, %v14721_v42  ;;  %v11182_v41 = vpack.c.bf16 %v8468_v0, %v8467_v20  ;;  %v12052_v30 = vld [vmem:[%s12388_s12 + $0x48] sm:$0xff]  ;;  %v12053_v0 = vld [vmem:[%s12388_s12 + $0x50] sm:$0xff] }
 0x258   : > { %v8472_v42 = vld [vmem:[%s16507_s2 + $0x458] sm:$0xff] }
 0x259   : > { %10070 = vmatmul.mubr.f32.gmra.mrb[2].mxu0 %v4133_v24  ;;  %v8469_v24 = vld [vmem:[%s16507_s2 + $0x440] sm:$0xff] }
 0x25a   : > { %v14735_v4 = vpop.permute.xlu1 %4007  ;;  %v14737_v51 = vpop.permute.xlu0 %4002  ;;  %10072 = vmatprep.mubr.f32.mxu0 %v4134_v54  ;;  %11177 = vmatpush3.bf16.msra.mxu0 %v11174_v59 }
 0x25b   : > { %17241 = vst [vmem:[#allocation232_spill] sm:$0xff] %v14735_v4  ;;  %17242 = vst [vmem:[#allocation233_spill] sm:$0xff] %v14737_v51  ;;  %v4136_v46 = vmul.f32 %v12051_v62, %v14737_v51  ;;  %11179 = vmatprep.subr.bf16.mxu0 %v11178_v48  ;;  %v4137_v20 = vmul.f32 %v12052_v30, %v14735_v4  ;;  %v11186_v51 = vpack.c.bf16 %v8470_v34, %v8469_v24  ;;  %v12054_v30 = vld [vmem:[%s12388_s12 + $0x58] sm:$0xff]  ;;  %v12055_v24 = vld [vmem:[%s12388_s12 + $0x60] sm:$0xff] }
 0x25c   : > { %v8474_v4 = vld [vmem:[%s16507_s2 + $0x468] sm:$0xff] }
 0x25d   : > { %10073 = vmatmul.mubr.f32.gmra.mrb[4].mxu0 %v4135_v38  ;;  %v8471_v38 = vld [vmem:[%s16507_s2 + $0x450] sm:$0xff] }
 0x25e   : > { %v14749_v54 = vpop.permute.xlu1 %4017  ;;  %v14751_v59 = vpop.permute.xlu0 %4012  ;;  %10075 = vmatprep.mubr.f32.mxu0 %v4136_v46  ;;  %11181 = vmatpush3.bf16.msra.mxu0 %v11178_v48 }
 0x25f   : > { %17243 = vst [vmem:[#allocation234_spill] sm:$0xff] %v14749_v54  ;;  %17244 = vst [vmem:[#allocation235_spill] sm:$0xff] %v14751_v59  ;;  %v4138_v62 = vmul.f32 %v12053_v0, %v14751_v59  ;;  %11183 = vmatprep.subr.bf16.mxu0 %v11182_v41  ;;  %v4139_v34 = vmul.f32 %v12054_v30, %v14749_v54  ;;  %v11190_v59 = vpack.c.bf16 %v8472_v42, %v8471_v38  ;;  %v12056_v30 = vld [vmem:[%s12388_s12 + $0x68] sm:$0xff]  ;;  %v12057_v38 = vld [vmem:[%s12388_s12 + $0x70] sm:$0xff] }
 0x260   : > { %v8476_v54 = vld [vmem:[%s16507_s2 + $0x478] sm:$0xff] }
 0x261   : > { %10076 = vmatmul.mubr.f32.gmra.mrb[6].mxu0 %v4137_v20  ;;  %v8473_v20 = vld [vmem:[%s16507_s2 + $0x460] sm:$0xff] }
 0x262   : > { %v14763_v46 = vpop.permute.xlu1 %4027  ;;  %v14765_v48 = vpop.permute.xlu0 %4022  ;;  %10078 = vmatprep.mubr.f32.mxu0 %v4138_v62  ;;  %11185 = vmatpush3.bf16.msra.mxu0 %v11182_v41 }
 0x263   : > { %17245 = vst [vmem:[#allocation236_spill] sm:$0xff] %v14763_v46  ;;  %17246 = vst [vmem:[#allocation237_spill] sm:$0xff] %v14765_v48  ;;  %v4140_v0 = vmul.f32 %v12055_v24, %v14765_v48  ;;  %11187 = vmatprep.subr.bf16.mxu0 %v11186_v51  ;;  %v4141_v42 = vmul.f32 %v12056_v30, %v14763_v46  ;;  %v11194_v48 = vpack.c.bf16 %v8474_v4, %v8473_v20  ;;  %v12058_v30 = vld [vmem:[%s12388_s12 + $0x78] sm:$0xff]  ;;  %v12059_v20 = vld [vmem:[%s12388_s12 + $0x80] sm:$0xff] }
 0x265   : > { %10079 = vmatmul.mubr.f32.gmra.mrb[8].mxu0 %v4139_v34  ;;  %v8475_v34 = vld [vmem:[%s16507_s2 + $0x470] sm:$0xff] }
 0x266   : > { %v14777_v62 = vpop.permute.xlu1 %4037  ;;  %v14779_v41 = vpop.permute.xlu0 %4032  ;;  %10081 = vmatprep.mubr.f32.mxu0 %v4140_v0  ;;  %11189 = vmatpush3.bf16.msra.mxu0 %v11186_v51 }
 0x267   : > { %17247 = vst [vmem:[#allocation238_spill] sm:$0xff] %v14777_v62  ;;  %17248 = vst [vmem:[#allocation239_spill] sm:$0xff] %v14779_v41  ;;  %v4142_v24 = vmul.f32 %v12057_v38, %v14779_v41  ;;  %11191 = vmatprep.subr.bf16.mxu0 %v11190_v59  ;;  %v4143_v4 = vmul.f32 %v12058_v30, %v14777_v62  ;;  %v11198_v41 = vpack.c.bf16 %v8476_v54, %v8475_v34 }
 0x269   : > { %10082 = vmatmul.mubr.f32.gmra.mrb[10].mxu0 %v4141_v42 }
 0x26a   : > { %v14791_v51 = vpop.permute.xlu1 %4047  ;;  %v14793_v0 = vpop.permute.xlu0 %4042  ;;  %10084 = vmatprep.mubr.f32.mxu0 %v4142_v24  ;;  %11193 = vmatpush3.bf16.msra.mxu0 %v11190_v59  ;;  %v12061_v24 = vld [vmem:[%s12388_s12 + $0x90] sm:$0xff] }
 0x26b   : > { %17249 = vst [vmem:[#allocation240_spill] sm:$0xff] %v14791_v51  ;;  %17250 = vst [vmem:[#allocation241_spill] sm:$0xff] %v14793_v0  ;;  %v4144_v38 = vmul.f32 %v12059_v20, %v14793_v0  ;;  %11195 = vmatprep.subr.bf16.mxu0 %v11194_v48  ;;  %v4145_v59 = vmul.f32 %v12060_v50, %v14791_v51  ;;  %v12063_v20 = vld [vmem:[%s12388_s12 + $0xa0] sm:$0xff] }
 0x26d   : > { %10085 = vmatmul.mubr.f32.gmra.mrb[12].mxu0 %v4143_v4  ;;  %v12062_v4 = vld [vmem:[%s12388_s12 + $0x98] sm:$0xff] }
 0x26e   : > { %v14799_v46 = vpop.permute.xlu1 %4057  ;;  %v14801_v42 = vpop.permute.xlu0 %4052  ;;  %10087 = vmatprep.mubr.f32.mxu0 %v4144_v38  ;;  %11197 = vmatpush3.bf16.msra.mxu0 %v11194_v48 }
 0x26f   : > { %17251 = vst [vmem:[#allocation242_spill] sm:$0xff] %v14799_v46  ;;  %17252 = vst [vmem:[#allocation243_spill] sm:$0xff] %v14801_v42  ;;  %v4146_v30 = vmul.f32 %v12061_v24, %v14801_v42  ;;  %11199 = vmatprep.subr.bf16.mxu0 %v11198_v41  ;;  %v4147_v48 = vmul.f32 %v12062_v4, %v14799_v46 }
 0x271   : > { %10088 = vmatmul.mubr.f32.gmra.mrb[14].mxu0 %v4145_v59  ;;  %v12064_v59 = vld [vmem:[%s12388_s12 + $0xa8] sm:$0xff] }
 0x272   : > { %v14807_v54 = vpop.permute.xlu1 %4067  ;;  %v14809_v34 = vpop.permute.xlu0 %4062  ;;  %10090 = vmatprep.mubr.f32.mxu0 %v4146_v30  ;;  %11201 = vmatpush3.bf16.msra.mxu0 %v11198_v41  ;;  %v12065_v30 = vld [vmem:[%s12388_s12 + $0xb0] sm:$0xff] }
 0x273   : > { %17253 = vst [vmem:[#allocation244_spill] sm:$0xff] %v14807_v54  ;;  %17254 = vst [vmem:[#allocation245_spill] sm:$0xff] %v14809_v34  ;;  %v4148_v50 = vmul.f32 %v12063_v20, %v14809_v34  ;;  %v4149_v42 = vmul.f32 %v12064_v59, %v14807_v54  ;;  %v12067_v34 = vld [vmem:[%s12388_s12 + $0xc0] sm:$0xff] }
 0x275   : > { %10091 = vmatmul.mubr.f32.gmra.mrb[16].mxu0 %v4147_v48  ;;  %v12066_v48 = vld [vmem:[%s12388_s12 + $0xb8] sm:$0xff] }
 0x276   : > { %v14815_v38 = vpop.permute.xlu1 %4077  ;;  %v14817_v24 = vpop.permute.xlu0 %4072  ;;  %10093 = vmatprep.mubr.f32.mxu0 %v4148_v50 }
 0x277   : > { %17255 = vst [vmem:[#allocation246_spill] sm:$0xff] %v14815_v38  ;;  %17256 = vst [vmem:[#allocation247_spill] sm:$0xff] %v14817_v24  ;;  %v4150_v41 = vmul.f32 %v12065_v30, %v14817_v24  ;;  %v4151_v20 = vmul.f32 %v12066_v48, %v14815_v38  ;;  %v12069_v24 = vld [vmem:[%s12388_s12 + $0xd0] sm:$0xff] }
 0x279   : > { %10094 = vmatmul.mubr.f32.gmra.mrb[18].mxu0 %v4149_v42  ;;  %v12068_v42 = vld [vmem:[%s12388_s12 + $0xc8] sm:$0xff] }
 0x27a   : > { %v14823_v4 = vpop.permute.xlu1 %4087  ;;  %v14825_v46 = vpop.permute.xlu0 %4082  ;;  %10096 = vmatprep.mubr.f32.mxu0 %v4150_v41 }
 0x27b   : > { %17257 = vst [vmem:[#allocation248_spill] sm:$0xff] %v14823_v4  ;;  %17258 = vst [vmem:[#allocation249_spill] sm:$0xff] %v14825_v46  ;;  %v4152_v50 = vmul.f32 %v12067_v34, %v14825_v46  ;;  %v4153_v30 = vmul.f32 %v12068_v42, %v14823_v4  ;;  %v12070_v34 = vld [vmem:[%s12388_s12 + $0xd8] sm:$0xff]  ;;  %v12071_v46 = vld [vmem:[%s12388_s12 + $0xe0] sm:$0xff] }
 0x27d   : > { %10097 = vmatmul.mubr.f32.gmra.mrb[20].mxu0 %v4151_v20 }
 0x27e   : > { %v14831_v59 = vpop.permute.xlu1 %4097  ;;  %v14833_v54 = vpop.permute.xlu0 %4092  ;;  %10099 = vmatprep.mubr.f32.mxu0 %v4152_v50 }
 0x27f   : > { %17259 = vst [vmem:[#allocation250_spill] sm:$0xff] %v14831_v59  ;;  %17260 = vst [vmem:[#allocation251_spill] sm:$0xff] %v14833_v54  ;;  %v4154_v41 = vmul.f32 %v12069_v24, %v14833_v54  ;;  %v4155_v20 = vmul.f32 %v12070_v34, %v14831_v59  ;;  %v12072_v24 = vld [vmem:[%s12388_s12 + $0xe8] sm:$0xff]  ;;  %v12073_v54 = vld [vmem:[%s12388_s12 + $0xf0] sm:$0xff] }
 0x281   : > { %10100 = vmatmul.mubr.f32.gmra.mrb[22].mxu0 %v4153_v30 }
 0x282   : > { %v14839_v48 = vpop.permute.xlu1 %4107  ;;  %v14841_v38 = vpop.permute.xlu0 %4102  ;;  %10102 = vmatprep.mubr.f32.mxu0 %v4154_v41 }
 0x283   : > { %17261 = vst [vmem:[#allocation252_spill] sm:$0xff] %v14839_v48  ;;  %17262 = vst [vmem:[#allocation253_spill] sm:$0xff] %v14841_v38  ;;  %v4156_v50 = vmul.f32 %v12071_v46, %v14841_v38  ;;  %v4157_v30 = vmul.f32 %v12072_v24, %v14839_v48  ;;  %v12074_v46 = vld [vmem:[%s12388_s12 + $0xf8] sm:$0xff]  ;;  %v12075_v38 = vld [vmem:[%s12388_s12] sm:$0xff] }
 0x284   : > { %v12076_v24 = vld [vmem:[%s12388_s12 + $0x8] sm:$0xff] }
 0x285   : > { %10103 = vmatmul.mubr.f32.gmra.mrb[24].mxu0 %v4155_v20 }
 0x286   : > { %v14847_v42 = vpop.permute.xlu1 %4117  ;;  %v14849_v4 = vpop.permute.xlu0 %4112  ;;  %10105 = vmatprep.mubr.f32.mxu0 %v4156_v50 }
 0x287   : > { %17263 = vst [vmem:[#allocation254_spill] sm:$0xff] %v14847_v42  ;;  %17264 = vst [vmem:[#allocation255_spill] sm:$0xff] %v14849_v4  ;;  %v4158_v41 = vmul.f32 %v12073_v54, %v14849_v4  ;;  %v4159_v20 = vmul.f32 %v12074_v46, %v14847_v42 }
 0x289   : > { %10106 = vmatmul.mubr.f32.gmra.mrb[26].mxu0 %v4157_v30 }
 0x28a   : > { %v14855_v51 = vpop.permute.xlu1 %4127  ;;  %v14857_v34 = vpop.permute.xlu0 %4122  ;;  %10108 = vmatprep.mubr.f32.mxu0 %v4158_v41 }
 0x28b   : > { %17265 = vst [vmem:[#allocation256_spill] sm:$0xff] %v14855_v51  ;;  %17266 = vst [vmem:[#allocation257_spill] sm:$0xff] %v14857_v34  ;;  %v4160_v59 = vmul.f32 %v12075_v38, %v14857_v34  ;;  %v4161_v54 = vmul.f32 %v12076_v24, %v14855_v51 }
 0x28d   : > { %10109 = vmatmul.mubr.f32.gmra.mrb[28].mxu0 %v4159_v20 }
 0x28e   : > { %v14863_v50 = vpop.permute.xlu1 %4476  ;;  %v14865_v0 = vpop.permute.xlu0 %4471  ;;  %10111 = vmatprep.mubr.f32.mxu0 %v4160_v59 }
 0x28f   : > { %17267 = vst [vmem:[#allocation258_spill] sm:$0xff] %v14863_v50  ;;  %17268 = vst [vmem:[#allocation259_spill] sm:$0xff] %v14865_v0  ;;  %v4629_v30 = vmul.f32 %v14865_v0, %v13224_v17  ;;  %v4630_v38 = vmul.f32 %v14863_v50, %v13247_v31 }
 0x291   : > { %10112 = vmatmul.mubr.f32.gmra.mrb[30].mxu0 %v4161_v54 }
 0x292   : > { %v14871_v41 = vpop.permute.xlu1 %4486  ;;  %v14873_v4 = vpop.permute.xlu0 %4481  ;;  %10146 = vmatprep.mubr.f32.mxu0 %v4629_v30 }
 0x293   : > { %17269 = vst [vmem:[#allocation260_spill] sm:$0xff] %v14871_v41  ;;  %17270 = vst [vmem:[#allocation261_spill] sm:$0xff] %v14873_v4  ;;  %v4631_v46 = vmul.f32 %v14873_v4, %v13253_v10  ;;  %v4632_v17 = vmul.f32 %v14871_v41, %v13278_v32 }
 0x295   : > { %10147 = vmatmul.mubr.f32.vlgmr.msra.gmra.mrb[0].mxu0 %v4630_v38 }
 0x296   : > { %v14879_v59 = vpop.permute.xlu1 %4496  ;;  %v14881_v20 = vpop.permute.xlu0 %4491  ;;  %10149 = vmatprep.mubr.f32.mxu0 %v4631_v46 }
 0x297   : > { %17271 = vst [vmem:[#allocation262_spill] sm:$0xff] %v14879_v59  ;;  %17272 = vst [vmem:[#allocation263_spill] sm:$0xff] %v14881_v20  ;;  %v4633_v24 = vmul.f32 %v14881_v20, %v13281_v1  ;;  %v4634_v31 = vmul.f32 %v14879_v59, %v13303_v3 }
 0x299   : > { %10150 = vmatmul.mubr.f32.gmra.mrb[2].mxu0 %v4632_v17 }
 0x29a   : > { %v14887_v54 = vpop.permute.xlu1 %4506  ;;  %v14889_v30 = vpop.permute.xlu0 %4501  ;;  %10152 = vmatprep.mubr.f32.mxu0 %v4633_v24 }
 0x29b   : > { %17273 = vst [vmem:[#allocation264_spill] sm:$0xff] %v14887_v54  ;;  %17274 = vst [vmem:[#allocation265_spill] sm:$0xff] %v14889_v30  ;;  %v4635_v10 = vmul.f32 %v14889_v30, %v13309_v16  ;;  %v4636_v32 = vmul.f32 %v14887_v54, %v13334_v23 }
 0x29d   : > { %10153 = vmatmul.mubr.f32.gmra.mrb[4].mxu0 %v4634_v31 }
 0x29e   : > { %v14895_v38 = vpop.permute.xlu1 %4516  ;;  %v14897_v46 = vpop.permute.xlu0 %4511  ;;  %10155 = vmatprep.mubr.f32.mxu0 %v4635_v10 }
 0x29f   : > { %17275 = vst [vmem:[#allocation266_spill] sm:$0xff] %v14895_v38  ;;  %17276 = vst [vmem:[#allocation267_spill] sm:$0xff] %v14897_v46  ;;  %v4637_v1 = vmul.f32 %v14897_v46, %v13337_v55  ;;  %v4638_v16 = vmul.f32 %v14895_v38, %v13359_v25 }
 0x2a1   : > { %10156 = vmatmul.mubr.f32.gmra.mrb[6].mxu0 %v4636_v32 }
 0x2a2   : > { %v14903_v17 = vpop.permute.xlu1 %4526  ;;  %v14905_v24 = vpop.permute.xlu0 %4521  ;;  %10158 = vmatprep.mubr.f32.mxu0 %v4637_v1 }
 0x2a3   : > { %17277 = vst [vmem:[#allocation268_spill] sm:$0xff] %v14903_v17  ;;  %17278 = vst [vmem:[#allocation269_spill] sm:$0xff] %v14905_v24  ;;  %v4639_v3 = vmul.f32 %v14905_v24, %v13365_v61  ;;  %v4640_v55 = vmul.f32 %v14903_v17, %v13390_v58 }
 0x2a5   : > { %10159 = vmatmul.mubr.f32.gmra.mrb[8].mxu0 %v4638_v16 }
 0x2a6   : > { %v14911_v31 = vpop.permute.xlu1 %4536  ;;  %v14913_v10 = vpop.permute.xlu0 %4531  ;;  %10161 = vmatprep.mubr.f32.mxu0 %v4639_v3 }
 0x2a7   : > { %17279 = vst [vmem:[#allocation270_spill] sm:$0xff] %v14911_v31  ;;  %17280 = vst [vmem:[#allocation271_spill] sm:$0xff] %v14913_v10  ;;  %v4641_v23 = vmul.f32 %v14913_v10, %v13393_v12  ;;  %v4642_v61 = vmul.f32 %v14911_v31, %v13415_v60 }
 0x2a9   : > { %10162 = vmatmul.mubr.f32.gmra.mrb[10].mxu0 %v4640_v55 }
 0x2aa   : > { %v14919_v32 = vpop.permute.xlu1 %4546  ;;  %v14921_v1 = vpop.permute.xlu0 %4541  ;;  %10164 = vmatprep.mubr.f32.mxu0 %v4641_v23 }
 0x2ab   : > { %17281 = vst [vmem:[#allocation272_spill] sm:$0xff] %v14919_v32  ;;  %17282 = vst [vmem:[#allocation273_spill] sm:$0xff] %v14921_v1  ;;  %v4643_v25 = vmul.f32 %v14921_v1, %v13421_v56  ;;  %v4644_v12 = vmul.f32 %v14919_v32, %v13441_v47 }
 0x2ad   : > { %10165 = vmatmul.mubr.f32.gmra.mrb[12].mxu0 %v4642_v61 }
 0x2ae   : > { %v14927_v16 = vpop.permute.xlu1 %4556  ;;  %v14929_v3 = vpop.permute.xlu0 %4551  ;;  %10167 = vmatprep.mubr.f32.mxu0 %v4643_v25 }
 0x2af   : > { %17283 = vst [vmem:[#allocation274_spill] sm:$0xff] %v14927_v16  ;;  %17284 = vst [vmem:[#allocation275_spill] sm:$0xff] %v14929_v3  ;;  %v4645_v58 = vmul.f32 %v14929_v3, %v13445_v45  ;;  %v4646_v56 = vmul.f32 %v14927_v16, %v13464_v44 }
 0x2b1   : > { %10168 = vmatmul.mubr.f32.gmra.mrb[14].mxu0 %v4644_v12 }
 0x2b2   : > { %v14935_v55 = vpop.permute.xlu1 %4566  ;;  %v14937_v23 = vpop.permute.xlu0 %4561  ;;  %10170 = vmatprep.mubr.f32.mxu0 %v4645_v58 }
 0x2b3   : > { %17285 = vst [vmem:[#allocation276_spill] sm:$0xff] %v14935_v55  ;;  %17286 = vst [vmem:[#allocation277_spill] sm:$0xff] %v14937_v23  ;;  %v4647_v60 = vmul.f32 %v14937_v23, %v13468_v6  ;;  %v4648_v47 = vmul.f32 %v14935_v55, %v17175_v5 }
 0x2b5   : > { %10171 = vmatmul.mubr.f32.gmra.mrb[16].mxu0 %v4646_v56 }
 0x2b6   : > { %v14943_v61 = vpop.permute.xlu1 %4576  ;;  %v14945_v25 = vpop.permute.xlu0 %4571  ;;  %10173 = vmatprep.mubr.f32.mxu0 %v4647_v60 }
 0x2b7   : > { %17287 = vst [vmem:[#allocation278_spill] sm:$0xff] %v14943_v61  ;;  %17288 = vst [vmem:[#allocation279_spill] sm:$0xff] %v14945_v25  ;;  %v4649_v45 = vmul.f32 %v14945_v25, %v17176_v29  ;;  %v4650_v44 = vmul.f32 %v14943_v61, %v17179_v57 }
 0x2b9   : > { %10174 = vmatmul.mubr.f32.gmra.mrb[18].mxu0 %v4648_v47 }
 0x2ba   : > { %v14951_v12 = vpop.permute.xlu1 %4586  ;;  %v14953_v58 = vpop.permute.xlu0 %4581  ;;  %10176 = vmatprep.mubr.f32.mxu0 %v4649_v45 }
 0x2bb   : > { %17289 = vst [vmem:[#allocation280_spill] sm:$0xff] %v14951_v12  ;;  %17290 = vst [vmem:[#allocation281_spill] sm:$0xff] %v14953_v58  ;;  %v4651_v6 = vmul.f32 %v14953_v58, %v17180_v15  ;;  %v4652_v5 = vmul.f32 %v14951_v12, %v13536_v13 }
 0x2bd   : > { %10177 = vmatmul.mubr.f32.gmra.mrb[20].mxu0 %v4650_v44 }
 0x2be   : > { %v14959_v56 = vpop.permute.xlu1 %4596  ;;  %v14961_v60 = vpop.permute.xlu0 %4591  ;;  %10179 = vmatprep.mubr.f32.mxu0 %v4651_v6 }
 0x2bf   : > { %17291 = vst [vmem:[#allocation282_spill] sm:$0xff] %v14959_v56  ;;  %17292 = vst [vmem:[#allocation283_spill] sm:$0xff] %v14961_v60  ;;  %v4653_v29 = vmul.f32 %v14961_v60, %v13543_v2  ;;  %v4654_v57 = vmul.f32 %v14959_v56, %v17185_v26 }
 0x2c1   : > { %10180 = vmatmul.mubr.f32.gmra.mrb[22].mxu0 %v4652_v5 }
 0x2c2   : > { %v14967_v47 = vpop.permute.xlu1 %4606  ;;  %v14969_v45 = vpop.permute.xlu0 %4601  ;;  %10182 = vmatprep.mubr.f32.mxu0 %v4653_v29 }
 0x2c3   : > { %17293 = vst [vmem:[#allocation284_spill] sm:$0xff] %v14967_v47  ;;  %17294 = vst [vmem:[#allocation285_spill] sm:$0xff] %v14969_v45  ;;  %v4655_v15 = vmul.f32 %v14969_v45, %v13567_v53  ;;  %v4656_v13 = vmul.f32 %v14967_v47, %v13586_v21 }
 0x2c5   : > { %10183 = vmatmul.mubr.f32.gmra.mrb[24].mxu0 %v4654_v57  ;;  %v8479_v57 = vld [vmem:[%s16509_s4 + $0x88] sm:$0xff] }
 0x2c6   : > { %v14975_v44 = vpop.permute.xlu1 %4616  ;;  %v14977_v6 = vpop.permute.xlu0 %4611  ;;  %10185 = vmatprep.mubr.f32.mxu0 %v4655_v15 }
 0x2c7   : > { %17295 = vst [vmem:[#allocation286_spill] sm:$0xff] %v14975_v44  ;;  %17296 = vst [vmem:[#allocation287_spill] sm:$0xff] %v14977_v6  ;;  %v4657_v2 = vmul.f32 %v14977_v6, %v17188_v49  ;;  %v4658_v26 = vmul.f32 %v14975_v44, %v17191_v28  ;;  %v8478_v49 = vld [vmem:[%s16509_s4 + $0x80] sm:$0xff] }
 0x2c8   : > { %v11202_v28 = vpack.c.bf16 %v8479_v57, %v8478_v49  ;;  %v8486_v57 = vld [vmem:[%s16509_s4 + $0xc0] sm:$0xff] }
 0x2c9   : > { %10186 = vmatmul.mubr.f32.gmra.mrb[26].mxu0 %v4656_v13  ;;  %v8482_v13 = vld [vmem:[%s16509_s4 + $0xa0] sm:$0xff] }
 0x2ca   : > { %v14983_v5 = vpop.permute.xlu0 %4621  ;;  %10188 = vmatprep.mubr.f32.mxu0 %v4657_v2  ;;  %v14989_v29 = vpop.permute.xlu1 %4626  ;;  %11203 = vmatprep.subr.bf16.mxu1 %v11202_v28  ;;  %v8483_v2 = vld [vmem:[%s16509_s4 + $0xa8] sm:$0xff] }
 0x2cb   : > { %17297 = vst [vmem:[#allocation288_spill] sm:$0xff] %v14983_v5  ;;  %v4659_v53 = vmul.f32 %v14983_v5, %v13196_v43  ;;  %17298 = vst [vmem:[#allocation289_spill] sm:$0xff] %v14989_v29  ;;  %v4660_v21 = vmul.f32 %v14989_v29, %v13221_v63  ;;  %11205 = vmatpush3.bf16.msra.mxu1 %v11202_v28  ;;  %v8480_v43 = vld [vmem:[%s16509_s4 + $0x90] sm:$0xff]  ;;  %v8481_v63 = vld [vmem:[%s16509_s4 + $0x98] sm:$0xff] }
 0x2cc   : > { %v11206_v15 = vpack.c.bf16 %v8481_v63, %v8480_v43  ;;  %v8487_v28 = vld [vmem:[%s16509_s4 + $0xc8] sm:$0xff]  ;;  %v8488_v63 = vld [vmem:[%s16509_s4 + $0xd0] sm:$0xff] }
 0x2cd   : > { %10189 = vmatmul.mubr.f32.gmra.mrb[28].mxu0 %v4658_v26  ;;  %v11210_v26 = vpack.c.bf16 %v8483_v2, %v8482_v13  ;;  %v11218_v43 = vpack.c.bf16 %v8487_v28, %v8486_v57  ;;  %v8490_v2 = vld [vmem:[%s16509_s4 + $0xe0] sm:$0xff] }
 0x2ce   : > { %10191 = vmatprep.mubr.f32.mxu0 %v4659_v53  ;;  %11207 = vmatprep.subr.bf16.mxu1 %v11206_v15  ;;  %v8484_v53 = vld [vmem:[%s16509_s4 + $0xb0] sm:$0xff]  ;;  %v5167_v28 = vld [vmem:[%s16509_s4] sm:$0xff] }
 0x2cf   : > { %11209 = vmatpush3.bf16.msra.mxu1 %v11206_v15  ;;  %v8489_v15 = vld [vmem:[%s16509_s4 + $0xd8] sm:$0xff] }
 0x2d0   : > { %11211 = vmatprep.subr.bf16.mxu1 %v11210_v26  ;;  %v11222_v13 = vpack.c.bf16 %v8489_v15, %v8488_v63  ;;  %v15053_v15 = vld [vmem:[%s16508_s3] ss:$0 sm:$0xff] }
 0x2d1   : > { %10192 = vmatmul.mubr.f32.gmra.mrb[30].mxu0 %v4660_v21  ;;  %v8485_v21 = vld [vmem:[%s16509_s4 + $0xb8] sm:$0xff] }
 0x2d2   : > { %v11214_v49 = vpack.c.bf16 %v8485_v21, %v8484_v53  ;;  %v8492_v21 = vld [vmem:[%s16509_s4 + $0xf0] sm:$0xff] }
 0x2d3   : > { %11213 = vmatpush3.bf16.msra.mxu1 %v11210_v26  ;;  %v8491_v26 = vld [vmem:[%s16509_s4 + $0xe8] sm:$0xff] }
 0x2d4   : > { %11215 = vmatprep.subr.bf16.mxu1 %v11214_v49  ;;  %v11226_v53 = vpack.c.bf16 %v8491_v26, %v8490_v2 }
 0x2d7   : > { %11217 = vmatpush3.bf16.msra.mxu1 %v11214_v49  ;;  %v8493_v49 = vld [vmem:[%s16509_s4 + $0xf8] sm:$0xff] }
 0x2d8   : > { %11219 = vmatprep.subr.bf16.mxu1 %v11218_v43  ;;  %v11230_v57 = vpack.c.bf16 %v8493_v49, %v8492_v21 }
 0x2db   : > { %11221 = vmatpush3.bf16.msra.mxu1 %v11218_v43  ;;  %v5168_v43 = vld [vmem:[%s16509_s4 + $0x8] sm:$0xff] }
 0x2dc   : > { %11223 = vmatprep.subr.bf16.mxu1 %v11222_v13  ;;  %v15047_v63 = vpack.c.bf16 %v5168_v43, %v5167_v28 }
 0x2df   : > { %11225 = vmatpush3.bf16.msra.mxu1 %v11222_v13 }
 0x2e0   : > { %11227 = vmatprep.subr.bf16.mxu1 %v11226_v53 }
 0x2e3   : > { %11229 = vmatpush3.bf16.msra.mxu1 %v11226_v53 }
 0x2e4   : > { %11231 = vmatprep.subr.bf16.mxu1 %v11230_v57 }
 0x2e7   : > { %11233 = vmatpush3.bf16.msra.mxu1 %v11230_v57 }
 0x2e8   : > { %11235 = vmatprep.subr.bf16.mxu1 %v15047_v63 }
 0x368   : > { %v10148_v13 = vpop.f32.mrb[0].mxu0 }
 0x369   : > { %v4943_v2 = vadd.f32 %v10148_v13, %v15053_v15  ;;  %v4744_v26 = vpop.f32.mrb[1].mxu0 }
 0x36a   : > { %v4942_v53 = vadd.f32 %v15053_v15, %v4744_v26 }
 0x36b   : > { %v15057_v21 = vmax.f32 %v4943_v2, 0.0 }
 0x36c   : > { %v15059_v49 = vmax.f32 %v4942_v53, 0.0  ;;  %v10151_v57 = vpop.f32.mrb[2].mxu0 }
 0x36d   : > { %17299 = vst [vmem:[#allocation290_spill] sm:$0xff] %v15057_v21  ;;  %v4754_v28 = vpop.f32.mrb[3].mxu0  ;;  %v16798_v43 = vrot.slane %v15057_v21, 7  ;;  %v16802_v29 = vrot.slane %v15057_v21, 1  ;;  %v4945_v22 = vadd.f32 %v10151_v57, %v15053_v15 }
 0x36e   : > { %17300 = vst [vmem:[#allocation291_spill] sm:$0xff] %v15059_v49  ;;  %v16803_v5 = vrot.slane %v15059_v49, 1  ;;  %v16799_v44 = vrot.slane %v15059_v49, 7  ;;  %v5185_v57 = vmul.f32 %v15059_v49, %v17312_v35  ;;  %v17313_v7 = vrot.slane %v15059_v49, 7 }
 0x370   : > { %v15065_v6 = vpop.f32.mrb[4].mxu0  ;;  %v15072_v13 = vsel %vm285_vm0, %v16799_v44, %v16798_v43  ;;  %v15079_v2 = vsel %vm1344_vm1, %v16803_v5, %v16802_v29 }
 0x371   : > { %17301 = vst [vmem:[#allocation292_spill] sm:$0xff] %v15072_v13  ;;  %17302 = vst [vmem:[#allocation293_spill] sm:$0xff] %v15079_v2  ;;  %v4764_v26 = vpop.f32.mrb[5].mxu0  ;;  %v4947_v11 = vadd.f32 %v15065_v6, %v15053_v15  ;;  %v5173_v6 = vld [vmem:[%s16509_s4 + $0x30] sm:$0xff] }
 0x374   : > { %v15081_v53 = vpop.f32.mrb[6].mxu0 }
 0x375   : > { %v15083_v47 = vpop.f32.mrb[7].mxu0 }
 0x378   : > { %v15085_v45 = vpop.f32.mrb[8].mxu0 }
 0x379   : > { %v15087_v56 = vpop.f32.mrb[9].mxu0 }
 0x37c   : > { %v15089_v60 = vpop.f32.mrb[10].mxu0 }
 0x37d   : > { %v15091_v43 = vpop.f32.mrb[11].mxu0 }
 0x380   : > { %v15093_v44 = vpop.f32.mrb[12].mxu0 }
 0x381   : > { %v15095_v12 = vpop.f32.mrb[13].mxu0 }
 0x384   : > { %v15097_v58 = vpop.f32.mrb[14].mxu0 }
 0x385   : > { %v15099_v29 = vpop.f32.mrb[15].mxu0 }
 0x388   : > { %v15101_v5 = vpop.f32.mrb[16].mxu0 }
 0x389   : > { %v15103_v61 = vpop.f32.mrb[17].mxu0 }
 0x38c   : > { %v15105_v25 = vpop.f32.mrb[18].mxu0 }
 0x38d   : > { %v15107_v55 = vpop.f32.mrb[19].mxu0 }
 0x390   : > { %v15109_v23 = vpop.f32.mrb[20].mxu0 }
 0x391   : > { %v15111_v16 = vpop.f32.mrb[21].mxu0 }
 0x394   : > { %v15113_v3 = vpop.f32.mrb[22].mxu0 }
 0x395   : > { %v15115_v32 = vpop.f32.mrb[23].mxu0 }
 0x398   : > { %v15117_v1 = vpop.f32.mrb[24].mxu0 }
 0x399   : > { %v15119_v31 = vpop.f32.mrb[25].mxu0 }
 0x39c   : > { %v10187_v10 = vpop.f32.mrb[26].mxu0 }
 0x39d   : > { %v4969_v17 = vadd.f32 %v10187_v10, %v15053_v15  ;;  %v4874_v24 = vpop.f32.mrb[27].mxu0 }
 0x39e   : > { %v4968_v38 = vadd.f32 %v15053_v15, %v4874_v24 }
 0x39f   : > { %v15123_v46 = vmax.f32 %v4969_v17, 0.0 }
 0x3a0   : > { %v15125_v54 = vmax.f32 %v4968_v38, 0.0  ;;  %v10190_v30 = vpop.f32.mrb[28].mxu0 }
 0x3a1   : > { %17303 = vst [vmem:[#allocation294_spill] sm:$0xff] %v15123_v46  ;;  %v4971_v59 = vadd.f32 %v10190_v30, %v15053_v15  ;;  %v4884_v20 = vpop.f32.mrb[29].mxu0  ;;  %v5099_v0 = vrot.slane %v15123_v46, 7  ;;  %v4944_v30 = vadd.f32 %v15053_v15, %v4754_v28 }
 0x3a2   : > { %17304 = vst [vmem:[#allocation295_spill] sm:$0xff] %v15125_v54  ;;  %v4970_v41 = vadd.f32 %v15053_v15, %v4884_v20  ;;  %v16833_v4 = vrot.slane %v15125_v54, 7  ;;  %v5169_v20 = vld [vmem:[%s16509_s4 + $0x10] sm:$0xff] }
 0x3a3   : > { %v15130_v50 = vmax.f32 %v4971_v59, 0.0  ;;  %v5170_v59 = vld [vmem:[%s16509_s4 + $0x18] sm:$0xff]  ;;  %v15168_v33 = vmax.f32 %v4944_v30, 0.0  ;;  %v5172_v30 = vld [vmem:[%s16509_s4 + $0x28] sm:$0xff] }
 0x3a4   : > { %v15133_v10 = vmax.f32 %v4970_v41, 0.0  ;;  %v10193_v51 = vpop.f32.mrb[30].mxu0  ;;  %v15147_v41 = vsel %vm285_vm0, %v16833_v4, %v5099_v0  ;;  %v11238_v4 = vpack.c.bf16 %v5170_v59, %v5169_v20  ;;  %v5171_v59 = vld [vmem:[%s16509_s4 + $0x20] sm:$0xff] }
 0x3a5   : > { %17305 = vst [vmem:[#allocation296_spill] sm:$0xff] %v15130_v50  ;;  %v4973_v17 = vadd.f32 %v10193_v51, %v15053_v15  ;;  %v4894_v24 = vpop.f32.mrb[31].mxu0  ;;  %v5009_v38 = vrot.slane %v15130_v50, 7  ;;  %17310 = vst [vmem:[#allocation3_spill] sm:$0xff] %v15168_v33 }
 0x3a6   : > { %17306 = vst [vmem:[#allocation297_spill] sm:$0xff] %v15133_v10  ;;  %v4972_v34 = vadd.f32 %v15053_v15, %v4894_v24  ;;  %v5101_v51 = vrot.slane %v15133_v10, 7 }
 0x3a7   : > { %v15151_v42 = vmax.f32 %v4973_v17, 0.0 }
 0x3a8   : > { %v15153_v24 = vmax.f32 %v4972_v34, 0.0  ;;  %v15156_v48 = vsel %vm285_vm0, %v5099_v0, %v5101_v51  ;;  %v15159_v62 = vsel %vm285_vm0, %v5101_v51, %v5009_v38  ;;  %v17311_v0 = vld [vmem:[#allocation5_spill] sm:$0xff] }
 0x3a9   : > { %17307 = vst [vmem:[#allocation298_spill] sm:$0xff] %v15151_v42  ;;  %v5012_v36 = vrot.slane %v15151_v42, 7  ;;  %v5683_v34 = vrot.slane %v15151_v42, 1  ;;  %v5184_v51 = vmul.f32 %v15151_v42, %v17311_v0 }
 0x3aa   : > { %17308 = vst [vmem:[#allocation299_spill] sm:$0xff] %v15153_v24  ;;  %v5183_v19 = vmul.f32 %v15153_v24, %v17309_v39  ;;  %v5010_v28 = vrot.slane %v15153_v24, 7  ;;  %v5682_v17 = vrot.slane %v15153_v24, 1  ;;  %v4946_v39 = vadd.f32 %v15053_v15, %v4764_v26 }
 0x3ab   : > { %v15177_v20 = vsel %vm285_vm0, %v5012_v36, %v17313_v7 }
 0x3ac   : > { %17314 = vst [vmem:[#allocation5_spill] sm:$0xff] %v15177_v20  ;;  %10226 = vmatprep.mubr.f32.mxu1 %v5183_v19  ;;  %v15187_v0 = vsel %vm285_vm0, %v5009_v38, %v5010_v28  ;;  %v15190_v35 = vsel %vm285_vm0, %v5010_v28, %v5012_v36  ;;  %v15193_v7 = vsel %vm1344_vm1, %v5682_v17, %v5683_v34  ;;  %v17318_v19 = vrot.slane %v15059_v49, 1  ;;  %v17320_v28 = vld [vmem:[#allocation4_spill] sm:$0xff] }
 0x3ad   : > { %17315 = vst [vmem:[#allocation2_spill] sm:$0xff] %v15187_v0  ;;  %17316 = vst [vmem:[#allocation300_spill] sm:$0xff] %v15190_v35  ;;  %10227 = vmatmul.mubr.f32.vlgmr.msra.gmra.mrb[0].mxu1 %v5184_v51  ;;  %v15203_v38 = vmax.f32 %v4945_v22, 0.0  ;;  %v4948_v36 = vadd.f32 %v15053_v15, %v15083_v47  ;;  %v5186_v14 = vmul.f32 %v15057_v21, %v17320_v28  ;;  %v15209_v9 = vmax.f32 %v4946_v39, 0.0  ;;  %v5174_v22 = vld [vmem:[%s16509_s4 + $0x38] sm:$0xff]  ;;  %v17323_v39 = vld [vmem:[#allocation6_spill] sm:$0xff] }
 0x3ae   : > { %17317 = vst [vmem:[#allocation301_spill] sm:$0xff] %v15193_v7  ;;  %v15198_v26 = vsel %vm1344_vm1, %v5683_v34, %v17318_v19  ;;  %11237 = vmatpush3.bf16.msra.mxu1 %v15047_v63  ;;  %10229 = vmatprep.mubr.f32.mxu1 %v5185_v57  ;;  %v11242_v51 = vpack.c.bf16 %v5172_v30, %v5171_v59  ;;  %v17322_v34 = vld [vmem:[#allocation7_spill] sm:$0xff]  ;;  %v15219_v47 = vmax.f32 %v4947_v11, 0.0  ;;  %v5175_v28 = vld [vmem:[%s16509_s4 + $0x40] sm:$0xff] }
 0x3af   : > { %17319 = vst [vmem:[#allocation302_spill] sm:$0xff] %v15198_v26  ;;  %11239 = vmatprep.subr.bf16.mxu1 %v11238_v4  ;;  %17321 = vst [vmem:[#allocation4_spill] sm:$0xff] %v15209_v9  ;;  %v5187_v19 = vmul.f32 %v15168_v33, %v17322_v34  ;;  %v4949_v63 = vadd.f32 %v15081_v53, %v15053_v15  ;;  %v15223_v57 = vmax.f32 %v4948_v36, 0.0  ;;  %v5176_v11 = vld [vmem:[%s16509_s4 + $0x48] sm:$0xff]  ;;  %v17324_v53 = vld [vmem:[#allocation9_spill] sm:$0xff]  ;;  %v5740_v34 = vrot.slane %v15123_v46, 1 }
 0x3b0   : > { %v5188_v59 = vmul.f32 %v15203_v38, %v17323_v39  ;;  %v11246_v30 = vpack.c.bf16 %v5174_v22, %v5173_v6  ;;  %v5189_v36 = vmul.f32 %v15209_v9, %v17324_v53  ;;  %v17325_v22 = vld [vmem:[#allocation8_spill] sm:$0xff]  ;;  %v11250_v27 = vpack.c.bf16 %v5176_v11, %v5175_v28 }
 0x3b1   : > { %10230 = vmatmul.mubr.f32.gmra.mrb[2].mxu1 %v5186_v14  ;;  %v15240_v6 = vmax.f32 %v4949_v63, 0.0  ;;  %v5190_v39 = vmul.f32 %v15219_v47, %v17325_v22  ;;  %v5744_v14 = vrot.slane %v15130_v50, 1  ;;  %v17327_v53 = vrot.slane %v15125_v54, 1 }
 0x3b2   : > { %10232 = vmatprep.mubr.f32.mxu1 %v5187_v19  ;;  %11241 = vmatpush3.bf16.msra.mxu1 %v11238_v4  ;;  %v4950_v4 = vadd.f32 %v15053_v15, %v15087_v56  ;;  %v5742_v19 = vrot.slane %v15133_v10, 1  ;;  %v4951_v56 = vadd.f32 %v15085_v45, %v15053_v15  ;;  %v5177_v45 = vld [vmem:[%s16509_s4 + $0x50] sm:$0xff]  ;;  %v5055_v40 = vrot.slane %v15219_v47, 7 }
 0x3b3   : > { %11243 = vmatprep.subr.bf16.mxu1 %v11242_v51  ;;  %v15252_v63 = vsel %vm1344_vm1, %v17327_v53, %v5740_v34  ;;  %v15271_v11 = vsel %vm1344_vm1, %v5744_v14, %v5682_v17  ;;  %v17330_v17 = vld [vmem:[#allocation13_spill] sm:$0xff] }
 0x3b4   : > { %17328 = vst [vmem:[#allocation7_spill] sm:$0xff] %v15252_v63  ;;  %v15257_v22 = vmax.f32 %v4950_v4, 0.0  ;;  %v15268_v28 = vsel %vm1344_vm1, %v5742_v19, %v5744_v14  ;;  %v15273_v4 = vmax.f32 %v4951_v56, 0.0  ;;  %v4955_v56 = vadd.f32 %v15093_v44, %v15053_v15  ;;  %v5182_v44 = vld [vmem:[%s16509_s4 + $0x78] sm:$0xff] }
 0x3b5   : > { %10233 = vmatmul.mubr.f32.gmra.mrb[4].mxu1 %v5188_v59  ;;  %v5191_v59 = vmul.f32 %v15223_v57, %v17326_v52  ;;  %v5178_v52 = vld [vmem:[%s16509_s4 + $0x58] sm:$0xff] }
 0x3b6   : > { %10235 = vmatprep.mubr.f32.mxu1 %v5189_v36  ;;  %11245 = vmatpush3.bf16.msra.mxu1 %v11242_v51  ;;  %v15255_v36 = vsel %vm1344_vm1, %v5740_v34, %v5742_v19  ;;  %v4952_v51 = vadd.f32 %v15053_v15, %v15091_v43  ;;  %v4953_v43 = vadd.f32 %v15089_v60, %v15053_v15  ;;  %v17329_v34 = vld [vmem:[#allocation10_spill] sm:$0xff]  ;;  %v5180_v60 = vld [vmem:[%s16509_s4 + $0x68] sm:$0xff] }
 0x3b7   : > { %11247 = vmatprep.subr.bf16.mxu1 %v11246_v30  ;;  %v5192_v53 = vmul.f32 %v15240_v6, %v17329_v34  ;;  %v11254_v18 = vpack.c.bf16 %v5178_v52, %v5177_v45  ;;  %v4954_v19 = vadd.f32 %v15053_v15, %v15095_v12  ;;  %v5193_v14 = vmul.f32 %v15257_v22, %v17330_v17  ;;  %v17331_v12 = vld [vmem:[#allocation12_spill] sm:$0xff]  ;;  %v17332_v34 = vld [vmem:[#allocation15_spill] sm:$0xff] }
 0x3b8   : > { %v15279_v37 = vmax.f32 %v4952_v51, 0.0  ;;  %v4956_v52 = vadd.f32 %v15053_v15, %v15099_v29  ;;  %v17333_v29 = vld [vmem:[#allocation14_spill] sm:$0xff] }
 0x3b9   : > { %10236 = vmatmul.mubr.f32.gmra.mrb[6].mxu1 %v5190_v39  ;;  %v15291_v39 = vmax.f32 %v4953_v43, 0.0  ;;  %v15297_v45 = vmax.f32 %v4954_v19, 0.0  ;;  %v15309_v43 = vmax.f32 %v4955_v56, 0.0  ;;  %v4957_v19 = vadd.f32 %v15097_v58, %v15053_v15  ;;  %v8495_v58 = vld [vmem:[%s16509_s4 + $0x108] sm:$0xff] }
 0x3ba   : > { %10238 = vmatprep.mubr.f32.mxu1 %v5191_v59  ;;  %11249 = vmatpush3.bf16.msra.mxu1 %v11246_v30  ;;  %v5179_v30 = vld [vmem:[%s16509_s4 + $0x60] sm:$0xff]  ;;  %v5194_v59 = vmul.f32 %v15273_v4, %v17331_v12  ;;  %v17335_v12 = vld [vmem:[#allocation17_spill] sm:$0xff] }
 0x3bb   : > { %11251 = vmatprep.subr.bf16.mxu1 %v11250_v27  ;;  %v11258_v51 = vpack.c.bf16 %v5180_v60, %v5179_v30  ;;  %v5196_v17 = vmul.f32 %v15291_v39, %v17333_v29  ;;  %v15315_v30 = vmax.f32 %v4956_v52, 0.0  ;;  %v4958_v60 = vadd.f32 %v15053_v15, %v15103_v61  ;;  %v17336_v61 = vld [vmem:[#allocation16_spill] sm:$0xff]  ;;  %v17337_v29 = vld [vmem:[#allocation19_spill] sm:$0xff] }
 0x3bc   : > { %v15327_v56 = vmax.f32 %v4957_v19, 0.0  ;;  %v4959_v52 = vadd.f32 %v15101_v5, %v15053_v15  ;;  %v4961_v5 = vadd.f32 %v15105_v25, %v15053_v15  ;;  %v17338_v19 = vld [vmem:[#allocation18_spill] sm:$0xff]  ;;  %v4963_v25 = vadd.f32 %v15109_v23, %v15053_v15 }
 0x3bd   : > { %10239 = vmatmul.mubr.f32.gmra.mrb[8].mxu1 %v5192_v53  ;;  %v5195_v53 = vmul.f32 %v15279_v37, %v17332_v34  ;;  %17334 = vst [vmem:[#allocation6_spill] sm:$0xff] %v15315_v30  ;;  %v5198_v34 = vmul.f32 %v15309_v43, %v17336_v61 }
 0x3be   : > { %10241 = vmatprep.mubr.f32.mxu1 %v5193_v14  ;;  %11253 = vmatpush3.bf16.msra.mxu1 %v11250_v27  ;;  %v5181_v27 = vld [vmem:[%s16509_s4 + $0x70] sm:$0xff] }
 0x3bf   : > { %11255 = vmatprep.subr.bf16.mxu1 %v11254_v18  ;;  %v11262_v14 = vpack.c.bf16 %v5182_v44, %v5181_v27  ;;  %v15335_v27 = vmax.f32 %v4958_v60, 0.0  ;;  %v4960_v44 = vadd.f32 %v15053_v15, %v15107_v55  ;;  %v4962_v55 = vadd.f32 %v15053_v15, %v15111_v16 }
 0x3c1   : > { %10242 = vmatmul.mubr.f32.gmra.mrb[10].mxu1 %v5194_v59  ;;  %v5197_v59 = vmul.f32 %v15297_v45, %v17335_v12  ;;  %v5200_v12 = vmul.f32 %v15327_v56, %v17338_v19  ;;  %v15348_v60 = vmax.f32 %v4960_v44, 0.0  ;;  %v15360_v61 = vmax.f32 %v4962_v55, 0.0  ;;  %v17341_v44 = vld [vmem:[#allocation23_spill] sm:$0xff]  ;;  %v17344_v55 = vld [vmem:[#allocation25_spill] sm:$0xff] }
 0x3c2   : > { %10244 = vmatprep.mubr.f32.mxu1 %v5195_v53  ;;  %11257 = vmatpush3.bf16.msra.mxu1 %v11254_v18  ;;  %v8494_v18 = vld [vmem:[%s16509_s4 + $0x100] sm:$0xff] }
 0x3c3   : > { %11259 = vmatprep.subr.bf16.mxu1 %v11258_v51  ;;  %v15333_v53 = vpack.c.bf16 %v8495_v58, %v8494_v18  ;;  %v17340_v58 = vld [vmem:[#allocation20_spill] sm:$0xff]  ;;  %v5203_v16 = vmul.f32 %v15348_v60, %v17341_v44  ;;  %v17350_v44 = vld [vmem:[#allocation26_spill] sm:$0xff] }
 0x3c5   : > { %10245 = vmatmul.mubr.f32.gmra.mrb[12].mxu1 %v5196_v17  ;;  %v5199_v17 = vmul.f32 %v15315_v30, %v17337_v29  ;;  %v15366_v29 = vmax.f32 %v4963_v25, 0.0  ;;  %v17346_v25 = vld [vmem:[#allocation24_spill] sm:$0xff] }
 0x3c6   : > { %10247 = vmatprep.mubr.f32.mxu1 %v5197_v59  ;;  %11261 = vmatpush3.bf16.msra.mxu1 %v11258_v51  ;;  %v15341_v51 = vmax.f32 %v4959_v52, 0.0  ;;  %v17339_v59 = vld [vmem:[#allocation21_spill] sm:$0xff] }
 0x3c7   : > { %11263 = vmatprep.subr.bf16.mxu1 %v11262_v14  ;;  %v5201_v18 = vmul.f32 %v15335_v27, %v17339_v59 }
 0x3c8   : > { %v5202_v52 = vmul.f32 %v15341_v51, %v17340_v58 }
 0x3c9   : > { %10248 = vmatmul.mubr.f32.gmra.mrb[14].mxu1 %v5198_v34  ;;  %v4964_v34 = vadd.f32 %v15053_v15, %v15115_v32  ;;  %v5205_v32 = vmul.f32 %v15360_v61, %v17344_v55  ;;  %v17354_v55 = vld [vmem:[#allocation30_spill] sm:$0xff] }
 0x3ca   : > { %10250 = vmatprep.mubr.f32.mxu1 %v5199_v17  ;;  %11265 = vmatpush3.bf16.msra.mxu1 %v11262_v14  ;;  %v15354_v14 = vmax.f32 %v4961_v5, 0.0  ;;  %v4965_v17 = vadd.f32 %v15113_v3, %v15053_v15  ;;  %v17342_v5 = vld [vmem:[#allocation22_spill] sm:$0xff]  ;;  %v5206_v3 = vmul.f32 %v15366_v29, %v17346_v25 }
 0x3cb   : > { %11267 = vmatprep.subr.bf16.mxu1 %v15333_v53  ;;  %v15372_v19 = vmax.f32 %v4964_v34, 0.0 }
 0x3cc   : > { %v5204_v23 = vmul.f32 %v15354_v14, %v17342_v5  ;;  %v15378_v59 = vmax.f32 %v4965_v17, 0.0  ;;  %v17351_v17 = vld [vmem:[#allocation29_spill] sm:$0xff] }
 0x3cd   : > { %10251 = vmatmul.mubr.f32.gmra.mrb[16].mxu1 %v5200_v12  ;;  %17343 = vst [vmem:[#allocation9_spill] sm:$0xff] %v15372_v19  ;;  %v4966_v12 = vadd.f32 %v15053_v15, %v15119_v31 }
 0x3ce   : > { %10253 = vmatprep.mubr.f32.mxu1 %v5201_v18  ;;  %17345 = vst [vmem:[#allocation8_spill] sm:$0xff] %v15378_v59  ;;  %v4967_v18 = vadd.f32 %v15117_v1, %v15053_v15  ;;  %v17352_v1 = vld [vmem:[#allocation28_spill] sm:$0xff] }
 0x3cf   : > { %v15384_v58 = vmax.f32 %v4966_v12, 0.0 }
 0x3d0   : > { %v15388_v31 = vmax.f32 %v4967_v18, 0.0  ;;  %v17355_v18 = vld [vmem:[#allocation33_spill] sm:$0xff] }
 0x3d1   : > { %10254 = vmatmul.mubr.f32.gmra.mrb[18].mxu1 %v5202_v52  ;;  %17347 = vst [vmem:[#allocation11_spill] sm:$0xff] %v15384_v58  ;;  %v17348_v52 = vld [vmem:[#allocation27_spill] sm:$0xff]  ;;  %v5209_v5 = vmul.f32 %v15384_v58, %v17351_v17  ;;  %v5213_v25 = vmul.f32 %v15133_v10, %v17355_v18  ;;  %v8497_v17 = vld [vmem:[%s16509_s4 + $0x118] sm:$0xff]  ;;  %v8498_v18 = vld [vmem:[%s16509_s4 + $0x120] sm:$0xff] }
 0x3d2   : > { %10256 = vmatprep.mubr.f32.mxu1 %v5203_v16  ;;  %v5207_v34 = vmul.f32 %v15372_v19, %v17348_v52  ;;  %17349 = vst [vmem:[#allocation10_spill] sm:$0xff] %v15388_v31  ;;  %v5208_v16 = vmul.f32 %v15378_v59, %v17350_v44  ;;  %v5210_v15 = vmul.f32 %v15388_v31, %v17352_v1  ;;  %v17358_v1 = vld [vmem:[#allocation35_spill] sm:$0xff] }
 0x3d5   : > { %10257 = vmatmul.mubr.f32.gmra.mrb[20].mxu1 %v5204_v23  ;;  %v17353_v23 = vld [vmem:[#allocation31_spill] sm:$0xff] }
 0x3d6   : > { %10259 = vmatprep.mubr.f32.mxu1 %v5205_v32  ;;  %v5211_v12 = vmul.f32 %v15125_v54, %v17353_v23  ;;  %v5212_v32 = vmul.f32 %v15123_v46, %v17354_v55 }
 0x3d9   : > { %10260 = vmatmul.mubr.f32.gmra.mrb[22].mxu1 %v5206_v3  ;;  %v17356_v3 = vld [vmem:[#allocation32_spill] sm:$0xff] }
 0x3da   : > { %10262 = vmatprep.mubr.f32.mxu1 %v5207_v34  ;;  %v5214_v52 = vmul.f32 %v15130_v50, %v17356_v3  ;;  %v17357_v34 = vld [vmem:[#allocation36_spill] sm:$0xff]  ;;  %v17360_v3 = vrot.slane %v15057_v21, 7 }
 0x3db   : > { %v5135_v44 = vmul.f32 %v15187_v0, %v17357_v34  ;;  %v5053_v34 = vrot.slane %v15209_v9, 7 }
 0x3dd   : > { %10263 = vmatmul.mubr.f32.gmra.mrb[24].mxu1 %v5208_v16  ;;  %v8496_v16 = vld [vmem:[%s16509_s4 + $0x110] sm:$0xff]  ;;  %v15454_v42 = vsel %vm285_vm0, %v5053_v34, %v5055_v40 }
 0x3de   : > { %10265 = vmatprep.mubr.f32.mxu1 %v5209_v5  ;;  %v5049_v5 = vrot.slane %v15168_v33, 7  ;;  %v11270_v23 = vpack.c.bf16 %v8497_v17, %v8496_v16 }
 0x3e1   : > { %10266 = vmatmul.mubr.f32.gmra.mrb[26].mxu1 %v5210_v15  ;;  %v5136_v15 = vmul.f32 %v15190_v35, %v17358_v1  ;;  %v17362_v1 = vld [vmem:[#allocation43_spill] sm:$0xff] }
 0x3e2   : > { %10268 = vmatprep.mubr.f32.mxu1 %v5211_v12  ;;  %v17359_v12 = vld [vmem:[#allocation40_spill] sm:$0xff] }
 0x3e3   : > { %v5137_v55 = vmul.f32 %v15177_v20, %v17359_v12 }
 0x3e5   : > { %10269 = vmatmul.mubr.f32.gmra.mrb[28].mxu1 %v5212_v32  ;;  %v5051_v32 = vrot.slane %v15203_v38, 7 }
 0x3e6   : > { %10271 = vmatprep.mubr.f32.mxu1 %v5213_v25  ;;  %v8499_v25 = vld [vmem:[%s16509_s4 + $0x128] sm:$0xff] }
 0x3e7   : > { %v11274_v17 = vpack.c.bf16 %v8499_v25, %v8498_v18  ;;  %v5057_v18 = vrot.slane %v15223_v57, 7 }
 0x3e9   : > { %10272 = vmatmul.mubr.f32.gmra.mrb[30].mxu1 %v5214_v52  ;;  %v15427_v52 = vsel %vm285_vm0, %v17360_v3, %v5049_v5  ;;  %v8500_v3 = vld [vmem:[%s16509_s4 + $0x130] sm:$0xff] }
 0x3ea   : > { %10306 = vmatprep.mubr.f32.mxu1 %v5135_v44  ;;  %v17361_v44 = vld [vmem:[#allocation39_spill] sm:$0xff]  ;;  %v5139_v12 = vmul.f32 %v15427_v52, %v17362_v1  ;;  %v17364_v1 = vld [vmem:[#allocation45_spill] sm:$0xff] }
 0x3eb   : > { %v5138_v16 = vmul.f32 %v15072_v13, %v17361_v44 }
 0x3ed   : > { %10307 = vmatmul.mubr.f32.vlgmr.msra.gmra.mrb[0].mxu1 %v5136_v15  ;;  %v15436_v15 = vsel %vm285_vm0, %v5049_v5, %v5051_v32  ;;  %v17363_v5 = vld [vmem:[#allocation42_spill] sm:$0xff] }
 0x3ee   : > { %11269 = vmatpush3.bf16.msra.mxu1 %v15333_v53  ;;  %10309 = vmatprep.mubr.f32.mxu1 %v5137_v55  ;;  %v8501_v53 = vld [vmem:[%s16509_s4 + $0x138] sm:$0xff]  ;;  %v15446_v55 = vsel %vm285_vm0, %v5051_v32, %v5053_v34  ;;  %v5140_v25 = vmul.f32 %v15436_v15, %v17363_v5  ;;  %v8502_v32 = vld [vmem:[%s16509_s4 + $0x140] sm:$0xff]  ;;  %v17365_v34 = vld [vmem:[#allocation44_spill] sm:$0xff] }
 0x3ef   : > { %11271 = vmatprep.subr.bf16.mxu1 %v11270_v23  ;;  %v11278_v44 = vpack.c.bf16 %v8501_v53, %v8500_v3  ;;  %v5141_v8 = vmul.f32 %v15446_v55, %v17364_v1  ;;  %v5061_v3 = vrot.slane %v15257_v22, 7  ;;  %v5142_v53 = vmul.f32 %v15454_v42, %v17365_v34  ;;  %v17366_v1 = vld [vmem:[#allocation47_spill] sm:$0xff] }
 0x3f1   : > { %10310 = vmatmul.mubr.f32.gmra.mrb[2].mxu1 %v5138_v16  ;;  %v5059_v16 = vrot.slane %v15240_v6, 7 }
 0x3f2   : > { %10312 = vmatprep.mubr.f32.mxu1 %v5139_v12  ;;  %11273 = vmatpush3.bf16.msra.mxu1 %v11270_v23  ;;  %v8503_v23 = vld [vmem:[%s16509_s4 + $0x148] sm:$0xff]  ;;  %v15464_v12 = vsel %vm285_vm0, %v5055_v40, %v5057_v18  ;;  %v8504_v40 = vld [vmem:[%s16509_s4 + $0x150] sm:$0xff] }
 0x3f3   : > { %11275 = vmatprep.subr.bf16.mxu1 %v11274_v17  ;;  %v11282_v5 = vpack.c.bf16 %v8503_v23, %v8502_v32  ;;  %v5143_v24 = vmul.f32 %v15464_v12, %v17366_v1  ;;  %v15472_v50 = vsel %vm285_vm0, %v5057_v18, %v5059_v16  ;;  %v5065_v32 = vrot.slane %v15279_v37, 7  ;;  %v17368_v18 = vld [vmem:[#allocation46_spill] sm:$0xff]  ;;  %v17369_v1 = vld [vmem:[#allocation49_spill] sm:$0xff] }
 0x3f4   : > { %v5144_v23 = vmul.f32 %v15472_v50, %v17368_v18 }
 0x3f5   : > { %10313 = vmatmul.mubr.f32.gmra.mrb[4].mxu1 %v5140_v25  ;;  %v5063_v25 = vrot.slane %v15273_v4, 7 }
 0x3f6   : > { %10315 = vmatprep.mubr.f32.mxu1 %v5141_v8  ;;  %11277 = vmatpush3.bf16.msra.mxu1 %v11274_v17  ;;  %v8505_v8 = vld [vmem:[%s16509_s4 + $0x158] sm:$0xff]  ;;  %v15482_v17 = vsel %vm285_vm0, %v5059_v16, %v5061_v3  ;;  %v8506_v16 = vld [vmem:[%s16509_s4 + $0x160] sm:$0xff] }
 0x3f7   : > { %11279 = vmatprep.subr.bf16.mxu1 %v11278_v44  ;;  %17367 = vst [vmem:[#allocation13_spill] sm:$0xff] %v15482_v17  ;;  %v11286_v34 = vpack.c.bf16 %v8505_v8, %v8504_v40  ;;  %v5145_v10 = vmul.f32 %v15482_v17, %v17369_v1  ;;  %v15490_v46 = vsel %vm285_vm0, %v5061_v3, %v5063_v25  ;;  %v5069_v40 = vrot.slane %v15297_v45, 7  ;;  %v17372_v3 = vld [vmem:[#allocation48_spill] sm:$0xff]  ;;  %v17373_v1 = vld [vmem:[#allocation51_spill] sm:$0xff] }
 0x3f8   : > { %17370 = vst [vmem:[#allocation12_spill] sm:$0xff] %v15490_v46  ;;  %v5146_v8 = vmul.f32 %v15490_v46, %v17372_v3 }
 0x3f9   : > { %10316 = vmatmul.mubr.f32.gmra.mrb[6].mxu1 %v5142_v53  ;;  %v5067_v53 = vrot.slane %v15291_v39, 7 }
 0x3fa   : > { %10318 = vmatprep.mubr.f32.mxu1 %v5143_v24  ;;  %11281 = vmatpush3.bf16.msra.mxu1 %v11278_v44  ;;  %v8507_v24 = vld [vmem:[%s16509_s4 + $0x168] sm:$0xff]  ;;  %v15500_v44 = vsel %vm285_vm0, %v5063_v25, %v5065_v32  ;;  %v8508_v25 = vld [vmem:[%s16509_s4 + $0x170] sm:$0xff] }
 0x3fb   : > { %11283 = vmatprep.subr.bf16.mxu1 %v11282_v5  ;;  %17371 = vst [vmem:[#allocation15_spill] sm:$0xff] %v15500_v44  ;;  %v11290_v18 = vpack.c.bf16 %v8507_v24, %v8506_v16  ;;  %v5147_v49 = vmul.f32 %v15500_v44, %v17373_v1  ;;  %v15508_v35 = vsel %vm285_vm0, %v5065_v32, %v5067_v53  ;;  %v5073_v16 = vrot.slane %v15315_v30, 7  ;;  %v17376_v32 = vld [vmem:[#allocation50_spill] sm:$0xff] }
 0x3fc   : > { %17374 = vst [vmem:[#allocation14_spill] sm:$0xff] %v15508_v35  ;;  %v5148_v24 = vmul.f32 %v15508_v35, %v17376_v32  ;;  %v17377_v1 = vld [vmem:[#allocation54_spill] sm:$0xff] }
 0x3fd   : > { %10319 = vmatmul.mubr.f32.gmra.mrb[8].mxu1 %v5144_v23  ;;  %v5071_v23 = vrot.slane %v15309_v43, 7 }
 0x3fe   : > { %10321 = vmatprep.mubr.f32.mxu1 %v5145_v10  ;;  %11285 = vmatpush3.bf16.msra.mxu1 %v11282_v5  ;;  %v8509_v10 = vld [vmem:[%s16509_s4 + $0x178] sm:$0xff]  ;;  %v15518_v5 = vsel %vm285_vm0, %v5067_v53, %v5069_v40  ;;  %v8510_v53 = vld [vmem:[%s16509_s4 + $0x180] sm:$0xff] }
 0x3ff   : > { %11287 = vmatprep.subr.bf16.mxu1 %v11286_v34  ;;  %17375 = vst [vmem:[#allocation17_spill] sm:$0xff] %v15518_v5  ;;  %v11294_v3 = vpack.c.bf16 %v8509_v10, %v8508_v25  ;;  %v5149_v0 = vmul.f32 %v15518_v5, %v17377_v1  ;;  %v15526_v44 = vsel %vm285_vm0, %v5069_v40, %v5071_v23  ;;  %v5077_v25 = vrot.slane %v15335_v27, 7  ;;  %v17380_v40 = vld [vmem:[#allocation53_spill] sm:$0xff] }
 0x400   : > { %17378 = vst [vmem:[#allocation16_spill] sm:$0xff] %v15526_v44  ;;  %v5150_v10 = vmul.f32 %v15526_v44, %v17380_v40  ;;  %v17381_v1 = vld [vmem:[#allocation57_spill] sm:$0xff] }
 0x401   : > { %10322 = vmatmul.mubr.f32.gmra.mrb[10].mxu1 %v5146_v8  ;;  %v5075_v8 = vrot.slane %v15327_v56, 7 }
 0x402   : > { %10324 = vmatprep.mubr.f32.mxu1 %v5147_v49  ;;  %11289 = vmatpush3.bf16.msra.mxu1 %v11286_v34  ;;  %v8511_v49 = vld [vmem:[%s16509_s4 + $0x188] sm:$0xff]  ;;  %v15536_v34 = vsel %vm285_vm0, %v5071_v23, %v5073_v16 }
 0x403   : > { %11291 = vmatprep.subr.bf16.mxu1 %v11290_v18  ;;  %17379 = vst [vmem:[#allocation19_spill] sm:$0xff] %v15536_v34  ;;  %v15541_v32 = vpack.c.bf16 %v8511_v49, %v8510_v53  ;;  %v5151_v5 = vmul.f32 %v15536_v34, %v17381_v1  ;;  %v15546_v35 = vsel %vm285_vm0, %v5073_v16, %v5075_v8  ;;  %v17385_v49 = vld [vmem:[#allocation59_spill] sm:$0xff] }
 0x404   : > { %17382 = vst [vmem:[#allocation18_spill] sm:$0xff] %v15546_v35  ;;  %v15550_v23 = vsel %vm285_vm0, %v5075_v8, %v5077_v25  ;;  %v17393_v34 = vld [vmem:[#allocation67_spill] sm:$0xff] }
 0x405   : > { %10325 = vmatmul.mubr.f32.gmra.mrb[12].mxu1 %v5148_v24  ;;  %v5079_v24 = vrot.slane %v15341_v51, 7  ;;  %17383 = vst [vmem:[#allocation21_spill] sm:$0xff] %v15550_v23  ;;  %v5153_v40 = vmul.f32 %v15550_v23, %v17385_v49  ;;  %v17392_v23 = vld [vmem:[#allocation62_spill] sm:$0xff] }
 0x406   : > { %10327 = vmatprep.mubr.f32.mxu1 %v5149_v0  ;;  %11293 = vmatpush3.bf16.msra.mxu1 %v11290_v18  ;;  %v5081_v0 = vrot.slane %v15348_v60, 7  ;;  %v17384_v18 = vld [vmem:[#allocation56_spill] sm:$0xff] }
 0x407   : > { %11295 = vmatprep.subr.bf16.mxu1 %v11294_v3  ;;  %v5152_v53 = vmul.f32 %v15546_v35, %v17384_v18  ;;  %v15559_v16 = vsel %vm285_vm0, %v5077_v25, %v5079_v24  ;;  %v17389_v18 = vld [vmem:[#allocation63_spill] sm:$0xff]  ;;  %v5087_v25 = vrot.slane %v15366_v29, 7 }
 0x408   : > { %17386 = vst [vmem:[#allocation20_spill] sm:$0xff] %v15559_v16  ;;  %v15563_v8 = vsel %vm285_vm0, %v5079_v24, %v5081_v0  ;;  %v5089_v24 = vrot.slane %v15372_v19, 7 }
 0x409   : > { %10328 = vmatmul.mubr.f32.gmra.mrb[14].mxu1 %v5150_v10  ;;  %v5083_v10 = vrot.slane %v15354_v14, 7  ;;  %17387 = vst [vmem:[#allocation23_spill] sm:$0xff] %v15563_v8  ;;  %v5155_v35 = vmul.f32 %v15563_v8, %v17389_v18  ;;  %v17395_v8 = vld [vmem:[#allocation66_spill] sm:$0xff] }
 0x40a   : > { %10330 = vmatprep.mubr.f32.mxu1 %v5151_v5  ;;  %11297 = vmatpush3.bf16.msra.mxu1 %v11294_v3  ;;  %v5085_v5 = vrot.slane %v15360_v61, 7  ;;  %v17388_v3 = vld [vmem:[#allocation58_spill] sm:$0xff] }
 0x40b   : > { %11299 = vmatprep.subr.bf16.mxu1 %v15541_v32  ;;  %v5154_v1 = vmul.f32 %v15559_v16, %v17388_v3  ;;  %v15571_v49 = vsel %vm285_vm0, %v5081_v0, %v5083_v10  ;;  %v5091_v0 = vrot.slane %v15378_v59, 7  ;;  %v17396_v16 = vld [vmem:[#allocation70_spill] sm:$0xff] }
 0x40c   : > { %17390 = vst [vmem:[#allocation22_spill] sm:$0xff] %v15571_v49  ;;  %v15583_v18 = vsel %vm285_vm0, %v5085_v5, %v5087_v25 }
 0x40d   : > { %10331 = vmatmul.mubr.f32.gmra.mrb[16].mxu1 %v5152_v53  ;;  %v15575_v53 = vsel %vm285_vm0, %v5083_v10, %v5085_v5  ;;  %v5093_v10 = vrot.slane %v15384_v58, 7  ;;  %v5095_v5 = vrot.slane %v15388_v31, 7 }
 0x40e   : > { %10333 = vmatprep.mubr.f32.mxu1 %v5153_v40  ;;  %17391 = vst [vmem:[#allocation25_spill] sm:$0xff] %v15575_v53  ;;  %v5156_v40 = vmul.f32 %v15571_v49, %v17392_v23  ;;  %v5157_v3 = vmul.f32 %v15575_v53, %v17393_v34  ;;  %v15595_v34 = vsel %vm285_vm0, %v5089_v24, %v5091_v0 }
 0x411   : > { %10334 = vmatmul.mubr.f32.gmra.mrb[18].mxu1 %v5154_v1  ;;  %v15587_v1 = vsel %vm285_vm0, %v5087_v25, %v5089_v24  ;;  %v17398_v25 = vld [vmem:[#allocation69_spill] sm:$0xff] }
 0x412   : > { %10336 = vmatprep.mubr.f32.mxu1 %v5155_v35  ;;  %17394 = vst [vmem:[#allocation24_spill] sm:$0xff] %v15587_v1  ;;  %v5158_v35 = vmul.f32 %v15583_v18, %v17395_v8  ;;  %v5159_v23 = vmul.f32 %v15587_v1, %v17396_v16  ;;  %v5160_v53 = vmul.f32 %v15595_v34, %v17398_v25  ;;  %v17401_v16 = vrot.slane %v15125_v54, 7  ;;  %v17405_v25 = vld [vmem:[#allocation75_spill] sm:$0xff] }
 0x413   : > { %v15606_v8 = vsel %vm285_vm0, %v5093_v10, %v5095_v5 }
 0x414   : > { %17400 = vst [vmem:[#allocation26_spill] sm:$0xff] %v15606_v8  ;;  %v15611_v24 = vsel %vm285_vm0, %v5095_v5, %v17401_v16 }
 0x415   : > { %10337 = vmatmul.mubr.f32.gmra.mrb[20].mxu1 %v5156_v40  ;;  %v15599_v40 = vsel %vm285_vm0, %v5091_v0, %v5093_v10  ;;  %17402 = vst [vmem:[#allocation29_spill] sm:$0xff] %v15611_v24  ;;  %v17406_v10 = vld [vmem:[#allocation80_spill] sm:$0xff] }
 0x416   : > { %10339 = vmatprep.mubr.f32.mxu1 %v5157_v3  ;;  %17397 = vst [vmem:[#allocation27_spill] sm:$0xff] %v15599_v40  ;;  %v17399_v3 = vld [vmem:[#allocation73_spill] sm:$0xff] }
 0x417   : > { %v5161_v49 = vmul.f32 %v15599_v40, %v17399_v3  ;;  %v5164_v3 = vmul.f32 %v15147_v41, %v17405_v25  ;;  %v17407_v40 = vld [vmem:[#allocation79_spill] sm:$0xff] }
 0x418   : > { %v5166_v5 = vmul.f32 %v15159_v62, %v17407_v40  ;;  %v17409_v25 = vld [vmem:[#allocation83_spill] sm:$0xff] }
 0x419   : > { %10340 = vmatmul.mubr.f32.gmra.mrb[22].mxu1 %v5158_v35  ;;  %v17403_v35 = vld [vmem:[#allocation72_spill] sm:$0xff]  ;;  %v5780_v40 = vmul.f32 %v15198_v26, %v17409_v25  ;;  %v17414_v25 = vld [vmem:[#allocation86_spill] sm:$0xff]  ;;  %v17415_v26 = vld [vmem:[#allocation89_spill] sm:$0xff] }
 0x41a   : > { %10342 = vmatprep.mubr.f32.mxu1 %v5159_v23  ;;  %v5162_v0 = vmul.f32 %v15606_v8, %v17403_v35  ;;  %v17404_v23 = vld [vmem:[#allocation76_spill] sm:$0xff]  ;;  %v5690_v35 = vrot.slane %v15168_v33, 1  ;;  %v5694_v33 = vrot.slane %v15209_v9, 1 }
 0x41b   : > { %v5163_v1 = vmul.f32 %v15611_v24, %v17404_v23  ;;  %v5692_v23 = vrot.slane %v15203_v38, 1 }
 0x41d   : > { %10343 = vmatmul.mubr.f32.gmra.mrb[24].mxu1 %v5160_v53  ;;  %v5165_v53 = vmul.f32 %v15156_v48, %v17406_v10  ;;  %v17410_v10 = vld [vmem:[#allocation87_spill] sm:$0xff]  ;;  %v15659_v9 = vsel %vm1344_vm1, %v5692_v23, %v5694_v33 }
 0x41e   : > { %10345 = vmatprep.mubr.f32.mxu1 %v5161_v49  ;;  %v17408_v49 = vld [vmem:[#allocation84_spill] sm:$0xff]  ;;  %17416 = vst [vmem:[#allocation30_spill] sm:$0xff] %v15659_v9 }
 0x41f   : > { %v5779_v16 = vmul.f32 %v15193_v7, %v17408_v49  ;;  %v17411_v49 = vrot.slane %v15057_v21, 1 }
 0x421   : > { %10346 = vmatmul.mubr.f32.gmra.mrb[26].mxu1 %v5162_v0  ;;  %v8513_v0 = vld [vmem:[%s16509_s4 + $0x198] sm:$0xff]  ;;  %v15640_v7 = vsel %vm1344_vm1, %v17411_v49, %v5690_v35 }
 0x422   : > { %10348 = vmatprep.mubr.f32.mxu1 %v5163_v1  ;;  %v8512_v1 = vld [vmem:[%s16509_s4 + $0x190] sm:$0xff]  ;;  %17412 = vst [vmem:[#allocation28_spill] sm:$0xff] %v15640_v7 }
 0x425   : > { %10349 = vmatmul.mubr.f32.gmra.mrb[28].mxu1 %v5164_v3  ;;  %v11302_v3 = vpack.c.bf16 %v8513_v0, %v8512_v1  ;;  %v15650_v1 = vsel %vm1344_vm1, %v5690_v35, %v5692_v23  ;;  %v5696_v0 = vrot.slane %v15219_v47, 1  ;;  %v8516_v35 = vld [vmem:[%s16509_s4 + $0x1b0] sm:$0xff] }
 0x426   : > { %10351 = vmatprep.mubr.f32.mxu1 %v5165_v53  ;;  %v5781_v53 = vmul.f32 %v15079_v2, %v17410_v10  ;;  %17413 = vst [vmem:[#allocation31_spill] sm:$0xff] %v15650_v1  ;;  %v5782_v10 = vmul.f32 %v15640_v7, %v17414_v25  ;;  %v5783_v2 = vmul.f32 %v15650_v1, %v17415_v26  ;;  %v17418_v26 = vld [vmem:[#allocation88_spill] sm:$0xff]  ;;  %v17419_v25 = vld [vmem:[#allocation91_spill] sm:$0xff] }
 0x427   : > { %v5784_v23 = vmul.f32 %v15659_v9, %v17418_v26 }
 0x429   : > { %10352 = vmatmul.mubr.f32.gmra.mrb[30].mxu1 %v5166_v5  ;;  %v8514_v5 = vld [vmem:[%s16509_s4 + $0x1a0] sm:$0xff] }
 0x42a   : > { %10386 = vmatprep.mubr.f32.mxu1 %v5779_v16  ;;  %v8515_v16 = vld [vmem:[%s16509_s4 + $0x1a8] sm:$0xff] }
 0x42b   : > { %v11306_v49 = vpack.c.bf16 %v8515_v16, %v8514_v5  ;;  %v5700_v5 = vrot.slane %v15240_v6, 1 }
 0x42d   : > { %10387 = vmatmul.mubr.f32.vlgmr.msra.gmra.mrb[0].mxu1 %v5780_v40  ;;  %v5698_v40 = vrot.slane %v15223_v57, 1 }
 0x42e   : > { %11301 = vmatpush3.bf16.msra.mxu1 %v15541_v32  ;;  %10389 = vmatprep.mubr.f32.mxu1 %v5781_v53  ;;  %v8517_v32 = vld [vmem:[%s16509_s4 + $0x1b8] sm:$0xff]  ;;  %v15669_v53 = vsel %vm1344_vm1, %v5694_v33, %v5696_v0  ;;  %v8518_v33 = vld [vmem:[%s16509_s4 + $0x1c0] sm:$0xff] }
 0x42f   : > { %11303 = vmatprep.subr.bf16.mxu1 %v11302_v3  ;;  %17417 = vst [vmem:[#allocation33_spill] sm:$0xff] %v15669_v53  ;;  %v11310_v16 = vpack.c.bf16 %v8517_v32, %v8516_v35  ;;  %v5785_v1 = vmul.f32 %v15669_v53, %v17419_v25  ;;  %v15677_v7 = vsel %vm1344_vm1, %v5696_v0, %v5698_v40  ;;  %v5704_v35 = vrot.slane %v15273_v4, 1  ;;  %v17422_v0 = vld [vmem:[#allocation90_spill] sm:$0xff]  ;;  %v17423_v25 = vld [vmem:[#allocation93_spill] sm:$0xff] }
 0x430   : > { %17420 = vst [vmem:[#allocation32_spill] sm:$0xff] %v15677_v7  ;;  %v5786_v32 = vmul.f32 %v15677_v7, %v17422_v0 }
 0x431   : > { %10390 = vmatmul.mubr.f32.gmra.mrb[2].mxu1 %v5782_v10  ;;  %v5702_v10 = vrot.slane %v15257_v22, 1 }
 0x432   : > { %10392 = vmatprep.mubr.f32.mxu1 %v5783_v2  ;;  %11305 = vmatpush3.bf16.msra.mxu1 %v11302_v3  ;;  %v8519_v2 = vld [vmem:[%s16509_s4 + $0x1c8] sm:$0xff]  ;;  %v15687_v3 = vsel %vm1344_vm1, %v5698_v40, %v5700_v5  ;;  %v8520_v40 = vld [vmem:[%s16509_s4 + $0x1d0] sm:$0xff] }
 0x433   : > { %11307 = vmatprep.subr.bf16.mxu1 %v11306_v49  ;;  %17421 = vst [vmem:[#allocation36_spill] sm:$0xff] %v15687_v3  ;;  %v11314_v26 = vpack.c.bf16 %v8519_v2, %v8518_v33  ;;  %v5787_v53 = vmul.f32 %v15687_v3, %v17423_v25  ;;  %v15695_v9 = vsel %vm1344_vm1, %v5700_v5, %v5702_v10  ;;  %v5708_v33 = vrot.slane %v15291_v39, 1  ;;  %v17426_v5 = vld [vmem:[#allocation92_spill] sm:$0xff]  ;;  %v17427_v25 = vld [vmem:[#allocation95_spill] sm:$0xff] }
 0x434   : > { %17424 = vst [vmem:[#allocation35_spill] sm:$0xff] %v15695_v9  ;;  %v5788_v2 = vmul.f32 %v15695_v9, %v17426_v5 }
 0x435   : > { %10393 = vmatmul.mubr.f32.gmra.mrb[4].mxu1 %v5784_v23  ;;  %v5706_v23 = vrot.slane %v15279_v37, 1 }
 0x436   : > { %10395 = vmatprep.mubr.f32.mxu1 %v5785_v1  ;;  %11309 = vmatpush3.bf16.msra.mxu1 %v11306_v49  ;;  %v8521_v1 = vld [vmem:[%s16509_s4 + $0x1d8] sm:$0xff]  ;;  %v15705_v49 = vsel %vm1344_vm1, %v5702_v10, %v5704_v35  ;;  %v8522_v10 = vld [vmem:[%s16509_s4 + $0x1e0] sm:$0xff] }
 0x437   : > { %11311 = vmatprep.subr.bf16.mxu1 %v11310_v16  ;;  %17425 = vst [vmem:[#allocation40_spill] sm:$0xff] %v15705_v49  ;;  %v11318_v0 = vpack.c.bf16 %v8521_v1, %v8520_v40  ;;  %v5789_v3 = vmul.f32 %v15705_v49, %v17427_v25  ;;  %v15713_v7 = vsel %vm1344_vm1, %v5704_v35, %v5706_v23  ;;  %v5712_v40 = vrot.slane %v15309_v43, 1  ;;  %v17430_v35 = vld [vmem:[#allocation94_spill] sm:$0xff]  ;;  %v17431_v25 = vld [vmem:[#allocation97_spill] sm:$0xff] }
 0x438   : > { %17428 = vst [vmem:[#allocation39_spill] sm:$0xff] %v15713_v7  ;;  %v5790_v1 = vmul.f32 %v15713_v7, %v17430_v35 }
 0x439   : > { %10396 = vmatmul.mubr.f32.gmra.mrb[6].mxu1 %v5786_v32  ;;  %v5710_v32 = vrot.slane %v15297_v45, 1 }
 0x43a   : > { %10398 = vmatprep.mubr.f32.mxu1 %v5787_v53  ;;  %11313 = vmatpush3.bf16.msra.mxu1 %v11310_v16  ;;  %v8523_v53 = vld [vmem:[%s16509_s4 + $0x1e8] sm:$0xff]  ;;  %v15723_v16 = vsel %vm1344_vm1, %v5706_v23, %v5708_v33  ;;  %v8524_v23 = vld [vmem:[%s16509_s4 + $0x1f0] sm:$0xff] }
 0x43b   : > { %11315 = vmatprep.subr.bf16.mxu1 %v11314_v26  ;;  %17429 = vst [vmem:[#allocation43_spill] sm:$0xff] %v15723_v16  ;;  %v11322_v5 = vpack.c.bf16 %v8523_v53, %v8522_v10  ;;  %v5791_v49 = vmul.f32 %v15723_v16, %v17431_v25  ;;  %v15731_v9 = vsel %vm1344_vm1, %v5708_v33, %v5710_v32  ;;  %v5716_v10 = vrot.slane %v15327_v56, 1  ;;  %v17434_v33 = vld [vmem:[#allocation96_spill] sm:$0xff]  ;;  %v17435_v25 = vld [vmem:[#allocation99_spill] sm:$0xff] }
 0x43c   : > { %17432 = vst [vmem:[#allocation42_spill] sm:$0xff] %v15731_v9  ;;  %v5792_v53 = vmul.f32 %v15731_v9, %v17434_v33 }
 0x43d   : > { %10399 = vmatmul.mubr.f32.gmra.mrb[8].mxu1 %v5788_v2  ;;  %v5714_v2 = vrot.slane %v15315_v30, 1 }
 0x43e   : > { %10401 = vmatprep.mubr.f32.mxu1 %v5789_v3  ;;  %11317 = vmatpush3.bf16.msra.mxu1 %v11314_v26  ;;  %v8525_v3 = vld [vmem:[%s16509_s4 + $0x1f8] sm:$0xff]  ;;  %v15741_v26 = vsel %vm1344_vm1, %v5710_v32, %v5712_v40  ;;  %v8526_v32 = vld [vmem:[%s16509_s4 + $0x200] sm:$0xff] }
 0x43f   : > { %11319 = vmatprep.subr.bf16.mxu1 %v11318_v0  ;;  %17433 = vst [vmem:[#allocation45_spill] sm:$0xff] %v15741_v26  ;;  %v11326_v35 = vpack.c.bf16 %v8525_v3, %v8524_v23  ;;  %v5793_v16 = vmul.f32 %v15741_v26, %v17435_v25  ;;  %v15749_v7 = vsel %vm1344_vm1, %v5712_v40, %v5714_v2  ;;  %v5720_v23 = vrot.slane %v15341_v51, 1  ;;  %v17438_v40 = vld [vmem:[#allocation98_spill] sm:$0xff]  ;;  %v17439_v25 = vld [vmem:[#allocation101_spill] sm:$0xff] }
 0x440   : > { %17436 = vst [vmem:[#allocation44_spill] sm:$0xff] %v15749_v7  ;;  %v5794_v3 = vmul.f32 %v15749_v7, %v17438_v40 }
 0x441   : > { %10402 = vmatmul.mubr.f32.gmra.mrb[10].mxu1 %v5790_v1  ;;  %v5718_v1 = vrot.slane %v15335_v27, 1 }
 0x442   : > { %10404 = vmatprep.mubr.f32.mxu1 %v5791_v49  ;;  %11321 = vmatpush3.bf16.msra.mxu1 %v11318_v0  ;;  %v8527_v49 = vld [vmem:[%s16509_s4 + $0x208] sm:$0xff]  ;;  %v15759_v0 = vsel %vm1344_vm1, %v5714_v2, %v5716_v10 }
 0x443   : > { %11323 = vmatprep.subr.bf16.mxu1 %v11322_v5  ;;  %17437 = vst [vmem:[#allocation47_spill] sm:$0xff] %v15759_v0  ;;  %v15764_v33 = vpack.c.bf16 %v8527_v49, %v8526_v32  ;;  %v5795_v26 = vmul.f32 %v15759_v0, %v17439_v25  ;;  %v15769_v9 = vsel %vm1344_vm1, %v5716_v10, %v5718_v1  ;;  %v17443_v49 = vld [vmem:[#allocation103_spill] sm:$0xff] }
 0x444   : > { %17440 = vst [vmem:[#allocation46_spill] sm:$0xff] %v15769_v9  ;;  %v15773_v2 = vsel %vm1344_vm1, %v5718_v1, %v5720_v23  ;;  %v17451_v0 = vld [vmem:[#allocation107_spill] sm:$0xff] }
 0x445   : > { %10405 = vmatmul.mubr.f32.gmra.mrb[12].mxu1 %v5792_v53  ;;  %v5722_v53 = vrot.slane %v15348_v60, 1  ;;  %17441 = vst [vmem:[#allocation49_spill] sm:$0xff] %v15773_v2  ;;  %v5797_v40 = vmul.f32 %v15773_v2, %v17443_v49  ;;  %v17450_v2 = vld [vmem:[#allocation104_spill] sm:$0xff] }
 0x446   : > { %10407 = vmatprep.mubr.f32.mxu1 %v5793_v16  ;;  %11325 = vmatpush3.bf16.msra.mxu1 %v11322_v5  ;;  %v5724_v16 = vrot.slane %v15354_v14, 1  ;;  %v17442_v5 = vld [vmem:[#allocation100_spill] sm:$0xff] }
 0x447   : > { %11327 = vmatprep.subr.bf16.mxu1 %v11326_v35  ;;  %v5796_v32 = vmul.f32 %v15769_v9, %v17442_v5  ;;  %v15782_v10 = vsel %vm1344_vm1, %v5720_v23, %v5722_v53  ;;  %v17447_v5 = vld [vmem:[#allocation105_spill] sm:$0xff]  ;;  %v5730_v23 = vrot.slane %v15372_v19, 1 }
 0x448   : > { %17444 = vst [vmem:[#allocation48_spill] sm:$0xff] %v15782_v10  ;;  %v15786_v1 = vsel %vm1344_vm1, %v5722_v53, %v5724_v16  ;;  %v5732_v53 = vrot.slane %v15378_v59, 1 }
 0x449   : > { %10408 = vmatmul.mubr.f32.gmra.mrb[14].mxu1 %v5794_v3  ;;  %v5726_v3 = vrot.slane %v15360_v61, 1  ;;  %17445 = vst [vmem:[#allocation51_spill] sm:$0xff] %v15786_v1  ;;  %v5799_v9 = vmul.f32 %v15786_v1, %v17447_v5  ;;  %v17452_v1 = vld [vmem:[#allocation106_spill] sm:$0xff] }
 0x44a   : > { %10410 = vmatprep.mubr.f32.mxu1 %v5795_v26  ;;  %11329 = vmatpush3.bf16.msra.mxu1 %v11326_v35  ;;  %v5728_v26 = vrot.slane %v15366_v29, 1  ;;  %v17446_v35 = vld [vmem:[#allocation102_spill] sm:$0xff] }
 0x44b   : > { %11331 = vmatprep.subr.bf16.mxu1 %v15764_v33  ;;  %v5798_v25 = vmul.f32 %v15782_v10, %v17446_v35  ;;  %v15794_v49 = vsel %vm1344_vm1, %v5724_v16, %v5726_v3  ;;  %v5734_v16 = vrot.slane %v15384_v58, 1  ;;  %v17453_v10 = vld [vmem:[#allocation111_spill] sm:$0xff] }
 0x44c   : > { %17448 = vst [vmem:[#allocation50_spill] sm:$0xff] %v15794_v49  ;;  %v15806_v5 = vsel %vm1344_vm1, %v5728_v26, %v5730_v23 }
 0x44d   : > { %10411 = vmatmul.mubr.f32.gmra.mrb[16].mxu1 %v5796_v32  ;;  %v15798_v32 = vsel %vm1344_vm1, %v5726_v3, %v5728_v26  ;;  %v5736_v3 = vrot.slane %v15388_v31, 1 }
 0x44e   : > { %10413 = vmatprep.mubr.f32.mxu1 %v5797_v40  ;;  %17449 = vst [vmem:[#allocation54_spill] sm:$0xff] %v15798_v32  ;;  %v5800_v40 = vmul.f32 %v15794_v49, %v17450_v2  ;;  %v5801_v35 = vmul.f32 %v15798_v32, %v17451_v0  ;;  %v15818_v0 = vsel %vm1344_vm1, %v5732_v53, %v5734_v16  ;;  %v17457_v32 = vld [vmem:[#allocation115_spill] sm:$0xff]  ;;  %v17458_v49 = vrot.slane %v15125_v54, 1 }
 0x44f   : > { %17454 = vst [vmem:[#allocation53_spill] sm:$0xff] %v15818_v0  ;;  %v15821_v26 = vsel %vm1344_vm1, %v5734_v16, %v5736_v3 }
 0x450   : > { %17455 = vst [vmem:[#allocation57_spill] sm:$0xff] %v15821_v26 }
 0x451   : > { %10414 = vmatmul.mubr.f32.gmra.mrb[18].mxu1 %v5798_v25  ;;  %v15810_v25 = vsel %vm1344_vm1, %v5730_v23, %v5732_v53 }
 0x452   : > { %10416 = vmatprep.mubr.f32.mxu1 %v5799_v9  ;;  %v5802_v9 = vmul.f32 %v15806_v5, %v17452_v1  ;;  %v5803_v2 = vmul.f32 %v15810_v25, %v17453_v10  ;;  %v15830_v1 = vsel %vm1344_vm1, %v5736_v3, %v17458_v49  ;;  %v17459_v10 = vld [vmem:[#allocation114_spill] sm:$0xff]  ;;  %v17463_v49 = vld [vmem:[#allocation119_spill] sm:$0xff] }
 0x453   : > { %v5806_v53 = vmul.f32 %v15830_v1, %v17459_v10  ;;  %v5810_v3 = vmul.f32 %v15271_v11, %v17463_v49  ;;  %v8528_v10 = vld [vmem:[%s16509_s4 + $0x210] sm:$0xff]  ;;  %v8531_v49 = vld [vmem:[%s16509_s4 + $0x228] sm:$0xff] }
 0x455   : > { %10417 = vmatmul.mubr.f32.gmra.mrb[20].mxu1 %v5800_v40  ;;  %v17456_v40 = vld [vmem:[#allocation110_spill] sm:$0xff] }
 0x456   : > { %10419 = vmatprep.mubr.f32.mxu1 %v5801_v35  ;;  %v5804_v23 = vmul.f32 %v15818_v0, %v17456_v40  ;;  %v5805_v35 = vmul.f32 %v15821_v26, %v17457_v32  ;;  %v17462_v0 = vld [vmem:[#allocation120_spill] sm:$0xff] }
 0x457   : > { %v5809_v32 = vmul.f32 %v15268_v28, %v17462_v0 }
 0x459   : > { %10420 = vmatmul.mubr.f32.gmra.mrb[22].mxu1 %v5802_v9  ;;  %v17460_v9 = vld [vmem:[#allocation117_spill] sm:$0xff] }
 0x45a   : > { %10422 = vmatprep.mubr.f32.mxu1 %v5803_v2  ;;  %v5807_v16 = vmul.f32 %v15252_v63, %v17460_v9  ;;  %v17461_v2 = vld [vmem:[#allocation116_spill] sm:$0xff]  ;;  %v17465_v9 = vld [vmem:[#allocation121_spill] sm:$0xff] }
 0x45b   : > { %v5808_v40 = vmul.f32 %v15255_v36, %v17461_v2  ;;  %v6086_v0 = vmul.f32 %v15072_v13, %v17465_v9  ;;  %v17466_v2 = vld [vmem:[#allocation124_spill] sm:$0xff]  ;;  %v8539_v13 = vld [vmem:[%s16509_s4 + $0x268] sm:$0xff] }
 0x45c   : > { %v8532_v9 = vld [vmem:[%s16509_s4 + $0x230] sm:$0xff] }
 0x45d   : > { %10423 = vmatmul.mubr.f32.gmra.mrb[24].mxu1 %v5804_v23  ;;  %v17464_v23 = vld [vmem:[#allocation122_spill] sm:$0xff] }
 0x45e   : > { %10425 = vmatprep.mubr.f32.mxu1 %v5805_v35  ;;  %v6085_v35 = vmul.f32 %v15177_v20, %v17464_v23 }
 0x461   : > { %10426 = vmatmul.mubr.f32.gmra.mrb[26].mxu1 %v5806_v53  ;;  %v8529_v53 = vld [vmem:[%s16509_s4 + $0x218] sm:$0xff] }
 0x462   : > { %10428 = vmatprep.mubr.f32.mxu1 %v5807_v16  ;;  %v11334_v16 = vpack.c.bf16 %v8529_v53, %v8528_v10  ;;  %v17468_v10 = vld [vmem:[#allocation126_spill] sm:$0xff] }
 0x463   : > { %v6089_v53 = vmul.f32 %v15446_v55, %v17468_v10  ;;  %v8535_v10 = vld [vmem:[%s16509_s4 + $0x248] sm:$0xff] }
 0x465   : > { %10429 = vmatmul.mubr.f32.gmra.mrb[28].mxu1 %v5808_v40  ;;  %v6087_v40 = vmul.f32 %v15427_v52, %v17466_v2  ;;  %v8533_v2 = vld [vmem:[%s16509_s4 + $0x238] sm:$0xff] }
 0x466   : > { %10431 = vmatprep.mubr.f32.mxu1 %v5809_v32  ;;  %v8530_v32 = vld [vmem:[%s16509_s4 + $0x220] sm:$0xff] }
 0x469   : > { %10432 = vmatmul.mubr.f32.gmra.mrb[30].mxu1 %v5810_v3  ;;  %v17467_v3 = vld [vmem:[#allocation123_spill] sm:$0xff] }
 0x46a   : > { %10466 = vmatprep.mubr.f32.mxu1 %v6085_v35  ;;  %v6088_v23 = vmul.f32 %v15436_v15, %v17467_v3  ;;  %v11338_v35 = vpack.c.bf16 %v8531_v49, %v8530_v32  ;;  %v17470_v32 = vld [vmem:[#allocation128_spill] sm:$0xff]  ;;  %v8534_v3 = vld [vmem:[%s16509_s4 + $0x240] sm:$0xff] }
 0x46b   : > { %v6091_v49 = vmul.f32 %v15464_v12, %v17470_v32  ;;  %v8537_v32 = vld [vmem:[%s16509_s4 + $0x258] sm:$0xff] }
 0x46d   : > { %10467 = vmatmul.mubr.f32.vlgmr.msra.gmra.mrb[0].mxu1 %v6086_v0 }
 0x46e   : > { %11333 = vmatpush3.bf16.msra.mxu1 %v15764_v33  ;;  %10469 = vmatprep.mubr.f32.mxu1 %v6087_v40  ;;  %v17469_v33 = vld [vmem:[#allocation125_spill] sm:$0xff]  ;;  %v11342_v40 = vpack.c.bf16 %v8533_v2, %v8532_v9  ;;  %v17472_v9 = vld [vmem:[#allocation130_spill] sm:$0xff] }
 0x46f   : > { %11335 = vmatprep.subr.bf16.mxu1 %v11334_v16  ;;  %v6090_v0 = vmul.f32 %v15454_v42, %v17469_v33  ;;  %v6093_v2 = vmul.f32 %v15482_v17, %v17472_v9  ;;  %v8536_v33 = vld [vmem:[%s16509_s4 + $0x250] sm:$0xff]  ;;  %v8538_v9 = vld [vmem:[%s16509_s4 + $0x260] sm:$0xff]  ;;  %v17490_v17 = vld [vmem:[#allocation23_spill] sm:$0xff] }
 0x471   : > { %10470 = vmatmul.mubr.f32.gmra.mrb[2].mxu1 %v6088_v23 }
 0x472   : > { %10472 = vmatprep.mubr.f32.mxu1 %v6089_v53  ;;  %11337 = vmatpush3.bf16.msra.mxu1 %v11334_v16  ;;  %v17471_v16 = vld [vmem:[#allocation127_spill] sm:$0xff]  ;;  %v11346_v53 = vpack.c.bf16 %v8535_v10, %v8534_v3  ;;  %v17474_v3 = vld [vmem:[#allocation132_spill] sm:$0xff] }
 0x473   : > { %11339 = vmatprep.subr.bf16.mxu1 %v11338_v35  ;;  %v6092_v23 = vmul.f32 %v15472_v50, %v17471_v16  ;;  %v17475_v10 = vld [vmem:[#allocation15_spill] sm:$0xff] }
 0x474   : > { %v6095_v16 = vmul.f32 %v17475_v10, %v17474_v3  ;;  %v8540_v3 = vld [vmem:[%s16509_s4 + $0x270] sm:$0xff]  ;;  %v8541_v10 = vld [vmem:[%s16509_s4 + $0x278] sm:$0xff] }
 0x475   : > { %10473 = vmatmul.mubr.f32.gmra.mrb[4].mxu1 %v6090_v0 }
 0x476   : > { %10475 = vmatprep.mubr.f32.mxu1 %v6091_v49  ;;  %11341 = vmatpush3.bf16.msra.mxu1 %v11338_v35  ;;  %v17473_v35 = vld [vmem:[#allocation129_spill] sm:$0xff]  ;;  %v11350_v49 = vpack.c.bf16 %v8537_v32, %v8536_v33  ;;  %v17478_v33 = vld [vmem:[#allocation134_spill] sm:$0xff] }
 0x477   : > { %11343 = vmatprep.subr.bf16.mxu1 %v11342_v40  ;;  %v6094_v0 = vmul.f32 %v15490_v46, %v17473_v35  ;;  %v11354_v35 = vpack.c.bf16 %v8539_v13, %v8538_v9  ;;  %v17479_v32 = vld [vmem:[#allocation17_spill] sm:$0xff]  ;;  %v17481_v13 = vld [vmem:[#allocation136_spill] sm:$0xff]  ;;  %v17482_v9 = vld [vmem:[#allocation19_spill] sm:$0xff] }
 0x478   : > { %v6097_v20 = vmul.f32 %v17479_v32, %v17478_v33  ;;  %v8542_v33 = vld [vmem:[%s16509_s4 + $0x280] sm:$0xff]  ;;  %v8543_v32 = vld [vmem:[%s16509_s4 + $0x288] sm:$0xff] }
 0x479   : > { %10476 = vmatmul.mubr.f32.gmra.mrb[6].mxu1 %v6092_v23  ;;  %v17477_v23 = vld [vmem:[#allocation14_spill] sm:$0xff]  ;;  %v17489_v46 = vld [vmem:[#allocation139_spill] sm:$0xff] }
 0x47a   : > { %10478 = vmatprep.mubr.f32.mxu1 %v6093_v2  ;;  %11345 = vmatpush3.bf16.msra.mxu1 %v11342_v40  ;;  %v17476_v40 = vld [vmem:[#allocation131_spill] sm:$0xff] }
 0x47b   : > { %11347 = vmatprep.subr.bf16.mxu1 %v11346_v53  ;;  %v6096_v2 = vmul.f32 %v17477_v23, %v17476_v40  ;;  %v6099_v40 = vmul.f32 %v17482_v9, %v17481_v13  ;;  %v17487_v13 = vld [vmem:[#allocation55_spill] sm:$0xff]  ;;  %v17488_v9 = vld [vmem:[#allocation20_spill] sm:$0xff] }
 0x47c   : > { %v6102_v23 = vmul.f32 %v17488_v9, %v17487_v13  ;;  %v17498_v9 = vld [vmem:[#allocation64_spill] sm:$0xff] }
 0x47d   : > { %10479 = vmatmul.mubr.f32.gmra.mrb[8].mxu1 %v6094_v0 }
 0x47e   : > { %10481 = vmatprep.mubr.f32.mxu1 %v6095_v16  ;;  %11349 = vmatpush3.bf16.msra.mxu1 %v11346_v53  ;;  %v17480_v53 = vld [vmem:[#allocation133_spill] sm:$0xff]  ;;  %v11358_v16 = vpack.c.bf16 %v8541_v10, %v8540_v3 }
 0x47f   : > { %11351 = vmatprep.subr.bf16.mxu1 %v11350_v49  ;;  %v6098_v0 = vmul.f32 %v15526_v44, %v17480_v53  ;;  %v11362_v53 = vpack.c.bf16 %v8543_v32, %v8542_v33  ;;  %v17485_v10 = vld [vmem:[#allocation137_spill] sm:$0xff] }
 0x480   : > { %v17486_v3 = vld [vmem:[#allocation21_spill] sm:$0xff] }
 0x481   : > { %10482 = vmatmul.mubr.f32.gmra.mrb[10].mxu1 %v6096_v2  ;;  %v6101_v44 = vmul.f32 %v17486_v3, %v17485_v10  ;;  %v17494_v32 = vld [vmem:[#allocation25_spill] sm:$0xff]  ;;  %v17497_v10 = vld [vmem:[#allocation24_spill] sm:$0xff] }
 0x482   : > { %10484 = vmatprep.mubr.f32.mxu1 %v6097_v20  ;;  %11353 = vmatpush3.bf16.msra.mxu1 %v11350_v49  ;;  %v17483_v20 = vld [vmem:[#allocation135_spill] sm:$0xff]  ;;  %v17484_v49 = vld [vmem:[#allocation18_spill] sm:$0xff] }
 0x483   : > { %11355 = vmatprep.subr.bf16.mxu1 %v11354_v35  ;;  %v6100_v2 = vmul.f32 %v17484_v49, %v17483_v20  ;;  %v17493_v49 = vld [vmem:[#allocation140_spill] sm:$0xff] }
 0x484   : > { %v6105_v33 = vmul.f32 %v17494_v32, %v17493_v49 }
 0x485   : > { %10485 = vmatmul.mubr.f32.gmra.mrb[12].mxu1 %v6098_v0  ;;  %v6103_v0 = vmul.f32 %v17490_v17, %v17489_v46  ;;  %v6108_v46 = vmul.f32 %v15595_v34, %v17498_v9  ;;  %v17505_v9 = vld [vmem:[#allocation146_spill] sm:$0xff] }
 0x486   : > { %10487 = vmatprep.mubr.f32.mxu1 %v6099_v40  ;;  %11357 = vmatpush3.bf16.msra.mxu1 %v11354_v35  ;;  %v17491_v35 = vld [vmem:[#allocation138_spill] sm:$0xff] }
 0x487   : > { %11359 = vmatprep.subr.bf16.mxu1 %v11358_v16  ;;  %v17492_v40 = vld [vmem:[#allocation22_spill] sm:$0xff] }
 0x488   : > { %v6104_v20 = vmul.f32 %v17492_v40, %v17491_v35  ;;  %v17501_v35 = vld [vmem:[#allocation142_spill] sm:$0xff] }
 0x489   : > { %10488 = vmatmul.mubr.f32.gmra.mrb[14].mxu1 %v6100_v2  ;;  %v17495_v2 = vld [vmem:[#allocation60_spill] sm:$0xff]  ;;  %v6110_v49 = vmul.f32 %v15606_v8, %v17501_v35 }
 0x48a   : > { %10490 = vmatprep.mubr.f32.mxu1 %v6101_v44  ;;  %11361 = vmatpush3.bf16.msra.mxu1 %v11358_v16  ;;  %v6106_v44 = vmul.f32 %v15583_v18, %v17495_v2  ;;  %v17496_v16 = vld [vmem:[#allocation141_spill] sm:$0xff]  ;;  %v17503_v2 = vld [vmem:[#allocation144_spill] sm:$0xff] }
 0x48b   : > { %11363 = vmatprep.subr.bf16.mxu1 %v11362_v53  ;;  %v6107_v13 = vmul.f32 %v17497_v10, %v17496_v16  ;;  %v17504_v16 = vld [vmem:[#allocation147_spill] sm:$0xff]  ;;  %v17508_v35 = vld [vmem:[#allocation148_spill] sm:$0xff] }
 0x48d   : > { %10491 = vmatmul.mubr.f32.gmra.mrb[16].mxu1 %v6102_v23  ;;  %v17499_v23 = vld [vmem:[#allocation143_spill] sm:$0xff] }
 0x48e   : > { %10493 = vmatprep.mubr.f32.mxu1 %v6103_v0  ;;  %v17500_v0 = vld [vmem:[#allocation27_spill] sm:$0xff] }
 0x48f   : > { %v6109_v17 = vmul.f32 %v17500_v0, %v17499_v23  ;;  %v17507_v23 = vld [vmem:[#allocation2_spill] sm:$0xff] }
 0x491   : > { %10494 = vmatmul.mubr.f32.gmra.mrb[18].mxu1 %v6104_v20  ;;  %v17502_v20 = vld [vmem:[#allocation145_spill] sm:$0xff] }
 0x492   : > { %10496 = vmatprep.mubr.f32.mxu1 %v6105_v33  ;;  %v6111_v33 = vmul.f32 %v15611_v24, %v17502_v20  ;;  %v17509_v20 = vld [vmem:[#allocation300_spill] sm:$0xff]  ;;  %v17511_v24 = vld [vmem:[#allocation291_spill] sm:$0xff] }
 0x495   : > { %10497 = vmatmul.mubr.f32.gmra.mrb[20].mxu1 %v6106_v44  ;;  %v6112_v44 = vmul.f32 %v15147_v41, %v17503_v2  ;;  %v8544_v2 = vld [vmem:[%s16509_s4 + $0x290] sm:$0xff] }
 0x496   : > { %10499 = vmatprep.mubr.f32.mxu1 %v6107_v13  ;;  %v6113_v13 = vmul.f32 %v15156_v48, %v17504_v16  ;;  %v17512_v16 = vld [vmem:[#allocation150_spill] sm:$0xff] }
 0x499   : > { %10500 = vmatmul.mubr.f32.gmra.mrb[22].mxu1 %v6108_v46  ;;  %v6114_v46 = vmul.f32 %v15159_v62, %v17505_v9  ;;  %v17513_v9 = vld [vmem:[#allocation153_spill] sm:$0xff] }
 0x49a   : > { %10502 = vmatprep.mubr.f32.mxu1 %v6109_v17  ;;  %v17506_v17 = vld [vmem:[#allocation149_spill] sm:$0xff] }
 0x49b   : > { %v6115_v0 = vmul.f32 %v17507_v23, %v17506_v17 }
 0x49d   : > { %10503 = vmatmul.mubr.f32.gmra.mrb[24].mxu1 %v6110_v49  ;;  %v6116_v49 = vmul.f32 %v17509_v20, %v17508_v35  ;;  %v8546_v35 = vld [vmem:[%s16509_s4 + $0x2a0] sm:$0xff] }
 0x49e   : > { %10505 = vmatprep.mubr.f32.mxu1 %v6111_v33  ;;  %v17510_v33 = vld [vmem:[#allocation151_spill] sm:$0xff] }
 0x49f   : > { %v6391_v8 = vmul.f32 %v17511_v24, %v17510_v33  ;;  %v8547_v33 = vld [vmem:[%s16509_s4 + $0x2a8] sm:$0xff]  ;;  %v8549_v24 = vld [vmem:[%s16509_s4 + $0x2b8] sm:$0xff] }
 0x4a1   : > { %10506 = vmatmul.mubr.f32.gmra.mrb[26].mxu1 %v6112_v44  ;;  %v8545_v44 = vld [vmem:[%s16509_s4 + $0x298] sm:$0xff] }
 0x4a2   : > { %10508 = vmatprep.mubr.f32.mxu1 %v6113_v13  ;;  %v6392_v13 = vmul.f32 %v15057_v21, %v17512_v16  ;;  %v11370_v16 = vpack.c.bf16 %v8547_v33, %v8546_v35  ;;  %v17519_v35 = vld [vmem:[#allocation157_spill] sm:$0xff] }
 0x4a3   : > { %v6397_v33 = vmul.f32 %v15223_v57, %v17519_v35  ;;  %v8553_v35 = vld [vmem:[%s16509_s4 + $0x2d8] sm:$0xff] }
 0x4a5   : > { %10509 = vmatmul.mubr.f32.gmra.mrb[28].mxu1 %v6114_v46  ;;  %v17514_v46 = vld [vmem:[#allocation3_spill] sm:$0xff] }
 0x4a6   : > { %10511 = vmatprep.mubr.f32.mxu1 %v6115_v0  ;;  %v11366_v0 = vpack.c.bf16 %v8545_v44, %v8544_v2  ;;  %v6393_v17 = vmul.f32 %v17514_v46, %v17513_v9  ;;  %v17516_v2 = vld [vmem:[#allocation155_spill] sm:$0xff]  ;;  %v17517_v44 = vld [vmem:[#allocation4_spill] sm:$0xff] }
 0x4a7   : > { %v6395_v21 = vmul.f32 %v17517_v44, %v17516_v2  ;;  %v8548_v9 = vld [vmem:[%s16509_s4 + $0x2b0] sm:$0xff]  ;;  %v8551_v2 = vld [vmem:[%s16509_s4 + $0x2c8] sm:$0xff] }
 0x4a9   : > { %10512 = vmatmul.mubr.f32.gmra.mrb[30].mxu1 %v6116_v49  ;;  %v17515_v49 = vld [vmem:[#allocation152_spill] sm:$0xff] }
 0x4aa   : > { %10546 = vmatprep.mubr.f32.mxu1 %v6391_v8  ;;  %v6394_v8 = vmul.f32 %v15203_v38, %v17515_v49  ;;  %v8550_v49 = vld [vmem:[%s16509_s4 + $0x2c0] sm:$0xff] }
 0x4ad   : > { %10547 = vmatmul.mubr.f32.vlgmr.msra.gmra.mrb[0].mxu1 %v6392_v13 }
 0x4ae   : > { %11365 = vmatpush3.bf16.msra.mxu1 %v11362_v53  ;;  %10549 = vmatprep.mubr.f32.mxu1 %v6393_v17  ;;  %v17518_v53 = vld [vmem:[#allocation154_spill] sm:$0xff]  ;;  %v11374_v17 = vpack.c.bf16 %v8549_v24, %v8548_v9  ;;  %v17521_v24 = vld [vmem:[#allocation159_spill] sm:$0xff] }
 0x4af   : > { %11367 = vmatprep.subr.bf16.mxu1 %v11366_v0  ;;  %v6396_v13 = vmul.f32 %v15219_v47, %v17518_v53  ;;  %v6399_v9 = vmul.f32 %v15257_v22, %v17521_v24  ;;  %v8552_v53 = vld [vmem:[%s16509_s4 + $0x2d0] sm:$0xff]  ;;  %v8555_v24 = vld [vmem:[%s16509_s4 + $0x2e8] sm:$0xff] }
 0x4b1   : > { %10550 = vmatmul.mubr.f32.gmra.mrb[2].mxu1 %v6394_v8  ;;  %v11378_v8 = vpack.c.bf16 %v8551_v2, %v8550_v49  ;;  %v17523_v49 = vld [vmem:[#allocation161_spill] sm:$0xff] }
 0x4b2   : > { %10552 = vmatprep.mubr.f32.mxu1 %v6395_v21  ;;  %11369 = vmatpush3.bf16.msra.mxu1 %v11366_v0  ;;  %v17520_v21 = vld [vmem:[#allocation156_spill] sm:$0xff]  ;;  %v6401_v2 = vmul.f32 %v15279_v37, %v17523_v49  ;;  %v8557_v49 = vld [vmem:[%s16509_s4 + $0x2f8] sm:$0xff] }
 0x4b3   : > { %11371 = vmatprep.subr.bf16.mxu1 %v11370_v16  ;;  %v6398_v0 = vmul.f32 %v15240_v6, %v17520_v21  ;;  %v8554_v21 = vld [vmem:[%s16509_s4 + $0x2e0] sm:$0xff] }
 0x4b5   : > { %10553 = vmatmul.mubr.f32.gmra.mrb[4].mxu1 %v6396_v13 }
 0x4b6   : > { %10555 = vmatprep.mubr.f32.mxu1 %v6397_v33  ;;  %11373 = vmatpush3.bf16.msra.mxu1 %v11370_v16  ;;  %v17522_v16 = vld [vmem:[#allocation158_spill] sm:$0xff]  ;;  %v11382_v33 = vpack.c.bf16 %v8553_v35, %v8552_v53  ;;  %v17525_v53 = vld [vmem:[#allocation163_spill] sm:$0xff] }
 0x4b7   : > { %11375 = vmatprep.subr.bf16.mxu1 %v11374_v17  ;;  %v6400_v13 = vmul.f32 %v15273_v4, %v17522_v16  ;;  %v6403_v35 = vmul.f32 %v15297_v45, %v17525_v53  ;;  %v8556_v16 = vld [vmem:[%s16509_s4 + $0x2f0] sm:$0xff]  ;;  %v8559_v53 = vld [vmem:[%s16509_s4 + $0x308] sm:$0xff] }
 0x4b9   : > { %10556 = vmatmul.mubr.f32.gmra.mrb[6].mxu1 %v6398_v0 }
 0x4ba   : > { %10558 = vmatprep.mubr.f32.mxu1 %v6399_v9  ;;  %11377 = vmatpush3.bf16.msra.mxu1 %v11374_v17  ;;  %v17524_v17 = vld [vmem:[#allocation160_spill] sm:$0xff]  ;;  %v11386_v9 = vpack.c.bf16 %v8555_v24, %v8554_v21  ;;  %v17527_v21 = vld [vmem:[#allocation165_spill] sm:$0xff] }
 0x4bb   : > { %11379 = vmatprep.subr.bf16.mxu1 %v11378_v8  ;;  %v6402_v0 = vmul.f32 %v15291_v39, %v17524_v17  ;;  %v6405_v24 = vmul.f32 %v15315_v30, %v17527_v21  ;;  %v8558_v17 = vld [vmem:[%s16509_s4 + $0x300] sm:$0xff]  ;;  %v17531_v30 = vld [vmem:[#allocation169_spill] sm:$0xff] }
 0x4bd   : > { %10559 = vmatmul.mubr.f32.gmra.mrb[8].mxu1 %v6400_v13 }
 0x4be   : > { %10561 = vmatprep.mubr.f32.mxu1 %v6401_v2  ;;  %11381 = vmatpush3.bf16.msra.mxu1 %v11378_v8  ;;  %v17526_v8 = vld [vmem:[#allocation162_spill] sm:$0xff]  ;;  %v11390_v2 = vpack.c.bf16 %v8557_v49, %v8556_v16  ;;  %v17529_v16 = vld [vmem:[#allocation167_spill] sm:$0xff] }
 0x4bf   : > { %11383 = vmatprep.subr.bf16.mxu1 %v11382_v33  ;;  %v6404_v13 = vmul.f32 %v15309_v43, %v17526_v8  ;;  %v6407_v49 = vmul.f32 %v15335_v27, %v17529_v16  ;;  %v17530_v8 = vld [vmem:[#allocation166_spill] sm:$0xff] }
 0x4c0   : > { %v6408_v21 = vmul.f32 %v15341_v51, %v17530_v8  ;;  %v17537_v8 = vld [vmem:[#allocation175_spill] sm:$0xff] }
 0x4c1   : > { %10562 = vmatmul.mubr.f32.gmra.mrb[10].mxu1 %v6402_v0 }
 0x4c2   : > { %10564 = vmatprep.mubr.f32.mxu1 %v6403_v35  ;;  %11385 = vmatpush3.bf16.msra.mxu1 %v11382_v33  ;;  %v17528_v33 = vld [vmem:[#allocation164_spill] sm:$0xff]  ;;  %v11394_v35 = vpack.c.bf16 %v8559_v53, %v8558_v17  ;;  %v17534_v53 = vld [vmem:[#allocation170_spill] sm:$0xff] }
 0x4c3   : > { %11387 = vmatprep.subr.bf16.mxu1 %v11386_v9  ;;  %v6406_v0 = vmul.f32 %v15327_v56, %v17528_v33  ;;  %v17533_v33 = vld [vmem:[#allocation171_spill] sm:$0xff] }
 0x4c4   : > { %v6411_v17 = vmul.f32 %v15360_v61, %v17533_v33 }
 0x4c5   : > { %10565 = vmatmul.mubr.f32.gmra.mrb[12].mxu1 %v6404_v13  ;;  %v6409_v13 = vmul.f32 %v15348_v60, %v17531_v30 }
 0x4c6   : > { %10567 = vmatprep.mubr.f32.mxu1 %v6405_v24  ;;  %11389 = vmatpush3.bf16.msra.mxu1 %v11386_v9  ;;  %v17532_v9 = vld [vmem:[#allocation168_spill] sm:$0xff] }
 0x4c7   : > { %11391 = vmatprep.subr.bf16.mxu1 %v11390_v2  ;;  %v6410_v24 = vmul.f32 %v15354_v14, %v17532_v9 }
 0x4c9   : > { %10568 = vmatmul.mubr.f32.gmra.mrb[14].mxu1 %v6406_v0  ;;  %v17535_v0 = vld [vmem:[#allocation173_spill] sm:$0xff] }
 0x4ca   : > { %10570 = vmatprep.mubr.f32.mxu1 %v6407_v49  ;;  %11393 = vmatpush3.bf16.msra.mxu1 %v11390_v2  ;;  %v6412_v2 = vmul.f32 %v15366_v29, %v17534_v53  ;;  %v6413_v16 = vmul.f32 %v15372_v19, %v17535_v0  ;;  %v17536_v49 = vld [vmem:[#allocation172_spill] sm:$0xff]  ;;  %v17541_v53 = vld [vmem:[#allocation294_spill] sm:$0xff]  ;;  %v17542_v0 = vld [vmem:[#allocation179_spill] sm:$0xff] }
 0x4cb   : > { %11395 = vmatprep.subr.bf16.mxu1 %v11394_v35  ;;  %v6414_v30 = vmul.f32 %v15378_v59, %v17536_v49  ;;  %v17544_v49 = vld [vmem:[#allocation178_spill] sm:$0xff] }
 0x4cd   : > { %10571 = vmatmul.mubr.f32.gmra.mrb[16].mxu1 %v6408_v21  ;;  %v6415_v21 = vmul.f32 %v15384_v58, %v17537_v8  ;;  %v17545_v8 = vld [vmem:[#allocation296_spill] sm:$0xff]  ;;  %v17547_v58 = vld [vmem:[#allocation299_spill] sm:$0xff] }
 0x4ce   : > { %10573 = vmatprep.mubr.f32.mxu1 %v6409_v13  ;;  %v17538_v13 = vld [vmem:[#allocation174_spill] sm:$0xff] }
 0x4cf   : > { %v6416_v9 = vmul.f32 %v15388_v31, %v17538_v13  ;;  %v17548_v13 = vld [vmem:[#allocation180_spill] sm:$0xff] }
 0x4d1   : > { %10574 = vmatmul.mubr.f32.gmra.mrb[18].mxu1 %v6410_v24  ;;  %v17539_v24 = vld [vmem:[#allocation177_spill] sm:$0xff] }
 0x4d2   : > { %10576 = vmatprep.mubr.f32.mxu1 %v6411_v17  ;;  %v6417_v33 = vmul.f32 %v15125_v54, %v17539_v24  ;;  %v17540_v17 = vld [vmem:[#allocation176_spill] sm:$0xff]  ;;  %v17549_v24 = vld [vmem:[#allocation298_spill] sm:$0xff]  ;;  %v17551_v54 = vld [vmem:[#allocation293_spill] sm:$0xff] }
 0x4d5   : > { %10577 = vmatmul.mubr.f32.gmra.mrb[20].mxu1 %v6412_v2  ;;  %v6418_v2 = vmul.f32 %v17541_v53, %v17540_v17  ;;  %v8560_v17 = vld [vmem:[%s16509_s4 + $0x310] sm:$0xff] }
 0x4d6   : > { %10579 = vmatprep.mubr.f32.mxu1 %v6413_v16  ;;  %v17543_v16 = vld [vmem:[#allocation297_spill] sm:$0xff] }
 0x4d7   : > { %v6419_v19 = vmul.f32 %v17543_v16, %v17542_v0  ;;  %v17553_v0 = vld [vmem:[#allocation28_spill] sm:$0xff] }
 0x4d9   : > { %10580 = vmatmul.mubr.f32.gmra.mrb[22].mxu1 %v6414_v30  ;;  %v6420_v30 = vmul.f32 %v17545_v8, %v17544_v49  ;;  %v17586_v8 = vld [vmem:[#allocation51_spill] sm:$0xff] }
 0x4da   : > { %10582 = vmatprep.mubr.f32.mxu1 %v6415_v21  ;;  %v17546_v21 = vld [vmem:[#allocation181_spill] sm:$0xff] }
 0x4db   : > { %v6421_v59 = vmul.f32 %v17547_v58, %v17546_v21  ;;  %v17555_v21 = vld [vmem:[#allocation31_spill] sm:$0xff]  ;;  %v17585_v58 = vld [vmem:[#allocation201_spill] sm:$0xff] }
 0x4dd   : > { %10583 = vmatmul.mubr.f32.gmra.mrb[24].mxu1 %v6416_v9  ;;  %v6422_v9 = vmul.f32 %v17549_v24, %v17548_v13 }
 0x4de   : > { %10585 = vmatprep.mubr.f32.mxu1 %v6417_v33  ;;  %v17550_v33 = vld [vmem:[#allocation183_spill] sm:$0xff] }
 0x4df   : > { %v6697_v31 = vmul.f32 %v17551_v54, %v17550_v33  ;;  %v8562_v33 = vld [vmem:[%s16509_s4 + $0x320] sm:$0xff]  ;;  %v8563_v54 = vld [vmem:[%s16509_s4 + $0x328] sm:$0xff] }
 0x4e1   : > { %10586 = vmatmul.mubr.f32.gmra.mrb[26].mxu1 %v6418_v2  ;;  %v17552_v2 = vld [vmem:[#allocation182_spill] sm:$0xff] }
 0x4e2   : > { %10588 = vmatprep.mubr.f32.mxu1 %v6419_v19  ;;  %v8561_v19 = vld [vmem:[%s16509_s4 + $0x318] sm:$0xff]  ;;  %v6698_v49 = vmul.f32 %v17553_v0, %v17552_v2  ;;  %v11402_v2 = vpack.c.bf16 %v8563_v54, %v8562_v33  ;;  %v17563_v33 = vld [vmem:[#allocation36_spill] sm:$0xff] }
 0x4e3   : > { %v17562_v54 = vld [vmem:[#allocation189_spill] sm:$0xff] }
 0x4e5   : > { %10589 = vmatmul.mubr.f32.gmra.mrb[28].mxu1 %v6420_v30  ;;  %v17554_v30 = vld [vmem:[#allocation185_spill] sm:$0xff] }
 0x4e6   : > { %10591 = vmatprep.mubr.f32.mxu1 %v6421_v59  ;;  %v11398_v59 = vpack.c.bf16 %v8561_v19, %v8560_v17  ;;  %v6699_v13 = vmul.f32 %v17555_v21, %v17554_v30  ;;  %v17558_v17 = vld [vmem:[#allocation187_spill] sm:$0xff]  ;;  %v17559_v19 = vld [vmem:[#allocation33_spill] sm:$0xff]  ;;  %v8564_v30 = vld [vmem:[%s16509_s4 + $0x330] sm:$0xff] }
 0x4e7   : > { %v6701_v0 = vmul.f32 %v17559_v19, %v17558_v17  ;;  %v8565_v21 = vld [vmem:[%s16509_s4 + $0x338] sm:$0xff]  ;;  %v8566_v17 = vld [vmem:[%s16509_s4 + $0x340] sm:$0xff]  ;;  %v8567_v19 = vld [vmem:[%s16509_s4 + $0x348] sm:$0xff] }
 0x4e9   : > { %10592 = vmatmul.mubr.f32.gmra.mrb[30].mxu1 %v6422_v9  ;;  %v17556_v9 = vld [vmem:[#allocation184_spill] sm:$0xff] }
 0x4ea   : > { %10626 = vmatprep.mubr.f32.mxu1 %v6697_v31  ;;  %v17557_v31 = vld [vmem:[#allocation30_spill] sm:$0xff] }
 0x4eb   : > { %v6700_v24 = vmul.f32 %v17557_v31, %v17556_v9  ;;  %v11406_v9 = vpack.c.bf16 %v8565_v21, %v8564_v30  ;;  %v6703_v31 = vmul.f32 %v17563_v33, %v17562_v54  ;;  %v17566_v21 = vld [vmem:[#allocation191_spill] sm:$0xff]  ;;  %v17567_v30 = vld [vmem:[#allocation40_spill] sm:$0xff]  ;;  %v8569_v33 = vld [vmem:[%s16509_s4 + $0x358] sm:$0xff] }
 0x4ec   : > { %v8568_v54 = vld [vmem:[%s16509_s4 + $0x350] sm:$0xff] }
 0x4ed   : > { %10627 = vmatmul.mubr.f32.vlgmr.msra.gmra.mrb[0].mxu1 %v6698_v49  ;;  %v17561_v49 = vld [vmem:[#allocation32_spill] sm:$0xff] }
 0x4ee   : > { %11397 = vmatpush3.bf16.msra.mxu1 %v11394_v35  ;;  %10629 = vmatprep.mubr.f32.mxu1 %v6699_v13  ;;  %v17560_v35 = vld [vmem:[#allocation186_spill] sm:$0xff] }
 0x4ef   : > { %11399 = vmatprep.subr.bf16.mxu1 %v11398_v59  ;;  %v6702_v13 = vmul.f32 %v17561_v49, %v17560_v35  ;;  %v11410_v35 = vpack.c.bf16 %v8567_v19, %v8566_v17  ;;  %v6705_v49 = vmul.f32 %v17567_v30, %v17566_v21  ;;  %v17570_v19 = vld [vmem:[#allocation193_spill] sm:$0xff]  ;;  %v17571_v17 = vld [vmem:[#allocation43_spill] sm:$0xff]  ;;  %v8570_v21 = vld [vmem:[%s16509_s4 + $0x360] sm:$0xff] }
 0x4f0   : > { %v8571_v30 = vld [vmem:[%s16509_s4 + $0x368] sm:$0xff] }
 0x4f1   : > { %10630 = vmatmul.mubr.f32.gmra.mrb[2].mxu1 %v6700_v24  ;;  %v17564_v24 = vld [vmem:[#allocation188_spill] sm:$0xff] }
 0x4f2   : > { %10632 = vmatprep.mubr.f32.mxu1 %v6701_v0  ;;  %11401 = vmatpush3.bf16.msra.mxu1 %v11398_v59  ;;  %v17565_v0 = vld [vmem:[#allocation35_spill] sm:$0xff] }
 0x4f3   : > { %11403 = vmatprep.subr.bf16.mxu1 %v11402_v2  ;;  %v6704_v59 = vmul.f32 %v17565_v0, %v17564_v24  ;;  %v11414_v24 = vpack.c.bf16 %v8569_v33, %v8568_v54  ;;  %v6707_v0 = vmul.f32 %v17571_v17, %v17570_v19  ;;  %v17574_v33 = vld [vmem:[#allocation195_spill] sm:$0xff]  ;;  %v17575_v54 = vld [vmem:[#allocation45_spill] sm:$0xff]  ;;  %v8572_v19 = vld [vmem:[%s16509_s4 + $0x370] sm:$0xff] }
 0x4f4   : > { %v8573_v17 = vld [vmem:[%s16509_s4 + $0x378] sm:$0xff] }
 0x4f5   : > { %10633 = vmatmul.mubr.f32.gmra.mrb[4].mxu1 %v6702_v13 }
 0x4f6   : > { %10635 = vmatprep.mubr.f32.mxu1 %v6703_v31  ;;  %11405 = vmatpush3.bf16.msra.mxu1 %v11402_v2  ;;  %v17568_v31 = vld [vmem:[#allocation190_spill] sm:$0xff]  ;;  %v17569_v2 = vld [vmem:[#allocation39_spill] sm:$0xff] }
 0x4f7   : > { %11407 = vmatprep.subr.bf16.mxu1 %v11406_v9  ;;  %v6706_v13 = vmul.f32 %v17569_v2, %v17568_v31  ;;  %v11418_v31 = vpack.c.bf16 %v8571_v30, %v8570_v21  ;;  %v6709_v2 = vmul.f32 %v17575_v54, %v17574_v33  ;;  %v17577_v30 = vld [vmem:[#allocation197_spill] sm:$0xff]  ;;  %v17578_v21 = vld [vmem:[#allocation47_spill] sm:$0xff]  ;;  %v8574_v33 = vld [vmem:[%s16509_s4 + $0x380] sm:$0xff] }
 0x4f8   : > { %v8575_v54 = vld [vmem:[%s16509_s4 + $0x388] sm:$0xff] }
 0x4f9   : > { %10636 = vmatmul.mubr.f32.gmra.mrb[6].mxu1 %v6704_v59 }
 0x4fa   : > { %10638 = vmatprep.mubr.f32.mxu1 %v6705_v49  ;;  %11409 = vmatpush3.bf16.msra.mxu1 %v11406_v9  ;;  %v17572_v49 = vld [vmem:[#allocation192_spill] sm:$0xff]  ;;  %v17573_v9 = vld [vmem:[#allocation42_spill] sm:$0xff] }
 0x4fb   : > { %11411 = vmatprep.subr.bf16.mxu1 %v11410_v35  ;;  %v6708_v59 = vmul.f32 %v17573_v9, %v17572_v49  ;;  %v6711_v49 = vmul.f32 %v17578_v21, %v17577_v30  ;;  %v17583_v30 = vld [vmem:[#allocation198_spill] sm:$0xff]  ;;  %v17584_v21 = vld [vmem:[#allocation48_spill] sm:$0xff] }
 0x4fc   : > { %v6714_v9 = vmul.f32 %v17584_v21, %v17583_v30  ;;  %v17593_v30 = vld [vmem:[#allocation204_spill] sm:$0xff] }
 0x4fd   : > { %10639 = vmatmul.mubr.f32.gmra.mrb[8].mxu1 %v6706_v13  ;;  %v11422_v13 = vpack.c.bf16 %v8573_v17, %v8572_v19  ;;  %v17581_v17 = vld [vmem:[#allocation199_spill] sm:$0xff]  ;;  %v17582_v19 = vld [vmem:[#allocation49_spill] sm:$0xff] }
 0x4fe   : > { %10641 = vmatprep.mubr.f32.mxu1 %v6707_v0  ;;  %11413 = vmatpush3.bf16.msra.mxu1 %v11410_v35  ;;  %v17576_v0 = vld [vmem:[#allocation194_spill] sm:$0xff] }
 0x4ff   : > { %11415 = vmatprep.subr.bf16.mxu1 %v11414_v24  ;;  %v6710_v35 = vmul.f32 %v15749_v7, %v17576_v0  ;;  %v11426_v0 = vpack.c.bf16 %v8575_v54, %v8574_v33  ;;  %v6713_v7 = vmul.f32 %v17582_v19, %v17581_v17  ;;  %v17590_v54 = vld [vmem:[#allocation54_spill] sm:$0xff] }
 0x501   : > { %10642 = vmatmul.mubr.f32.gmra.mrb[10].mxu1 %v6708_v59 }
 0x502   : > { %10644 = vmatprep.mubr.f32.mxu1 %v6709_v2  ;;  %11417 = vmatpush3.bf16.msra.mxu1 %v11414_v24  ;;  %v17579_v2 = vld [vmem:[#allocation196_spill] sm:$0xff]  ;;  %v17580_v24 = vld [vmem:[#allocation46_spill] sm:$0xff] }
 0x503   : > { %11419 = vmatprep.subr.bf16.mxu1 %v11418_v31  ;;  %v6712_v59 = vmul.f32 %v17580_v24, %v17579_v2  ;;  %v17589_v24 = vld [vmem:[#allocation203_spill] sm:$0xff] }
 0x504   : > { %v6717_v33 = vmul.f32 %v17590_v54, %v17589_v24 }
 0x505   : > { %10645 = vmatmul.mubr.f32.gmra.mrb[12].mxu1 %v6710_v35  ;;  %v6715_v35 = vmul.f32 %v17586_v8, %v17585_v58  ;;  %v17594_v58 = vld [vmem:[#allocation53_spill] sm:$0xff] }
 0x506   : > { %10647 = vmatprep.mubr.f32.mxu1 %v6711_v49  ;;  %11421 = vmatpush3.bf16.msra.mxu1 %v11418_v31  ;;  %v17587_v31 = vld [vmem:[#allocation200_spill] sm:$0xff]  ;;  %v17588_v49 = vld [vmem:[#allocation50_spill] sm:$0xff] }
 0x507   : > { %11423 = vmatprep.subr.bf16.mxu1 %v11422_v13  ;;  %v6716_v2 = vmul.f32 %v17588_v49, %v17587_v31  ;;  %v17596_v31 = vld [vmem:[#allocation108_spill] sm:$0xff] }
 0x508   : > { %v6722_v24 = vmul.f32 %v15830_v1, %v17596_v31  ;;  %v17603_v31 = vld [vmem:[#allocation118_spill] sm:$0xff] }
 0x509   : > { %10648 = vmatmul.mubr.f32.gmra.mrb[14].mxu1 %v6712_v59  ;;  %v17591_v59 = vld [vmem:[#allocation202_spill] sm:$0xff] }
 0x50a   : > { %10650 = vmatprep.mubr.f32.mxu1 %v6713_v7  ;;  %11425 = vmatpush3.bf16.msra.mxu1 %v11422_v13  ;;  %v6718_v7 = vmul.f32 %v15806_v5, %v17591_v59  ;;  %v17592_v13 = vld [vmem:[#allocation205_spill] sm:$0xff]  ;;  %v17598_v59 = vld [vmem:[#allocation112_spill] sm:$0xff] }
 0x50b   : > { %11427 = vmatprep.subr.bf16.mxu1 %v11426_v0  ;;  %v6719_v17 = vmul.f32 %v15810_v25, %v17592_v13  ;;  %v17599_v13 = vld [vmem:[#allocation207_spill] sm:$0xff] }
 0x50d   : > { %10651 = vmatmul.mubr.f32.gmra.mrb[16].mxu1 %v6714_v9  ;;  %v6720_v9 = vmul.f32 %v17594_v58, %v17593_v30  ;;  %v17600_v30 = vld [vmem:[#allocation206_spill] sm:$0xff] }
 0x50e   : > { %10653 = vmatprep.mubr.f32.mxu1 %v6715_v35  ;;  %v17595_v35 = vld [vmem:[#allocation109_spill] sm:$0xff] }
 0x50f   : > { %v6721_v8 = vmul.f32 %v15821_v26, %v17595_v35  ;;  %v17602_v35 = vld [vmem:[#allocation301_spill] sm:$0xff] }
 0x511   : > { %10654 = vmatmul.mubr.f32.gmra.mrb[18].mxu1 %v6716_v2  ;;  %v17597_v2 = vld [vmem:[#allocation113_spill] sm:$0xff] }
 0x512   : > { %10656 = vmatprep.mubr.f32.mxu1 %v6717_v33  ;;  %v6723_v33 = vmul.f32 %v15252_v63, %v17597_v2  ;;  %v17604_v2 = vld [vmem:[#allocation302_spill] sm:$0xff] }
 0x515   : > { %10657 = vmatmul.mubr.f32.gmra.mrb[20].mxu1 %v6718_v7  ;;  %v6724_v7 = vmul.f32 %v15255_v36, %v17598_v59  ;;  %v8576_v59 = vld [vmem:[%s16509_s4 + $0x390] sm:$0xff] }
 0x516   : > { %10659 = vmatprep.mubr.f32.mxu1 %v6719_v17  ;;  %v6725_v17 = vmul.f32 %v15268_v28, %v17599_v13  ;;  %v17606_v13 = vld [vmem:[#allocation82_spill] sm:$0xff] }
 0x519   : > { %10660 = vmatmul.mubr.f32.gmra.mrb[22].mxu1 %v6720_v9  ;;  %v6726_v9 = vmul.f32 %v15271_v11, %v17600_v30  ;;  %v17607_v30 = vld [vmem:[#allocation210_spill] sm:$0xff] }
 0x51a   : > { %10662 = vmatprep.mubr.f32.mxu1 %v6721_v8  ;;  %v17601_v8 = vld [vmem:[#allocation208_spill] sm:$0xff] }
 0x51b   : > { %v6727_v26 = vmul.f32 %v17602_v35, %v17601_v8  ;;  %v8579_v8 = vld [vmem:[%s16509_s4 + $0x3a8] sm:$0xff] }
 0x51d   : > { %10663 = vmatmul.mubr.f32.gmra.mrb[24].mxu1 %v6722_v24  ;;  %v6728_v24 = vmul.f32 %v17604_v2, %v17603_v31  ;;  %v17608_v31 = vld [vmem:[#allocation85_spill] sm:$0xff] }
 0x51e   : > { %10665 = vmatprep.mubr.f32.mxu1 %v6723_v33  ;;  %v17605_v33 = vld [vmem:[#allocation209_spill] sm:$0xff] }
 0x51f   : > { %v7003_v63 = vmul.f32 %v15427_v52, %v17605_v33  ;;  %v8578_v52 = vld [vmem:[%s16509_s4 + $0x3a0] sm:$0xff] }
 0x521   : > { %10666 = vmatmul.mubr.f32.gmra.mrb[26].mxu1 %v6724_v7  ;;  %v8577_v7 = vld [vmem:[%s16509_s4 + $0x398] sm:$0xff] }
 0x522   : > { %10668 = vmatprep.mubr.f32.mxu1 %v6725_v17  ;;  %v7004_v17 = vmul.f32 %v15436_v15, %v17606_v13  ;;  %v11434_v15 = vpack.c.bf16 %v8579_v8, %v8578_v52  ;;  %v17611_v13 = vld [vmem:[#allocation214_spill] sm:$0xff]  ;;  %v17614_v52 = vld [vmem:[#allocation12_spill] sm:$0xff] }
 0x525   : > { %10669 = vmatmul.mubr.f32.gmra.mrb[28].mxu1 %v6726_v9  ;;  %v7005_v9 = vmul.f32 %v15446_v55, %v17607_v30  ;;  %v8580_v55 = vld [vmem:[%s16509_s4 + $0x3b0] sm:$0xff] }
 0x526   : > { %10671 = vmatprep.mubr.f32.mxu1 %v6727_v26  ;;  %v11430_v26 = vpack.c.bf16 %v8577_v7, %v8576_v59  ;;  %v8581_v59 = vld [vmem:[%s16509_s4 + $0x3b8] sm:$0xff] }
 0x529   : > { %10672 = vmatmul.mubr.f32.gmra.mrb[30].mxu1 %v6728_v24  ;;  %v17609_v24 = vld [vmem:[#allocation212_spill] sm:$0xff] }
 0x52a   : > { %10706 = vmatprep.mubr.f32.mxu1 %v7003_v63  ;;  %v7006_v63 = vmul.f32 %v15454_v42, %v17608_v31  ;;  %v7007_v33 = vmul.f32 %v15464_v12, %v17609_v24  ;;  %v11438_v42 = vpack.c.bf16 %v8581_v59, %v8580_v55  ;;  %v8582_v12 = vld [vmem:[%s16509_s4 + $0x3c0] sm:$0xff]  ;;  %v17615_v31 = vld [vmem:[#allocation216_spill] sm:$0xff]  ;;  %v8585_v55 = vld [vmem:[%s16509_s4 + $0x3d8] sm:$0xff] }
 0x52b   : > { %v17618_v59 = vld [vmem:[#allocation14_spill] sm:$0xff] }
 0x52d   : > { %10707 = vmatmul.mubr.f32.vlgmr.msra.gmra.mrb[0].mxu1 %v7004_v17  ;;  %v17612_v17 = vld [vmem:[#allocation13_spill] sm:$0xff] }
 0x52e   : > { %11429 = vmatpush3.bf16.msra.mxu1 %v11426_v0  ;;  %10709 = vmatprep.mubr.f32.mxu1 %v7005_v9  ;;  %v17610_v0 = vld [vmem:[#allocation211_spill] sm:$0xff]  ;;  %v7009_v30 = vmul.f32 %v17612_v17, %v17611_v13  ;;  %v17619_v13 = vld [vmem:[#allocation218_spill] sm:$0xff]  ;;  %v17620_v17 = vld [vmem:[#allocation17_spill] sm:$0xff] }
 0x52f   : > { %11431 = vmatprep.subr.bf16.mxu1 %v11430_v26  ;;  %v7008_v7 = vmul.f32 %v15472_v50, %v17610_v0  ;;  %v8583_v9 = vld [vmem:[%s16509_s4 + $0x3c8] sm:$0xff] }
 0x530   : > { %v11442_v50 = vpack.c.bf16 %v8583_v9, %v8582_v12  ;;  %v8586_v12 = vld [vmem:[%s16509_s4 + $0x3e0] sm:$0xff]  ;;  %v8587_v9 = vld [vmem:[%s16509_s4 + $0x3e8] sm:$0xff] }
 0x531   : > { %10710 = vmatmul.mubr.f32.gmra.mrb[2].mxu1 %v7006_v63  ;;  %v17616_v63 = vld [vmem:[#allocation15_spill] sm:$0xff] }
 0x532   : > { %10712 = vmatprep.mubr.f32.mxu1 %v7007_v33  ;;  %11433 = vmatpush3.bf16.msra.mxu1 %v11430_v26  ;;  %v17613_v26 = vld [vmem:[#allocation213_spill] sm:$0xff]  ;;  %v7011_v24 = vmul.f32 %v17616_v63, %v17615_v31  ;;  %v8584_v33 = vld [vmem:[%s16509_s4 + $0x3d0] sm:$0xff]  ;;  %v17623_v31 = vld [vmem:[#allocation219_spill] sm:$0xff] }
 0x533   : > { %11435 = vmatprep.subr.bf16.mxu1 %v11434_v15  ;;  %v7010_v8 = vmul.f32 %v17614_v52, %v17613_v26  ;;  %v17622_v26 = vld [vmem:[#allocation16_spill] sm:$0xff]  ;;  %v17624_v63 = vld [vmem:[#allocation19_spill] sm:$0xff] }
 0x535   : > { %10713 = vmatmul.mubr.f32.gmra.mrb[4].mxu1 %v7008_v7  ;;  %v11446_v7 = vpack.c.bf16 %v8585_v55, %v8584_v33  ;;  %v8588_v33 = vld [vmem:[%s16509_s4 + $0x3f0] sm:$0xff]  ;;  %v8589_v55 = vld [vmem:[%s16509_s4 + $0x3f8] sm:$0xff] }
 0x536   : > { %10715 = vmatprep.mubr.f32.mxu1 %v7009_v30  ;;  %11437 = vmatpush3.bf16.msra.mxu1 %v11434_v15  ;;  %v17617_v15 = vld [vmem:[#allocation215_spill] sm:$0xff]  ;;  %v7013_v30 = vmul.f32 %v17620_v17, %v17619_v13  ;;  %v17627_v13 = vld [vmem:[#allocation221_spill] sm:$0xff] }
 0x537   : > { %11439 = vmatprep.subr.bf16.mxu1 %v11438_v42  ;;  %v7012_v0 = vmul.f32 %v17618_v59, %v17617_v15  ;;  %v17626_v15 = vld [vmem:[#allocation18_spill] sm:$0xff]  ;;  %v7017_v17 = vmul.f32 %v17486_v3, %v17627_v13  ;;  %v17636_v13 = vld [vmem:[#allocation65_spill] sm:$0xff] }
 0x538   : > { %v17632_v3 = vld [vmem:[#allocation222_spill] sm:$0xff] }
 0x539   : > { %10716 = vmatmul.mubr.f32.gmra.mrb[6].mxu1 %v7010_v8  ;;  %v11450_v8 = vpack.c.bf16 %v8587_v9, %v8586_v12  ;;  %v8591_v12 = vld [vmem:[%s16509_s4 + $0x408] sm:$0xff]  ;;  %v17629_v9 = vld [vmem:[#allocation20_spill] sm:$0xff] }
 0x53a   : > { %10718 = vmatprep.mubr.f32.mxu1 %v7011_v24  ;;  %11441 = vmatpush3.bf16.msra.mxu1 %v11438_v42  ;;  %v17621_v42 = vld [vmem:[#allocation217_spill] sm:$0xff]  ;;  %v7015_v24 = vmul.f32 %v17624_v63, %v17623_v31  ;;  %v17631_v31 = vld [vmem:[#allocation23_spill] sm:$0xff] }
 0x53b   : > { %11443 = vmatprep.subr.bf16.mxu1 %v11442_v50  ;;  %v7014_v52 = vmul.f32 %v17622_v26, %v17621_v42 }
 0x53d   : > { %10719 = vmatmul.mubr.f32.gmra.mrb[8].mxu1 %v7012_v0  ;;  %v11454_v0 = vpack.c.bf16 %v8589_v55, %v8588_v33  ;;  %v17633_v33 = vld [vmem:[#allocation224_spill] sm:$0xff] }
 0x53e   : > { %10721 = vmatprep.mubr.f32.mxu1 %v7013_v30  ;;  %11445 = vmatpush3.bf16.msra.mxu1 %v11442_v50  ;;  %v17625_v50 = vld [vmem:[#allocation52_spill] sm:$0xff]  ;;  %v8590_v30 = vld [vmem:[%s16509_s4 + $0x400] sm:$0xff]  ;;  %v7021_v55 = vmul.f32 %v17494_v32, %v17633_v33 }
 0x53f   : > { %11447 = vmatprep.subr.bf16.mxu1 %v11446_v7  ;;  %v7016_v59 = vmul.f32 %v17626_v15, %v17625_v50  ;;  %v11458_v26 = vpack.c.bf16 %v8591_v12, %v8590_v30  ;;  %v17635_v15 = vld [vmem:[#allocation225_spill] sm:$0xff]  ;;  %v17638_v30 = vld [vmem:[#allocation27_spill] sm:$0xff]  ;;  %v17639_v12 = vld [vmem:[#allocation68_spill] sm:$0xff] }
 0x540   : > { %v17640_v32 = vld [vmem:[#allocation26_spill] sm:$0xff] }
 0x541   : > { %10722 = vmatmul.mubr.f32.gmra.mrb[10].mxu1 %v7014_v52  ;;  %v17630_v52 = vld [vmem:[#allocation223_spill] sm:$0xff] }
 0x542   : > { %10724 = vmatprep.mubr.f32.mxu1 %v7015_v24  ;;  %11449 = vmatpush3.bf16.msra.mxu1 %v11446_v7  ;;  %v17628_v7 = vld [vmem:[#allocation220_spill] sm:$0xff]  ;;  %v7019_v63 = vmul.f32 %v17631_v31, %v17630_v52  ;;  %v7020_v24 = vmul.f32 %v17492_v40, %v17632_v3 }
 0x543   : > { %11451 = vmatprep.subr.bf16.mxu1 %v11450_v8  ;;  %v7018_v42 = vmul.f32 %v17629_v9, %v17628_v7  ;;  %v7026_v7 = vmul.f32 %v17640_v32, %v17639_v12  ;;  %v17641_v9 = vld [vmem:[#allocation227_spill] sm:$0xff]  ;;  %v17644_v31 = vld [vmem:[#allocation228_spill] sm:$0xff]  ;;  %v17654_v12 = vld [vmem:[#allocation229_spill] sm:$0xff] }
 0x544   : > { %v7311_v32 = vmul.f32 %v17517_v44, %v17654_v12  ;;  %v8596_v44 = vld [vmem:[%s16509_s4 + $0x430] sm:$0xff] }
 0x545   : > { %10725 = vmatmul.mubr.f32.gmra.mrb[12].mxu1 %v7016_v59  ;;  %v7023_v59 = vmul.f32 %v17497_v10, %v17635_v15  ;;  %v17649_v15 = vld [vmem:[#allocation5_spill] sm:$0xff] }
 0x546   : > { %10727 = vmatprep.mubr.f32.mxu1 %v7017_v17  ;;  %11453 = vmatpush3.bf16.msra.mxu1 %v11450_v8  ;;  %v17634_v8 = vld [vmem:[#allocation61_spill] sm:$0xff]  ;;  %v17637_v17 = vld [vmem:[#allocation226_spill] sm:$0xff] }
 0x547   : > { %11455 = vmatprep.subr.bf16.mxu1 %v11454_v0  ;;  %v7022_v50 = vmul.f32 %v15583_v18, %v17634_v8  ;;  %v7025_v40 = vmul.f32 %v17638_v30, %v17637_v17  ;;  %v17643_v18 = vld [vmem:[#allocation71_spill] sm:$0xff] }
 0x548   : > { %v7028_v10 = vmul.f32 %v15147_v41, %v17643_v18  ;;  %v17650_v41 = vld [vmem:[#allocation81_spill] sm:$0xff] }
 0x549   : > { %10728 = vmatmul.mubr.f32.gmra.mrb[14].mxu1 %v7018_v42  ;;  %v17642_v42 = vld [vmem:[#allocation29_spill] sm:$0xff] }
 0x54a   : > { %10730 = vmatprep.mubr.f32.mxu1 %v7019_v63  ;;  %11457 = vmatpush3.bf16.msra.mxu1 %v11454_v0  ;;  %v7024_v0 = vmul.f32 %v15595_v34, %v17636_v13  ;;  %v7027_v52 = vmul.f32 %v17642_v42, %v17641_v9  ;;  %v7029_v63 = vmul.f32 %v15156_v48, %v17644_v31  ;;  %v17645_v34 = vld [vmem:[#allocation74_spill] sm:$0xff]  ;;  %v17651_v48 = vld [vmem:[#allocation292_spill] sm:$0xff]  ;;  %v17655_v9 = vld [vmem:[#allocation41_spill] sm:$0xff] }
 0x54b   : > { %11459 = vmatprep.subr.bf16.mxu1 %v11458_v26  ;;  %v7030_v3 = vmul.f32 %v15159_v62, %v17645_v34  ;;  %v7034_v13 = vmul.f32 %v17651_v48, %v17650_v41  ;;  %v8592_v62 = vld [vmem:[%s16509_s4 + $0x410] sm:$0xff]  ;;  %v7312_v42 = vmul.f32 %v15219_v47, %v17655_v9  ;;  %v17662_v41 = vld [vmem:[#allocation237_spill] sm:$0xff] }
 0x54c   : > { %v7319_v48 = vmul.f32 %v15297_v45, %v17662_v41  ;;  %v8604_v45 = vld [vmem:[%s16509_s4 + $0x470] sm:$0xff]  ;;  %v17687_v41 = vld [vmem:[#allocation255_spill] sm:$0xff] }
 0x54d   : > { %10731 = vmatmul.mubr.f32.gmra.mrb[16].mxu1 %v7020_v24  ;;  %v17646_v24 = vld [vmem:[#allocation78_spill] sm:$0xff] }
 0x54e   : > { %10733 = vmatprep.mubr.f32.mxu1 %v7021_v55  ;;  %v7031_v33 = vmul.f32 %v17507_v23, %v17646_v24  ;;  %v17647_v55 = vld [vmem:[#allocation77_spill] sm:$0xff]  ;;  %v17659_v24 = vld [vmem:[#allocation232_spill] sm:$0xff] }
 0x54f   : > { %v7032_v8 = vmul.f32 %v17509_v20, %v17647_v55  ;;  %v8593_v23 = vld [vmem:[%s16509_s4 + $0x418] sm:$0xff]  ;;  %v17660_v55 = vld [vmem:[#allocation235_spill] sm:$0xff] }
 0x550   : > { %v17653_v20 = vld [vmem:[#allocation37_spill] sm:$0xff] }
 0x551   : > { %10734 = vmatmul.mubr.f32.gmra.mrb[18].mxu1 %v7022_v50  ;;  %v17648_v50 = vld [vmem:[#allocation34_spill] sm:$0xff]  ;;  %v7310_v30 = vmul.f32 %v15203_v38, %v17653_v20 }
 0x552   : > { %10736 = vmatprep.mubr.f32.mxu1 %v7023_v59  ;;  %v7033_v59 = vmul.f32 %v17649_v15, %v17648_v50  ;;  %v8601_v50 = vld [vmem:[%s16509_s4 + $0x458] sm:$0xff]  ;;  %v17661_v15 = vld [vmem:[#allocation234_spill] sm:$0xff] }
 0x555   : > { %10737 = vmatmul.mubr.f32.gmra.mrb[20].mxu1 %v7024_v0  ;;  %v17652_v0 = vld [vmem:[#allocation38_spill] sm:$0xff] }
 0x556   : > { %10739 = vmatprep.mubr.f32.mxu1 %v7025_v40  ;;  %v7309_v17 = vmul.f32 %v17514_v46, %v17652_v0  ;;  %v11462_v40 = vpack.c.bf16 %v8593_v23, %v8592_v62  ;;  %v8594_v46 = vld [vmem:[%s16509_s4 + $0x420] sm:$0xff]  ;;  %v17663_v0 = vld [vmem:[#allocation236_spill] sm:$0xff]  ;;  %v17664_v62 = vld [vmem:[#allocation239_spill] sm:$0xff] }
 0x557   : > { %v17665_v23 = vld [vmem:[#allocation6_spill] sm:$0xff] }
 0x558   : > { %v7321_v20 = vmul.f32 %v17665_v23, %v17664_v62  ;;  %v17692_v62 = vld [vmem:[#allocation291_spill] sm:$0xff] }
 0x559   : > { %10740 = vmatmul.mubr.f32.gmra.mrb[22].mxu1 %v7026_v7  ;;  %v8595_v7 = vld [vmem:[%s16509_s4 + $0x428] sm:$0xff] }
 0x55a   : > { %10742 = vmatprep.mubr.f32.mxu1 %v7027_v52  ;;  %v11466_v38 = vpack.c.bf16 %v8595_v7, %v8594_v46  ;;  %v17656_v52 = vld [vmem:[#allocation231_spill] sm:$0xff]  ;;  %v17668_v7 = vld [vmem:[#allocation240_spill] sm:$0xff] }
 0x55b   : > { %v7313_v18 = vmul.f32 %v15223_v57, %v17656_v52  ;;  %v8598_v57 = vld [vmem:[%s16509_s4 + $0x440] sm:$0xff]  ;;  %v7324_v9 = vmul.f32 %v15341_v51, %v17668_v7  ;;  %v17674_v51 = vld [vmem:[#allocation9_spill] sm:$0xff] }
 0x55c   : > { %v17670_v52 = vld [vmem:[#allocation242_spill] sm:$0xff]  ;;  %v17700_v7 = vld [vmem:[#allocation33_spill] sm:$0xff] }
 0x55d   : > { %10743 = vmatmul.mubr.f32.gmra.mrb[24].mxu1 %v7028_v10  ;;  %v8597_v10 = vld [vmem:[%s16509_s4 + $0x438] sm:$0xff] }
 0x55e   : > { %10745 = vmatprep.mubr.f32.mxu1 %v7029_v63  ;;  %v11470_v47 = vpack.c.bf16 %v8597_v10, %v8596_v44  ;;  %v17658_v63 = vld [vmem:[#allocation233_spill] sm:$0xff] }
 0x55f   : > { %v7315_v34 = vmul.f32 %v15257_v22, %v17658_v63  ;;  %v8600_v22 = vld [vmem:[%s16509_s4 + $0x450] sm:$0xff] }
 0x561   : > { %10746 = vmatmul.mubr.f32.gmra.mrb[26].mxu1 %v7030_v3  ;;  %v8599_v3 = vld [vmem:[%s16509_s4 + $0x448] sm:$0xff] }
 0x562   : > { %10748 = vmatprep.mubr.f32.mxu1 %v7031_v33  ;;  %v7316_v33 = vmul.f32 %v15273_v4, %v17659_v24  ;;  %v11478_v4 = vpack.c.bf16 %v8601_v50, %v8600_v22  ;;  %v17684_v22 = vld [vmem:[#allocation253_spill] sm:$0xff] }
 0x563   : > { %v7335_v50 = vmul.f32 %v17543_v16, %v17684_v22  ;;  %v17694_v16 = vld [vmem:[#allocation290_spill] sm:$0xff]  ;;  %v17718_v22 = vld [vmem:[#allocation44_spill] sm:$0xff] }
 0x565   : > { %10749 = vmatmul.mubr.f32.gmra.mrb[28].mxu1 %v7032_v8  ;;  %v7317_v8 = vmul.f32 %v15279_v37, %v17660_v55  ;;  %v8602_v37 = vld [vmem:[%s16509_s4 + $0x460] sm:$0xff] }
 0x566   : > { %10751 = vmatprep.mubr.f32.mxu1 %v7033_v59  ;;  %v7318_v59 = vmul.f32 %v15291_v39, %v17661_v15  ;;  %v17685_v15 = vld [vmem:[#allocation252_spill] sm:$0xff] }
 0x569   : > { %10752 = vmatmul.mubr.f32.gmra.mrb[30].mxu1 %v7034_v13  ;;  %v8603_v13 = vld [vmem:[%s16509_s4 + $0x468] sm:$0xff] }
 0x56a   : > { %10786 = vmatprep.mubr.f32.mxu1 %v7309_v17  ;;  %v7320_v17 = vmul.f32 %v15309_v43, %v17663_v0  ;;  %v11482_v39 = vpack.c.bf16 %v8603_v13, %v8602_v37  ;;  %v17689_v13 = vld [vmem:[#allocation254_spill] sm:$0xff] }
 0x56b   : > { %v17690_v0 = vld [vmem:[#allocation298_spill] sm:$0xff] }
 0x56d   : > { %10787 = vmatmul.mubr.f32.vlgmr.msra.gmra.mrb[0].mxu1 %v7310_v30  ;;  %v8605_v30 = vld [vmem:[%s16509_s4 + $0x478] sm:$0xff] }
 0x56e   : > { %11461 = vmatpush3.bf16.msra.mxu1 %v11458_v26  ;;  %10789 = vmatprep.mubr.f32.mxu1 %v7311_v32  ;;  %v17657_v26 = vld [vmem:[#allocation230_spill] sm:$0xff]  ;;  %v11486_v43 = vpack.c.bf16 %v8605_v30, %v8604_v45  ;;  %v17667_v32 = vld [vmem:[#allocation241_spill] sm:$0xff]  ;;  %v17695_v45 = vld [vmem:[#allocation259_spill] sm:$0xff] }
 0x56f   : > { %11463 = vmatprep.subr.bf16.mxu1 %v11462_v40  ;;  %v7314_v31 = vmul.f32 %v15240_v6, %v17657_v26  ;;  %v11474_v6 = vpack.c.bf16 %v8599_v3, %v8598_v57  ;;  %v7323_v46 = vmul.f32 %v15335_v27, %v17667_v32  ;;  %v17672_v27 = vld [vmem:[#allocation244_spill] sm:$0xff]  ;;  %v17673_v26 = vld [vmem:[#allocation247_spill] sm:$0xff] }
 0x570   : > { %v7328_v10 = vmul.f32 %v15366_v29, %v17672_v27  ;;  %v17678_v57 = vld [vmem:[#allocation11_spill] sm:$0xff]  ;;  %v17683_v29 = vld [vmem:[#allocation250_spill] sm:$0xff] }
 0x571   : > { %10790 = vmatmul.mubr.f32.gmra.mrb[2].mxu1 %v7312_v42  ;;  %v17669_v42 = vld [vmem:[#allocation243_spill] sm:$0xff]  ;;  %v17705_v27 = vld [vmem:[#allocation262_spill] sm:$0xff] }
 0x572   : > { %10792 = vmatprep.mubr.f32.mxu1 %v7313_v18  ;;  %11465 = vmatpush3.bf16.msra.mxu1 %v11462_v40  ;;  %v17666_v40 = vld [vmem:[#allocation238_spill] sm:$0xff]  ;;  %v17671_v18 = vld [vmem:[#allocation245_spill] sm:$0xff]  ;;  %v17696_v30 = vld [vmem:[#allocation31_spill] sm:$0xff] }
 0x573   : > { %11467 = vmatprep.subr.bf16.mxu1 %v11466_v38  ;;  %v7322_v12 = vmul.f32 %v15327_v56, %v17666_v40  ;;  %v7326_v56 = vmul.f32 %v15354_v14, %v17670_v52  ;;  %v7327_v44 = vmul.f32 %v15360_v61, %v17671_v18  ;;  %v17679_v14 = vld [vmem:[#allocation248_spill] sm:$0xff]  ;;  %v17680_v61 = vld [vmem:[#allocation10_spill] sm:$0xff]  ;;  %v7615_v40 = vmul.f32 %v17696_v30, %v17695_v45  ;;  %v17728_v45 = vld [vmem:[#allocation277_spill] sm:$0xff] }
 0x574   : > { %v7332_v24 = vmul.f32 %v17680_v61, %v17679_v14  ;;  %v17704_v18 = vld [vmem:[#allocation36_spill] sm:$0xff]  ;;  %v17713_v61 = vld [vmem:[#allocation266_spill] sm:$0xff]  ;;  %v7633_v30 = vmul.f32 %v17590_v54, %v17728_v45 }
 0x575   : > { %10793 = vmatmul.mubr.f32.gmra.mrb[4].mxu1 %v7314_v31  ;;  %v7329_v31 = vmul.f32 %v17674_v51, %v17673_v26  ;;  %v17707_v51 = vld [vmem:[#allocation265_spill] sm:$0xff] }
 0x576   : > { %10795 = vmatprep.mubr.f32.mxu1 %v7315_v34  ;;  %11469 = vmatpush3.bf16.msra.mxu1 %v11466_v38  ;;  %v7325_v38 = vmul.f32 %v15348_v60, %v17669_v42  ;;  %v17675_v60 = vld [vmem:[#allocation246_spill] sm:$0xff]  ;;  %v17677_v34 = vld [vmem:[#allocation249_spill] sm:$0xff]  ;;  %v17701_v42 = vld [vmem:[#allocation260_spill] sm:$0xff] }
 0x577   : > { %11471 = vmatprep.subr.bf16.mxu1 %v11470_v47  ;;  %v7331_v3 = vmul.f32 %v17678_v57, %v17677_v34  ;;  %v17711_v57 = vld [vmem:[#allocation267_spill] sm:$0xff] }
 0x579   : > { %10796 = vmatmul.mubr.f32.gmra.mrb[6].mxu1 %v7316_v33  ;;  %v17681_v33 = vld [vmem:[#allocation251_spill] sm:$0xff] }
 0x57a   : > { %10798 = vmatprep.mubr.f32.mxu1 %v7317_v8  ;;  %11473 = vmatpush3.bf16.msra.mxu1 %v11470_v47  ;;  %v17676_v47 = vld [vmem:[#allocation8_spill] sm:$0xff]  ;;  %v7334_v8 = vmul.f32 %v17541_v53, %v17683_v29 }
 0x57b   : > { %11475 = vmatprep.subr.bf16.mxu1 %v11474_v6  ;;  %v7330_v63 = vmul.f32 %v17676_v47, %v17675_v60  ;;  %v17693_v53 = vld [vmem:[#allocation256_spill] sm:$0xff] }
 0x57c   : > { %v17709_v47 = vld [vmem:[#allocation264_spill] sm:$0xff] }
 0x57d   : > { %10799 = vmatmul.mubr.f32.gmra.mrb[8].mxu1 %v7318_v59  ;;  %v17686_v59 = vld [vmem:[#allocation296_spill] sm:$0xff] }
 0x57e   : > { %10801 = vmatprep.mubr.f32.mxu1 %v7319_v48  ;;  %11477 = vmatpush3.bf16.msra.mxu1 %v11474_v6  ;;  %v17682_v6 = vld [vmem:[#allocation295_spill] sm:$0xff] }
 0x57f   : > { %11479 = vmatprep.subr.bf16.mxu1 %v11478_v4  ;;  %v7333_v55 = vmul.f32 %v17682_v6, %v17681_v33  ;;  %v17688_v48 = vld [vmem:[#allocation299_spill] sm:$0xff]  ;;  %v17715_v6 = vld [vmem:[#allocation269_spill] sm:$0xff] }
 0x580   : > { %v7337_v37 = vmul.f32 %v17688_v48, %v17687_v41  ;;  %v17721_v41 = vld [vmem:[#allocation270_spill] sm:$0xff] }
 0x581   : > { %10802 = vmatmul.mubr.f32.gmra.mrb[10].mxu1 %v7320_v17  ;;  %v7338_v17 = vmul.f32 %v17690_v0, %v17689_v13  ;;  %v17722_v48 = vld [vmem:[#allocation46_spill] sm:$0xff]  ;;  %v17723_v13 = vld [vmem:[#allocation273_spill] sm:$0xff] }
 0x582   : > { %10804 = vmatprep.mubr.f32.mxu1 %v7321_v20  ;;  %11481 = vmatpush3.bf16.msra.mxu1 %v11478_v4  ;;  %v7336_v4 = vmul.f32 %v17686_v59, %v17685_v15  ;;  %v7340_v20 = vmul.f32 %v17694_v16, %v17693_v53  ;;  %v17719_v15 = vld [vmem:[#allocation271_spill] sm:$0xff]  ;;  %v7629_v0 = vmul.f32 %v17582_v19, %v17723_v13  ;;  %v17727_v16 = vld [vmem:[#allocation274_spill] sm:$0xff] }
 0x583   : > { %11483 = vmatprep.subr.bf16.mxu1 %v11482_v39  ;;  %v17720_v59 = vld [vmem:[#allocation47_spill] sm:$0xff] }
 0x585   : > { %10805 = vmatmul.mubr.f32.gmra.mrb[12].mxu1 %v7322_v12  ;;  %v17697_v12 = vld [vmem:[#allocation258_spill] sm:$0xff] }
 0x586   : > { %10807 = vmatprep.mubr.f32.mxu1 %v7323_v46  ;;  %11485 = vmatpush3.bf16.msra.mxu1 %v11482_v39  ;;  %v17691_v39 = vld [vmem:[#allocation257_spill] sm:$0xff] }
 0x587   : > { %11487 = vmatprep.subr.bf16.mxu1 %v11486_v43  ;;  %v7339_v23 = vmul.f32 %v17692_v62, %v17691_v39  ;;  %v17699_v46 = vld [vmem:[#allocation261_spill] sm:$0xff]  ;;  %v17725_v62 = vld [vmem:[#allocation275_spill] sm:$0xff] }
 0x589   : > { %10808 = vmatmul.mubr.f32.gmra.mrb[14].mxu1 %v7324_v9  ;;  %v7617_v9 = vmul.f32 %v17700_v7, %v17699_v46  ;;  %v17732_v46 = vld [vmem:[#allocation281_spill] sm:$0xff] }
 0x58a   : > { %10810 = vmatprep.mubr.f32.mxu1 %v7325_v38  ;;  %11489 = vmatpush3.bf16.msra.mxu1 %v11486_v43  ;;  %v17698_v43 = vld [vmem:[#allocation30_spill] sm:$0xff]  ;;  %v17702_v38 = vld [vmem:[#allocation32_spill] sm:$0xff]  ;;  %v17733_v7 = vld [vmem:[#allocation57_spill] sm:$0xff] }
 0x58b   : > { %v7616_v32 = vmul.f32 %v17698_v43, %v17697_v12  ;;  %v7618_v52 = vmul.f32 %v17702_v38, %v17701_v42  ;;  %v17730_v12 = vld [vmem:[#allocation279_spill] sm:$0xff] }
 0x58c   : > { %v7635_v43 = vmul.f32 %v15810_v25, %v17730_v12  ;;  %v17735_v42 = vld [vmem:[#allocation283_spill] sm:$0xff] }
 0x58d   : > { %10811 = vmatmul.mubr.f32.gmra.mrb[16].mxu1 %v7326_v56  ;;  %v17703_v56 = vld [vmem:[#allocation263_spill] sm:$0xff] }
 0x58e   : > { %10813 = vmatprep.mubr.f32.mxu1 %v7327_v44  ;;  %v7619_v44 = vmul.f32 %v17704_v18, %v17703_v56  ;;  %v17736_v38 = vld [vmem:[#allocation7_spill] sm:$0xff]  ;;  %v17738_v56 = vld [vmem:[#allocation285_spill] sm:$0xff] }
 0x58f   : > { %v7641_v18 = vmul.f32 %v15268_v28, %v17738_v56  ;;  %v17745_v28 = vld [vmem:[#allocation28_spill] sm:$0xff] }
 0x591   : > { %10814 = vmatmul.mubr.f32.gmra.mrb[18].mxu1 %v7328_v10  ;;  %v17706_v10 = vld [vmem:[#allocation35_spill] sm:$0xff] }
 0x592   : > { %10816 = vmatprep.mubr.f32.mxu1 %v7329_v31  ;;  %v7620_v26 = vmul.f32 %v17706_v10, %v17705_v27  ;;  %v17708_v31 = vld [vmem:[#allocation40_spill] sm:$0xff]  ;;  %v17740_v27 = vld [vmem:[#allocation287_spill] sm:$0xff] }
 0x593   : > { %v7621_v60 = vmul.f32 %v17708_v31, %v17707_v51  ;;  %v7643_v10 = vmul.f32 %v17602_v35, %v17740_v27  ;;  %v17742_v51 = vld [vmem:[#allocation288_spill] sm:$0xff]  ;;  %v17743_v31 = vld [vmem:[#allocation293_spill] sm:$0xff] }
 0x595   : > { %10817 = vmatmul.mubr.f32.gmra.mrb[20].mxu1 %v7330_v63  ;;  %v17710_v63 = vld [vmem:[#allocation39_spill] sm:$0xff] }
 0x596   : > { %10819 = vmatprep.mubr.f32.mxu1 %v7331_v3  ;;  %v7622_v34 = vmul.f32 %v17710_v63, %v17709_v47  ;;  %v17712_v3 = vld [vmem:[#allocation43_spill] sm:$0xff] }
 0x597   : > { %v7623_v14 = vmul.f32 %v17712_v3, %v17711_v57 }
 0x599   : > { %10820 = vmatmul.mubr.f32.gmra.mrb[22].mxu1 %v7332_v24  ;;  %v17714_v24 = vld [vmem:[#allocation42_spill] sm:$0xff] }
 0x59a   : > { %10822 = vmatprep.mubr.f32.mxu1 %v7333_v55  ;;  %v7624_v33 = vmul.f32 %v17714_v24, %v17713_v61  ;;  %v17716_v55 = vld [vmem:[#allocation45_spill] sm:$0xff] }
 0x59b   : > { %v7625_v29 = vmul.f32 %v17716_v55, %v17715_v6 }
 0x59d   : > { %10823 = vmatmul.mubr.f32.gmra.mrb[24].mxu1 %v7334_v8  ;;  %v17717_v8 = vld [vmem:[#allocation268_spill] sm:$0xff] }
 0x59e   : > { %10825 = vmatprep.mubr.f32.mxu1 %v7335_v50  ;;  %v7626_v50 = vmul.f32 %v17718_v22, %v17717_v8 }
 0x5a1   : > { %10826 = vmatmul.mubr.f32.gmra.mrb[26].mxu1 %v7336_v4  ;;  %v7627_v4 = vmul.f32 %v17720_v59, %v17719_v15 }
 0x5a2   : > { %10828 = vmatprep.mubr.f32.mxu1 %v7337_v37  ;;  %v7628_v37 = vmul.f32 %v17722_v48, %v17721_v41 }
 0x5a5   : > { %10829 = vmatmul.mubr.f32.gmra.mrb[28].mxu1 %v7338_v17  ;;  %v17724_v17 = vld [vmem:[#allocation272_spill] sm:$0xff] }
 0x5a6   : > { %10831 = vmatprep.mubr.f32.mxu1 %v7339_v23  ;;  %v7630_v39 = vmul.f32 %v17584_v21, %v17724_v17  ;;  %v17726_v23 = vld [vmem:[#allocation51_spill] sm:$0xff]  ;;  %v17731_v21 = vld [vmem:[#allocation278_spill] sm:$0xff] }
 0x5a7   : > { %v7631_v53 = vmul.f32 %v17726_v23, %v17725_v62 }
 0x5a9   : > { %10832 = vmatmul.mubr.f32.gmra.mrb[30].mxu1 %v7340_v20  ;;  %v7632_v20 = vmul.f32 %v17588_v49, %v17727_v16  ;;  %v17734_v49 = vld [vmem:[#allocation280_spill] sm:$0xff] }
 0x5aa   : > { %10866 = vmatprep.mubr.f32.mxu1 %v7615_v40  ;;  %v17729_v40 = vld [vmem:[#allocation276_spill] sm:$0xff]  ;;  %v7638_v54 = vmul.f32 %v15830_v1, %v17734_v49  ;;  %v17741_v1 = vld [vmem:[#allocation286_spill] sm:$0xff] }
 0x5ab   : > { %v7634_v19 = vmul.f32 %v15806_v5, %v17729_v40  ;;  %v17737_v5 = vld [vmem:[#allocation282_spill] sm:$0xff] }
 0x5ac   : > { %v7640_v25 = vmul.f32 %v15255_v36, %v17737_v5  ;;  %v17744_v36 = vld [vmem:[#allocation289_spill] sm:$0xff] }
 0x5ad   : > { %10867 = vmatmul.mubr.f32.vlgmr.msra.gmra.mrb[0].mxu1 %v7616_v32  ;;  %v7636_v32 = vmul.f32 %v17594_v58, %v17731_v21  ;;  %v17739_v58 = vld [vmem:[#allocation284_spill] sm:$0xff]  ;;  %v7646_v47 = vmul.f32 %v17745_v28, %v17744_v36 }
 0x5ae   : > { %10869 = vmatprep.mubr.f32.mxu1 %v7617_v9  ;;  %v7637_v9 = vmul.f32 %v17733_v7, %v17732_v46 }
 0x5b1   : > { %10870 = vmatmul.mubr.f32.gmra.mrb[2].mxu1 %v7618_v52  ;;  %v7639_v52 = vmul.f32 %v17736_v38, %v17735_v42 }
 0x5b2   : > { %10872 = vmatprep.mubr.f32.mxu1 %v7619_v44  ;;  %v7642_v44 = vmul.f32 %v15271_v11, %v17739_v58  ;;  %v16464_v11 = vld [vmem:[%s16510_s5] ss:$0 sm:$0xff] }
 0x5b5   : > { %10873 = vmatmul.mubr.f32.gmra.mrb[4].mxu1 %v7620_v26  ;;  %v7644_v26 = vmul.f32 %v17604_v2, %v17741_v1 }
 0x5b6   : > { %10875 = vmatprep.mubr.f32.mxu1 %v7621_v60  ;;  %v7645_v60 = vmul.f32 %v17743_v31, %v17742_v51 }
 0x5b9   : > { %10876 = vmatmul.mubr.f32.gmra.mrb[6].mxu1 %v7622_v34 }
 0x5ba   : > { %10878 = vmatprep.mubr.f32.mxu1 %v7623_v14 }
 0x5bd   : > { %10879 = vmatmul.mubr.f32.gmra.mrb[8].mxu1 %v7624_v33 }
 0x5be   : > { %10881 = vmatprep.mubr.f32.mxu1 %v7625_v29 }
 0x5c1   : > { %10882 = vmatmul.mubr.f32.gmra.mrb[10].mxu1 %v7626_v50 }
 0x5c2   : > { %10884 = vmatprep.mubr.f32.mxu1 %v7627_v4 }
 0x5c5   : > { %10885 = vmatmul.mubr.f32.gmra.mrb[12].mxu1 %v7628_v37 }
 0x5c6   : > { %10887 = vmatprep.mubr.f32.mxu1 %v7629_v0 }
 0x5c9   : > { %10888 = vmatmul.mubr.f32.gmra.mrb[14].mxu1 %v7630_v39 }
 0x5ca   : > { %10890 = vmatprep.mubr.f32.mxu1 %v7631_v53 }
 0x5cd   : > { %10891 = vmatmul.mubr.f32.gmra.mrb[16].mxu1 %v7632_v20 }
 0x5ce   : > { %10893 = vmatprep.mubr.f32.mxu1 %v7633_v30 }
 0x5d1   : > { %10894 = vmatmul.mubr.f32.gmra.mrb[18].mxu1 %v7634_v19 }
 0x5d2   : > { %10896 = vmatprep.mubr.f32.mxu1 %v7635_v43 }
 0x5d5   : > { %10897 = vmatmul.mubr.f32.gmra.mrb[20].mxu1 %v7636_v32 }
 0x5d6   : > { %10899 = vmatprep.mubr.f32.mxu1 %v7637_v9 }
 0x5d9   : > { %10900 = vmatmul.mubr.f32.gmra.mrb[22].mxu1 %v7638_v54 }
 0x5da   : > { %10902 = vmatprep.mubr.f32.mxu1 %v7639_v52 }
 0x5dd   : > { %10903 = vmatmul.mubr.f32.gmra.mrb[24].mxu1 %v7640_v25 }
 0x5de   : > { %10905 = vmatprep.mubr.f32.mxu1 %v7641_v18 }
 0x5e1   : > { %10906 = vmatmul.mubr.f32.gmra.mrb[26].mxu1 %v7642_v44 }
 0x5e2   : > { %10908 = vmatprep.mubr.f32.mxu1 %v7643_v10 }
 0x5e5   : > { %10909 = vmatmul.mubr.f32.gmra.mrb[28].mxu1 %v7644_v26 }
 0x5e6   : > { %10911 = vmatprep.mubr.f32.mxu1 %v7645_v60 }
 0x5e9   : > { %10912 = vmatmul.mubr.f32.gmra.mrb[30].mxu1 %v7646_v47 }
 0x680   : > { %v10868_v35 = vpop.f32.mrb[0].mxu1 }
 0x681   : > { %v7929_v63 = vadd.f32 %v10868_v35, %v16464_v11  ;;  %v7730_v34 = vpop.f32.mrb[1].mxu1 }
 0x682   : > { %v7928_v2 = vadd.f32 %v16464_v11, %v7730_v34 }
 0x683   : > { %v7961_v57 = vmax.f32 %v7929_v63, 0.0 }
 0x684   : > { %v7960_v3 = vmax.f32 %v7928_v2, 0.0  ;;  %v10871_v14 = vpop.f32.mrb[2].mxu1 }
 0x685   : > { %v7740_v61 = vpop.f32.mrb[3].mxu1  ;;  %v7931_v33 = vadd.f32 %v10871_v14, %v16464_v11 }
 0x686   : > { %v7992_v24 = vadd.f32 %v7961_v57, %v7960_v3  ;;  %v7930_v6 = vadd.f32 %v16464_v11, %v7740_v61 }
 0x687   : > { %v7963_v22 = vmax.f32 %v7931_v33, 0.0 }
 0x688   : > { %v7962_v55 = vmax.f32 %v7930_v6, 0.0  ;;  %v10874_v29 = vpop.f32.mrb[4].mxu1 }
 0x689   : > { %v7750_v8 = vpop.f32.mrb[5].mxu1  ;;  %v7933_v15 = vadd.f32 %v10874_v29, %v16464_v11 }
 0x68a   : > { %v7993_v50 = vadd.f32 %v7992_v24, %v7962_v55  ;;  %v7932_v59 = vadd.f32 %v16464_v11, %v7750_v8 }
 0x68b   : > { %v7965_v13 = vmax.f32 %v7933_v15, 0.0 }
 0x68c   : > { %v7964_v4 = vmax.f32 %v7932_v59, 0.0  ;;  %v7994_v41 = vadd.f32 %v7993_v50, %v7963_v22  ;;  %v10877_v48 = vpop.f32.mrb[6].mxu1 }
 0x68d   : > { %v7760_v37 = vpop.f32.mrb[7].mxu1  ;;  %v7935_v17 = vadd.f32 %v10877_v48, %v16464_v11 }
 0x68e   : > { %v7995_v0 = vadd.f32 %v7994_v41, %v7964_v4  ;;  %v7934_v39 = vadd.f32 %v16464_v11, %v7760_v37 }
 0x68f   : > { %v7967_v20 = vmax.f32 %v7935_v17, 0.0 }
 0x690   : > { %v7966_v62 = vmax.f32 %v7934_v39, 0.0  ;;  %v7996_v23 = vadd.f32 %v7995_v0, %v7965_v13  ;;  %v10880_v53 = vpop.f32.mrb[8].mxu1 }
 0x691   : > { %v7770_v16 = vpop.f32.mrb[9].mxu1  ;;  %v7937_v30 = vadd.f32 %v10880_v53, %v16464_v11 }
 0x692   : > { %v7997_v45 = vadd.f32 %v7996_v23, %v7966_v62  ;;  %v7936_v40 = vadd.f32 %v16464_v11, %v7770_v16 }
 0x693   : > { %v7969_v32 = vmax.f32 %v7937_v30, 0.0 }
 0x694   : > { %v7968_v19 = vmax.f32 %v7936_v40, 0.0  ;;  %v7998_v12 = vadd.f32 %v7997_v45, %v7967_v20  ;;  %v10883_v43 = vpop.f32.mrb[10].mxu1 }
 0x695   : > { %v7780_v21 = vpop.f32.mrb[11].mxu1  ;;  %v7939_v7 = vadd.f32 %v10883_v43, %v16464_v11 }
 0x696   : > { %v7999_v46 = vadd.f32 %v7998_v12, %v7968_v19  ;;  %v7938_v9 = vadd.f32 %v16464_v11, %v7780_v21 }
 0x697   : > { %v7971_v52 = vmax.f32 %v7939_v7, 0.0 }
 0x698   : > { %v7970_v49 = vmax.f32 %v7938_v9, 0.0  ;;  %v8000_v54 = vadd.f32 %v7999_v46, %v7969_v32  ;;  %v10886_v42 = vpop.f32.mrb[12].mxu1 }
 0x699   : > { %v7790_v38 = vpop.f32.mrb[13].mxu1  ;;  %v7941_v25 = vadd.f32 %v10886_v42, %v16464_v11 }
 0x69a   : > { %v8001_v5 = vadd.f32 %v8000_v54, %v7970_v49  ;;  %v7940_v56 = vadd.f32 %v16464_v11, %v7790_v38 }
 0x69b   : > { %v7973_v10 = vmax.f32 %v7941_v25, 0.0 }
 0x69c   : > { %v7972_v18 = vmax.f32 %v7940_v56, 0.0  ;;  %v8002_v58 = vadd.f32 %v8001_v5, %v7971_v52  ;;  %v10889_v44 = vpop.f32.mrb[14].mxu1 }
 0x69d   : > { %v7800_v27 = vpop.f32.mrb[15].mxu1  ;;  %v7943_v26 = vadd.f32 %v10889_v44, %v16464_v11 }
 0x69e   : > { %v8003_v1 = vadd.f32 %v8002_v58, %v7972_v18  ;;  %v7942_v51 = vadd.f32 %v16464_v11, %v7800_v27 }
 0x69f   : > { %v7975_v47 = vmax.f32 %v7943_v26, 0.0 }
 0x6a0   : > { %v7974_v31 = vmax.f32 %v7942_v51, 0.0  ;;  %v8004_v60 = vadd.f32 %v8003_v1, %v7973_v10  ;;  %v10892_v36 = vpop.f32.mrb[16].mxu1 }
 0x6a1   : > { %v7810_v28 = vpop.f32.mrb[17].mxu1  ;;  %v7945_v63 = vadd.f32 %v10892_v36, %v16464_v11 }
 0x6a2   : > { %v8005_v35 = vadd.f32 %v8004_v60, %v7974_v31  ;;  %v7944_v34 = vadd.f32 %v16464_v11, %v7810_v28 }
 0x6a3   : > { %v7977_v61 = vmax.f32 %v7945_v63, 0.0 }
 0x6a4   : > { %v7976_v2 = vmax.f32 %v7944_v34, 0.0  ;;  %v8006_v57 = vadd.f32 %v8005_v35, %v7975_v47  ;;  %v10895_v3 = vpop.f32.mrb[18].mxu1 }
 0x6a5   : > { %v7820_v14 = vpop.f32.mrb[19].mxu1  ;;  %v7947_v33 = vadd.f32 %v10895_v3, %v16464_v11 }
 0x6a6   : > { %v8007_v24 = vadd.f32 %v8006_v57, %v7976_v2  ;;  %v7946_v6 = vadd.f32 %v16464_v11, %v7820_v14 }
 0x6a7   : > { %v7979_v50 = vmax.f32 %v7947_v33, 0.0 }
 0x6a8   : > { %v7978_v55 = vmax.f32 %v7946_v6, 0.0  ;;  %v8008_v29 = vadd.f32 %v8007_v24, %v7977_v61  ;;  %v10898_v8 = vpop.f32.mrb[20].mxu1 }
 0x6a9   : > { %v7830_v22 = vpop.f32.mrb[21].mxu1  ;;  %v7949_v59 = vadd.f32 %v10898_v8, %v16464_v11 }
 0x6aa   : > { %v8009_v15 = vadd.f32 %v8008_v29, %v7978_v55  ;;  %v7948_v4 = vadd.f32 %v16464_v11, %v7830_v22 }
 0x6ab   : > { %v7981_v0 = vmax.f32 %v7949_v59, 0.0 }
 0x6ac   : > { %v7980_v41 = vmax.f32 %v7948_v4, 0.0  ;;  %v8010_v48 = vadd.f32 %v8009_v15, %v7979_v50  ;;  %v10901_v37 = vpop.f32.mrb[22].mxu1 }
 0x6ad   : > { %v7840_v13 = vpop.f32.mrb[23].mxu1  ;;  %v7951_v39 = vadd.f32 %v10901_v37, %v16464_v11 }
 0x6ae   : > { %v8011_v17 = vadd.f32 %v8010_v48, %v7980_v41  ;;  %v7950_v62 = vadd.f32 %v16464_v11, %v7840_v13 }
 0x6af   : > { %v7983_v45 = vmax.f32 %v7951_v39, 0.0 }
 0x6b0   : > { %v7982_v23 = vmax.f32 %v7950_v62, 0.0  ;;  %v8012_v53 = vadd.f32 %v8011_v17, %v7981_v0  ;;  %v10904_v16 = vpop.f32.mrb[24].mxu1 }
 0x6b1   : > { %v7850_v20 = vpop.f32.mrb[25].mxu1  ;;  %v7953_v40 = vadd.f32 %v10904_v16, %v16464_v11 }
 0x6b2   : > { %v8013_v30 = vadd.f32 %v8012_v53, %v7982_v23  ;;  %v7952_v19 = vadd.f32 %v16464_v11, %v7850_v20 }
 0x6b3   : > { %v7985_v46 = vmax.f32 %v7953_v40, 0.0 }
 0x6b4   : > { %v7984_v12 = vmax.f32 %v7952_v19, 0.0  ;;  %v8014_v43 = vadd.f32 %v8013_v30, %v7983_v45  ;;  %v10907_v21 = vpop.f32.mrb[26].mxu1 }
 0x6b5   : > { %v7860_v32 = vpop.f32.mrb[27].mxu1  ;;  %v7955_v9 = vadd.f32 %v10907_v21, %v16464_v11 }
 0x6b6   : > { %v8015_v7 = vadd.f32 %v8014_v43, %v7984_v12  ;;  %v7954_v49 = vadd.f32 %v16464_v11, %v7860_v32 }
 0x6b7   : > { %v7987_v5 = vmax.f32 %v7955_v9, 0.0 }
 0x6b8   : > { %v7986_v54 = vmax.f32 %v7954_v49, 0.0  ;;  %v8016_v42 = vadd.f32 %v8015_v7, %v7985_v46  ;;  %v10910_v38 = vpop.f32.mrb[28].mxu1 }
 0x6b9   : > { %v7870_v52 = vpop.f32.mrb[29].mxu1  ;;  %v7957_v56 = vadd.f32 %v10910_v38, %v16464_v11 }
 0x6ba   : > { %v8017_v25 = vadd.f32 %v8016_v42, %v7986_v54  ;;  %v7956_v18 = vadd.f32 %v16464_v11, %v7870_v52 }
 0x6bb   : > { %v7989_v1 = vmax.f32 %v7957_v56, 0.0 }
 0x6bc   : > { %v7988_v58 = vmax.f32 %v7956_v18, 0.0  ;;  %v8018_v44 = vadd.f32 %v8017_v25, %v7987_v5  ;;  %v10913_v27 = vpop.f32.mrb[30].mxu1 }
 0x6bd   : > { %v7880_v10 = vpop.f32.mrb[31].mxu1  ;;  %v7959_v51 = vadd.f32 %v10913_v27, %v16464_v11 }
 0x6be   : > { %v8019_v26 = vadd.f32 %v8018_v44, %v7988_v58  ;;  %v7958_v31 = vadd.f32 %v16464_v11, %v7880_v10 }
 0x6bf   : > { %v7991_v28 = vmax.f32 %v7959_v51, 0.0 }
 0x6c0   : > { %v7990_v60 = vmax.f32 %v7958_v31, 0.0  ;;  %v8020_v36 = vadd.f32 %v8019_v26, %v7989_v1 }
 0x6c2   : > { %v8021_v47 = vadd.f32 %v8020_v36, %v7990_v60 }
 0x6c4   : > { %v8022_v35 = vadd.f32 %v8021_v47, %v7991_v28 }
 0x6c6   : > { %v8023_v63 = vrot.slane %v8022_v35, 4 }
 0x6c8   : > { %v8024_v34 = vadd.f32 %v8023_v63, %v8022_v35 }
 0x6ca   : > { %v8025_v2 = vrot.slane %v8024_v34, 2 }
 0x6cc   : > { %v8026_v57 = vadd.f32 %v8025_v2, %v8024_v34 }
 0x6ce   : > { %v8027_v3 = vrot.slane %v8026_v57, 1 }
 0x6d0   : > { %v8028_v14 = vadd.f32 %v8027_v3, %v8026_v57 }
 0x6d2   : > { %v8030_v61 = vmul.f32 0.00390625, %v8028_v14 }
 0x6d4   : > { %8031 = vst [vmem:[%s249_s30] sm:$0xff] %v8030_v61 }
 0x6d5 PF: > { %s16_s21 = sadd.s32 1, %s12083_s21  }
 0x6d6   : > { %p13_p4 = scmp.ge.s32.totalorder %s16_s21, 6  }
 0x6d8   :  { %15 = sbr.rel (!%p13_p4) target bundleno = 1 (0x1), region = 98 }

</bundles_post_ra>
